<compile_context>
chip_gen: v7x
topology: tpu7x:2x2x1
jax: 0.10.0
libtpu: 0.0.40
codegen_flags: <defaults>
</compile_context>

<pallas_src>
import functools

import jax
import jax.numpy as jnp
from jax.experimental import pallas as pl
from jax.experimental.pallas import tpu as pltpu


# ----------------------------------------------------------------------------
# Pallas kernels: per-neighbor shared Linear -> running max over neighbors ->
# bias -> ReLU.  Inputs are neighbor-major (S, tm, Cin); the unrolled loop keeps
# a single (tm, Cout) f32 accumulator.
# ----------------------------------------------------------------------------
def _conv_pool_kernel1(lc_ref, w_ref, b_ref, o_ref):
    # lc_ref: (S, tm, C) bf16 ; w_ref: (C, Cout) bf16 ; b_ref: (1, Cout) f32.
    S = lc_ref.shape[0]
    w = w_ref[...]
    acc = jnp.dot(lc_ref[0], w, preferred_element_type=jnp.float32)
    for s in range(1, S):                      # unrolled running max over neighbors
        acc = jnp.maximum(acc, jnp.dot(lc_ref[s], w,
                                       preferred_element_type=jnp.float32))
    # bias + ReLU hoisted past the max — exact because b is a per-channel constant
    # and ReLU is monotone (would become invalid with a signed-scale BatchNorm
    # between the Linear and the max).
    o_ref[...] = jnp.maximum(acc + b_ref[...], 0.0).astype(o_ref.dtype)


def _conv_pool_kernel2(lc_ref, gp_ref, w1_ref, w2_ref, b_ref, o_ref):
    # Split-weight form: concat([lc, grouped]) @ W == lc @ W1 + grouped @ W2, so the
    # concatenated tensor is never materialized in HBM.
    S = lc_ref.shape[0]
    w1 = w1_ref[...]
    w2 = w2_ref[...]

    def neighbor(s):
        y = jnp.dot(lc_ref[s], w1, preferred_element_type=jnp.float32)
        return y + jnp.dot(gp_ref[s], w2, preferred_element_type=jnp.float32)

    acc = neighbor(0)
    for s in range(1, S):                      # unrolled running max over neighbors
        acc = jnp.maximum(acc, neighbor(s))
    o_ref[...] = jnp.maximum(acc + b_ref[...], 0.0).astype(o_ref.dtype)


# ----------------------------------------------------------------------------
# Tiling / budget helpers
# ----------------------------------------------------------------------------
def _round_up(x, m):
    return (x + m - 1) // m * m


def _pick_tm(M, tm_max=512):
    """Row-tile size along the flattened point axis.

    Prefers an exact divisor of M (no HBM padding pass; production point counts are
    powers of two).  For small M: one whole-M tile, or a free 2-way split when M is
    large enough (keeps both v7x TensorCores busy; costs a single extra ~0.35 us
    grid step on single-TC v5e/v6e)."""
    if M <= tm_max:
        if M >= 256 and M % 16 == 0:
            return M // 2
        return M
    for step in (16, 8):
        start = tm_max - (tm_max % step)
        for cand in range(start, step - 1, -step):
            if cand >= 64 and M % cand == 0:
                return cand
    return tm_max  # no good divisor: fall back to padding M up to a tile multiple


def _vmem_limit_bytes():
    # ~70% of physical VMEM per core (v7x: 64 MiB -> ~44 MiB; v5e/v6e: 128 MiB ->
    # capped at 64 MiB).  Worst-case tile set here needs ~6-10 MiB, so this leaves
    # ample headroom for pipeline buffers + compiler-internal scratch everywhere.
    try:
        cap = pltpu.get_tpu_info().vmem_capacity_bytes
    except Exception:  # older jax / no hardware query available
        cap = 64 * 1024 * 1024
    return int(min(cap * 0.7, 64 * 1024 * 1024))


# ----------------------------------------------------------------------------
# Pallas wrapper
# ----------------------------------------------------------------------------
def conv_pool_pallas(lc, grouped, W, b, *, out_dtype=jnp.bfloat16, tm_max=512):
    """out[m] = max_s relu(concat(lc, grouped)[s, m] @ W + b).

    lc:      (S, M, C1)  neighbor-major local surface coordinates (always present)
    grouped: (S, M, C2)  neighbor-major gathered neighbor features, or None
    W:       (C1 + C2, Cout); b: (1, Cout)
    returns  (M, Cout) in out_dtype
    """
    S, M, C1 = lc.shape
    Cout = W.shape[1]
    tm = _pick_tm(M, tm_max)
    Mp = _round_up(M, tm)
    grid = Mp // tm

    # bf16 inputs/weights (half the HBM/VMEM bytes, 2x MXU rate), f32 accumulation.
    W = W.astype(jnp.bfloat16)
    b = b.astype(jnp.float32)

    # Pad the tiny local-coordinate channel (6) up to 16 and (rarely) M up to a tile
    # multiple.  For production shapes tm | M, so no M-padding HBM pass is issued.
    C1p = _round_up(C1, 16)
    lc = lc.astype(jnp.bfloat16)
    if Mp > M or C1p > C1:
        lc = jnp.pad(lc, ((0, 0), (0, Mp - M), (0, C1p - C1)))

    # Deeper input buffering on the feature streams for every layer whenever the
    # grid is long enough to profit (3 bufs x S*tm*C2 bf16 <= ~6 MiB at tm=512).
    buf_kwargs = {"pipeline_mode": pl.Buffered(3)} if grid >= 3 else {}

    def feat_spec(C):
        return pl.BlockSpec((S, tm, C), lambda i: (0, i, 0), **buf_kwargs)

    def full_spec(arr):
        return pl.BlockSpec(arr.shape, lambda i: (0,) * arr.ndim)

    if grouped is None:
        Wlc = jnp.pad(W, ((0, C1p - C1), (0, 0)))
        kernel = _conv_pool_kernel1
        args = (lc, Wlc, b)
        in_specs = [feat_spec(C1p), full_spec(Wlc), full_spec(b)]
    else:
        C2 = grouped.shape[-1]
        if Mp > M:
            grouped = jnp.pad(grouped, ((0, 0), (0, Mp - M), (0, 0)))
        Wlc = jnp.pad(W[:C1], ((0, C1p - C1), (0, 0)))
        Wgp = W[C1:]
        kernel = _conv_pool_kernel2
        args = (lc, grouped, Wlc, Wgp, b)
        in_specs = [feat_spec(C1p), feat_spec(C2),
                    full_spec(Wlc), full_spec(Wgp), full_spec(b)]

    # TODO(synk): lane-dense (Mp*Cout/128, 128) output packing intentionally dropped
    # pending per-generation measurement — with bf16 outputs the Cout=32 masked-store
    # traffic is negligible and the in-kernel 32->128-lane regroup is relayout work.
    out = pl.pallas_call(
        kernel,
        out_shape=jax.ShapeDtypeStruct((Mp, Cout), out_dtype),
        grid=(grid,),
        in_specs=in_specs,
        out_specs=pl.BlockSpec((tm, Cout), lambda i: (i, 0)),
        compiler_params=pltpu.CompilerParams(
            dimension_semantics=("parallel",),
            vmem_limit_bytes=_vmem_limit_bytes()),
    )(*args)

    return out[:M] if Mp > M else out


# ----------------------------------------------------------------------------
# Glue (gathers / layout) in plain JAX
# ----------------------------------------------------------------------------
def _gather_points(points, idx):
    # points: (B, N, C); idx: (B, ...) int32 -> (B, ..., C)
    return jax.vmap(lambda p, i: p[i])(points, idx)


def surface_conv_purity(xyz, points, local_coords, neighbors, data_idxes, W, b,
                        *, out_dtype=jnp.bfloat16):
    """Reconstructed SurfaceConvPurity forward (gather + shared MLP + max-pool).

    xyz:           (B, N, 3)
    points:        (B, N, D) or None
    local_coords:  (B, npoint, S, 6)
    neighbors:     (B, npoint, S) int32, indices into N
    data_idxes:    (B, npoint)    int32, indices into N
    returns new_xyz (B, npoint, 3), new_points (B, npoint, Cout)
    """
    B, npoint, S, C1 = local_coords.shape
    M = B * npoint
    new_xyz = _gather_points(xyz, data_idxes)                       # (B, npoint, 3)

    # Neighbor-major (S, M, C) layouts: per-neighbor kernel slices are zero-cost
    # leading-dim views and bf16 (tm, C) tiles carry no sublane padding.  The lc
    # transpose+cast+pad is one fused XLA copy over the *small* tensor only.
    lc_sm = jnp.transpose(local_coords, (2, 0, 1, 3)).reshape(S, M, C1)

    if points is None:
        grouped_sm = None
    else:
        N, D = points.shape[1], points.shape[2]
        flat_points = points.reshape(B * N, D).astype(jnp.bfloat16)  # no-op if bf16
        idx = neighbors + (jnp.arange(B, dtype=neighbors.dtype) * N)[:, None, None]
        idx_sm = jnp.transpose(idx, (2, 0, 1)).reshape(S, M)
        # TODO(synk): this XLA gather still materializes (S, M, D) once in HBM before
        # the kernel reads it back (see module-level TODO on in-kernel gathering).
        grouped_sm = jnp.take(flat_points, idx_sm, axis=0)           # (S, M, D) bf16

    out = conv_pool_pallas(lc_sm, grouped_sm, W, b, out_dtype=out_dtype)
    return new_xyz, out.reshape(B, npoint, -1)


# ----------------------------------------------------------------------------
# SurfaceNet parameters & forward (layers actually used by forward())
# ----------------------------------------------------------------------------
def _init_linear(key, cin, cout):
    kw, kb = jax.random.split(key)
    W = jax.random.normal(kw, (cin, cout), jnp.float32) / jnp.sqrt(float(cin))
    b = 0.01 * jax.random.normal(kb, (1, cout), jnp.float32)
    return W, b


def init_surfacenet_params(key):
    scale = 2
    pad = 6  # normal=False
    cfg = {
        "sa0":  (pad + 0,            16 * scale),   # 6   -> 32
        "sa02": (16 * scale + pad,   16 * scale),   # 38  -> 32
        "sa1":  (16 * scale + pad,   64 * scale),   # 38  -> 128
        "sa12": (64 * scale + pad,   64 * scale),   # 134 -> 128
        "sa2":  (64 * scale + pad,  128 * scale),   # 134 -> 256
    }
    params = {}
    for name, (cin, cout) in cfg.items():
        key, sub = jax.random.split(key)
        params[name] = _init_linear(sub, cin, cout)
    return params


def surfacenet_forward(params, xyz, local_coordinates_layer, neighbors_layer,
                       data_idxes_layer, parameters_layer):
    # parameters_layer accepted for signature parity but unused (see TODO above).
    del parameters_layer
    lc, nb, di = local_coordinates_layer, neighbors_layer, data_idxes_layer
    bf16, f32 = jnp.bfloat16, jnp.float32

    # Intermediate layers emit bf16 (their outputs only feed the next layer's
    # gather); the final layer emits f32.
    # NOTE: as in the PyTorch model, sa02 reuses neighbors_layer[0] against the
    # downsampled l0 set — valid only because point_num[0] == N in this config.
    l0_xyz, l0_points = surface_conv_purity(
        xyz, None, lc[0], nb[0], di[0], *params["sa0"], out_dtype=bf16)
    l0_xyz, l0_points = surface_conv_purity(
        l0_xyz, l0_points, lc[0], nb[0], di[0], *params["sa02"], out_dtype=bf16)
    l1_xyz, l1_points = surface_conv_purity(
        l0_xyz, l0_points, lc[1], nb[1], di[1], *params["sa1"], out_dtype=bf16)
    l2_xyz, l2_points = surface_conv_purity(
        l1_xyz, l1_points, lc[2], nb[2], di[2], *params["sa12"], out_dtype=bf16)
    l2_xyz, l2_points = surface_conv_purity(
        l2_xyz, l2_points, lc[3], nb[3], di[3], *params["sa2"], out_dtype=f32)
    return l2_xyz, l2_points


# ----------------------------------------------------------------------------
# Demo
# ----------------------------------------------------------------------------
if __name__ == "__main__":
    key = jax.random.PRNGKey(0)

    B, N, S = 2, 128, 8
    # downsampled point counts per layer (small analogue of [2048, 512, 512, 128])
    npoints = [128, 64, 64, 32]
    # source point count each layer's neighbor/sample indices refer to
    src_counts = [N, npoints[0], npoints[1], npoints[2]]
    # sa02 reuses neighbors_layer[0] against the downsampled l0 set (see NOTE above)
    assert npoints[0] == N

    key, kxyz = jax.random.split(key)
    xyz = jax.random.normal(kxyz, (B, N, 3), jnp.float32)

    local_coordinates_layer = []
    neighbors_layer = []
    data_idxes_layer = []
    for np_l, src in zip(npoints, src_counts):
        key, k1, k2, k3 = jax.random.split(key, 4)
        local_coordinates_layer.append(
            jax.random.normal(k1, (B, np_l, S, 6), jnp.float32))
        neighbors_layer.append(
            jax.random.randint(k2, (B, np_l, S), 0, src, dtype=jnp.int32))
        data_idxes_layer.append(
            jax.random.randint(k3, (B, np_l), 0, src, dtype=jnp.int32))

    parameters_layer = []
    for np_l in (npoints[0], npoints[2], npoints[3]):
        key, kp = jax.random.split(key)
        parameters_layer.append(
            jax.random.normal(kp, (B, np_l, S), jnp.float32))

    key, kparam = jax.random.split(key)
    params = init_surfacenet_params(kparam)

    fwd = jax.jit(functools.partial(surfacenet_forward, params))
    l2_xyz, l2_points = fwd(xyz, local_coordinates_layer, neighbors_layer,
                            data_idxes_layer, parameters_layer)
    jax.block_until_ready((l2_xyz, l2_points))

    assert l2_xyz.shape == (B, npoints[3], 3), l2_xyz.shape
    assert l2_points.shape == (B, npoints[3], 256), l2_points.shape
    assert bool(jnp.all(jnp.isfinite(l2_points)))
    print("KERNEL_OK")
</pallas_src>

<mosaic_0001>
module attributes {stable_mosaic.version = 11 : i64} {
  func.func @_conv_pool_kernel1(%arg0: i32, %arg1: memref<8x128x16xbf16, #tpu.memory_space<vmem>>, %arg2: memref<16x32xbf16, #tpu.memory_space<vmem>>, %arg3: memref<1x32xf32, #tpu.memory_space<vmem>>, %arg4: memref<128x32xbf16, #tpu.memory_space<vmem>>) attributes {dimension_semantics = [#tpu.dimension_semantics<parallel>], iteration_bounds = array<i64: 2>, scalar_prefetch = 0 : i64, scratch_operands = 0 : i64, tpu.core_type = #tpu.core_type<tc>, window_params = [{transform_indices = @transform_0, window_bounds = array<i64: 8, 128, 16>}, {pipeline_mode = #tpu.pipeline_mode<synchronous>, transform_indices = @transform_1, window_bounds = array<i64: 16, 32>}, {pipeline_mode = #tpu.pipeline_mode<synchronous>, transform_indices = @transform_2, window_bounds = array<i64: 1, 32>}, {transform_indices = @transform_3, window_bounds = array<i64: 128, 32>}]} {
    %c0 = arith.constant 0 : index
    %c0_0 = arith.constant 0 : index
    %0 = vector.load %arg2[%c0, %c0_0] : memref<16x32xbf16, #tpu.memory_space<vmem>>, vector<16x32xbf16>
    %c0_1 = arith.constant 0 : index
    %c0_2 = arith.constant 0 : index
    %c0_3 = arith.constant 0 : index
    %1 = vector.load %arg1[%c0_1, %c0_2, %c0_3] : memref<8x128x16xbf16, #tpu.memory_space<vmem>>, vector<1x128x16xbf16>
    %2 = vector.shape_cast %1 : vector<1x128x16xbf16> to vector<128x16xbf16>
    %cst = arith.constant dense<0.000000e+00> : vector<128x32xf32>
    %3 = tpu.matmul %2, %0, %cst {dimension_numbers = #tpu.dot_dimension_numbers<[1], [0], [0], [1], [0, 0, 1, 1], [], []>} : vector<128x16xbf16>, vector<16x32xbf16>, vector<128x32xf32> -> vector<128x32xf32>
    %c1 = arith.constant 1 : index
    %c0_4 = arith.constant 0 : index
    %c0_5 = arith.constant 0 : index
    %4 = vector.load %arg1[%c1, %c0_4, %c0_5] : memref<8x128x16xbf16, #tpu.memory_space<vmem>>, vector<1x128x16xbf16>
    %5 = vector.shape_cast %4 : vector<1x128x16xbf16> to vector<128x16xbf16>
    %cst_6 = arith.constant dense<0.000000e+00> : vector<128x32xf32>
    %6 = tpu.matmul %5, %0, %cst_6 {dimension_numbers = #tpu.dot_dimension_numbers<[1], [0], [0], [1], [0, 0, 1, 1], [], []>} : vector<128x16xbf16>, vector<16x32xbf16>, vector<128x32xf32> -> vector<128x32xf32>
    %7 = arith.maximumf %3, %6 : vector<128x32xf32>
    %c2 = arith.constant 2 : index
    %c0_7 = arith.constant 0 : index
    %c0_8 = arith.constant 0 : index
    %8 = vector.load %arg1[%c2, %c0_7, %c0_8] : memref<8x128x16xbf16, #tpu.memory_space<vmem>>, vector<1x128x16xbf16>
    %9 = vector.shape_cast %8 : vector<1x128x16xbf16> to vector<128x16xbf16>
    %cst_9 = arith.constant dense<0.000000e+00> : vector<128x32xf32>
    %10 = tpu.matmul %9, %0, %cst_9 {dimension_numbers = #tpu.dot_dimension_numbers<[1], [0], [0], [1], [0, 0, 1, 1], [], []>} : vector<128x16xbf16>, vector<16x32xbf16>, vector<128x32xf32> -> vector<128x32xf32>
    %11 = arith.maximumf %7, %10 : vector<128x32xf32>
    %c3 = arith.constant 3 : index
    %c0_10 = arith.constant 0 : index
    %c0_11 = arith.constant 0 : index
    %12 = vector.load %arg1[%c3, %c0_10, %c0_11] : memref<8x128x16xbf16, #tpu.memory_space<vmem>>, vector<1x128x16xbf16>
    %13 = vector.shape_cast %12 : vector<1x128x16xbf16> to vector<128x16xbf16>
    %cst_12 = arith.constant dense<0.000000e+00> : vector<128x32xf32>
    %14 = tpu.matmul %13, %0, %cst_12 {dimension_numbers = #tpu.dot_dimension_numbers<[1], [0], [0], [1], [0, 0, 1, 1], [], []>} : vector<128x16xbf16>, vector<16x32xbf16>, vector<128x32xf32> -> vector<128x32xf32>
    %15 = arith.maximumf %11, %14 : vector<128x32xf32>
    %c4 = arith.constant 4 : index
    %c0_13 = arith.constant 0 : index
    %c0_14 = arith.constant 0 : index
    %16 = vector.load %arg1[%c4, %c0_13, %c0_14] : memref<8x128x16xbf16, #tpu.memory_space<vmem>>, vector<1x128x16xbf16>
    %17 = vector.shape_cast %16 : vector<1x128x16xbf16> to vector<128x16xbf16>
    %cst_15 = arith.constant dense<0.000000e+00> : vector<128x32xf32>
    %18 = tpu.matmul %17, %0, %cst_15 {dimension_numbers = #tpu.dot_dimension_numbers<[1], [0], [0], [1], [0, 0, 1, 1], [], []>} : vector<128x16xbf16>, vector<16x32xbf16>, vector<128x32xf32> -> vector<128x32xf32>
    %19 = arith.maximumf %15, %18 : vector<128x32xf32>
    %c5 = arith.constant 5 : index
    %c0_16 = arith.constant 0 : index
    %c0_17 = arith.constant 0 : index
    %20 = vector.load %arg1[%c5, %c0_16, %c0_17] : memref<8x128x16xbf16, #tpu.memory_space<vmem>>, vector<1x128x16xbf16>
    %21 = vector.shape_cast %20 : vector<1x128x16xbf16> to vector<128x16xbf16>
    %cst_18 = arith.constant dense<0.000000e+00> : vector<128x32xf32>
    %22 = tpu.matmul %21, %0, %cst_18 {dimension_numbers = #tpu.dot_dimension_numbers<[1], [0], [0], [1], [0, 0, 1, 1], [], []>} : vector<128x16xbf16>, vector<16x32xbf16>, vector<128x32xf32> -> vector<128x32xf32>
    %23 = arith.maximumf %19, %22 : vector<128x32xf32>
    %c6 = arith.constant 6 : index
    %c0_19 = arith.constant 0 : index
    %c0_20 = arith.constant 0 : index
    %24 = vector.load %arg1[%c6, %c0_19, %c0_20] : memref<8x128x16xbf16, #tpu.memory_space<vmem>>, vector<1x128x16xbf16>
    %25 = vector.shape_cast %24 : vector<1x128x16xbf16> to vector<128x16xbf16>
    %cst_21 = arith.constant dense<0.000000e+00> : vector<128x32xf32>
    %26 = tpu.matmul %25, %0, %cst_21 {dimension_numbers = #tpu.dot_dimension_numbers<[1], [0], [0], [1], [0, 0, 1, 1], [], []>} : vector<128x16xbf16>, vector<16x32xbf16>, vector<128x32xf32> -> vector<128x32xf32>
    %27 = arith.maximumf %23, %26 : vector<128x32xf32>
    %c7 = arith.constant 7 : index
    %c0_22 = arith.constant 0 : index
    %c0_23 = arith.constant 0 : index
    %28 = vector.load %arg1[%c7, %c0_22, %c0_23] : memref<8x128x16xbf16, #tpu.memory_space<vmem>>, vector<1x128x16xbf16>
    %29 = vector.shape_cast %28 : vector<1x128x16xbf16> to vector<128x16xbf16>
    %cst_24 = arith.constant dense<0.000000e+00> : vector<128x32xf32>
    %30 = tpu.matmul %29, %0, %cst_24 {dimension_numbers = #tpu.dot_dimension_numbers<[1], [0], [0], [1], [0, 0, 1, 1], [], []>} : vector<128x16xbf16>, vector<16x32xbf16>, vector<128x32xf32> -> vector<128x32xf32>
    %31 = arith.maximumf %27, %30 : vector<128x32xf32>
    %c0_25 = arith.constant 0 : index
    %c0_26 = arith.constant 0 : index
    %32 = vector.load %arg3[%c0_25, %c0_26] : memref<1x32xf32, #tpu.memory_space<vmem>>, vector<1x32xf32>
    %33 = vector.broadcast %32 : vector<1x32xf32> to vector<128x32xf32>
    %34 = arith.addf %31, %33 : vector<128x32xf32>
    %cst_27 = arith.constant 0.000000e+00 : f32
    %35 = vector.broadcast %cst_27 : f32 to vector<128x32xf32>
    %36 = arith.maximumf %34, %35 : vector<128x32xf32>
    %37 = arith.truncf %36 : vector<128x32xf32> to vector<128x32xbf16>
    %c0_28 = arith.constant 0 : index
    %c0_29 = arith.constant 0 : index
    %38 = vector.load %arg4[%c0_28, %c0_29] : memref<128x32xbf16, #tpu.memory_space<vmem>>, vector<128x32xbf16>
    tpu.vector_store %arg4[%c0_28, %c0_29], %37 {strides = array<i32>} : memref<128x32xbf16, #tpu.memory_space<vmem>>, vector<128x32xbf16>,
    return
  }
  func.func @transform_0(%arg0: i32) -> (i32, i32, i32) {
    %c0_i32 = arith.constant 0 : i32
    %c0_i32_0 = arith.constant 0 : i32
    %c0_i32_1 = arith.constant 0 : i32
    return %c0_i32, %arg0, %c0_i32_0 : i32, i32, i32
  }
  func.func @transform_1(%arg0: i32) -> (i32, i32) {
    %c0_i32 = arith.constant 0 : i32
    %c0_i32_0 = arith.constant 0 : i32
    %c0_i32_1 = arith.constant 0 : i32
    return %c0_i32, %c0_i32_0 : i32, i32
  }
  func.func @transform_2(%arg0: i32) -> (i32, i32) {
    %c0_i32 = arith.constant 0 : i32
    %c0_i32_0 = arith.constant 0 : i32
    %c0_i32_1 = arith.constant 0 : i32
    return %c0_i32, %c0_i32_0 : i32, i32
  }
  func.func @transform_3(%arg0: i32) -> (i32, i32) {
    %c0_i32 = arith.constant 0 : i32
    %c0_i32_0 = arith.constant 0 : i32
    return %arg0, %c0_i32 : i32, i32
  }
}

module attributes {stable_mosaic.version = 11 : i64} {
  func.func @_conv_pool_kernel2(%arg0: i32, %arg1: memref<8x128x16xbf16, #tpu.memory_space<vmem>>, %arg2: memref<8x128x32xbf16, #tpu.memory_space<vmem>>, %arg3: memref<16x32xbf16, #tpu.memory_space<vmem>>, %arg4: memref<32x32xbf16, #tpu.memory_space<vmem>>, %arg5: memref<1x32xf32, #tpu.memory_space<vmem>>, %arg6: memref<128x32xbf16, #tpu.memory_space<vmem>>) attributes {dimension_semantics = [#tpu.dimension_semantics<parallel>], iteration_bounds = array<i64: 2>, scalar_prefetch = 0 : i64, scratch_operands = 0 : i64, tpu.core_type = #tpu.core_type<tc>, window_params = [{transform_indices = @transform_0, window_bounds = array<i64: 8, 128, 16>}, {transform_indices = @transform_1, window_bounds = array<i64: 8, 128, 32>}, {pipeline_mode = #tpu.pipeline_mode<synchronous>, transform_indices = @transform_2, window_bounds = array<i64: 16, 32>}, {pipeline_mode = #tpu.pipeline_mode<synchronous>, transform_indices = @transform_3, window_bounds = array<i64: 32, 32>}, {pipeline_mode = #tpu.pipeline_mode<synchronous>, transform_indices = @transform_4, window_bounds = array<i64: 1, 32>}, {transform_indices = @transform_5, window_bounds = array<i64: 128, 32>}]} {
    %c0 = arith.constant 0 : index
    %c0_0 = arith.constant 0 : index
    %0 = vector.load %arg3[%c0, %c0_0] : memref<16x32xbf16, #tpu.memory_space<vmem>>, vector<16x32xbf16>
    %c0_1 = arith.constant 0 : index
    %c0_2 = arith.constant 0 : index
    %1 = vector.load %arg4[%c0_1, %c0_2] : memref<32x32xbf16, #tpu.memory_space<vmem>>, vector<32x32xbf16>
    %c0_3 = arith.constant 0 : index
    %c0_4 = arith.constant 0 : index
    %c0_5 = arith.constant 0 : index
    %2 = vector.load %arg1[%c0_3, %c0_4, %c0_5] : memref<8x128x16xbf16, #tpu.memory_space<vmem>>, vector<1x128x16xbf16>
    %3 = vector.shape_cast %2 : vector<1x128x16xbf16> to vector<128x16xbf16>
    %cst = arith.constant dense<0.000000e+00> : vector<128x32xf32>
    %4 = tpu.matmul %3, %0, %cst {dimension_numbers = #tpu.dot_dimension_numbers<[1], [0], [0], [1], [0, 0, 1, 1], [], []>} : vector<128x16xbf16>, vector<16x32xbf16>, vector<128x32xf32> -> vector<128x32xf32>
    %c0_6 = arith.constant 0 : index
    %c0_7 = arith.constant 0 : index
    %c0_8 = arith.constant 0 : index
    %5 = vector.load %arg2[%c0_6, %c0_7, %c0_8] : memref<8x128x32xbf16, #tpu.memory_space<vmem>>, vector<1x128x32xbf16>
    %6 = vector.shape_cast %5 : vector<1x128x32xbf16> to vector<128x32xbf16>
    %cst_9 = arith.constant dense<0.000000e+00> : vector<128x32xf32>
    %7 = tpu.matmul %6, %1, %cst_9 {dimension_numbers = #tpu.dot_dimension_numbers<[1], [0], [0], [1], [0, 0, 1, 1], [], []>} : vector<128x32xbf16>, vector<32x32xbf16>, vector<128x32xf32> -> vector<128x32xf32>
    %8 = arith.addf %4, %7 : vector<128x32xf32>
    %c1 = arith.constant 1 : index
    %c0_10 = arith.constant 0 : index
    %c0_11 = arith.constant 0 : index
    %9 = vector.load %arg1[%c1, %c0_10, %c0_11] : memref<8x128x16xbf16, #tpu.memory_space<vmem>>, vector<1x128x16xbf16>
    %10 = vector.shape_cast %9 : vector<1x128x16xbf16> to vector<128x16xbf16>
    %cst_12 = arith.constant dense<0.000000e+00> : vector<128x32xf32>
    %11 = tpu.matmul %10, %0, %cst_12 {dimension_numbers = #tpu.dot_dimension_numbers<[1], [0], [0], [1], [0, 0, 1, 1], [], []>} : vector<128x16xbf16>, vector<16x32xbf16>, vector<128x32xf32> -> vector<128x32xf32>
    %c1_13 = arith.constant 1 : index
    %c0_14 = arith.constant 0 : index
    %c0_15 = arith.constant 0 : index
    %12 = vector.load %arg2[%c1_13, %c0_14, %c0_15] : memref<8x128x32xbf16, #tpu.memory_space<vmem>>, vector<1x128x32xbf16>
    %13 = vector.shape_cast %12 : vector<1x128x32xbf16> to vector<128x32xbf16>
    %cst_16 = arith.constant dense<0.000000e+00> : vector<128x32xf32>
    %14 = tpu.matmul %13, %1, %cst_16 {dimension_numbers = #tpu.dot_dimension_numbers<[1], [0], [0], [1], [0, 0, 1, 1], [], []>} : vector<128x32xbf16>, vector<32x32xbf16>, vector<128x32xf32> -> vector<128x32xf32>
    %15 = arith.addf %11, %14 : vector<128x32xf32>
    %16 = arith.maximumf %8, %15 : vector<128x32xf32>
    %c2 = arith.constant 2 : index
    %c0_17 = arith.constant 0 : index
    %c0_18 = arith.constant 0 : index
    %17 = vector.load %arg1[%c2, %c0_17, %c0_18] : memref<8x128x16xbf16, #tpu.memory_space<vmem>>, vector<1x128x16xbf16>
    %18 = vector.shape_cast %17 : vector<1x128x16xbf16> to vector<128x16xbf16>
    %cst_19 = arith.constant dense<0.000000e+00> : vector<128x32xf32>
    %19 = tpu.matmul %18, %0, %cst_19 {dimension_numbers = #tpu.dot_dimension_numbers<[1], [0], [0], [1], [0, 0, 1, 1], [], []>} : vector<128x16xbf16>, vector<16x32xbf16>, vector<128x32xf32> -> vector<128x32xf32>
    %c2_20 = arith.constant 2 : index
    %c0_21 = arith.constant 0 : index
    %c0_22 = arith.constant 0 : index
    %20 = vector.load %arg2[%c2_20, %c0_21, %c0_22] : memref<8x128x32xbf16, #tpu.memory_space<vmem>>, vector<1x128x32xbf16>
    %21 = vector.shape_cast %20 : vector<1x128x32xbf16> to vector<128x32xbf16>
    %cst_23 = arith.constant dense<0.000000e+00> : vector<128x32xf32>
    %22 = tpu.matmul %21, %1, %cst_23 {dimension_numbers = #tpu.dot_dimension_numbers<[1], [0], [0], [1], [0, 0, 1, 1], [], []>} : vector<128x32xbf16>, vector<32x32xbf16>, vector<128x32xf32> -> vector<128x32xf32>
    %23 = arith.addf %19, %22 : vector<128x32xf32>
    %24 = arith.maximumf %16, %23 : vector<128x32xf32>
    %c3 = arith.constant 3 : index
    %c0_24 = arith.constant 0 : index
    %c0_25 = arith.constant 0 : index
    %25 = vector.load %arg1[%c3, %c0_24, %c0_25] : memref<8x128x16xbf16, #tpu.memory_space<vmem>>, vector<1x128x16xbf16>
    %26 = vector.shape_cast %25 : vector<1x128x16xbf16> to vector<128x16xbf16>
    %cst_26 = arith.constant dense<0.000000e+00> : vector<128x32xf32>
    %27 = tpu.matmul %26, %0, %cst_26 {dimension_numbers = #tpu.dot_dimension_numbers<[1], [0], [0], [1], [0, 0, 1, 1], [], []>} : vector<128x16xbf16>, vector<16x32xbf16>, vector<128x32xf32> -> vector<128x32xf32>
    %c3_27 = arith.constant 3 : index
    %c0_28 = arith.constant 0 : index
    %c0_29 = arith.constant 0 : index
    %28 = vector.load %arg2[%c3_27, %c0_28, %c0_29] : memref<8x128x32xbf16, #tpu.memory_space<vmem>>, vector<1x128x32xbf16>
    %29 = vector.shape_cast %28 : vector<1x128x32xbf16> to vector<128x32xbf16>
    %cst_30 = arith.constant dense<0.000000e+00> : vector<128x32xf32>
    %30 = tpu.matmul %29, %1, %cst_30 {dimension_numbers = #tpu.dot_dimension_numbers<[1], [0], [0], [1], [0, 0, 1, 1], [], []>} : vector<128x32xbf16>, vector<32x32xbf16>, vector<128x32xf32> -> vector<128x32xf32>
    %31 = arith.addf %27, %30 : vector<128x32xf32>
    %32 = arith.maximumf %24, %31 : vector<128x32xf32>
    %c4 = arith.constant 4 : index
    %c0_31 = arith.constant 0 : index
    %c0_32 = arith.constant 0 : index
    %33 = vector.load %arg1[%c4, %c0_31, %c0_32] : memref<8x128x16xbf16, #tpu.memory_space<vmem>>, vector<1x128x16xbf16>
    %34 = vector.shape_cast %33 : vector<1x128x16xbf16> to vector<128x16xbf16>
    %cst_33 = arith.constant dense<0.000000e+00> : vector<128x32xf32>
    %35 = tpu.matmul %34, %0, %cst_33 {dimension_numbers = #tpu.dot_dimension_numbers<[1], [0], [0], [1], [0, 0, 1, 1], [], []>} : vector<128x16xbf16>, vector<16x32xbf16>, vector<128x32xf32> -> vector<128x32xf32>
    %c4_34 = arith.constant 4 : index
    %c0_35 = arith.constant 0 : index
    %c0_36 = arith.constant 0 : index
    %36 = vector.load %arg2[%c4_34, %c0_35, %c0_36] : memref<8x128x32xbf16, #tpu.memory_space<vmem>>, vector<1x128x32xbf16>
    %37 = vector.shape_cast %36 : vector<1x128x32xbf16> to vector<128x32xbf16>
    %cst_37 = arith.constant dense<0.000000e+00> : vector<128x32xf32>
    %38 = tpu.matmul %37, %1, %cst_37 {dimension_numbers = #tpu.dot_dimension_numbers<[1], [0], [0], [1], [0, 0, 1, 1], [], []>} : vector<128x32xbf16>, vector<32x32xbf16>, vector<128x32xf32> -> vector<128x32xf32>
    %39 = arith.addf %35, %38 : vector<128x32xf32>
    %40 = arith.maximumf %32, %39 : vector<128x32xf32>
    %c5 = arith.constant 5 : index
    %c0_38 = arith.constant 0 : index
    %c0_39 = arith.constant 0 : index
    %41 = vector.load %arg1[%c5, %c0_38, %c0_39] : memref<8x128x16xbf16, #tpu.memory_space<vmem>>, vector<1x128x16xbf16>
    %42 = vector.shape_cast %41 : vector<1x128x16xbf16> to vector<128x16xbf16>
    %cst_40 = arith.constant dense<0.000000e+00> : vector<128x32xf32>
    %43 = tpu.matmul %42, %0, %cst_40 {dimension_numbers = #tpu.dot_dimension_numbers<[1], [0], [0], [1], [0, 0, 1, 1], [], []>} : vector<128x16xbf16>, vector<16x32xbf16>, vector<128x32xf32> -> vector<128x32xf32>
    %c5_41 = arith.constant 5 : index
    %c0_42 = arith.constant 0 : index
    %c0_43 = arith.constant 0 : index
    %44 = vector.load %arg2[%c5_41, %c0_42, %c0_43] : memref<8x128x32xbf16, #tpu.memory_space<vmem>>, vector<1x128x32xbf16>
    %45 = vector.shape_cast %44 : vector<1x128x32xbf16> to vector<128x32xbf16>
    %cst_44 = arith.constant dense<0.000000e+00> : vector<128x32xf32>
    %46 = tpu.matmul %45, %1, %cst_44 {dimension_numbers = #tpu.dot_dimension_numbers<[1], [0], [0], [1], [0, 0, 1, 1], [], []>} : vector<128x32xbf16>, vector<32x32xbf16>, vector<128x32xf32> -> vector<128x32xf32>
    %47 = arith.addf %43, %46 : vector<128x32xf32>
    %48 = arith.maximumf %40, %47 : vector<128x32xf32>
    %c6 = arith.constant 6 : index
    %c0_45 = arith.constant 0 : index
    %c0_46 = arith.constant 0 : index
    %49 = vector.load %arg1[%c6, %c0_45, %c0_46] : memref<8x128x16xbf16, #tpu.memory_space<vmem>>, vector<1x128x16xbf16>
    %50 = vector.shape_cast %49 : vector<1x128x16xbf16> to vector<128x16xbf16>
    %cst_47 = arith.constant dense<0.000000e+00> : vector<128x32xf32>
    %51 = tpu.matmul %50, %0, %cst_47 {dimension_numbers = #tpu.dot_dimension_numbers<[1], [0], [0], [1], [0, 0, 1, 1], [], []>} : vector<128x16xbf16>, vector<16x32xbf16>, vector<128x32xf32> -> vector<128x32xf32>
    %c6_48 = arith.constant 6 : index
    %c0_49 = arith.constant 0 : index
    %c0_50 = arith.constant 0 : index
    %52 = vector.load %arg2[%c6_48, %c0_49, %c0_50] : memref<8x128x32xbf16, #tpu.memory_space<vmem>>, vector<1x128x32xbf16>
    %53 = vector.shape_cast %52 : vector<1x128x32xbf16> to vector<128x32xbf16>
    %cst_51 = arith.constant dense<0.000000e+00> : vector<128x32xf32>
    %54 = tpu.matmul %53, %1, %cst_51 {dimension_numbers = #tpu.dot_dimension_numbers<[1], [0], [0], [1], [0, 0, 1, 1], [], []>} : vector<128x32xbf16>, vector<32x32xbf16>, vector<128x32xf32> -> vector<128x32xf32>
    %55 = arith.addf %51, %54 : vector<128x32xf32>
    %56 = arith.maximumf %48, %55 : vector<128x32xf32>
    %c7 = arith.constant 7 : index
    %c0_52 = arith.constant 0 : index
    %c0_53 = arith.constant 0 : index
    %57 = vector.load %arg1[%c7, %c0_52, %c0_53] : memref<8x128x16xbf16, #tpu.memory_space<vmem>>, vector<1x128x16xbf16>
    %58 = vector.shape_cast %57 : vector<1x128x16xbf16> to vector<128x16xbf16>
    %cst_54 = arith.constant dense<0.000000e+00> : vector<128x32xf32>
    %59 = tpu.matmul %58, %0, %cst_54 {dimension_numbers = #tpu.dot_dimension_numbers<[1], [0], [0], [1], [0, 0, 1, 1], [], []>} : vector<128x16xbf16>, vector<16x32xbf16>, vector<128x32xf32> -> vector<128x32xf32>
    %c7_55 = arith.constant 7 : index
    %c0_56 = arith.constant 0 : index
    %c0_57 = arith.constant 0 : index
    %60 = vector.load %arg2[%c7_55, %c0_56, %c0_57] : memref<8x128x32xbf16, #tpu.memory_space<vmem>>, vector<1x128x32xbf16>
    %61 = vector.shape_cast %60 : vector<1x128x32xbf16> to vector<128x32xbf16>
    %cst_58 = arith.constant dense<0.000000e+00> : vector<128x32xf32>
    %62 = tpu.matmul %61, %1, %cst_58 {dimension_numbers = #tpu.dot_dimension_numbers<[1], [0], [0], [1], [0, 0, 1, 1], [], []>} : vector<128x32xbf16>, vector<32x32xbf16>, vector<128x32xf32> -> vector<128x32xf32>
    %63 = arith.addf %59, %62 : vector<128x32xf32>
    %64 = arith.maximumf %56, %63 : vector<128x32xf32>
    %c0_59 = arith.constant 0 : index
    %c0_60 = arith.constant 0 : index
    %65 = vector.load %arg5[%c0_59, %c0_60] : memref<1x32xf32, #tpu.memory_space<vmem>>, vector<1x32xf32>
    %66 = vector.broadcast %65 : vector<1x32xf32> to vector<128x32xf32>
    %67 = arith.addf %64, %66 : vector<128x32xf32>
    %cst_61 = arith.constant 0.000000e+00 : f32
    %68 = vector.broadcast %cst_61 : f32 to vector<128x32xf32>
    %69 = arith.maximumf %67, %68 : vector<128x32xf32>
    %70 = arith.truncf %69 : vector<128x32xf32> to vector<128x32xbf16>
    %c0_62 = arith.constant 0 : index
    %c0_63 = arith.constant 0 : index
    %71 = vector.load %arg6[%c0_62, %c0_63] : memref<128x32xbf16, #tpu.memory_space<vmem>>, vector<128x32xbf16>
    tpu.vector_store %arg6[%c0_62, %c0_63], %70 {strides = array<i32>} : memref<128x32xbf16, #tpu.memory_space<vmem>>, vector<128x32xbf16>,
    return
  }
  func.func @transform_0(%arg0: i32) -> (i32, i32, i32) {
    %c0_i32 = arith.constant 0 : i32
    %c0_i32_0 = arith.constant 0 : i32
    %c0_i32_1 = arith.constant 0 : i32
    return %c0_i32, %arg0, %c0_i32_0 : i32, i32, i32
  }
  func.func @transform_1(%arg0: i32) -> (i32, i32, i32) {
    %c0_i32 = arith.constant 0 : i32
    %c0_i32_0 = arith.constant 0 : i32
    %c0_i32_1 = arith.constant 0 : i32
    return %c0_i32, %arg0, %c0_i32_0 : i32, i32, i32
  }
  func.func @transform_2(%arg0: i32) -> (i32, i32) {
    %c0_i32 = arith.constant 0 : i32
    %c0_i32_0 = arith.constant 0 : i32
    %c0_i32_1 = arith.constant 0 : i32
    return %c0_i32, %c0_i32_0 : i32, i32
  }
  func.func @transform_3(%arg0: i32) -> (i32, i32) {
    %c0_i32 = arith.constant 0 : i32
    %c0_i32_0 = arith.constant 0 : i32
    %c0_i32_1 = arith.constant 0 : i32
    return %c0_i32, %c0_i32_0 : i32, i32
  }
  func.func @transform_4(%arg0: i32) -> (i32, i32) {
    %c0_i32 = arith.constant 0 : i32
    %c0_i32_0 = arith.constant 0 : i32
    %c0_i32_1 = arith.constant 0 : i32
    return %c0_i32, %c0_i32_0 : i32, i32
  }
  func.func @transform_5(%arg0: i32) -> (i32, i32) {
    %c0_i32 = arith.constant 0 : i32
    %c0_i32_0 = arith.constant 0 : i32
    return %arg0, %c0_i32 : i32, i32
  }
}

module attributes {stable_mosaic.version = 11 : i64} {
  func.func @_conv_pool_kernel2(%arg0: i32, %arg1: memref<8x128x16xbf16, #tpu.memory_space<vmem>>, %arg2: memref<8x128x32xbf16, #tpu.memory_space<vmem>>, %arg3: memref<16x128xbf16, #tpu.memory_space<vmem>>, %arg4: memref<32x128xbf16, #tpu.memory_space<vmem>>, %arg5: memref<1x128xf32, #tpu.memory_space<vmem>>, %arg6: memref<128x128xbf16, #tpu.memory_space<vmem>>) attributes {dimension_semantics = [#tpu.dimension_semantics<parallel>], iteration_bounds = array<i64: 1>, scalar_prefetch = 0 : i64, scratch_operands = 0 : i64, tpu.core_type = #tpu.core_type<tc>, window_params = [{transform_indices = @transform_0, window_bounds = array<i64: 8, 128, 16>}, {transform_indices = @transform_1, window_bounds = array<i64: 8, 128, 32>}, {pipeline_mode = #tpu.pipeline_mode<synchronous>, transform_indices = @transform_2, window_bounds = array<i64: 16, 128>}, {pipeline_mode = #tpu.pipeline_mode<synchronous>, transform_indices = @transform_3, window_bounds = array<i64: 32, 128>}, {pipeline_mode = #tpu.pipeline_mode<synchronous>, transform_indices = @transform_4, window_bounds = array<i64: 1, 128>}, {transform_indices = @transform_5, window_bounds = array<i64: 128, 128>}]} {
    %c0 = arith.constant 0 : index
    %c0_0 = arith.constant 0 : index
    %0 = vector.load %arg3[%c0, %c0_0] : memref<16x128xbf16, #tpu.memory_space<vmem>>, vector<16x128xbf16>
    %c0_1 = arith.constant 0 : index
    %c0_2 = arith.constant 0 : index
    %1 = vector.load %arg4[%c0_1, %c0_2] : memref<32x128xbf16, #tpu.memory_space<vmem>>, vector<32x128xbf16>
    %c0_3 = arith.constant 0 : index
    %c0_4 = arith.constant 0 : index
    %c0_5 = arith.constant 0 : index
    %2 = vector.load %arg1[%c0_3, %c0_4, %c0_5] : memref<8x128x16xbf16, #tpu.memory_space<vmem>>, vector<1x128x16xbf16>
    %3 = vector.shape_cast %2 : vector<1x128x16xbf16> to vector<128x16xbf16>
    %cst = arith.constant dense<0.000000e+00> : vector<128x128xf32>
    %4 = tpu.matmul %3, %0, %cst {dimension_numbers = #tpu.dot_dimension_numbers<[1], [0], [0], [1], [0, 0, 1, 1], [], []>} : vector<128x16xbf16>, vector<16x128xbf16>, vector<128x128xf32> -> vector<128x128xf32>
    %c0_6 = arith.constant 0 : index
    %c0_7 = arith.constant 0 : index
    %c0_8 = arith.constant 0 : index
    %5 = vector.load %arg2[%c0_6, %c0_7, %c0_8] : memref<8x128x32xbf16, #tpu.memory_space<vmem>>, vector<1x128x32xbf16>
    %6 = vector.shape_cast %5 : vector<1x128x32xbf16> to vector<128x32xbf16>
    %cst_9 = arith.constant dense<0.000000e+00> : vector<128x128xf32>
    %7 = tpu.matmul %6, %1, %cst_9 {dimension_numbers = #tpu.dot_dimension_numbers<[1], [0], [0], [1], [0, 0, 1, 1], [], []>} : vector<128x32xbf16>, vector<32x128xbf16>, vector<128x128xf32> -> vector<128x128xf32>
    %8 = arith.addf %4, %7 : vector<128x128xf32>
    %c1 = arith.constant 1 : index
    %c0_10 = arith.constant 0 : index
    %c0_11 = arith.constant 0 : index
    %9 = vector.load %arg1[%c1, %c0_10, %c0_11] : memref<8x128x16xbf16, #tpu.memory_space<vmem>>, vector<1x128x16xbf16>
    %10 = vector.shape_cast %9 : vector<1x128x16xbf16> to vector<128x16xbf16>
    %cst_12 = arith.constant dense<0.000000e+00> : vector<128x128xf32>
    %11 = tpu.matmul %10, %0, %cst_12 {dimension_numbers = #tpu.dot_dimension_numbers<[1], [0], [0], [1], [0, 0, 1, 1], [], []>} : vector<128x16xbf16>, vector<16x128xbf16>, vector<128x128xf32> -> vector<128x128xf32>
    %c1_13 = arith.constant 1 : index
    %c0_14 = arith.constant 0 : index
    %c0_15 = arith.constant 0 : index
    %12 = vector.load %arg2[%c1_13, %c0_14, %c0_15] : memref<8x128x32xbf16, #tpu.memory_space<vmem>>, vector<1x128x32xbf16>
    %13 = vector.shape_cast %12 : vector<1x128x32xbf16> to vector<128x32xbf16>
    %cst_16 = arith.constant dense<0.000000e+00> : vector<128x128xf32>
    %14 = tpu.matmul %13, %1, %cst_16 {dimension_numbers = #tpu.dot_dimension_numbers<[1], [0], [0], [1], [0, 0, 1, 1], [], []>} : vector<128x32xbf16>, vector<32x128xbf16>, vector<128x128xf32> -> vector<128x128xf32>
    %15 = arith.addf %11, %14 : vector<128x128xf32>
    %16 = arith.maximumf %8, %15 : vector<128x128xf32>
    %c2 = arith.constant 2 : index
    %c0_17 = arith.constant 0 : index
    %c0_18 = arith.constant 0 : index
    %17 = vector.load %arg1[%c2, %c0_17, %c0_18] : memref<8x128x16xbf16, #tpu.memory_space<vmem>>, vector<1x128x16xbf16>
    %18 = vector.shape_cast %17 : vector<1x128x16xbf16> to vector<128x16xbf16>
    %cst_19 = arith.constant dense<0.000000e+00> : vector<128x128xf32>
    %19 = tpu.matmul %18, %0, %cst_19 {dimension_numbers = #tpu.dot_dimension_numbers<[1], [0], [0], [1], [0, 0, 1, 1], [], []>} : vector<128x16xbf16>, vector<16x128xbf16>, vector<128x128xf32> -> vector<128x128xf32>
    %c2_20 = arith.constant 2 : index
    %c0_21 = arith.constant 0 : index
    %c0_22 = arith.constant 0 : index
    %20 = vector.load %arg2[%c2_20, %c0_21, %c0_22] : memref<8x128x32xbf16, #tpu.memory_space<vmem>>, vector<1x128x32xbf16>
    %21 = vector.shape_cast %20 : vector<1x128x32xbf16> to vector<128x32xbf16>
    %cst_23 = arith.constant dense<0.000000e+00> : vector<128x128xf32>
    %22 = tpu.matmul %21, %1, %cst_23 {dimension_numbers = #tpu.dot_dimension_numbers<[1], [0], [0], [1], [0, 0, 1, 1], [], []>} : vector<128x32xbf16>, vector<32x128xbf16>, vector<128x128xf32> -> vector<128x128xf32>
    %23 = arith.addf %19, %22 : vector<128x128xf32>
    %24 = arith.maximumf %16, %23 : vector<128x128xf32>
    %c3 = arith.constant 3 : index
    %c0_24 = arith.constant 0 : index
    %c0_25 = arith.constant 0 : index
    %25 = vector.load %arg1[%c3, %c0_24, %c0_25] : memref<8x128x16xbf16, #tpu.memory_space<vmem>>, vector<1x128x16xbf16>
    %26 = vector.shape_cast %25 : vector<1x128x16xbf16> to vector<128x16xbf16>
    %cst_26 = arith.constant dense<0.000000e+00> : vector<128x128xf32>
    %27 = tpu.matmul %26, %0, %cst_26 {dimension_numbers = #tpu.dot_dimension_numbers<[1], [0], [0], [1], [0, 0, 1, 1], [], []>} : vector<128x16xbf16>, vector<16x128xbf16>, vector<128x128xf32> -> vector<128x128xf32>
    %c3_27 = arith.constant 3 : index
    %c0_28 = arith.constant 0 : index
    %c0_29 = arith.constant 0 : index
    %28 = vector.load %arg2[%c3_27, %c0_28, %c0_29] : memref<8x128x32xbf16, #tpu.memory_space<vmem>>, vector<1x128x32xbf16>
    %29 = vector.shape_cast %28 : vector<1x128x32xbf16> to vector<128x32xbf16>
    %cst_30 = arith.constant dense<0.000000e+00> : vector<128x128xf32>
    %30 = tpu.matmul %29, %1, %cst_30 {dimension_numbers = #tpu.dot_dimension_numbers<[1], [0], [0], [1], [0, 0, 1, 1], [], []>} : vector<128x32xbf16>, vector<32x128xbf16>, vector<128x128xf32> -> vector<128x128xf32>
    %31 = arith.addf %27, %30 : vector<128x128xf32>
    %32 = arith.maximumf %24, %31 : vector<128x128xf32>
    %c4 = arith.constant 4 : index
    %c0_31 = arith.constant 0 : index
    %c0_32 = arith.constant 0 : index
    %33 = vector.load %arg1[%c4, %c0_31, %c0_32] : memref<8x128x16xbf16, #tpu.memory_space<vmem>>, vector<1x128x16xbf16>
    %34 = vector.shape_cast %33 : vector<1x128x16xbf16> to vector<128x16xbf16>
    %cst_33 = arith.constant dense<0.000000e+00> : vector<128x128xf32>
    %35 = tpu.matmul %34, %0, %cst_33 {dimension_numbers = #tpu.dot_dimension_numbers<[1], [0], [0], [1], [0, 0, 1, 1], [], []>} : vector<128x16xbf16>, vector<16x128xbf16>, vector<128x128xf32> -> vector<128x128xf32>
    %c4_34 = arith.constant 4 : index
    %c0_35 = arith.constant 0 : index
    %c0_36 = arith.constant 0 : index
    %36 = vector.load %arg2[%c4_34, %c0_35, %c0_36] : memref<8x128x32xbf16, #tpu.memory_space<vmem>>, vector<1x128x32xbf16>
    %37 = vector.shape_cast %36 : vector<1x128x32xbf16> to vector<128x32xbf16>
    %cst_37 = arith.constant dense<0.000000e+00> : vector<128x128xf32>
    %38 = tpu.matmul %37, %1, %cst_37 {dimension_numbers = #tpu.dot_dimension_numbers<[1], [0], [0], [1], [0, 0, 1, 1], [], []>} : vector<128x32xbf16>, vector<32x128xbf16>, vector<128x128xf32> -> vector<128x128xf32>
    %39 = arith.addf %35, %38 : vector<128x128xf32>
    %40 = arith.maximumf %32, %39 : vector<128x128xf32>
    %c5 = arith.constant 5 : index
    %c0_38 = arith.constant 0 : index
    %c0_39 = arith.constant 0 : index
    %41 = vector.load %arg1[%c5, %c0_38, %c0_39] : memref<8x128x16xbf16, #tpu.memory_space<vmem>>, vector<1x128x16xbf16>
    %42 = vector.shape_cast %41 : vector<1x128x16xbf16> to vector<128x16xbf16>
    %cst_40 = arith.constant dense<0.000000e+00> : vector<128x128xf32>
    %43 = tpu.matmul %42, %0, %cst_40 {dimension_numbers = #tpu.dot_dimension_numbers<[1], [0], [0], [1], [0, 0, 1, 1], [], []>} : vector<128x16xbf16>, vector<16x128xbf16>, vector<128x128xf32> -> vector<128x128xf32>
    %c5_41 = arith.constant 5 : index
    %c0_42 = arith.constant 0 : index
    %c0_43 = arith.constant 0 : index
    %44 = vector.load %arg2[%c5_41, %c0_42, %c0_43] : memref<8x128x32xbf16, #tpu.memory_space<vmem>>, vector<1x128x32xbf16>
    %45 = vector.shape_cast %44 : vector<1x128x32xbf16> to vector<128x32xbf16>
    %cst_44 = arith.constant dense<0.000000e+00> : vector<128x128xf32>
    %46 = tpu.matmul %45, %1, %cst_44 {dimension_numbers = #tpu.dot_dimension_numbers<[1], [0], [0], [1], [0, 0, 1, 1], [], []>} : vector<128x32xbf16>, vector<32x128xbf16>, vector<128x128xf32> -> vector<128x128xf32>
    %47 = arith.addf %43, %46 : vector<128x128xf32>
    %48 = arith.maximumf %40, %47 : vector<128x128xf32>
    %c6 = arith.constant 6 : index
    %c0_45 = arith.constant 0 : index
    %c0_46 = arith.constant 0 : index
    %49 = vector.load %arg1[%c6, %c0_45, %c0_46] : memref<8x128x16xbf16, #tpu.memory_space<vmem>>, vector<1x128x16xbf16>
    %50 = vector.shape_cast %49 : vector<1x128x16xbf16> to vector<128x16xbf16>
    %cst_47 = arith.constant dense<0.000000e+00> : vector<128x128xf32>
    %51 = tpu.matmul %50, %0, %cst_47 {dimension_numbers = #tpu.dot_dimension_numbers<[1], [0], [0], [1], [0, 0, 1, 1], [], []>} : vector<128x16xbf16>, vector<16x128xbf16>, vector<128x128xf32> -> vector<128x128xf32>
    %c6_48 = arith.constant 6 : index
    %c0_49 = arith.constant 0 : index
    %c0_50 = arith.constant 0 : index
    %52 = vector.load %arg2[%c6_48, %c0_49, %c0_50] : memref<8x128x32xbf16, #tpu.memory_space<vmem>>, vector<1x128x32xbf16>
    %53 = vector.shape_cast %52 : vector<1x128x32xbf16> to vector<128x32xbf16>
    %cst_51 = arith.constant dense<0.000000e+00> : vector<128x128xf32>
    %54 = tpu.matmul %53, %1, %cst_51 {dimension_numbers = #tpu.dot_dimension_numbers<[1], [0], [0], [1], [0, 0, 1, 1], [], []>} : vector<128x32xbf16>, vector<32x128xbf16>, vector<128x128xf32> -> vector<128x128xf32>
    %55 = arith.addf %51, %54 : vector<128x128xf32>
    %56 = arith.maximumf %48, %55 : vector<128x128xf32>
    %c7 = arith.constant 7 : index
    %c0_52 = arith.constant 0 : index
    %c0_53 = arith.constant 0 : index
    %57 = vector.load %arg1[%c7, %c0_52, %c0_53] : memref<8x128x16xbf16, #tpu.memory_space<vmem>>, vector<1x128x16xbf16>
    %58 = vector.shape_cast %57 : vector<1x128x16xbf16> to vector<128x16xbf16>
    %cst_54 = arith.constant dense<0.000000e+00> : vector<128x128xf32>
    %59 = tpu.matmul %58, %0, %cst_54 {dimension_numbers = #tpu.dot_dimension_numbers<[1], [0], [0], [1], [0, 0, 1, 1], [], []>} : vector<128x16xbf16>, vector<16x128xbf16>, vector<128x128xf32> -> vector<128x128xf32>
    %c7_55 = arith.constant 7 : index
    %c0_56 = arith.constant 0 : index
    %c0_57 = arith.constant 0 : index
    %60 = vector.load %arg2[%c7_55, %c0_56, %c0_57] : memref<8x128x32xbf16, #tpu.memory_space<vmem>>, vector<1x128x32xbf16>
    %61 = vector.shape_cast %60 : vector<1x128x32xbf16> to vector<128x32xbf16>
    %cst_58 = arith.constant dense<0.000000e+00> : vector<128x128xf32>
    %62 = tpu.matmul %61, %1, %cst_58 {dimension_numbers = #tpu.dot_dimension_numbers<[1], [0], [0], [1], [0, 0, 1, 1], [], []>} : vector<128x32xbf16>, vector<32x128xbf16>, vector<128x128xf32> -> vector<128x128xf32>
    %63 = arith.addf %59, %62 : vector<128x128xf32>
    %64 = arith.maximumf %56, %63 : vector<128x128xf32>
    %c0_59 = arith.constant 0 : index
    %c0_60 = arith.constant 0 : index
    %65 = vector.load %arg5[%c0_59, %c0_60] : memref<1x128xf32, #tpu.memory_space<vmem>>, vector<1x128xf32>
    %66 = vector.broadcast %65 : vector<1x128xf32> to vector<128x128xf32>
    %67 = arith.addf %64, %66 : vector<128x128xf32>
    %cst_61 = arith.constant 0.000000e+00 : f32
    %68 = vector.broadcast %cst_61 : f32 to vector<128x128xf32>
    %69 = arith.maximumf %67, %68 : vector<128x128xf32>
    %70 = arith.truncf %69 : vector<128x128xf32> to vector<128x128xbf16>
    %c0_62 = arith.constant 0 : index
    %c0_63 = arith.constant 0 : index
    %71 = vector.load %arg6[%c0_62, %c0_63] : memref<128x128xbf16, #tpu.memory_space<vmem>>, vector<128x128xbf16>
    tpu.vector_store %arg6[%c0_62, %c0_63], %70 {strides = array<i32>} : memref<128x128xbf16, #tpu.memory_space<vmem>>, vector<128x128xbf16>,
    return
  }
  func.func @transform_0(%arg0: i32) -> (i32, i32, i32) {
    %c0_i32 = arith.constant 0 : i32
    %c0_i32_0 = arith.constant 0 : i32
    %c0_i32_1 = arith.constant 0 : i32
    return %c0_i32, %arg0, %c0_i32_0 : i32, i32, i32
  }
  func.func @transform_1(%arg0: i32) -> (i32, i32, i32) {
    %c0_i32 = arith.constant 0 : i32
    %c0_i32_0 = arith.constant 0 : i32
    %c0_i32_1 = arith.constant 0 : i32
    return %c0_i32, %arg0, %c0_i32_0 : i32, i32, i32
  }
  func.func @transform_2(%arg0: i32) -> (i32, i32) {
    %c0_i32 = arith.constant 0 : i32
    %c0_i32_0 = arith.constant 0 : i32
    %c0_i32_1 = arith.constant 0 : i32
    return %c0_i32, %c0_i32_0 : i32, i32
  }
  func.func @transform_3(%arg0: i32) -> (i32, i32) {
    %c0_i32 = arith.constant 0 : i32
    %c0_i32_0 = arith.constant 0 : i32
    %c0_i32_1 = arith.constant 0 : i32
    return %c0_i32, %c0_i32_0 : i32, i32
  }
  func.func @transform_4(%arg0: i32) -> (i32, i32) {
    %c0_i32 = arith.constant 0 : i32
    %c0_i32_0 = arith.constant 0 : i32
    %c0_i32_1 = arith.constant 0 : i32
    return %c0_i32, %c0_i32_0 : i32, i32
  }
  func.func @transform_5(%arg0: i32) -> (i32, i32) {
    %c0_i32 = arith.constant 0 : i32
    %c0_i32_0 = arith.constant 0 : i32
    return %arg0, %c0_i32 : i32, i32
  }
}

module attributes {stable_mosaic.version = 11 : i64} {
  func.func @_conv_pool_kernel2(%arg0: i32, %arg1: memref<8x128x16xbf16, #tpu.memory_space<vmem>>, %arg2: memref<8x128x128xbf16, #tpu.memory_space<vmem>>, %arg3: memref<16x128xbf16, #tpu.memory_space<vmem>>, %arg4: memref<128x128xbf16, #tpu.memory_space<vmem>>, %arg5: memref<1x128xf32, #tpu.memory_space<vmem>>, %arg6: memref<128x128xbf16, #tpu.memory_space<vmem>>) attributes {dimension_semantics = [#tpu.dimension_semantics<parallel>], iteration_bounds = array<i64: 1>, scalar_prefetch = 0 : i64, scratch_operands = 0 : i64, tpu.core_type = #tpu.core_type<tc>, window_params = [{transform_indices = @transform_0, window_bounds = array<i64: 8, 128, 16>}, {transform_indices = @transform_1, window_bounds = array<i64: 8, 128, 128>}, {pipeline_mode = #tpu.pipeline_mode<synchronous>, transform_indices = @transform_2, window_bounds = array<i64: 16, 128>}, {pipeline_mode = #tpu.pipeline_mode<synchronous>, transform_indices = @transform_3, window_bounds = array<i64: 128, 128>}, {pipeline_mode = #tpu.pipeline_mode<synchronous>, transform_indices = @transform_4, window_bounds = array<i64: 1, 128>}, {transform_indices = @transform_5, window_bounds = array<i64: 128, 128>}]} {
    %c0 = arith.constant 0 : index
    %c0_0 = arith.constant 0 : index
    %0 = vector.load %arg3[%c0, %c0_0] : memref<16x128xbf16, #tpu.memory_space<vmem>>, vector<16x128xbf16>
    %c0_1 = arith.constant 0 : index
    %c0_2 = arith.constant 0 : index
    %1 = vector.load %arg4[%c0_1, %c0_2] : memref<128x128xbf16, #tpu.memory_space<vmem>>, vector<128x128xbf16>
    %c0_3 = arith.constant 0 : index
    %c0_4 = arith.constant 0 : index
    %c0_5 = arith.constant 0 : index
    %2 = vector.load %arg1[%c0_3, %c0_4, %c0_5] : memref<8x128x16xbf16, #tpu.memory_space<vmem>>, vector<1x128x16xbf16>
    %3 = vector.shape_cast %2 : vector<1x128x16xbf16> to vector<128x16xbf16>
    %cst = arith.constant dense<0.000000e+00> : vector<128x128xf32>
    %4 = tpu.matmul %3, %0, %cst {dimension_numbers = #tpu.dot_dimension_numbers<[1], [0], [0], [1], [0, 0, 1, 1], [], []>} : vector<128x16xbf16>, vector<16x128xbf16>, vector<128x128xf32> -> vector<128x128xf32>
    %c0_6 = arith.constant 0 : index
    %c0_7 = arith.constant 0 : index
    %c0_8 = arith.constant 0 : index
    %5 = vector.load %arg2[%c0_6, %c0_7, %c0_8] : memref<8x128x128xbf16, #tpu.memory_space<vmem>>, vector<1x128x128xbf16>
    %6 = vector.shape_cast %5 : vector<1x128x128xbf16> to vector<128x128xbf16>
    %cst_9 = arith.constant dense<0.000000e+00> : vector<128x128xf32>
    %7 = tpu.matmul %6, %1, %cst_9 {dimension_numbers = #tpu.dot_dimension_numbers<[1], [0], [0], [1], [0, 0, 1, 1], [], []>} : vector<128x128xbf16>, vector<128x128xbf16>, vector<128x128xf32> -> vector<128x128xf32>
    %8 = arith.addf %4, %7 : vector<128x128xf32>
    %c1 = arith.constant 1 : index
    %c0_10 = arith.constant 0 : index
    %c0_11 = arith.constant 0 : index
    %9 = vector.load %arg1[%c1, %c0_10, %c0_11] : memref<8x128x16xbf16, #tpu.memory_space<vmem>>, vector<1x128x16xbf16>
    %10 = vector.shape_cast %9 : vector<1x128x16xbf16> to vector<128x16xbf16>
    %cst_12 = arith.constant dense<0.000000e+00> : vector<128x128xf32>
    %11 = tpu.matmul %10, %0, %cst_12 {dimension_numbers = #tpu.dot_dimension_numbers<[1], [0], [0], [1], [0, 0, 1, 1], [], []>} : vector<128x16xbf16>, vector<16x128xbf16>, vector<128x128xf32> -> vector<128x128xf32>
    %c1_13 = arith.constant 1 : index
    %c0_14 = arith.constant 0 : index
    %c0_15 = arith.constant 0 : index
    %12 = vector.load %arg2[%c1_13, %c0_14, %c0_15] : memref<8x128x128xbf16, #tpu.memory_space<vmem>>, vector<1x128x128xbf16>
    %13 = vector.shape_cast %12 : vector<1x128x128xbf16> to vector<128x128xbf16>
    %cst_16 = arith.constant dense<0.000000e+00> : vector<128x128xf32>
    %14 = tpu.matmul %13, %1, %cst_16 {dimension_numbers = #tpu.dot_dimension_numbers<[1], [0], [0], [1], [0, 0, 1, 1], [], []>} : vector<128x128xbf16>, vector<128x128xbf16>, vector<128x128xf32> -> vector<128x128xf32>
    %15 = arith.addf %11, %14 : vector<128x128xf32>
    %16 = arith.maximumf %8, %15 : vector<128x128xf32>
    %c2 = arith.constant 2 : index
    %c0_17 = arith.constant 0 : index
    %c0_18 = arith.constant 0 : index
    %17 = vector.load %arg1[%c2, %c0_17, %c0_18] : memref<8x128x16xbf16, #tpu.memory_space<vmem>>, vector<1x128x16xbf16>
    %18 = vector.shape_cast %17 : vector<1x128x16xbf16> to vector<128x16xbf16>
    %cst_19 = arith.constant dense<0.000000e+00> : vector<128x128xf32>
    %19 = tpu.matmul %18, %0, %cst_19 {dimension_numbers = #tpu.dot_dimension_numbers<[1], [0], [0], [1], [0, 0, 1, 1], [], []>} : vector<128x16xbf16>, vector<16x128xbf16>, vector<128x128xf32> -> vector<128x128xf32>
    %c2_20 = arith.constant 2 : index
    %c0_21 = arith.constant 0 : index
    %c0_22 = arith.constant 0 : index
    %20 = vector.load %arg2[%c2_20, %c0_21, %c0_22] : memref<8x128x128xbf16, #tpu.memory_space<vmem>>, vector<1x128x128xbf16>
    %21 = vector.shape_cast %20 : vector<1x128x128xbf16> to vector<128x128xbf16>
    %cst_23 = arith.constant dense<0.000000e+00> : vector<128x128xf32>
    %22 = tpu.matmul %21, %1, %cst_23 {dimension_numbers = #tpu.dot_dimension_numbers<[1], [0], [0], [1], [0, 0, 1, 1], [], []>} : vector<128x128xbf16>, vector<128x128xbf16>, vector<128x128xf32> -> vector<128x128xf32>
    %23 = arith.addf %19, %22 : vector<128x128xf32>
    %24 = arith.maximumf %16, %23 : vector<128x128xf32>
    %c3 = arith.constant 3 : index
    %c0_24 = arith.constant 0 : index
    %c0_25 = arith.constant 0 : index
    %25 = vector.load %arg1[%c3, %c0_24, %c0_25] : memref<8x128x16xbf16, #tpu.memory_space<vmem>>, vector<1x128x16xbf16>
    %26 = vector.shape_cast %25 : vector<1x128x16xbf16> to vector<128x16xbf16>
    %cst_26 = arith.constant dense<0.000000e+00> : vector<128x128xf32>
    %27 = tpu.matmul %26, %0, %cst_26 {dimension_numbers = #tpu.dot_dimension_numbers<[1], [0], [0], [1], [0, 0, 1, 1], [], []>} : vector<128x16xbf16>, vector<16x128xbf16>, vector<128x128xf32> -> vector<128x128xf32>
    %c3_27 = arith.constant 3 : index
    %c0_28 = arith.constant 0 : index
    %c0_29 = arith.constant 0 : index
    %28 = vector.load %arg2[%c3_27, %c0_28, %c0_29] : memref<8x128x128xbf16, #tpu.memory_space<vmem>>, vector<1x128x128xbf16>
    %29 = vector.shape_cast %28 : vector<1x128x128xbf16> to vector<128x128xbf16>
    %cst_30 = arith.constant dense<0.000000e+00> : vector<128x128xf32>
    %30 = tpu.matmul %29, %1, %cst_30 {dimension_numbers = #tpu.dot_dimension_numbers<[1], [0], [0], [1], [0, 0, 1, 1], [], []>} : vector<128x128xbf16>, vector<128x128xbf16>, vector<128x128xf32> -> vector<128x128xf32>
    %31 = arith.addf %27, %30 : vector<128x128xf32>
    %32 = arith.maximumf %24, %31 : vector<128x128xf32>
    %c4 = arith.constant 4 : index
    %c0_31 = arith.constant 0 : index
    %c0_32 = arith.constant 0 : index
    %33 = vector.load %arg1[%c4, %c0_31, %c0_32] : memref<8x128x16xbf16, #tpu.memory_space<vmem>>, vector<1x128x16xbf16>
    %34 = vector.shape_cast %33 : vector<1x128x16xbf16> to vector<128x16xbf16>
    %cst_33 = arith.constant dense<0.000000e+00> : vector<128x128xf32>
    %35 = tpu.matmul %34, %0, %cst_33 {dimension_numbers = #tpu.dot_dimension_numbers<[1], [0], [0], [1], [0, 0, 1, 1], [], []>} : vector<128x16xbf16>, vector<16x128xbf16>, vector<128x128xf32> -> vector<128x128xf32>
    %c4_34 = arith.constant 4 : index
    %c0_35 = arith.constant 0 : index
    %c0_36 = arith.constant 0 : index
    %36 = vector.load %arg2[%c4_34, %c0_35, %c0_36] : memref<8x128x128xbf16, #tpu.memory_space<vmem>>, vector<1x128x128xbf16>
    %37 = vector.shape_cast %36 : vector<1x128x128xbf16> to vector<128x128xbf16>
    %cst_37 = arith.constant dense<0.000000e+00> : vector<128x128xf32>
    %38 = tpu.matmul %37, %1, %cst_37 {dimension_numbers = #tpu.dot_dimension_numbers<[1], [0], [0], [1], [0, 0, 1, 1], [], []>} : vector<128x128xbf16>, vector<128x128xbf16>, vector<128x128xf32> -> vector<128x128xf32>
    %39 = arith.addf %35, %38 : vector<128x128xf32>
    %40 = arith.maximumf %32, %39 : vector<128x128xf32>
    %c5 = arith.constant 5 : index
    %c0_38 = arith.constant 0 : index
    %c0_39 = arith.constant 0 : index
    %41 = vector.load %arg1[%c5, %c0_38, %c0_39] : memref<8x128x16xbf16, #tpu.memory_space<vmem>>, vector<1x128x16xbf16>
    %42 = vector.shape_cast %41 : vector<1x128x16xbf16> to vector<128x16xbf16>
    %cst_40 = arith.constant dense<0.000000e+00> : vector<128x128xf32>
    %43 = tpu.matmul %42, %0, %cst_40 {dimension_numbers = #tpu.dot_dimension_numbers<[1], [0], [0], [1], [0, 0, 1, 1], [], []>} : vector<128x16xbf16>, vector<16x128xbf16>, vector<128x128xf32> -> vector<128x128xf32>
    %c5_41 = arith.constant 5 : index
    %c0_42 = arith.constant 0 : index
    %c0_43 = arith.constant 0 : index
    %44 = vector.load %arg2[%c5_41, %c0_42, %c0_43] : memref<8x128x128xbf16, #tpu.memory_space<vmem>>, vector<1x128x128xbf16>
    %45 = vector.shape_cast %44 : vector<1x128x128xbf16> to vector<128x128xbf16>
    %cst_44 = arith.constant dense<0.000000e+00> : vector<128x128xf32>
    %46 = tpu.matmul %45, %1, %cst_44 {dimension_numbers = #tpu.dot_dimension_numbers<[1], [0], [0], [1], [0, 0, 1, 1], [], []>} : vector<128x128xbf16>, vector<128x128xbf16>, vector<128x128xf32> -> vector<128x128xf32>
    %47 = arith.addf %43, %46 : vector<128x128xf32>
    %48 = arith.maximumf %40, %47 : vector<128x128xf32>
    %c6 = arith.constant 6 : index
    %c0_45 = arith.constant 0 : index
    %c0_46 = arith.constant 0 : index
    %49 = vector.load %arg1[%c6, %c0_45, %c0_46] : memref<8x128x16xbf16, #tpu.memory_space<vmem>>, vector<1x128x16xbf16>
    %50 = vector.shape_cast %49 : vector<1x128x16xbf16> to vector<128x16xbf16>
    %cst_47 = arith.constant dense<0.000000e+00> : vector<128x128xf32>
    %51 = tpu.matmul %50, %0, %cst_47 {dimension_numbers = #tpu.dot_dimension_numbers<[1], [0], [0], [1], [0, 0, 1, 1], [], []>} : vector<128x16xbf16>, vector<16x128xbf16>, vector<128x128xf32> -> vector<128x128xf32>
    %c6_48 = arith.constant 6 : index
    %c0_49 = arith.constant 0 : index
    %c0_50 = arith.constant 0 : index
    %52 = vector.load %arg2[%c6_48, %c0_49, %c0_50] : memref<8x128x128xbf16, #tpu.memory_space<vmem>>, vector<1x128x128xbf16>
    %53 = vector.shape_cast %52 : vector<1x128x128xbf16> to vector<128x128xbf16>
    %cst_51 = arith.constant dense<0.000000e+00> : vector<128x128xf32>
    %54 = tpu.matmul %53, %1, %cst_51 {dimension_numbers = #tpu.dot_dimension_numbers<[1], [0], [0], [1], [0, 0, 1, 1], [], []>} : vector<128x128xbf16>, vector<128x128xbf16>, vector<128x128xf32> -> vector<128x128xf32>
    %55 = arith.addf %51, %54 : vector<128x128xf32>
    %56 = arith.maximumf %48, %55 : vector<128x128xf32>
    %c7 = arith.constant 7 : index
    %c0_52 = arith.constant 0 : index
    %c0_53 = arith.constant 0 : index
    %57 = vector.load %arg1[%c7, %c0_52, %c0_53] : memref<8x128x16xbf16, #tpu.memory_space<vmem>>, vector<1x128x16xbf16>
    %58 = vector.shape_cast %57 : vector<1x128x16xbf16> to vector<128x16xbf16>
    %cst_54 = arith.constant dense<0.000000e+00> : vector<128x128xf32>
    %59 = tpu.matmul %58, %0, %cst_54 {dimension_numbers = #tpu.dot_dimension_numbers<[1], [0], [0], [1], [0, 0, 1, 1], [], []>} : vector<128x16xbf16>, vector<16x128xbf16>, vector<128x128xf32> -> vector<128x128xf32>
    %c7_55 = arith.constant 7 : index
    %c0_56 = arith.constant 0 : index
    %c0_57 = arith.constant 0 : index
    %60 = vector.load %arg2[%c7_55, %c0_56, %c0_57] : memref<8x128x128xbf16, #tpu.memory_space<vmem>>, vector<1x128x128xbf16>
    %61 = vector.shape_cast %60 : vector<1x128x128xbf16> to vector<128x128xbf16>
    %cst_58 = arith.constant dense<0.000000e+00> : vector<128x128xf32>
    %62 = tpu.matmul %61, %1, %cst_58 {dimension_numbers = #tpu.dot_dimension_numbers<[1], [0], [0], [1], [0, 0, 1, 1], [], []>} : vector<128x128xbf16>, vector<128x128xbf16>, vector<128x128xf32> -> vector<128x128xf32>
    %63 = arith.addf %59, %62 : vector<128x128xf32>
    %64 = arith.maximumf %56, %63 : vector<128x128xf32>
    %c0_59 = arith.constant 0 : index
    %c0_60 = arith.constant 0 : index
    %65 = vector.load %arg5[%c0_59, %c0_60] : memref<1x128xf32, #tpu.memory_space<vmem>>, vector<1x128xf32>
    %66 = vector.broadcast %65 : vector<1x128xf32> to vector<128x128xf32>
    %67 = arith.addf %64, %66 : vector<128x128xf32>
    %cst_61 = arith.constant 0.000000e+00 : f32
    %68 = vector.broadcast %cst_61 : f32 to vector<128x128xf32>
    %69 = arith.maximumf %67, %68 : vector<128x128xf32>
    %70 = arith.truncf %69 : vector<128x128xf32> to vector<128x128xbf16>
    %c0_62 = arith.constant 0 : index
    %c0_63 = arith.constant 0 : index
    %71 = vector.load %arg6[%c0_62, %c0_63] : memref<128x128xbf16, #tpu.memory_space<vmem>>, vector<128x128xbf16>
    tpu.vector_store %arg6[%c0_62, %c0_63], %70 {strides = array<i32>} : memref<128x128xbf16, #tpu.memory_space<vmem>>, vector<128x128xbf16>,
    return
  }
  func.func @transform_0(%arg0: i32) -> (i32, i32, i32) {
    %c0_i32 = arith.constant 0 : i32
    %c0_i32_0 = arith.constant 0 : i32
    %c0_i32_1 = arith.constant 0 : i32
    return %c0_i32, %arg0, %c0_i32_0 : i32, i32, i32
  }
  func.func @transform_1(%arg0: i32) -> (i32, i32, i32) {
    %c0_i32 = arith.constant 0 : i32
    %c0_i32_0 = arith.constant 0 : i32
    %c0_i32_1 = arith.constant 0 : i32
    return %c0_i32, %arg0, %c0_i32_0 : i32, i32, i32
  }
  func.func @transform_2(%arg0: i32) -> (i32, i32) {
    %c0_i32 = arith.constant 0 : i32
    %c0_i32_0 = arith.constant 0 : i32
    %c0_i32_1 = arith.constant 0 : i32
    return %c0_i32, %c0_i32_0 : i32, i32
  }
  func.func @transform_3(%arg0: i32) -> (i32, i32) {
    %c0_i32 = arith.constant 0 : i32
    %c0_i32_0 = arith.constant 0 : i32
    %c0_i32_1 = arith.constant 0 : i32
    return %c0_i32, %c0_i32_0 : i32, i32
  }
  func.func @transform_4(%arg0: i32) -> (i32, i32) {
    %c0_i32 = arith.constant 0 : i32
    %c0_i32_0 = arith.constant 0 : i32
    %c0_i32_1 = arith.constant 0 : i32
    return %c0_i32, %c0_i32_0 : i32, i32
  }
  func.func @transform_5(%arg0: i32) -> (i32, i32) {
    %c0_i32 = arith.constant 0 : i32
    %c0_i32_0 = arith.constant 0 : i32
    return %arg0, %c0_i32 : i32, i32
  }
}

module attributes {stable_mosaic.version = 11 : i64} {
  func.func @_conv_pool_kernel2(%arg0: i32, %arg1: memref<8x64x16xbf16, #tpu.memory_space<vmem>>, %arg2: memref<8x64x128xbf16, #tpu.memory_space<vmem>>, %arg3: memref<16x256xbf16, #tpu.memory_space<vmem>>, %arg4: memref<128x256xbf16, #tpu.memory_space<vmem>>, %arg5: memref<1x256xf32, #tpu.memory_space<vmem>>, %arg6: memref<64x256xf32, #tpu.memory_space<vmem>>) attributes {dimension_semantics = [#tpu.dimension_semantics<parallel>], iteration_bounds = array<i64: 1>, scalar_prefetch = 0 : i64, scratch_operands = 0 : i64, tpu.core_type = #tpu.core_type<tc>, window_params = [{transform_indices = @transform_0, window_bounds = array<i64: 8, 64, 16>}, {transform_indices = @transform_1, window_bounds = array<i64: 8, 64, 128>}, {pipeline_mode = #tpu.pipeline_mode<synchronous>, transform_indices = @transform_2, window_bounds = array<i64: 16, 256>}, {pipeline_mode = #tpu.pipeline_mode<synchronous>, transform_indices = @transform_3, window_bounds = array<i64: 128, 256>}, {pipeline_mode = #tpu.pipeline_mode<synchronous>, transform_indices = @transform_4, window_bounds = array<i64: 1, 256>}, {transform_indices = @transform_5, window_bounds = array<i64: 64, 256>}]} {
    %c0 = arith.constant 0 : index
    %c0_0 = arith.constant 0 : index
    %0 = vector.load %arg3[%c0, %c0_0] : memref<16x256xbf16, #tpu.memory_space<vmem>>, vector<16x256xbf16>
    %c0_1 = arith.constant 0 : index
    %c0_2 = arith.constant 0 : index
    %1 = vector.load %arg4[%c0_1, %c0_2] : memref<128x256xbf16, #tpu.memory_space<vmem>>, vector<128x256xbf16>
    %c0_3 = arith.constant 0 : index
    %c0_4 = arith.constant 0 : index
    %c0_5 = arith.constant 0 : index
    %2 = vector.load %arg1[%c0_3, %c0_4, %c0_5] : memref<8x64x16xbf16, #tpu.memory_space<vmem>>, vector<1x64x16xbf16>
    %3 = vector.shape_cast %2 : vector<1x64x16xbf16> to vector<64x16xbf16>
    %cst = arith.constant dense<0.000000e+00> : vector<64x256xf32>
    %4 = tpu.matmul %3, %0, %cst {dimension_numbers = #tpu.dot_dimension_numbers<[1], [0], [0], [1], [0, 0, 1, 1], [], []>} : vector<64x16xbf16>, vector<16x256xbf16>, vector<64x256xf32> -> vector<64x256xf32>
    %c0_6 = arith.constant 0 : index
    %c0_7 = arith.constant 0 : index
    %c0_8 = arith.constant 0 : index
    %5 = vector.load %arg2[%c0_6, %c0_7, %c0_8] : memref<8x64x128xbf16, #tpu.memory_space<vmem>>, vector<1x64x128xbf16>
    %6 = vector.shape_cast %5 : vector<1x64x128xbf16> to vector<64x128xbf16>
    %cst_9 = arith.constant dense<0.000000e+00> : vector<64x256xf32>
    %7 = tpu.matmul %6, %1, %cst_9 {dimension_numbers = #tpu.dot_dimension_numbers<[1], [0], [0], [1], [0, 0, 1, 1], [], []>} : vector<64x128xbf16>, vector<128x256xbf16>, vector<64x256xf32> -> vector<64x256xf32>
    %8 = arith.addf %4, %7 : vector<64x256xf32>
    %c1 = arith.constant 1 : index
    %c0_10 = arith.constant 0 : index
    %c0_11 = arith.constant 0 : index
    %9 = vector.load %arg1[%c1, %c0_10, %c0_11] : memref<8x64x16xbf16, #tpu.memory_space<vmem>>, vector<1x64x16xbf16>
    %10 = vector.shape_cast %9 : vector<1x64x16xbf16> to vector<64x16xbf16>
    %cst_12 = arith.constant dense<0.000000e+00> : vector<64x256xf32>
    %11 = tpu.matmul %10, %0, %cst_12 {dimension_numbers = #tpu.dot_dimension_numbers<[1], [0], [0], [1], [0, 0, 1, 1], [], []>} : vector<64x16xbf16>, vector<16x256xbf16>, vector<64x256xf32> -> vector<64x256xf32>
    %c1_13 = arith.constant 1 : index
    %c0_14 = arith.constant 0 : index
    %c0_15 = arith.constant 0 : index
    %12 = vector.load %arg2[%c1_13, %c0_14, %c0_15] : memref<8x64x128xbf16, #tpu.memory_space<vmem>>, vector<1x64x128xbf16>
    %13 = vector.shape_cast %12 : vector<1x64x128xbf16> to vector<64x128xbf16>
    %cst_16 = arith.constant dense<0.000000e+00> : vector<64x256xf32>
    %14 = tpu.matmul %13, %1, %cst_16 {dimension_numbers = #tpu.dot_dimension_numbers<[1], [0], [0], [1], [0, 0, 1, 1], [], []>} : vector<64x128xbf16>, vector<128x256xbf16>, vector<64x256xf32> -> vector<64x256xf32>
    %15 = arith.addf %11, %14 : vector<64x256xf32>
    %16 = arith.maximumf %8, %15 : vector<64x256xf32>
    %c2 = arith.constant 2 : index
    %c0_17 = arith.constant 0 : index
    %c0_18 = arith.constant 0 : index
    %17 = vector.load %arg1[%c2, %c0_17, %c0_18] : memref<8x64x16xbf16, #tpu.memory_space<vmem>>, vector<1x64x16xbf16>
    %18 = vector.shape_cast %17 : vector<1x64x16xbf16> to vector<64x16xbf16>
    %cst_19 = arith.constant dense<0.000000e+00> : vector<64x256xf32>
    %19 = tpu.matmul %18, %0, %cst_19 {dimension_numbers = #tpu.dot_dimension_numbers<[1], [0], [0], [1], [0, 0, 1, 1], [], []>} : vector<64x16xbf16>, vector<16x256xbf16>, vector<64x256xf32> -> vector<64x256xf32>
    %c2_20 = arith.constant 2 : index
    %c0_21 = arith.constant 0 : index
    %c0_22 = arith.constant 0 : index
    %20 = vector.load %arg2[%c2_20, %c0_21, %c0_22] : memref<8x64x128xbf16, #tpu.memory_space<vmem>>, vector<1x64x128xbf16>
    %21 = vector.shape_cast %20 : vector<1x64x128xbf16> to vector<64x128xbf16>
    %cst_23 = arith.constant dense<0.000000e+00> : vector<64x256xf32>
    %22 = tpu.matmul %21, %1, %cst_23 {dimension_numbers = #tpu.dot_dimension_numbers<[1], [0], [0], [1], [0, 0, 1, 1], [], []>} : vector<64x128xbf16>, vector<128x256xbf16>, vector<64x256xf32> -> vector<64x256xf32>
    %23 = arith.addf %19, %22 : vector<64x256xf32>
    %24 = arith.maximumf %16, %23 : vector<64x256xf32>
    %c3 = arith.constant 3 : index
    %c0_24 = arith.constant 0 : index
    %c0_25 = arith.constant 0 : index
    %25 = vector.load %arg1[%c3, %c0_24, %c0_25] : memref<8x64x16xbf16, #tpu.memory_space<vmem>>, vector<1x64x16xbf16>
    %26 = vector.shape_cast %25 : vector<1x64x16xbf16> to vector<64x16xbf16>
    %cst_26 = arith.constant dense<0.000000e+00> : vector<64x256xf32>
    %27 = tpu.matmul %26, %0, %cst_26 {dimension_numbers = #tpu.dot_dimension_numbers<[1], [0], [0], [1], [0, 0, 1, 1], [], []>} : vector<64x16xbf16>, vector<16x256xbf16>, vector<64x256xf32> -> vector<64x256xf32>
    %c3_27 = arith.constant 3 : index
    %c0_28 = arith.constant 0 : index
    %c0_29 = arith.constant 0 : index
    %28 = vector.load %arg2[%c3_27, %c0_28, %c0_29] : memref<8x64x128xbf16, #tpu.memory_space<vmem>>, vector<1x64x128xbf16>
    %29 = vector.shape_cast %28 : vector<1x64x128xbf16> to vector<64x128xbf16>
    %cst_30 = arith.constant dense<0.000000e+00> : vector<64x256xf32>
    %30 = tpu.matmul %29, %1, %cst_30 {dimension_numbers = #tpu.dot_dimension_numbers<[1], [0], [0], [1], [0, 0, 1, 1], [], []>} : vector<64x128xbf16>, vector<128x256xbf16>, vector<64x256xf32> -> vector<64x256xf32>
    %31 = arith.addf %27, %30 : vector<64x256xf32>
    %32 = arith.maximumf %24, %31 : vector<64x256xf32>
    %c4 = arith.constant 4 : index
    %c0_31 = arith.constant 0 : index
    %c0_32 = arith.constant 0 : index
    %33 = vector.load %arg1[%c4, %c0_31, %c0_32] : memref<8x64x16xbf16, #tpu.memory_space<vmem>>, vector<1x64x16xbf16>
    %34 = vector.shape_cast %33 : vector<1x64x16xbf16> to vector<64x16xbf16>
    %cst_33 = arith.constant dense<0.000000e+00> : vector<64x256xf32>
    %35 = tpu.matmul %34, %0, %cst_33 {dimension_numbers = #tpu.dot_dimension_numbers<[1], [0], [0], [1], [0, 0, 1, 1], [], []>} : vector<64x16xbf16>, vector<16x256xbf16>, vector<64x256xf32> -> vector<64x256xf32>
    %c4_34 = arith.constant 4 : index
    %c0_35 = arith.constant 0 : index
    %c0_36 = arith.constant 0 : index
    %36 = vector.load %arg2[%c4_34, %c0_35, %c0_36] : memref<8x64x128xbf16, #tpu.memory_space<vmem>>, vector<1x64x128xbf16>
    %37 = vector.shape_cast %36 : vector<1x64x128xbf16> to vector<64x128xbf16>
    %cst_37 = arith.constant dense<0.000000e+00> : vector<64x256xf32>
    %38 = tpu.matmul %37, %1, %cst_37 {dimension_numbers = #tpu.dot_dimension_numbers<[1], [0], [0], [1], [0, 0, 1, 1], [], []>} : vector<64x128xbf16>, vector<128x256xbf16>, vector<64x256xf32> -> vector<64x256xf32>
    %39 = arith.addf %35, %38 : vector<64x256xf32>
    %40 = arith.maximumf %32, %39 : vector<64x256xf32>
    %c5 = arith.constant 5 : index
    %c0_38 = arith.constant 0 : index
    %c0_39 = arith.constant 0 : index
    %41 = vector.load %arg1[%c5, %c0_38, %c0_39] : memref<8x64x16xbf16, #tpu.memory_space<vmem>>, vector<1x64x16xbf16>
    %42 = vector.shape_cast %41 : vector<1x64x16xbf16> to vector<64x16xbf16>
    %cst_40 = arith.constant dense<0.000000e+00> : vector<64x256xf32>
    %43 = tpu.matmul %42, %0, %cst_40 {dimension_numbers = #tpu.dot_dimension_numbers<[1], [0], [0], [1], [0, 0, 1, 1], [], []>} : vector<64x16xbf16>, vector<16x256xbf16>, vector<64x256xf32> -> vector<64x256xf32>
    %c5_41 = arith.constant 5 : index
    %c0_42 = arith.constant 0 : index
    %c0_43 = arith.constant 0 : index
    %44 = vector.load %arg2[%c5_41, %c0_42, %c0_43] : memref<8x64x128xbf16, #tpu.memory_space<vmem>>, vector<1x64x128xbf16>
    %45 = vector.shape_cast %44 : vector<1x64x128xbf16> to vector<64x128xbf16>
    %cst_44 = arith.constant dense<0.000000e+00> : vector<64x256xf32>
    %46 = tpu.matmul %45, %1, %cst_44 {dimension_numbers = #tpu.dot_dimension_numbers<[1], [0], [0], [1], [0, 0, 1, 1], [], []>} : vector<64x128xbf16>, vector<128x256xbf16>, vector<64x256xf32> -> vector<64x256xf32>
    %47 = arith.addf %43, %46 : vector<64x256xf32>
    %48 = arith.maximumf %40, %47 : vector<64x256xf32>
    %c6 = arith.constant 6 : index
    %c0_45 = arith.constant 0 : index
    %c0_46 = arith.constant 0 : index
    %49 = vector.load %arg1[%c6, %c0_45, %c0_46] : memref<8x64x16xbf16, #tpu.memory_space<vmem>>, vector<1x64x16xbf16>
    %50 = vector.shape_cast %49 : vector<1x64x16xbf16> to vector<64x16xbf16>
    %cst_47 = arith.constant dense<0.000000e+00> : vector<64x256xf32>
    %51 = tpu.matmul %50, %0, %cst_47 {dimension_numbers = #tpu.dot_dimension_numbers<[1], [0], [0], [1], [0, 0, 1, 1], [], []>} : vector<64x16xbf16>, vector<16x256xbf16>, vector<64x256xf32> -> vector<64x256xf32>
    %c6_48 = arith.constant 6 : index
    %c0_49 = arith.constant 0 : index
    %c0_50 = arith.constant 0 : index
    %52 = vector.load %arg2[%c6_48, %c0_49, %c0_50] : memref<8x64x128xbf16, #tpu.memory_space<vmem>>, vector<1x64x128xbf16>
    %53 = vector.shape_cast %52 : vector<1x64x128xbf16> to vector<64x128xbf16>
    %cst_51 = arith.constant dense<0.000000e+00> : vector<64x256xf32>
    %54 = tpu.matmul %53, %1, %cst_51 {dimension_numbers = #tpu.dot_dimension_numbers<[1], [0], [0], [1], [0, 0, 1, 1], [], []>} : vector<64x128xbf16>, vector<128x256xbf16>, vector<64x256xf32> -> vector<64x256xf32>
    %55 = arith.addf %51, %54 : vector<64x256xf32>
    %56 = arith.maximumf %48, %55 : vector<64x256xf32>
    %c7 = arith.constant 7 : index
    %c0_52 = arith.constant 0 : index
    %c0_53 = arith.constant 0 : index
    %57 = vector.load %arg1[%c7, %c0_52, %c0_53] : memref<8x64x16xbf16, #tpu.memory_space<vmem>>, vector<1x64x16xbf16>
    %58 = vector.shape_cast %57 : vector<1x64x16xbf16> to vector<64x16xbf16>
    %cst_54 = arith.constant dense<0.000000e+00> : vector<64x256xf32>
    %59 = tpu.matmul %58, %0, %cst_54 {dimension_numbers = #tpu.dot_dimension_numbers<[1], [0], [0], [1], [0, 0, 1, 1], [], []>} : vector<64x16xbf16>, vector<16x256xbf16>, vector<64x256xf32> -> vector<64x256xf32>
    %c7_55 = arith.constant 7 : index
    %c0_56 = arith.constant 0 : index
    %c0_57 = arith.constant 0 : index
    %60 = vector.load %arg2[%c7_55, %c0_56, %c0_57] : memref<8x64x128xbf16, #tpu.memory_space<vmem>>, vector<1x64x128xbf16>
    %61 = vector.shape_cast %60 : vector<1x64x128xbf16> to vector<64x128xbf16>
    %cst_58 = arith.constant dense<0.000000e+00> : vector<64x256xf32>
    %62 = tpu.matmul %61, %1, %cst_58 {dimension_numbers = #tpu.dot_dimension_numbers<[1], [0], [0], [1], [0, 0, 1, 1], [], []>} : vector<64x128xbf16>, vector<128x256xbf16>, vector<64x256xf32> -> vector<64x256xf32>
    %63 = arith.addf %59, %62 : vector<64x256xf32>
    %64 = arith.maximumf %56, %63 : vector<64x256xf32>
    %c0_59 = arith.constant 0 : index
    %c0_60 = arith.constant 0 : index
    %65 = vector.load %arg5[%c0_59, %c0_60] : memref<1x256xf32, #tpu.memory_space<vmem>>, vector<1x256xf32>
    %66 = vector.broadcast %65 : vector<1x256xf32> to vector<64x256xf32>
    %67 = arith.addf %64, %66 : vector<64x256xf32>
    %cst_61 = arith.constant 0.000000e+00 : f32
    %68 = vector.broadcast %cst_61 : f32 to vector<64x256xf32>
    %69 = arith.maximumf %67, %68 : vector<64x256xf32>
    %c0_62 = arith.constant 0 : index
    %c0_63 = arith.constant 0 : index
    %70 = vector.load %arg6[%c0_62, %c0_63] : memref<64x256xf32, #tpu.memory_space<vmem>>, vector<64x256xf32>
    tpu.vector_store %arg6[%c0_62, %c0_63], %69 {strides = array<i32>} : memref<64x256xf32, #tpu.memory_space<vmem>>, vector<64x256xf32>,
    return
  }
  func.func @transform_0(%arg0: i32) -> (i32, i32, i32) {
    %c0_i32 = arith.constant 0 : i32
    %c0_i32_0 = arith.constant 0 : i32
    %c0_i32_1 = arith.constant 0 : i32
    return %c0_i32, %arg0, %c0_i32_0 : i32, i32, i32
  }
  func.func @transform_1(%arg0: i32) -> (i32, i32, i32) {
    %c0_i32 = arith.constant 0 : i32
    %c0_i32_0 = arith.constant 0 : i32
    %c0_i32_1 = arith.constant 0 : i32
    return %c0_i32, %arg0, %c0_i32_0 : i32, i32, i32
  }
  func.func @transform_2(%arg0: i32) -> (i32, i32) {
    %c0_i32 = arith.constant 0 : i32
    %c0_i32_0 = arith.constant 0 : i32
    %c0_i32_1 = arith.constant 0 : i32
    return %c0_i32, %c0_i32_0 : i32, i32
  }
  func.func @transform_3(%arg0: i32) -> (i32, i32) {
    %c0_i32 = arith.constant 0 : i32
    %c0_i32_0 = arith.constant 0 : i32
    %c0_i32_1 = arith.constant 0 : i32
    return %c0_i32, %c0_i32_0 : i32, i32
  }
  func.func @transform_4(%arg0: i32) -> (i32, i32) {
    %c0_i32 = arith.constant 0 : i32
    %c0_i32_0 = arith.constant 0 : i32
    %c0_i32_1 = arith.constant 0 : i32
    return %c0_i32, %c0_i32_0 : i32, i32
  }
  func.func @transform_5(%arg0: i32) -> (i32, i32) {
    %c0_i32 = arith.constant 0 : i32
    %c0_i32_0 = arith.constant 0 : i32
    return %arg0, %c0_i32 : i32, i32
  }
}

</mosaic_0001>

<bundles_post_ra>
// kernel: surfacenet_forward.5
= control target key start
LH: loop header
LB: loop body
LE: loop exit
PB: predicated region body
PF: predicated region fallthrough
CT: control target
= control target key end

     0   :  { %s3087_s12 = smov 0   ;;  %s3089_s13 = smov 0   ;;  %s3720_s0 = inlined_call_operand.vmem [shape: bf16[8,256,16], index: 0, kind: input, shape index: {}]   ;;  %s3721_s1 = inlined_call_operand.vmem [shape: bf16[16,32], index: 1, kind: input, shape index: {}]   ;;  %s3722_s2 = inlined_call_operand.vmem [shape: f32[1,32], index: 2, kind: input, shape index: {}]   ;;  %s3723_s3 = inlined_call_operand.vmem [shape: bf16[256,32], index: 3, kind: output, shape index: {}]  }
   0x1   :  { %s3091_s14 = smov 0  }
   0x2 LB: > { %s2450_s15 = sadd.s32 4294967295, %s3065_s14   ;;  %s3104_s16 = sadd.s32 1, %s3065_s14   ;;  %s3065_s14 = sphi %s3091_s14, %s3726_s14   ;;  %s3061_s13 = sphi %s3089_s13, %s3725_s13   ;;  %s3057_s12 = sphi %s3087_s12, %s3724_s12  }
   0x3   : > { %s17_s17 = ssub.s32 %s3065_s14, %s3104_s16  ;;  %s20_s18 = sadd.s32 1, %s3061_s13 }
   0x4   : > { %p18_p0 = scmp.eq.s32.totalorder %s17_s17, 0  ;;  %p27_p1 = scmp.ne.s32.totalorder %s3061_s13, %s3057_s12 }
   0x5   : > { %p28_p2 = scmp.eq.s32.totalorder %s3065_s14, 0  ;;  %p2453_p4 = scmp.ge.s32.totalorder %s3065_s14, 2 }
   0x6   : > { %s3113_s19 = scalar_select %p18_p0, %s3061_s13, %s20_s18  }
   0x7   : > { %p29_p3 = por %p28_p2, %p27_p1  ;;  %127 = sbr.rel (%p2453_p4) target bundleno = 50 (0x32), region = 24 }
   0xe   : > { %130 = sbr.rel (!%p29_p3) target bundleno = 50 (0x32), region = 28  ;;  %s132_s20 = sand.u32 (%p29_p3), 1, %s3061_s13  }
   0xf   : > { %s2721_s21 = sshll.u32 (%p29_p3), %s3065_s14, 6  ;;  %s2454_s22 = sshll.u32 (%p29_p3), %s132_s20, 9 }
  0x10   : > { %s3121_s25 = scalar_lea.vmem (%p29_p3), %s3720_s0, %s2721_s21  ;;  %s3126_s26 = scalar_lea.vmem (%p29_p3), [#allocation2], %s2454_s22 }
  0x11   : > { %v153_v0 = vld [vmem:[%s3121_s25] sm:$0xff] (%p29_p3)   ;;  %v157_v1 = vld [vmem:[%s3121_s25 + $0x8] sm:$0xff] (%p29_p3)   ;;  %v161_v2 = vld [vmem:[%s3121_s25 + $0x10] sm:$0xff] (%p29_p3)  }
  0x12   : > { %154 = vst [vmem:[%s3126_s26] sm:$0xff] (%p29_p3), %v153_v0   ;;  %158 = vst [vmem:[%s3126_s26 + $0x8] sm:$0xff] (%p29_p3), %v157_v1   ;;  %v165_v3 = vld [vmem:[%s3121_s25 + $0x18] sm:$0xff] (%p29_p3)   ;;  %v169_v4 = vld [vmem:[%s3121_s25 + $0x20] sm:$0xff] (%p29_p3)  }
  0x13   : > { %162 = vst [vmem:[%s3126_s26 + $0x10] sm:$0xff] (%p29_p3), %v161_v2   ;;  %v173_v5 = vld [vmem:[%s3121_s25 + $0x28] sm:$0xff] (%p29_p3)   ;;  %166 = vst [vmem:[%s3126_s26 + $0x18] sm:$0xff] (%p29_p3), %v165_v3   ;;  %v177_v6 = vld [vmem:[%s3121_s25 + $0x30] sm:$0xff] (%p29_p3)  }
  0x14   : > { %170 = vst [vmem:[%s3126_s26 + $0x20] sm:$0xff] (%p29_p3), %v169_v4   ;;  %174 = vst [vmem:[%s3126_s26 + $0x28] sm:$0xff] (%p29_p3), %v173_v5   ;;  %v181_v7 = vld [vmem:[%s3121_s25 + $0x38] sm:$0xff] (%p29_p3)   ;;  %v185_v8 = vld [vmem:[%s3121_s25 + $0x80] sm:$0xff] (%p29_p3)  }
  0x15   : > { %178 = vst [vmem:[%s3126_s26 + $0x30] sm:$0xff] %v177_v6   ;;  %182 = vst [vmem:[%s3126_s26 + $0x38] sm:$0xff] %v181_v7   ;;  %v189_v9 = vld [vmem:[%s3121_s25 + $0x88] sm:$0xff]   ;;  %v193_v10 = vld [vmem:[%s3121_s25 + $0x90] sm:$0xff]  }
  0x16   : > { %186 = vst [vmem:[%s3126_s26 + $0x40] sm:$0xff] %v185_v8   ;;  %v197_v11 = vld [vmem:[%s3121_s25 + $0x98] sm:$0xff]   ;;  %190 = vst [vmem:[%s3126_s26 + $0x48] sm:$0xff] %v189_v9   ;;  %v201_v12 = vld [vmem:[%s3121_s25 + $0xa0] sm:$0xff]  }
  0x17   : > { %194 = vst [vmem:[%s3126_s26 + $0x50] sm:$0xff] %v193_v10   ;;  %198 = vst [vmem:[%s3126_s26 + $0x58] sm:$0xff] %v197_v11   ;;  %v205_v13 = vld [vmem:[%s3121_s25 + $0xa8] sm:$0xff]   ;;  %v209_v14 = vld [vmem:[%s3121_s25 + $0xb0] sm:$0xff]  }
  0x18   : > { %202 = vst [vmem:[%s3126_s26 + $0x60] sm:$0xff] %v201_v12   ;;  %206 = vst [vmem:[%s3126_s26 + $0x68] sm:$0xff] %v205_v13   ;;  %v213_v15 = vld [vmem:[%s3121_s25 + $0xb8] sm:$0xff]   ;;  %v217_v16 = vld [vmem:[%s3121_s25 + $0x100] sm:$0xff]  }
  0x19   : > { %210 = vst [vmem:[%s3126_s26 + $0x70] sm:$0xff] %v209_v14   ;;  %v221_v17 = vld [vmem:[%s3121_s25 + $0x108] sm:$0xff]   ;;  %214 = vst [vmem:[%s3126_s26 + $0x78] sm:$0xff] %v213_v15   ;;  %v225_v18 = vld [vmem:[%s3121_s25 + $0x110] sm:$0xff]  }
  0x1a   : > { %218 = vst [vmem:[%s3126_s26 + $0x80] sm:$0xff] %v217_v16   ;;  %222 = vst [vmem:[%s3126_s26 + $0x88] sm:$0xff] %v221_v17   ;;  %v229_v19 = vld [vmem:[%s3121_s25 + $0x118] sm:$0xff]   ;;  %v233_v20 = vld [vmem:[%s3121_s25 + $0x120] sm:$0xff]  }
  0x1b   : > { %226 = vst [vmem:[%s3126_s26 + $0x90] sm:$0xff] %v225_v18   ;;  %230 = vst [vmem:[%s3126_s26 + $0x98] sm:$0xff] %v229_v19   ;;  %v237_v21 = vld [vmem:[%s3121_s25 + $0x128] sm:$0xff]   ;;  %v241_v22 = vld [vmem:[%s3121_s25 + $0x130] sm:$0xff]  }
  0x1c   : > { %234 = vst [vmem:[%s3126_s26 + $0xa0] sm:$0xff] %v233_v20   ;;  %v245_v23 = vld [vmem:[%s3121_s25 + $0x138] sm:$0xff]   ;;  %238 = vst [vmem:[%s3126_s26 + $0xa8] sm:$0xff] %v237_v21   ;;  %v249_v24 = vld [vmem:[%s3121_s25 + $0x180] sm:$0xff]  }
  0x1d   : > { %242 = vst [vmem:[%s3126_s26 + $0xb0] sm:$0xff] %v241_v22   ;;  %246 = vst [vmem:[%s3126_s26 + $0xb8] sm:$0xff] %v245_v23   ;;  %v253_v25 = vld [vmem:[%s3121_s25 + $0x188] sm:$0xff]   ;;  %v257_v26 = vld [vmem:[%s3121_s25 + $0x190] sm:$0xff]  }
  0x1e   : > { %250 = vst [vmem:[%s3126_s26 + $0xc0] sm:$0xff] %v249_v24   ;;  %254 = vst [vmem:[%s3126_s26 + $0xc8] sm:$0xff] %v253_v25   ;;  %v261_v27 = vld [vmem:[%s3121_s25 + $0x198] sm:$0xff]   ;;  %v265_v28 = vld [vmem:[%s3121_s25 + $0x1a0] sm:$0xff]  }
  0x1f   : > { %258 = vst [vmem:[%s3126_s26 + $0xd0] sm:$0xff] %v257_v26   ;;  %v269_v29 = vld [vmem:[%s3121_s25 + $0x1a8] sm:$0xff]   ;;  %262 = vst [vmem:[%s3126_s26 + $0xd8] sm:$0xff] %v261_v27   ;;  %v273_v30 = vld [vmem:[%s3121_s25 + $0x1b0] sm:$0xff]  }
  0x20   : > { %266 = vst [vmem:[%s3126_s26 + $0xe0] sm:$0xff] %v265_v28   ;;  %270 = vst [vmem:[%s3126_s26 + $0xe8] sm:$0xff] %v269_v29   ;;  %v277_v31 = vld [vmem:[%s3121_s25 + $0x1b8] sm:$0xff]   ;;  %v281_v32 = vld [vmem:[%s3121_s25 + $0x200] sm:$0xff]  }
  0x21   : > { %274 = vst [vmem:[%s3126_s26 + $0xf0] sm:$0xff] %v273_v30   ;;  %278 = vst [vmem:[%s3126_s26 + $0xf8] sm:$0xff] %v277_v31   ;;  %v285_v33 = vld [vmem:[%s3121_s25 + $0x208] sm:$0xff]   ;;  %v289_v34 = vld [vmem:[%s3121_s25 + $0x210] sm:$0xff]  }
  0x22   : > { %282 = vst [vmem:[%s3126_s26 + $0x100] sm:$0xff] %v281_v32   ;;  %v293_v35 = vld [vmem:[%s3121_s25 + $0x218] sm:$0xff]   ;;  %286 = vst [vmem:[%s3126_s26 + $0x108] sm:$0xff] %v285_v33   ;;  %v297_v36 = vld [vmem:[%s3121_s25 + $0x220] sm:$0xff]  }
  0x23   : > { %290 = vst [vmem:[%s3126_s26 + $0x110] sm:$0xff] %v289_v34   ;;  %294 = vst [vmem:[%s3126_s26 + $0x118] sm:$0xff] %v293_v35   ;;  %v301_v37 = vld [vmem:[%s3121_s25 + $0x228] sm:$0xff]   ;;  %v305_v38 = vld [vmem:[%s3121_s25 + $0x230] sm:$0xff]  }
  0x24   : > { %298 = vst [vmem:[%s3126_s26 + $0x120] sm:$0xff] %v297_v36   ;;  %302 = vst [vmem:[%s3126_s26 + $0x128] sm:$0xff] %v301_v37   ;;  %v309_v39 = vld [vmem:[%s3121_s25 + $0x238] sm:$0xff]   ;;  %v313_v40 = vld [vmem:[%s3121_s25 + $0x280] sm:$0xff]  }
  0x25   : > { %306 = vst [vmem:[%s3126_s26 + $0x130] sm:$0xff] %v305_v38   ;;  %v317_v41 = vld [vmem:[%s3121_s25 + $0x288] sm:$0xff]   ;;  %310 = vst [vmem:[%s3126_s26 + $0x138] sm:$0xff] %v309_v39   ;;  %v321_v42 = vld [vmem:[%s3121_s25 + $0x290] sm:$0xff]  }
  0x26   : > { %314 = vst [vmem:[%s3126_s26 + $0x140] sm:$0xff] %v313_v40   ;;  %318 = vst [vmem:[%s3126_s26 + $0x148] sm:$0xff] %v317_v41   ;;  %v325_v43 = vld [vmem:[%s3121_s25 + $0x298] sm:$0xff]   ;;  %v329_v44 = vld [vmem:[%s3121_s25 + $0x2a0] sm:$0xff]  }
  0x27   : > { %322 = vst [vmem:[%s3126_s26 + $0x150] sm:$0xff] %v321_v42   ;;  %326 = vst [vmem:[%s3126_s26 + $0x158] sm:$0xff] %v325_v43   ;;  %v333_v45 = vld [vmem:[%s3121_s25 + $0x2a8] sm:$0xff]   ;;  %v337_v46 = vld [vmem:[%s3121_s25 + $0x2b0] sm:$0xff]  }
  0x28   : > { %330 = vst [vmem:[%s3126_s26 + $0x160] sm:$0xff] %v329_v44   ;;  %v341_v47 = vld [vmem:[%s3121_s25 + $0x2b8] sm:$0xff]   ;;  %334 = vst [vmem:[%s3126_s26 + $0x168] sm:$0xff] %v333_v45   ;;  %v345_v48 = vld [vmem:[%s3121_s25 + $0x300] sm:$0xff]  }
  0x29   : > { %338 = vst [vmem:[%s3126_s26 + $0x170] sm:$0xff] %v337_v46   ;;  %342 = vst [vmem:[%s3126_s26 + $0x178] sm:$0xff] %v341_v47   ;;  %v349_v49 = vld [vmem:[%s3121_s25 + $0x308] sm:$0xff]   ;;  %v353_v50 = vld [vmem:[%s3121_s25 + $0x310] sm:$0xff]  }
  0x2a   : > { %346 = vst [vmem:[%s3126_s26 + $0x180] sm:$0xff] %v345_v48   ;;  %350 = vst [vmem:[%s3126_s26 + $0x188] sm:$0xff] %v349_v49   ;;  %v357_v51 = vld [vmem:[%s3121_s25 + $0x318] sm:$0xff]   ;;  %v361_v52 = vld [vmem:[%s3121_s25 + $0x320] sm:$0xff]  }
  0x2b   : > { %354 = vst [vmem:[%s3126_s26 + $0x190] sm:$0xff] %v353_v50   ;;  %v365_v53 = vld [vmem:[%s3121_s25 + $0x328] sm:$0xff]   ;;  %358 = vst [vmem:[%s3126_s26 + $0x198] sm:$0xff] %v357_v51   ;;  %v369_v54 = vld [vmem:[%s3121_s25 + $0x330] sm:$0xff]  }
  0x2c   : > { %362 = vst [vmem:[%s3126_s26 + $0x1a0] sm:$0xff] %v361_v52   ;;  %366 = vst [vmem:[%s3126_s26 + $0x1a8] sm:$0xff] %v365_v53   ;;  %v373_v55 = vld [vmem:[%s3121_s25 + $0x338] sm:$0xff]   ;;  %v377_v56 = vld [vmem:[%s3121_s25 + $0x380] sm:$0xff]  }
  0x2d   : > { %370 = vst [vmem:[%s3126_s26 + $0x1b0] sm:$0xff] %v369_v54   ;;  %374 = vst [vmem:[%s3126_s26 + $0x1b8] sm:$0xff] %v373_v55   ;;  %v381_v57 = vld [vmem:[%s3121_s25 + $0x388] sm:$0xff]   ;;  %v385_v58 = vld [vmem:[%s3121_s25 + $0x390] sm:$0xff]  }
  0x2e   : > { %378 = vst [vmem:[%s3126_s26 + $0x1c0] sm:$0xff] %v377_v56   ;;  %v389_v59 = vld [vmem:[%s3121_s25 + $0x398] sm:$0xff]   ;;  %382 = vst [vmem:[%s3126_s26 + $0x1c8] sm:$0xff] %v381_v57   ;;  %v393_v60 = vld [vmem:[%s3121_s25 + $0x3a0] sm:$0xff]  }
  0x2f   : > { %386 = vst [vmem:[%s3126_s26 + $0x1d0] sm:$0xff] %v385_v58   ;;  %390 = vst [vmem:[%s3126_s26 + $0x1d8] sm:$0xff] %v389_v59   ;;  %v397_v61 = vld [vmem:[%s3121_s25 + $0x3a8] sm:$0xff]   ;;  %v401_v62 = vld [vmem:[%s3121_s25 + $0x3b0] sm:$0xff]  }
  0x30   : > { %394 = vst [vmem:[%s3126_s26 + $0x1e0] sm:$0xff] %v393_v60   ;;  %398 = vst [vmem:[%s3126_s26 + $0x1e8] sm:$0xff] %v397_v61   ;;  %v405_v63 = vld [vmem:[%s3121_s25 + $0x3b8] sm:$0xff]  }
  0x31   : > { %402 = vst [vmem:[%s3126_s26 + $0x1f0] sm:$0xff] %v401_v62   ;;  %406 = vst [vmem:[%s3126_s26 + $0x1f8] sm:$0xff] %v405_v63  }
  0x32 PF: > { %p2457_p5 = scmp.ge.s32.totalorder %s3065_s14, 1  ;;  %p686_p6 = scmp.lt.s32.totalorder %s3065_s14, 3 }
  0x34   : > { %p687_p7 = pnand %p2457_p5, %p686_p6 }
  0x35   : > { %v3258_v0 = vld [vmem:[%s3721_s1] sm:$0xff] (!%p687_p7)   ;;  %s693_s29 = sand.u32 (!%p687_p7), 1, %s3057_s12   ;;  %vm788_vm0 = vcmask (!%p687_p7), 130048   ;;  %s2459_s5 = sshll.u32 (!%p687_p7), %s2450_s15, 4  ;;  %vm2371_vm1 = vcmask (!%p687_p7), 257024  }
  0x36   : > { %690 = sbr.rel (%p687_p7) target bundleno = 404 (0x194), region = 69  ;;  %s2458_s30 = sshll.u32 (!%p687_p7), %s693_s29, 9  ;;  %2810 = vmatprep.subr.bf16.mxu0 (!%p687_p7), %v3258_v0  ;;  %2828 = vmatprep.subr.bf16.mxu1 (!%p687_p7), %v3258_v0 }
  0x37   : > { %2811 = vmatpush3.bf16.msra.mxu0 (!%p687_p7), %v3258_v0  ;;  %2829 = vmatpush3.bf16.msra.mxu1 (!%p687_p7), %v3258_v0  ;;  %s3265_s4 = scalar_lea.vmem (!%p687_p7), [#allocation2], %s2458_s30  ;;  %p718_p8 = scmp.lt.s32.totalorder (!%p687_p7), %s2459_s5, 31 }
  0x38   : > { %v2979_v1 = vld [vmem:[%s3265_s4] sm:$0xff] (!%p687_p7)   ;;  %2846 = vmatprep.subr.bf16.mxu0 (!%p687_p7), %v3258_v0  ;;  %2864 = vmatprep.subr.bf16.mxu1 (!%p687_p7), %v3258_v0  ;;  %v2981_v3 = vld [vmem:[%s3265_s4 + $0x8] sm:$0xff] (!%p687_p7)   ;;  %v2983_v5 = vld [vmem:[%s3265_s4 + $0x10] sm:$0xff] (!%p687_p7)  }
  0x39   : > { %v2980_v2 = vld [vmem:[%s3265_s4 + $0x40] sm:$0xff] (!%p687_p7)   ;;  %2812 = vmatprep.mubr.msk.bf16.mxu0 (!%p687_p7), %vm788_vm0, %v2979_v1  ;;  %v2982_v4 = vld [vmem:[%s3265_s4 + $0x48] sm:$0xff] (!%p687_p7)   ;;  %v2984_v6 = vld [vmem:[%s3265_s4 + $0x50] sm:$0xff] (!%p687_p7)  }
  0x3a   : > { %2830 = vmatprep.mubr.msk.bf16.mxu1 (!%p687_p7), %vm788_vm0, %v2980_v2  ;;  %2813 = vmatmul.mubr.msk.bf16.vlgmr.msra.gmra.mrb[0].mxu0 (!%p687_p7), %vm788_vm0, %v2981_v3  ;;  %v2985_v7 = vld [vmem:[%s3265_s4 + $0x18] sm:$0xff] (!%p687_p7)   ;;  %v2987_v9 = vld [vmem:[%s3265_s4 + $0x20] sm:$0xff] (!%p687_p7)   ;;  %v2989_v11 = vld [vmem:[%s3265_s4 + $0x28] sm:$0xff] (!%p687_p7)  }
  0x3b   : > { %2831 = vmatmul.mubr.msk.bf16.vlgmr.msra.gmra.mrb[0].mxu1 (!%p687_p7), %vm788_vm0, %v2982_v4  ;;  %2847 = vmatpush3.bf16.msra.mxu0 (!%p687_p7), %v3258_v0  ;;  %v2986_v8 = vld [vmem:[%s3265_s4 + $0x58] sm:$0xff] (!%p687_p7)   ;;  %v2988_v10 = vld [vmem:[%s3265_s4 + $0x60] sm:$0xff] (!%p687_p7)   ;;  %v2990_v12 = vld [vmem:[%s3265_s4 + $0x68] sm:$0xff] (!%p687_p7)  }
  0x3c   : > { %2865 = vmatpush3.bf16.msra.mxu1 (!%p687_p7), %v3258_v0  ;;  %2816 = vmatprep.mubr.msk.bf16.mxu0 (!%p687_p7), %vm788_vm0, %v2983_v5  ;;  %v2991_v13 = vld [vmem:[%s3265_s4 + $0x30] sm:$0xff] (!%p687_p7)   ;;  %v2993_v15 = vld [vmem:[%s3265_s4 + $0x38] sm:$0xff] (!%p687_p7)   ;;  %v2995_v17 = vld [vmem:[%s3265_s4 + $0x80] sm:$0xff] (!%p687_p7)  }
  0x3d   : > { %2834 = vmatprep.mubr.msk.bf16.mxu1 %vm788_vm0, %v2984_v6  ;;  %2882 = vmatprep.subr.bf16.mxu0 %v3258_v0  ;;  %v2992_v14 = vld [vmem:[%s3265_s4 + $0x70] sm:$0xff]   ;;  %v2994_v16 = vld [vmem:[%s3265_s4 + $0x78] sm:$0xff]   ;;  %v2996_v18 = vld [vmem:[%s3265_s4 + $0xc0] sm:$0xff]   ;;  %s3728_s5 = smov (!%p718_p8, %s2459_s5), 31 }
  0x3e   : > { %2900 = vmatprep.subr.bf16.mxu1 %v3258_v0  ;;  %v2997_v19 = vld [vmem:[%s3265_s4 + $0x88] sm:$0xff]   ;;  %v2999_v21 = vld [vmem:[%s3265_s4 + $0x90] sm:$0xff]   ;;  %v3001_v23 = vld [vmem:[%s3265_s4 + $0x98] sm:$0xff]   ;;  %s2460_s8 = sshll.u32 %s3728_s5, 2 }
  0x3f   : > { %v2998_v20 = vld [vmem:[%s3265_s4 + $0xc8] sm:$0xff]   ;;  %v3000_v22 = vld [vmem:[%s3265_s4 + $0xd0] sm:$0xff]   ;;  %v3002_v24 = vld [vmem:[%s3265_s4 + $0xd8] sm:$0xff]   ;;  %s3627_s11 = scalar_lea.vmem %s3723_s3, %s2460_s8 }
  0x40   : > { %v3003_v25 = vld [vmem:[%s3265_s4 + $0xa0] sm:$0xff]   ;;  %v3005_v27 = vld [vmem:[%s3265_s4 + $0xa8] sm:$0xff]   ;;  %v3007_v29 = vld [vmem:[%s3265_s4 + $0xb0] sm:$0xff]  }
  0x41   : > { %v3004_v26 = vld [vmem:[%s3265_s4 + $0xe0] sm:$0xff]   ;;  %v3006_v28 = vld [vmem:[%s3265_s4 + $0xe8] sm:$0xff]   ;;  %v3008_v30 = vld [vmem:[%s3265_s4 + $0xf0] sm:$0xff]  }
  0x42   : > { %2817 = vmatmul.mubr.msk.bf16.gmra.mrb[4].mxu0 %vm788_vm0, %v2985_v7  ;;  %v3009_v31 = vld [vmem:[%s3265_s4 + $0xb8] sm:$0xff]   ;;  %v3011_v33 = vld [vmem:[%s3265_s4 + $0x100] sm:$0xff]   ;;  %v3013_v35 = vld [vmem:[%s3265_s4 + $0x108] sm:$0xff]  }
  0x43   : > { %2835 = vmatmul.mubr.msk.bf16.gmra.mrb[4].mxu1 %vm788_vm0, %v2986_v8  ;;  %2820 = vmatprep.mubr.msk.bf16.mxu0 %vm788_vm0, %v2987_v9  ;;  %v3010_v32 = vld [vmem:[%s3265_s4 + $0xf8] sm:$0xff]   ;;  %v3012_v34 = vld [vmem:[%s3265_s4 + $0x140] sm:$0xff]   ;;  %v3014_v36 = vld [vmem:[%s3265_s4 + $0x148] sm:$0xff]  }
  0x44   : > { %2838 = vmatprep.mubr.msk.bf16.mxu1 %vm788_vm0, %v2988_v10  ;;  %v3015_v37 = vld [vmem:[%s3265_s4 + $0x110] sm:$0xff]   ;;  %v3017_v39 = vld [vmem:[%s3265_s4 + $0x118] sm:$0xff]   ;;  %v3019_v41 = vld [vmem:[%s3265_s4 + $0x120] sm:$0xff]  }
  0x45   : > { %v3016_v38 = vld [vmem:[%s3265_s4 + $0x150] sm:$0xff]   ;;  %v3018_v40 = vld [vmem:[%s3265_s4 + $0x158] sm:$0xff]   ;;  %v3020_v42 = vld [vmem:[%s3265_s4 + $0x160] sm:$0xff]  }
  0x46   : > { %v3021_v43 = vld [vmem:[%s3265_s4 + $0x128] sm:$0xff]   ;;  %v3023_v45 = vld [vmem:[%s3265_s4 + $0x130] sm:$0xff]   ;;  %v3025_v47 = vld [vmem:[%s3265_s4 + $0x138] sm:$0xff]  }
  0x47   : > { %v3022_v44 = vld [vmem:[%s3265_s4 + $0x168] sm:$0xff]   ;;  %v3024_v46 = vld [vmem:[%s3265_s4 + $0x170] sm:$0xff]   ;;  %v3026_v48 = vld [vmem:[%s3265_s4 + $0x178] sm:$0xff]  }
  0x48   : > { %v3027_v49 = vld [vmem:[%s3265_s4 + $0x180] sm:$0xff]   ;;  %v3029_v51 = vld [vmem:[%s3265_s4 + $0x188] sm:$0xff]   ;;  %v3031_v53 = vld [vmem:[%s3265_s4 + $0x190] sm:$0xff]  }
  0x49   : > { %v3028_v50 = vld [vmem:[%s3265_s4 + $0x1c0] sm:$0xff]   ;;  %v3030_v52 = vld [vmem:[%s3265_s4 + $0x1c8] sm:$0xff]   ;;  %v3032_v54 = vld [vmem:[%s3265_s4 + $0x1d0] sm:$0xff]  }
  0x4a   : > { %2821 = vmatmul.mubr.msk.bf16.gmra.mrb[8].mxu0 %vm788_vm0, %v2989_v11  ;;  %v3033_v55 = vld [vmem:[%s3265_s4 + $0x198] sm:$0xff]   ;;  %v3035_v57 = vld [vmem:[%s3265_s4 + $0x1a0] sm:$0xff]   ;;  %v3037_v59 = vld [vmem:[%s3265_s4 + $0x1a8] sm:$0xff]  }
  0x4b   : > { %2839 = vmatmul.mubr.msk.bf16.gmra.mrb[8].mxu1 %vm788_vm0, %v2990_v12  ;;  %2824 = vmatprep.mubr.msk.bf16.mxu0 %vm788_vm0, %v2991_v13  ;;  %v3034_v56 = vld [vmem:[%s3265_s4 + $0x1d8] sm:$0xff]   ;;  %v3036_v58 = vld [vmem:[%s3265_s4 + $0x1e0] sm:$0xff]   ;;  %v3038_v60 = vld [vmem:[%s3265_s4 + $0x1e8] sm:$0xff]  }
  0x4c   : > { %2842 = vmatprep.mubr.msk.bf16.mxu1 %vm788_vm0, %v2992_v14  ;;  %v3039_v61 = vld [vmem:[%s3265_s4 + $0x1b0] sm:$0xff]   ;;  %v3041_v63 = vld [vmem:[%s3265_s4 + $0x1b8] sm:$0xff]  }
  0x4d   : > { %v3040_v62 = vld [vmem:[%s3265_s4 + $0x1f0] sm:$0xff]  }
  0x52   : > { %2825 = vmatmul.mubr.msk.bf16.gmra.mrb[12].mxu0 %vm788_vm0, %v2993_v15 }
  0x53   : > { %2843 = vmatmul.mubr.msk.bf16.gmra.mrb[12].mxu1 %vm788_vm0, %v2994_v16  ;;  %2848 = vmatprep.mubr.msk.bf16.mxu0 %vm788_vm0, %v2995_v17 }
  0x54   : > { %2866 = vmatprep.mubr.msk.bf16.mxu1 %vm788_vm0, %v2996_v18 }
  0x5a   : > { %2849 = vmatmul.mubr.msk.bf16.vlgmr.msra.gmra.mrb[16].mxu0 %vm788_vm0, %v2997_v19 }
  0x5b   : > { %2867 = vmatmul.mubr.msk.bf16.vlgmr.msra.gmra.mrb[16].mxu1 %vm788_vm0, %v2998_v20  ;;  %2883 = vmatpush3.bf16.msra.mxu0 %v3258_v0 }
  0x5c   : > { %2901 = vmatpush3.bf16.msra.mxu1 %v3258_v0  ;;  %2852 = vmatprep.mubr.msk.bf16.mxu0 %vm788_vm0, %v2999_v21 }
  0x5d   : > { %2870 = vmatprep.mubr.msk.bf16.mxu1 %vm788_vm0, %v3000_v22  ;;  %2918 = vmatprep.subr.bf16.mxu0 %v3258_v0 }
  0x5e   : > { %2936 = vmatprep.subr.bf16.mxu1 %v3258_v0 }
  0x62   : > { %2853 = vmatmul.mubr.msk.bf16.gmra.mrb[20].mxu0 %vm788_vm0, %v3001_v23 }
  0x63   : > { %2871 = vmatmul.mubr.msk.bf16.gmra.mrb[20].mxu1 %vm788_vm0, %v3002_v24  ;;  %2856 = vmatprep.mubr.msk.bf16.mxu0 %vm788_vm0, %v3003_v25 }
  0x64   : > { %2874 = vmatprep.mubr.msk.bf16.mxu1 %vm788_vm0, %v3004_v26 }
  0x6a   : > { %2857 = vmatmul.mubr.msk.bf16.gmra.mrb[24].mxu0 %vm788_vm0, %v3005_v27 }
  0x6b   : > { %2875 = vmatmul.mubr.msk.bf16.gmra.mrb[24].mxu1 %vm788_vm0, %v3006_v28  ;;  %2860 = vmatprep.mubr.msk.bf16.mxu0 %vm788_vm0, %v3007_v29 }
  0x6c   : > { %2878 = vmatprep.mubr.msk.bf16.mxu1 %vm788_vm0, %v3008_v30 }
  0x72   : > { %2861 = vmatmul.mubr.msk.bf16.gmra.mrb[28].mxu0 %vm788_vm0, %v3009_v31 }
  0x73   : > { %2879 = vmatmul.mubr.msk.bf16.gmra.mrb[28].mxu1 %vm788_vm0, %v3010_v32  ;;  %2884 = vmatprep.mubr.msk.bf16.mxu0 %vm788_vm0, %v3011_v33 }
  0x74   : > { %2902 = vmatprep.mubr.msk.bf16.mxu1 %vm788_vm0, %v3012_v34 }
  0x7a   : > { %2885 = vmatmul.mubr.msk.bf16.vlgmr.msra.gmra.mrb[32].mxu0 %vm788_vm0, %v3013_v35 }
  0x7b   : > { %2903 = vmatmul.mubr.msk.bf16.vlgmr.msra.gmra.mrb[32].mxu1 %vm788_vm0, %v3014_v36  ;;  %2919 = vmatpush3.bf16.msra.mxu0 %v3258_v0 }
  0x7c   : > { %2937 = vmatpush3.bf16.msra.mxu1 %v3258_v0  ;;  %2888 = vmatprep.mubr.msk.bf16.mxu0 %vm788_vm0, %v3015_v37  ;;  %v3042_v0 = vld [vmem:[%s3265_s4 + $0x1f8] sm:$0xff]  }
  0x7d   : > { %2906 = vmatprep.mubr.msk.bf16.mxu1 %vm788_vm0, %v3016_v38 }
  0x82   : > { %2889 = vmatmul.mubr.msk.bf16.gmra.mrb[36].mxu0 %vm788_vm0, %v3017_v39 }
  0x83   : > { %2907 = vmatmul.mubr.msk.bf16.gmra.mrb[36].mxu1 %vm788_vm0, %v3018_v40  ;;  %2892 = vmatprep.mubr.msk.bf16.mxu0 %vm788_vm0, %v3019_v41 }
  0x84   : > { %2910 = vmatprep.mubr.msk.bf16.mxu1 %vm788_vm0, %v3020_v42 }
  0x8a   : > { %2893 = vmatmul.mubr.msk.bf16.gmra.mrb[40].mxu0 %vm788_vm0, %v3021_v43 }
  0x8b   : > { %2911 = vmatmul.mubr.msk.bf16.gmra.mrb[40].mxu1 %vm788_vm0, %v3022_v44  ;;  %2896 = vmatprep.mubr.msk.bf16.mxu0 %vm788_vm0, %v3023_v45 }
  0x8c   : > { %2914 = vmatprep.mubr.msk.bf16.mxu1 %vm788_vm0, %v3024_v46 }
  0x92   : > { %2897 = vmatmul.mubr.msk.bf16.gmra.mrb[44].mxu0 %vm788_vm0, %v3025_v47 }
  0x93   : > { %2915 = vmatmul.mubr.msk.bf16.gmra.mrb[44].mxu1 %vm788_vm0, %v3026_v48  ;;  %2920 = vmatprep.mubr.msk.bf16.mxu0 %vm788_vm0, %v3027_v49 }
  0x94   : > { %2938 = vmatprep.mubr.msk.bf16.mxu1 %vm788_vm0, %v3028_v50 }
  0x9a   : > { %2921 = vmatmul.mubr.msk.bf16.vlgmr.msra.gmra.mrb[48].mxu0 %vm788_vm0, %v3029_v51 }
  0x9b   : > { %2939 = vmatmul.mubr.msk.bf16.vlgmr.msra.gmra.mrb[48].mxu1 %vm788_vm0, %v3030_v52  ;;  %2924 = vmatprep.mubr.msk.bf16.mxu0 %vm788_vm0, %v3031_v53 }
  0x9c   : > { %2942 = vmatprep.mubr.msk.bf16.mxu1 %vm788_vm0, %v3032_v54 }
  0xa2   : > { %2925 = vmatmul.mubr.msk.bf16.gmra.mrb[52].mxu0 %vm788_vm0, %v3033_v55 }
  0xa3   : > { %2943 = vmatmul.mubr.msk.bf16.gmra.mrb[52].mxu1 %vm788_vm0, %v3034_v56  ;;  %2928 = vmatprep.mubr.msk.bf16.mxu0 %vm788_vm0, %v3035_v57 }
  0xa4   : > { %2946 = vmatprep.mubr.msk.bf16.mxu1 %vm788_vm0, %v3036_v58 }
  0xaa   : > { %2929 = vmatmul.mubr.msk.bf16.gmra.mrb[56].mxu0 %vm788_vm0, %v3037_v59 }
  0xab   : > { %2947 = vmatmul.mubr.msk.bf16.gmra.mrb[56].mxu1 %vm788_vm0, %v3038_v60  ;;  %2932 = vmatprep.mubr.msk.bf16.mxu0 %vm788_vm0, %v3039_v61 }
  0xac   : > { %2950 = vmatprep.mubr.msk.bf16.mxu1 %vm788_vm0, %v3040_v62 }
  0xb2   : > { %2933 = vmatmul.mubr.msk.bf16.gmra.mrb[60].mxu0 %vm788_vm0, %v3041_v63 }
  0xb3   : > { %2951 = vmatmul.mubr.msk.bf16.gmra.mrb[60].mxu1 %vm788_vm0, %v3042_v0 }
 0x10d   : > { %v2814_v1 = vpop.f32.mrb[0].mxu0 }
 0x10e   : > { %v2832_v2 = vpop.f32.mrb[0].mxu1  ;;  %v847_v3 = vpop.f32.mrb[1].mxu0 }
 0x10f   : > { %v1090_v4 = vmax.f32 %v2814_v1, %v2832_v2  ;;  %v1025_v5 = vpop.f32.mrb[1].mxu1  ;;  %v2815_v6 = vpop.f32.mrb[2].mxu0 }
 0x110   : > { %v1088_v7 = vmax.f32 %v847_v3, %v1025_v5  ;;  %v2833_v8 = vpop.f32.mrb[2].mxu1  ;;  %v850_v9 = vpop.f32.mrb[3].mxu0 }
 0x111   : > { %v1091_v10 = vmax.f32 %v2815_v6, %v2833_v8  ;;  %v1028_v11 = vpop.f32.mrb[3].mxu1 }
 0x112   : > { %v1089_v12 = vmax.f32 %v850_v9, %v1028_v11 }
 0x115   : > { %v2818_v13 = vpop.f32.mrb[4].mxu0 }
 0x116   : > { %v2836_v14 = vpop.f32.mrb[4].mxu1  ;;  %v863_v15 = vpop.f32.mrb[5].mxu0 }
 0x117   : > { %v1094_v16 = vmax.f32 %v2818_v13, %v2836_v14  ;;  %v1041_v17 = vpop.f32.mrb[5].mxu1  ;;  %v2819_v18 = vpop.f32.mrb[6].mxu0 }
 0x118   : > { %v1092_v19 = vmax.f32 %v863_v15, %v1041_v17  ;;  %v2837_v20 = vpop.f32.mrb[6].mxu1  ;;  %v866_v21 = vpop.f32.mrb[7].mxu0 }
 0x119   : > { %v1095_v22 = vmax.f32 %v2819_v18, %v2837_v20  ;;  %v1044_v23 = vpop.f32.mrb[7].mxu1 }
 0x11a   : > { %v1093_v24 = vmax.f32 %v866_v21, %v1044_v23 }
 0x11d   : > { %v2822_v25 = vpop.f32.mrb[8].mxu0 }
 0x11e   : > { %v2840_v26 = vpop.f32.mrb[8].mxu1  ;;  %v879_v27 = vpop.f32.mrb[9].mxu0 }
 0x11f   : > { %v1098_v28 = vmax.f32 %v2822_v25, %v2840_v26  ;;  %v1057_v29 = vpop.f32.mrb[9].mxu1  ;;  %v2823_v30 = vpop.f32.mrb[10].mxu0 }
 0x120   : > { %v1096_v31 = vmax.f32 %v879_v27, %v1057_v29  ;;  %v2841_v32 = vpop.f32.mrb[10].mxu1  ;;  %v882_v33 = vpop.f32.mrb[11].mxu0 }
 0x121   : > { %v1099_v34 = vmax.f32 %v2823_v30, %v2841_v32  ;;  %v1060_v35 = vpop.f32.mrb[11].mxu1 }
 0x122   : > { %v1097_v36 = vmax.f32 %v882_v33, %v1060_v35 }
 0x125   : > { %v2826_v37 = vpop.f32.mrb[12].mxu0 }
 0x126   : > { %v2844_v38 = vpop.f32.mrb[12].mxu1  ;;  %v3407_v39 = vpop.f32.mrb[13].mxu0 }
 0x127   : > { %v1102_v40 = vmax.f32 %v2826_v37, %v2844_v38  ;;  %v1073_v41 = vpop.f32.mrb[13].mxu1  ;;  %v3409_v42 = vpop.f32.mrb[14].mxu0 }
 0x128   : > { %v1100_v43 = vmax.f32 %v3407_v39, %v1073_v41  ;;  %v2845_v44 = vpop.f32.mrb[14].mxu1  ;;  %v3412_v45 = vpop.f32.mrb[15].mxu0 }
 0x129   : > { %v1103_v46 = vmax.f32 %v3409_v42, %v2845_v44  ;;  %v3415_v47 = vpop.f32.mrb[15].mxu1 }
 0x12a   : > { %v1101_v48 = vmax.f32 %v3412_v45, %v3415_v47 }
 0x12d   : > { %v2850_v49 = vpop.f32.mrb[16].mxu0 }
 0x12e   : > { %v3419_v50 = vmax.f32 %v1090_v4, %v2850_v49  ;;  %v3421_v51 = vpop.f32.mrb[16].mxu1  ;;  %v1219_v52 = vpop.f32.mrb[17].mxu0 }
 0x12f   : > { %v3423_v53 = vmax.f32 %v1088_v7, %v1219_v52  ;;  %v3425_v54 = vpop.f32.mrb[17].mxu1  ;;  %v2851_v55 = vpop.f32.mrb[18].mxu0 }
 0x130   : > { %v1478_v56 = vmax.f32 %v3419_v50, %v3421_v51  ;;  %v3429_v57 = vmax.f32 %v1091_v10, %v2851_v55  ;;  %v3431_v58 = vpop.f32.mrb[18].mxu1  ;;  %v1222_v59 = vpop.f32.mrb[19].mxu0 }
 0x131   : > { %v1476_v60 = vmax.f32 %v3423_v53, %v3425_v54  ;;  %v3435_v61 = vmax.f32 %v1089_v12, %v1222_v59  ;;  %v3437_v62 = vpop.f32.mrb[19].mxu1 }
 0x132   : > { %v1479_v63 = vmax.f32 %v3429_v57, %v3431_v58 }
 0x133   : > { %v1477_v0 = vmax.f32 %v3435_v61, %v3437_v62 }
 0x135   : > { %v2854_v1 = vpop.f32.mrb[20].mxu0 }
 0x136   : > { %v3443_v2 = vmax.f32 %v1094_v16, %v2854_v1  ;;  %v3445_v3 = vpop.f32.mrb[20].mxu1  ;;  %v1235_v4 = vpop.f32.mrb[21].mxu0 }
 0x137   : > { %v3447_v5 = vmax.f32 %v1092_v19, %v1235_v4  ;;  %v3449_v6 = vpop.f32.mrb[21].mxu1  ;;  %v2855_v7 = vpop.f32.mrb[22].mxu0 }
 0x138   : > { %v1482_v8 = vmax.f32 %v3443_v2, %v3445_v3  ;;  %v3453_v9 = vmax.f32 %v1095_v22, %v2855_v7  ;;  %v3455_v10 = vpop.f32.mrb[22].mxu1  ;;  %v1238_v11 = vpop.f32.mrb[23].mxu0 }
 0x139   : > { %v1480_v12 = vmax.f32 %v3447_v5, %v3449_v6  ;;  %v3459_v13 = vmax.f32 %v1093_v24, %v1238_v11  ;;  %v3461_v14 = vpop.f32.mrb[23].mxu1 }
 0x13a   : > { %v1483_v15 = vmax.f32 %v3453_v9, %v3455_v10 }
 0x13b   : > { %v1481_v16 = vmax.f32 %v3459_v13, %v3461_v14 }
 0x13d   : > { %v2858_v17 = vpop.f32.mrb[24].mxu0 }
 0x13e   : > { %v3467_v18 = vmax.f32 %v1098_v28, %v2858_v17  ;;  %v3469_v19 = vpop.f32.mrb[24].mxu1  ;;  %v1251_v20 = vpop.f32.mrb[25].mxu0 }
 0x13f   : > { %v3471_v21 = vmax.f32 %v1096_v31, %v1251_v20  ;;  %v3473_v22 = vpop.f32.mrb[25].mxu1  ;;  %v2859_v23 = vpop.f32.mrb[26].mxu0 }
 0x140   : > { %v1486_v24 = vmax.f32 %v3467_v18, %v3469_v19  ;;  %v3477_v25 = vmax.f32 %v1099_v34, %v2859_v23  ;;  %v3479_v26 = vpop.f32.mrb[26].mxu1  ;;  %v1254_v27 = vpop.f32.mrb[27].mxu0 }
 0x141   : > { %v1484_v28 = vmax.f32 %v3471_v21, %v3473_v22  ;;  %v3483_v29 = vmax.f32 %v1097_v36, %v1254_v27  ;;  %v3485_v30 = vpop.f32.mrb[27].mxu1 }
 0x142   : > { %v1487_v31 = vmax.f32 %v3477_v25, %v3479_v26 }
 0x143   : > { %v1485_v32 = vmax.f32 %v3483_v29, %v3485_v30 }
 0x145   : > { %v2862_v33 = vpop.f32.mrb[28].mxu0 }
 0x146   : > { %v3491_v35 = vmax.f32 %v1102_v40, %v2862_v33  ;;  %v3493_v34 = vpop.f32.mrb[28].mxu1  ;;  %v1267_v37 = vpop.f32.mrb[29].mxu0 }
 0x147   : > { %v3495_v38 = vmax.f32 %v1100_v43, %v1267_v37  ;;  %v3497_v39 = vpop.f32.mrb[29].mxu1  ;;  %v2863_v36 = vpop.f32.mrb[30].mxu0 }
 0x148   : > { %v1490_v41 = vmax.f32 %v3491_v35, %v3493_v34  ;;  %v3501_v42 = vmax.f32 %v1103_v46, %v2863_v36  ;;  %v3503_v44 = vpop.f32.mrb[30].mxu1  ;;  %v1270_v45 = vpop.f32.mrb[31].mxu0 }
 0x149   : > { %v1488_v40 = vmax.f32 %v3495_v38, %v3497_v39  ;;  %v3507_v47 = vmax.f32 %v1101_v48, %v1270_v45  ;;  %v3509_v49 = vpop.f32.mrb[31].mxu1 }
 0x14a   : > { %v1491_v43 = vmax.f32 %v3501_v42, %v3503_v44 }
 0x14b   : > { %v1489_v50 = vmax.f32 %v3507_v47, %v3509_v49 }
 0x14d   : > { %v2886_v51 = vpop.f32.mrb[32].mxu0 }
 0x14e   : > { %v3515_v52 = vmax.f32 %v1478_v56, %v2886_v51  ;;  %v3517_v46 = vpop.f32.mrb[32].mxu1  ;;  %v1607_v53 = vpop.f32.mrb[33].mxu0 }
 0x14f   : > { %v3519_v54 = vmax.f32 %v1476_v60, %v1607_v53  ;;  %v3521_v55 = vpop.f32.mrb[33].mxu1  ;;  %v2887_v48 = vpop.f32.mrb[34].mxu0 }
 0x150   : > { %v1866_v57 = vmax.f32 %v3515_v52, %v3517_v46  ;;  %v3525_v58 = vmax.f32 %v1479_v63, %v2887_v48  ;;  %v3527_v59 = vpop.f32.mrb[34].mxu1  ;;  %v1610_v61 = vpop.f32.mrb[35].mxu0 }
 0x151   : > { %v1864_v56 = vmax.f32 %v3519_v54, %v3521_v55  ;;  %v3531_v62 = vmax.f32 %v1477_v0, %v1610_v61  ;;  %v3533_v1 = vpop.f32.mrb[35].mxu1  ;;  %v3616_v55 = vld [vmem:[%s3722_s2] ss:$0 sm:$0xff] }
 0x152   : > { %v1867_v60 = vmax.f32 %v3525_v58, %v3527_v59 }
 0x153   : > { %v1865_v2 = vmax.f32 %v3531_v62, %v3533_v1 }
 0x155   : > { %v2890_v3 = vpop.f32.mrb[36].mxu0 }
 0x156   : > { %v3539_v4 = vmax.f32 %v1482_v8, %v2890_v3  ;;  %v3541_v63 = vpop.f32.mrb[36].mxu1  ;;  %v1623_v5 = vpop.f32.mrb[37].mxu0 }
 0x157   : > { %v3543_v6 = vmax.f32 %v1480_v12, %v1623_v5  ;;  %v3545_v7 = vpop.f32.mrb[37].mxu1  ;;  %v2891_v0 = vpop.f32.mrb[38].mxu0 }
 0x158   : > { %v1870_v9 = vmax.f32 %v3539_v4, %v3541_v63  ;;  %v3549_v10 = vmax.f32 %v1483_v15, %v2891_v0  ;;  %v3551_v11 = vpop.f32.mrb[38].mxu1  ;;  %v1626_v13 = vpop.f32.mrb[39].mxu0 }
 0x159   : > { %v1868_v8 = vmax.f32 %v3543_v6, %v3545_v7  ;;  %v3555_v14 = vmax.f32 %v1481_v16, %v1626_v13  ;;  %v3557_v17 = vpop.f32.mrb[39].mxu1 }
 0x15a   : > { %v1871_v12 = vmax.f32 %v3549_v10, %v3551_v11 }
 0x15b   : > { %v1869_v18 = vmax.f32 %v3555_v14, %v3557_v17 }
 0x15d   : > { %v2894_v19 = vpop.f32.mrb[40].mxu0 }
 0x15e   : > { %v3563_v20 = vmax.f32 %v1486_v24, %v2894_v19  ;;  %v3565_v15 = vpop.f32.mrb[40].mxu1  ;;  %v1639_v21 = vpop.f32.mrb[41].mxu0 }
 0x15f   : > { %v3567_v22 = vmax.f32 %v1484_v28, %v1639_v21  ;;  %v3569_v23 = vpop.f32.mrb[41].mxu1  ;;  %v2895_v16 = vpop.f32.mrb[42].mxu0 }
 0x160   : > { %v1874_v25 = vmax.f32 %v3563_v20, %v3565_v15  ;;  %v3573_v26 = vmax.f32 %v1487_v31, %v2895_v16  ;;  %v3575_v27 = vpop.f32.mrb[42].mxu1  ;;  %v1642_v29 = vpop.f32.mrb[43].mxu0 }
 0x161   : > { %v1872_v24 = vmax.f32 %v3567_v22, %v3569_v23  ;;  %v3579_v30 = vmax.f32 %v1485_v32, %v1642_v29  ;;  %v3581_v33 = vpop.f32.mrb[43].mxu1 }
 0x162   : > { %v1875_v28 = vmax.f32 %v3573_v26, %v3575_v27 }
 0x163   : > { %v1873_v35 = vmax.f32 %v3579_v30, %v3581_v33 }
 0x165   : > { %v2898_v34 = vpop.f32.mrb[44].mxu0 }
 0x166   : > { %v3587_v37 = vmax.f32 %v1490_v41, %v2898_v34  ;;  %v3589_v31 = vpop.f32.mrb[44].mxu1  ;;  %v1655_v38 = vpop.f32.mrb[45].mxu0 }
 0x167   : > { %v3591_v39 = vmax.f32 %v1488_v40, %v1655_v38  ;;  %v3593_v36 = vpop.f32.mrb[45].mxu1  ;;  %v2899_v32 = vpop.f32.mrb[46].mxu0 }
 0x168   : > { %v1878_v42 = vmax.f32 %v3587_v37, %v3589_v31  ;;  %v3599_v44 = vmax.f32 %v1491_v43, %v2899_v32  ;;  %v3601_v45 = vpop.f32.mrb[46].mxu1  ;;  %v1658_v47 = vpop.f32.mrb[47].mxu0 }
 0x169   : > { %v1876_v41 = vmax.f32 %v3591_v39, %v3593_v36  ;;  %v3605_v49 = vmax.f32 %v1489_v50, %v1658_v47  ;;  %v3607_v40 = vpop.f32.mrb[47].mxu1 }
 0x16a   : > { %v1879_v51 = vmax.f32 %v3599_v44, %v3601_v45 }
 0x16b   : > { %v1877_v52 = vmax.f32 %v3605_v49, %v3607_v40 }
 0x16d   : > { %v2922_v46 = vpop.f32.mrb[48].mxu0 }
 0x16e   : > { %v2060_v43 = vmax.f32 %v1866_v57, %v2922_v46  ;;  %v2940_v53 = vpop.f32.mrb[48].mxu1  ;;  %v1995_v54 = vpop.f32.mrb[49].mxu0 }
 0x16f   : > { %v2058_v50 = vmax.f32 %v1864_v56, %v1995_v54  ;;  %v2189_v48 = vpop.f32.mrb[49].mxu1  ;;  %v2923_v58 = vpop.f32.mrb[50].mxu0 }
 0x170   : > { %v2254_v59 = vmax.f32 %v2060_v43, %v2940_v53  ;;  %v2061_v61 = vmax.f32 %v1867_v60, %v2923_v58  ;;  %v2941_v3 = vpop.f32.mrb[50].mxu1  ;;  %v1998_v5 = vpop.f32.mrb[51].mxu0 }
 0x171   : > { %v2252_v0 = vmax.f32 %v2058_v50, %v2189_v48  ;;  %v2059_v57 = vmax.f32 %v1865_v2, %v1998_v5  ;;  %v2192_v13 = vpop.f32.mrb[51].mxu1 }
 0x172   : > { %v2277_v19 = vadd.f32 %v3616_v55, %v2254_v59  ;;  %v2255_v21 = vmax.f32 %v2061_v61, %v2941_v3 }
 0x173   : > { %v2275_v16 = vadd.f32 %v3616_v55, %v2252_v0  ;;  %v2253_v29 = vmax.f32 %v2059_v57, %v2192_v13 }
 0x174   : > { %v2293_v56 = vmax.f32 %v2277_v19, 0.0  ;;  %v2278_v34 = vadd.f32 %v3616_v55, %v2255_v21 }
 0x175   : > { %v2291_v62 = vmax.f32 %v2275_v16, 0.0  ;;  %v2276_v1 = vadd.f32 %v3616_v55, %v2253_v29  ;;  %v2926_v60 = vpop.f32.mrb[52].mxu0 }
 0x176   : > { %v2724_v2 = vpack.c.bf16 %v2293_v56, %v2293_v56  ;;  %v2294_v38 = vmax.f32 %v2278_v34, 0.0  ;;  %v2064_v32 = vmax.f32 %v1870_v9, %v2926_v60  ;;  %v2944_v47 = vpop.f32.mrb[52].mxu1  ;;  %v2011_v46 = vpop.f32.mrb[53].mxu0 }
 0x177   : > { %v2722_v43 = vpack.c.bf16 %v2291_v62, %v2291_v62  ;;  %v2292_v53 = vmax.f32 %v2276_v1, 0.0  ;;  %v2062_v54 = vmax.f32 %v1868_v8, %v2011_v46  ;;  %v2205_v50 = vpop.f32.mrb[53].mxu1  ;;  %v2927_v48 = vpop.f32.mrb[54].mxu0 }
 0x178   : > { %2374 = vst.msk [vmem:[%s3627_s11 + $0x8] sm:$0xf] %vm2371_vm1, %v2724_v2  ;;  %v2725_v58 = vpack.c.bf16 %v2294_v38, %v2294_v38  ;;  %v2258_v59 = vmax.f32 %v2064_v32, %v2944_v47  ;;  %v2065_v4 = vmax.f32 %v1871_v12, %v2927_v48  ;;  %v2945_v63 = vpop.f32.mrb[54].mxu1  ;;  %v2014_v9 = vpop.f32.mrb[55].mxu0 }
 0x179   : > { %2372 = vst.msk [vmem:[%s3627_s11] sm:$0xf] %vm2371_vm1, %v2722_v43  ;;  %v2723_v61 = vpack.c.bf16 %v2292_v53, %v2292_v53  ;;  %v2256_v3 = vmax.f32 %v2062_v54, %v2205_v50  ;;  %v2063_v6 = vmax.f32 %v1869_v18, %v2014_v9  ;;  %v2208_v7 = vpop.f32.mrb[55].mxu1 }
 0x17a   : > { %2375 = vst.msk [vmem:[%s3627_s11 + $0xc] sm:$0xf] %vm2371_vm1, %v2725_v58  ;;  %v2281_v8 = vadd.f32 %v3616_v55, %v2258_v59  ;;  %v2259_v5 = vmax.f32 %v2065_v4, %v2945_v63 }
 0x17b   : > { %2373 = vst.msk [vmem:[%s3627_s11 + $0x4] sm:$0xf] %vm2371_vm1, %v2723_v61  ;;  %v2279_v10 = vadd.f32 %v3616_v55, %v2256_v3  ;;  %v2257_v11 = vmax.f32 %v2063_v6, %v2208_v7 }
 0x17c   : > { %v2297_v12 = vmax.f32 %v2281_v8, 0.0  ;;  %v2282_v0 = vadd.f32 %v3616_v55, %v2259_v5 }
 0x17d   : > { %v2295_v57 = vmax.f32 %v2279_v10, 0.0  ;;  %v2280_v13 = vadd.f32 %v3616_v55, %v2257_v11  ;;  %v2930_v14 = vpop.f32.mrb[56].mxu0 }
 0x17e   : > { %v2728_v17 = vpack.c.bf16 %v2297_v12, %v2297_v12  ;;  %v2298_v18 = vmax.f32 %v2282_v0, 0.0  ;;  %v2068_v19 = vmax.f32 %v1874_v25, %v2930_v14  ;;  %v2948_v21 = vpop.f32.mrb[56].mxu1  ;;  %v2027_v16 = vpop.f32.mrb[57].mxu0 }
 0x17f   : > { %v2726_v29 = vpack.c.bf16 %v2295_v57, %v2295_v57  ;;  %v2296_v56 = vmax.f32 %v2280_v13, 0.0  ;;  %v2066_v34 = vmax.f32 %v1872_v24, %v2027_v16  ;;  %v2221_v62 = vpop.f32.mrb[57].mxu1  ;;  %v2931_v1 = vpop.f32.mrb[58].mxu0 }
 0x180   : > { %2378 = vst.msk [vmem:[%s3627_s11 + $0x18] sm:$0xf] %vm2371_vm1, %v2728_v17  ;;  %v2729_v60 = vpack.c.bf16 %v2298_v18, %v2298_v18  ;;  %v2262_v2 = vmax.f32 %v2068_v19, %v2948_v21  ;;  %v2069_v20 = vmax.f32 %v1875_v28, %v2931_v1  ;;  %v2949_v15 = vpop.f32.mrb[58].mxu1  ;;  %v2030_v25 = vpop.f32.mrb[59].mxu0 }
 0x181   : > { %2376 = vst.msk [vmem:[%s3627_s11 + $0x10] sm:$0xf] %vm2371_vm1, %v2726_v29  ;;  %v2727_v38 = vpack.c.bf16 %v2296_v56, %v2296_v56  ;;  %v2260_v32 = vmax.f32 %v2066_v34, %v2221_v62  ;;  %v2067_v22 = vmax.f32 %v1873_v35, %v2030_v25  ;;  %v2224_v23 = vpop.f32.mrb[59].mxu1 }
 0x182   : > { %2379 = vst.msk [vmem:[%s3627_s11 + $0x1c] sm:$0xf] %vm2371_vm1, %v2729_v60  ;;  %v2285_v24 = vadd.f32 %v3616_v55, %v2262_v2  ;;  %v2263_v47 = vmax.f32 %v2069_v20, %v2949_v15 }
 0x183   : > { %2377 = vst.msk [vmem:[%s3627_s11 + $0x14] sm:$0xf] %vm2371_vm1, %v2727_v38  ;;  %v2283_v26 = vadd.f32 %v3616_v55, %v2260_v32  ;;  %v2261_v27 = vmax.f32 %v2067_v22, %v2224_v23 }
 0x184   : > { %v2301_v28 = vmax.f32 %v2285_v24, 0.0  ;;  %v2286_v46 = vadd.f32 %v3616_v55, %v2263_v47 }
 0x185   : > { %v2299_v43 = vmax.f32 %v2283_v26, 0.0  ;;  %v2284_v53 = vadd.f32 %v3616_v55, %v2261_v27  ;;  %v2934_v30 = vpop.f32.mrb[60].mxu0 }
 0x186   : > { %v2732_v33 = vpack.c.bf16 %v2301_v28, %v2301_v28  ;;  %v2302_v35 = vmax.f32 %v2286_v46, 0.0  ;;  %v2072_v54 = vmax.f32 %v1878_v42, %v2934_v30  ;;  %v2952_v50 = vpop.f32.mrb[60].mxu1  ;;  %v2043_v48 = vpop.f32.mrb[61].mxu0 }
 0x187   : > { %v2730_v58 = vpack.c.bf16 %v2299_v43, %v2299_v43  ;;  %v2300_v59 = vmax.f32 %v2284_v53, 0.0  ;;  %v2070_v4 = vmax.f32 %v1876_v41, %v2043_v48  ;;  %v2237_v63 = vpop.f32.mrb[61].mxu1  ;;  %v2935_v9 = vpop.f32.mrb[62].mxu0 }
 0x188   : > { %2382 = vst.msk [vmem:[%s3627_s11 + $0x28] sm:$0xf] %vm2371_vm1, %v2732_v33  ;;  %v2733_v61 = vpack.c.bf16 %v2302_v35, %v2302_v35  ;;  %v2266_v3 = vmax.f32 %v2072_v54, %v2952_v50  ;;  %v2073_v37 = vmax.f32 %v1879_v51, %v2935_v9  ;;  %v2953_v31 = vpop.f32.mrb[62].mxu1  ;;  %v2046_v42 = vpop.f32.mrb[63].mxu0 }
 0x189   : > { %2380 = vst.msk [vmem:[%s3627_s11 + $0x20] sm:$0xf] %vm2371_vm1, %v2730_v58  ;;  %v2731_v6 = vpack.c.bf16 %v2300_v59, %v2300_v59  ;;  %v2264_v7 = vmax.f32 %v2070_v4, %v2237_v63  ;;  %v2071_v39 = vmax.f32 %v1877_v52, %v2046_v42  ;;  %v2240_v36 = vpop.f32.mrb[63].mxu1 }
 0x18a   : > { %2383 = vst.msk [vmem:[%s3627_s11 + $0x2c] sm:$0xf] %vm2371_vm1, %v2733_v61  ;;  %v2289_v41 = vadd.f32 %v3616_v55, %v2266_v3  ;;  %v2267_v8 = vmax.f32 %v2073_v37, %v2953_v31 }
 0x18b   : > { %2381 = vst.msk [vmem:[%s3627_s11 + $0x24] sm:$0xf] %vm2371_vm1, %v2731_v6  ;;  %v2287_v44 = vadd.f32 %v3616_v55, %v2264_v7  ;;  %v2265_v45 = vmax.f32 %v2071_v39, %v2240_v36 }
 0x18c   : > { %v2305_v51 = vmax.f32 %v2289_v41, 0.0  ;;  %v2290_v5 = vadd.f32 %v3616_v55, %v2267_v8 }
 0x18d   : > { %v2303_v49 = vmax.f32 %v2287_v44, 0.0  ;;  %v2288_v40 = vadd.f32 %v3616_v55, %v2265_v45 }
 0x18e   : > { %v2736_v52 = vpack.c.bf16 %v2305_v51, %v2305_v51  ;;  %v2306_v10 = vmax.f32 %v2290_v5, 0.0 }
 0x18f   : > { %v2734_v11 = vpack.c.bf16 %v2303_v49, %v2303_v49  ;;  %v2304_v12 = vmax.f32 %v2288_v40, 0.0 }
 0x190   : > { %2386 = vst.msk [vmem:[%s3627_s11 + $0x38] sm:$0xf] %vm2371_vm1, %v2736_v52  ;;  %v2737_v0 = vpack.c.bf16 %v2306_v10, %v2306_v10 }
 0x191   : > { %2384 = vst.msk [vmem:[%s3627_s11 + $0x30] sm:$0xf] %vm2371_vm1, %v2734_v11  ;;  %v2735_v57 = vpack.c.bf16 %v2304_v12, %v2304_v12 }
 0x192   : > { %2387 = vst.msk [vmem:[%s3627_s11 + $0x3c] sm:$0xf] %vm2371_vm1, %v2737_v0 }
 0x193   : > { %2385 = vst.msk [vmem:[%s3627_s11 + $0x34] sm:$0xf] %vm2371_vm1, %v2735_v57 }
 0x194 PF: > { %p10_p9 = scmp.ge.s32.totalorder %s3104_s16, 4   ;;  %s3724_s12 = smov %s3061_s13 }
 0x195   : > { %s3725_s13 = smov %s3113_s19  ;;  %s3726_s14 = smov %s3104_s16 }
 0x196   :  { %12 = sbr.rel (!%p10_p9) target bundleno = 2 (0x2), region = 115 }

// kernel: surfacenet_forward.6
= control target key start
LH: loop header
LB: loop body
LE: loop exit
PB: predicated region body
PF: predicated region fallthrough
CT: control target
= control target key end

     0   :  { %s5861_s18 = smov 0   ;;  %s5863_s19 = smov 0   ;;  %s6824_s0 = inlined_call_operand.vmem [shape: bf16[8,256,16], index: 0, kind: input, shape index: {}]   ;;  %s6825_s1 = inlined_call_operand.vmem [shape: bf16[8,256,32], index: 1, kind: input, shape index: {}]   ;;  %s6826_s2 = inlined_call_operand.vmem [shape: bf16[16,32], index: 2, kind: input, shape index: {}]   ;;  %s6827_s3 = inlined_call_operand.vmem [shape: bf16[32,32], index: 3, kind: input, shape index: {}]   ;;  %s6828_s4 = inlined_call_operand.vmem [shape: f32[1,32], index: 4, kind: input, shape index: {}]   ;;  %s6829_s5 = inlined_call_operand.vmem [shape: bf16[256,32], index: 5, kind: output, shape index: {}]  }
   0x1   :  { %s5865_s20 = smov 0  }
   0x2 LB: > { %s4533_s21 = sadd.s32 4294967295, %s5829_s20   ;;  %s5878_s22 = sadd.s32 1, %s5829_s20   ;;  %s5829_s20 = sphi %s5865_s20, %s6833_s20   ;;  %s5825_s19 = sphi %s5863_s19, %s6832_s19   ;;  %s5821_s18 = sphi %s5861_s18, %s6831_s18  }
   0x3   : > { %s19_s23 = ssub.s32 %s5829_s20, %s5878_s22  ;;  %s22_s24 = sadd.s32 1, %s5825_s19 }
   0x4   : > { %p20_p0 = scmp.eq.s32.totalorder %s19_s23, 0  ;;  %p29_p1 = scmp.ne.s32.totalorder %s5825_s19, %s5821_s18 }
   0x5   : > { %p30_p2 = scmp.eq.s32.totalorder %s5829_s20, 0  ;;  %p4536_p4 = scmp.ge.s32.totalorder %s5829_s20, 2 }
   0x6   : > { %s5887_s25 = scalar_select %p20_p0, %s5825_s19, %s22_s24  }
   0x7   : > { %p5889_p3 = por %p30_p2, %p29_p1  ;;  %179 = sbr.rel (%p4536_p4) target bundleno = 86 (0x56), region = 28 }
   0xe   : > { %182 = sbr.rel (!%p5889_p3) target bundleno = 50 (0x32), region = 32  ;;  %s184_s27 = sand.u32 (%p5889_p3), 1, %s5825_s19  }
   0xf   : > { %s5050_s28 = sshll.u32 (%p5889_p3), %s5829_s20, 6  ;;  %s4537_s29 = sshll.u32 (%p5889_p3), %s184_s27, 9 }
  0x10   : > { %s5901_s7 = scalar_lea.vmem (%p5889_p3), %s6824_s0, %s5050_s28  ;;  %s5906_s8 = scalar_lea.vmem (%p5889_p3), [#allocation2], %s4537_s29 }
  0x11   : > { %v205_v0 = vld [vmem:[%s5901_s7] sm:$0xff] (%p5889_p3)   ;;  %v209_v1 = vld [vmem:[%s5901_s7 + $0x8] sm:$0xff] (%p5889_p3)   ;;  %v213_v2 = vld [vmem:[%s5901_s7 + $0x10] sm:$0xff] (%p5889_p3)  }
  0x12   : > { %206 = vst [vmem:[%s5906_s8] sm:$0xff] (%p5889_p3), %v205_v0   ;;  %210 = vst [vmem:[%s5906_s8 + $0x8] sm:$0xff] (%p5889_p3), %v209_v1   ;;  %v217_v3 = vld [vmem:[%s5901_s7 + $0x18] sm:$0xff] (%p5889_p3)   ;;  %v221_v4 = vld [vmem:[%s5901_s7 + $0x20] sm:$0xff] (%p5889_p3)  }
  0x13   : > { %214 = vst [vmem:[%s5906_s8 + $0x10] sm:$0xff] (%p5889_p3), %v213_v2   ;;  %v225_v5 = vld [vmem:[%s5901_s7 + $0x28] sm:$0xff] (%p5889_p3)   ;;  %218 = vst [vmem:[%s5906_s8 + $0x18] sm:$0xff] (%p5889_p3), %v217_v3   ;;  %v229_v6 = vld [vmem:[%s5901_s7 + $0x30] sm:$0xff] (%p5889_p3)  }
  0x14   : > { %222 = vst [vmem:[%s5906_s8 + $0x20] sm:$0xff] (%p5889_p3), %v221_v4   ;;  %226 = vst [vmem:[%s5906_s8 + $0x28] sm:$0xff] (%p5889_p3), %v225_v5   ;;  %v233_v7 = vld [vmem:[%s5901_s7 + $0x38] sm:$0xff] (%p5889_p3)   ;;  %v237_v8 = vld [vmem:[%s5901_s7 + $0x80] sm:$0xff] (%p5889_p3)  }
  0x15   : > { %230 = vst [vmem:[%s5906_s8 + $0x30] sm:$0xff] %v229_v6   ;;  %234 = vst [vmem:[%s5906_s8 + $0x38] sm:$0xff] %v233_v7   ;;  %v241_v9 = vld [vmem:[%s5901_s7 + $0x88] sm:$0xff]   ;;  %v245_v10 = vld [vmem:[%s5901_s7 + $0x90] sm:$0xff]  }
  0x16   : > { %238 = vst [vmem:[%s5906_s8 + $0x40] sm:$0xff] %v237_v8   ;;  %v249_v11 = vld [vmem:[%s5901_s7 + $0x98] sm:$0xff]   ;;  %242 = vst [vmem:[%s5906_s8 + $0x48] sm:$0xff] %v241_v9   ;;  %v253_v12 = vld [vmem:[%s5901_s7 + $0xa0] sm:$0xff]  }
  0x17   : > { %246 = vst [vmem:[%s5906_s8 + $0x50] sm:$0xff] %v245_v10   ;;  %250 = vst [vmem:[%s5906_s8 + $0x58] sm:$0xff] %v249_v11   ;;  %v257_v13 = vld [vmem:[%s5901_s7 + $0xa8] sm:$0xff]   ;;  %v261_v14 = vld [vmem:[%s5901_s7 + $0xb0] sm:$0xff]  }
  0x18   : > { %254 = vst [vmem:[%s5906_s8 + $0x60] sm:$0xff] %v253_v12   ;;  %258 = vst [vmem:[%s5906_s8 + $0x68] sm:$0xff] %v257_v13   ;;  %v265_v15 = vld [vmem:[%s5901_s7 + $0xb8] sm:$0xff]   ;;  %v269_v16 = vld [vmem:[%s5901_s7 + $0x100] sm:$0xff]  }
  0x19   : > { %262 = vst [vmem:[%s5906_s8 + $0x70] sm:$0xff] %v261_v14   ;;  %v273_v17 = vld [vmem:[%s5901_s7 + $0x108] sm:$0xff]   ;;  %266 = vst [vmem:[%s5906_s8 + $0x78] sm:$0xff] %v265_v15   ;;  %v277_v18 = vld [vmem:[%s5901_s7 + $0x110] sm:$0xff]  }
  0x1a   : > { %270 = vst [vmem:[%s5906_s8 + $0x80] sm:$0xff] %v269_v16   ;;  %274 = vst [vmem:[%s5906_s8 + $0x88] sm:$0xff] %v273_v17   ;;  %v281_v19 = vld [vmem:[%s5901_s7 + $0x118] sm:$0xff]   ;;  %v285_v20 = vld [vmem:[%s5901_s7 + $0x120] sm:$0xff]  }
  0x1b   : > { %278 = vst [vmem:[%s5906_s8 + $0x90] sm:$0xff] %v277_v18   ;;  %282 = vst [vmem:[%s5906_s8 + $0x98] sm:$0xff] %v281_v19   ;;  %v289_v21 = vld [vmem:[%s5901_s7 + $0x128] sm:$0xff]   ;;  %v293_v22 = vld [vmem:[%s5901_s7 + $0x130] sm:$0xff]  }
  0x1c   : > { %286 = vst [vmem:[%s5906_s8 + $0xa0] sm:$0xff] %v285_v20   ;;  %v297_v23 = vld [vmem:[%s5901_s7 + $0x138] sm:$0xff]   ;;  %290 = vst [vmem:[%s5906_s8 + $0xa8] sm:$0xff] %v289_v21   ;;  %v301_v24 = vld [vmem:[%s5901_s7 + $0x180] sm:$0xff]  }
  0x1d   : > { %294 = vst [vmem:[%s5906_s8 + $0xb0] sm:$0xff] %v293_v22   ;;  %298 = vst [vmem:[%s5906_s8 + $0xb8] sm:$0xff] %v297_v23   ;;  %v305_v25 = vld [vmem:[%s5901_s7 + $0x188] sm:$0xff]   ;;  %v309_v26 = vld [vmem:[%s5901_s7 + $0x190] sm:$0xff]  }
  0x1e   : > { %302 = vst [vmem:[%s5906_s8 + $0xc0] sm:$0xff] %v301_v24   ;;  %306 = vst [vmem:[%s5906_s8 + $0xc8] sm:$0xff] %v305_v25   ;;  %v313_v27 = vld [vmem:[%s5901_s7 + $0x198] sm:$0xff]   ;;  %v317_v28 = vld [vmem:[%s5901_s7 + $0x1a0] sm:$0xff]  }
  0x1f   : > { %310 = vst [vmem:[%s5906_s8 + $0xd0] sm:$0xff] %v309_v26   ;;  %v321_v29 = vld [vmem:[%s5901_s7 + $0x1a8] sm:$0xff]   ;;  %314 = vst [vmem:[%s5906_s8 + $0xd8] sm:$0xff] %v313_v27   ;;  %v325_v30 = vld [vmem:[%s5901_s7 + $0x1b0] sm:$0xff]  }
  0x20   : > { %318 = vst [vmem:[%s5906_s8 + $0xe0] sm:$0xff] %v317_v28   ;;  %322 = vst [vmem:[%s5906_s8 + $0xe8] sm:$0xff] %v321_v29   ;;  %v329_v31 = vld [vmem:[%s5901_s7 + $0x1b8] sm:$0xff]   ;;  %v333_v32 = vld [vmem:[%s5901_s7 + $0x200] sm:$0xff]  }
  0x21   : > { %326 = vst [vmem:[%s5906_s8 + $0xf0] sm:$0xff] %v325_v30   ;;  %330 = vst [vmem:[%s5906_s8 + $0xf8] sm:$0xff] %v329_v31   ;;  %v337_v33 = vld [vmem:[%s5901_s7 + $0x208] sm:$0xff]   ;;  %v341_v34 = vld [vmem:[%s5901_s7 + $0x210] sm:$0xff]  }
  0x22   : > { %334 = vst [vmem:[%s5906_s8 + $0x100] sm:$0xff] %v333_v32   ;;  %v345_v35 = vld [vmem:[%s5901_s7 + $0x218] sm:$0xff]   ;;  %338 = vst [vmem:[%s5906_s8 + $0x108] sm:$0xff] %v337_v33   ;;  %v349_v36 = vld [vmem:[%s5901_s7 + $0x220] sm:$0xff]  }
  0x23   : > { %342 = vst [vmem:[%s5906_s8 + $0x110] sm:$0xff] %v341_v34   ;;  %346 = vst [vmem:[%s5906_s8 + $0x118] sm:$0xff] %v345_v35   ;;  %v353_v37 = vld [vmem:[%s5901_s7 + $0x228] sm:$0xff]   ;;  %v357_v38 = vld [vmem:[%s5901_s7 + $0x230] sm:$0xff]  }
  0x24   : > { %350 = vst [vmem:[%s5906_s8 + $0x120] sm:$0xff] %v349_v36   ;;  %354 = vst [vmem:[%s5906_s8 + $0x128] sm:$0xff] %v353_v37   ;;  %v361_v39 = vld [vmem:[%s5901_s7 + $0x238] sm:$0xff]   ;;  %v365_v40 = vld [vmem:[%s5901_s7 + $0x280] sm:$0xff]  }
  0x25   : > { %358 = vst [vmem:[%s5906_s8 + $0x130] sm:$0xff] %v357_v38   ;;  %v369_v41 = vld [vmem:[%s5901_s7 + $0x288] sm:$0xff]   ;;  %362 = vst [vmem:[%s5906_s8 + $0x138] sm:$0xff] %v361_v39   ;;  %v373_v42 = vld [vmem:[%s5901_s7 + $0x290] sm:$0xff]  }
  0x26   : > { %366 = vst [vmem:[%s5906_s8 + $0x140] sm:$0xff] %v365_v40   ;;  %370 = vst [vmem:[%s5906_s8 + $0x148] sm:$0xff] %v369_v41   ;;  %v377_v43 = vld [vmem:[%s5901_s7 + $0x298] sm:$0xff]   ;;  %v381_v44 = vld [vmem:[%s5901_s7 + $0x2a0] sm:$0xff]  }
  0x27   : > { %374 = vst [vmem:[%s5906_s8 + $0x150] sm:$0xff] %v373_v42   ;;  %378 = vst [vmem:[%s5906_s8 + $0x158] sm:$0xff] %v377_v43   ;;  %v385_v45 = vld [vmem:[%s5901_s7 + $0x2a8] sm:$0xff]   ;;  %v389_v46 = vld [vmem:[%s5901_s7 + $0x2b0] sm:$0xff]  }
  0x28   : > { %382 = vst [vmem:[%s5906_s8 + $0x160] sm:$0xff] %v381_v44   ;;  %v393_v47 = vld [vmem:[%s5901_s7 + $0x2b8] sm:$0xff]   ;;  %386 = vst [vmem:[%s5906_s8 + $0x168] sm:$0xff] %v385_v45   ;;  %v397_v48 = vld [vmem:[%s5901_s7 + $0x300] sm:$0xff]  }
  0x29   : > { %390 = vst [vmem:[%s5906_s8 + $0x170] sm:$0xff] %v389_v46   ;;  %394 = vst [vmem:[%s5906_s8 + $0x178] sm:$0xff] %v393_v47   ;;  %v401_v49 = vld [vmem:[%s5901_s7 + $0x308] sm:$0xff]   ;;  %v405_v50 = vld [vmem:[%s5901_s7 + $0x310] sm:$0xff]  }
  0x2a   : > { %398 = vst [vmem:[%s5906_s8 + $0x180] sm:$0xff] %v397_v48   ;;  %402 = vst [vmem:[%s5906_s8 + $0x188] sm:$0xff] %v401_v49   ;;  %v409_v51 = vld [vmem:[%s5901_s7 + $0x318] sm:$0xff]   ;;  %v413_v52 = vld [vmem:[%s5901_s7 + $0x320] sm:$0xff]  }
  0x2b   : > { %406 = vst [vmem:[%s5906_s8 + $0x190] sm:$0xff] %v405_v50   ;;  %v417_v53 = vld [vmem:[%s5901_s7 + $0x328] sm:$0xff]   ;;  %410 = vst [vmem:[%s5906_s8 + $0x198] sm:$0xff] %v409_v51   ;;  %v421_v54 = vld [vmem:[%s5901_s7 + $0x330] sm:$0xff]  }
  0x2c   : > { %414 = vst [vmem:[%s5906_s8 + $0x1a0] sm:$0xff] %v413_v52   ;;  %418 = vst [vmem:[%s5906_s8 + $0x1a8] sm:$0xff] %v417_v53   ;;  %v425_v55 = vld [vmem:[%s5901_s7 + $0x338] sm:$0xff]   ;;  %v429_v56 = vld [vmem:[%s5901_s7 + $0x380] sm:$0xff]  }
  0x2d   : > { %422 = vst [vmem:[%s5906_s8 + $0x1b0] sm:$0xff] %v421_v54   ;;  %426 = vst [vmem:[%s5906_s8 + $0x1b8] sm:$0xff] %v425_v55   ;;  %v433_v57 = vld [vmem:[%s5901_s7 + $0x388] sm:$0xff]   ;;  %v437_v58 = vld [vmem:[%s5901_s7 + $0x390] sm:$0xff]  }
  0x2e   : > { %430 = vst [vmem:[%s5906_s8 + $0x1c0] sm:$0xff] %v429_v56   ;;  %v441_v59 = vld [vmem:[%s5901_s7 + $0x398] sm:$0xff]   ;;  %434 = vst [vmem:[%s5906_s8 + $0x1c8] sm:$0xff] %v433_v57   ;;  %v445_v60 = vld [vmem:[%s5901_s7 + $0x3a0] sm:$0xff]  }
  0x2f   : > { %438 = vst [vmem:[%s5906_s8 + $0x1d0] sm:$0xff] %v437_v58   ;;  %442 = vst [vmem:[%s5906_s8 + $0x1d8] sm:$0xff] %v441_v59   ;;  %v449_v61 = vld [vmem:[%s5901_s7 + $0x3a8] sm:$0xff]   ;;  %v453_v62 = vld [vmem:[%s5901_s7 + $0x3b0] sm:$0xff]  }
  0x30   : > { %446 = vst [vmem:[%s5906_s8 + $0x1e0] sm:$0xff] %v445_v60   ;;  %450 = vst [vmem:[%s5906_s8 + $0x1e8] sm:$0xff] %v449_v61   ;;  %v457_v63 = vld [vmem:[%s5901_s7 + $0x3b8] sm:$0xff]  }
  0x31   : > { %454 = vst [vmem:[%s5906_s8 + $0x1f0] sm:$0xff] %v453_v62   ;;  %458 = vst [vmem:[%s5906_s8 + $0x1f8] sm:$0xff] %v457_v63  }
  0x32 PF: > { %739 = sbr.rel (!%p5889_p3) target bundleno = 86 (0x56), region = 73  ;;  %s741_s9 = sand.u32 (%p5889_p3), 1, %s5825_s19  }
  0x33   : > { %s5051_s10 = sshll.u32 (%p5889_p3), %s5829_s20, 6  ;;  %s4540_s11 = sshll.u32 (%p5889_p3), %s741_s9, 9 }
  0x34   : > { %s6040_s14 = scalar_lea.vmem (%p5889_p3), %s6825_s1, %s5051_s10  ;;  %s6045_s15 = scalar_lea.vmem (%p5889_p3), [#allocation3], %s4540_s11 }
  0x35   : > { %v762_v0 = vld [vmem:[%s6040_s14] sm:$0xff] (%p5889_p3)   ;;  %v766_v1 = vld [vmem:[%s6040_s14 + $0x8] sm:$0xff] (%p5889_p3)   ;;  %v770_v2 = vld [vmem:[%s6040_s14 + $0x10] sm:$0xff] (%p5889_p3)  }
  0x36   : > { %763 = vst [vmem:[%s6045_s15] sm:$0xff] (%p5889_p3), %v762_v0   ;;  %767 = vst [vmem:[%s6045_s15 + $0x8] sm:$0xff] (%p5889_p3), %v766_v1   ;;  %v774_v3 = vld [vmem:[%s6040_s14 + $0x18] sm:$0xff] (%p5889_p3)   ;;  %v778_v4 = vld [vmem:[%s6040_s14 + $0x20] sm:$0xff] (%p5889_p3)  }
  0x37   : > { %771 = vst [vmem:[%s6045_s15 + $0x10] sm:$0xff] (%p5889_p3), %v770_v2   ;;  %v782_v5 = vld [vmem:[%s6040_s14 + $0x28] sm:$0xff] (%p5889_p3)   ;;  %775 = vst [vmem:[%s6045_s15 + $0x18] sm:$0xff] (%p5889_p3), %v774_v3   ;;  %v786_v6 = vld [vmem:[%s6040_s14 + $0x30] sm:$0xff] (%p5889_p3)  }
  0x38   : > { %779 = vst [vmem:[%s6045_s15 + $0x20] sm:$0xff] (%p5889_p3), %v778_v4   ;;  %783 = vst [vmem:[%s6045_s15 + $0x28] sm:$0xff] (%p5889_p3), %v782_v5   ;;  %v790_v7 = vld [vmem:[%s6040_s14 + $0x38] sm:$0xff] (%p5889_p3)   ;;  %v794_v8 = vld [vmem:[%s6040_s14 + $0x80] sm:$0xff] (%p5889_p3)  }
  0x39   : > { %787 = vst [vmem:[%s6045_s15 + $0x30] sm:$0xff] %v786_v6   ;;  %791 = vst [vmem:[%s6045_s15 + $0x38] sm:$0xff] %v790_v7   ;;  %v798_v9 = vld [vmem:[%s6040_s14 + $0x88] sm:$0xff]   ;;  %v802_v10 = vld [vmem:[%s6040_s14 + $0x90] sm:$0xff]  }
  0x3a   : > { %795 = vst [vmem:[%s6045_s15 + $0x40] sm:$0xff] %v794_v8   ;;  %v806_v11 = vld [vmem:[%s6040_s14 + $0x98] sm:$0xff]   ;;  %799 = vst [vmem:[%s6045_s15 + $0x48] sm:$0xff] %v798_v9   ;;  %v810_v12 = vld [vmem:[%s6040_s14 + $0xa0] sm:$0xff]  }
  0x3b   : > { %803 = vst [vmem:[%s6045_s15 + $0x50] sm:$0xff] %v802_v10   ;;  %807 = vst [vmem:[%s6045_s15 + $0x58] sm:$0xff] %v806_v11   ;;  %v814_v13 = vld [vmem:[%s6040_s14 + $0xa8] sm:$0xff]   ;;  %v818_v14 = vld [vmem:[%s6040_s14 + $0xb0] sm:$0xff]  }
  0x3c   : > { %811 = vst [vmem:[%s6045_s15 + $0x60] sm:$0xff] %v810_v12   ;;  %815 = vst [vmem:[%s6045_s15 + $0x68] sm:$0xff] %v814_v13   ;;  %v822_v15 = vld [vmem:[%s6040_s14 + $0xb8] sm:$0xff]   ;;  %v826_v16 = vld [vmem:[%s6040_s14 + $0x100] sm:$0xff]  }
  0x3d   : > { %819 = vst [vmem:[%s6045_s15 + $0x70] sm:$0xff] %v818_v14   ;;  %v830_v17 = vld [vmem:[%s6040_s14 + $0x108] sm:$0xff]   ;;  %823 = vst [vmem:[%s6045_s15 + $0x78] sm:$0xff] %v822_v15   ;;  %v834_v18 = vld [vmem:[%s6040_s14 + $0x110] sm:$0xff]  }
  0x3e   : > { %827 = vst [vmem:[%s6045_s15 + $0x80] sm:$0xff] %v826_v16   ;;  %831 = vst [vmem:[%s6045_s15 + $0x88] sm:$0xff] %v830_v17   ;;  %v838_v19 = vld [vmem:[%s6040_s14 + $0x118] sm:$0xff]   ;;  %v842_v20 = vld [vmem:[%s6040_s14 + $0x120] sm:$0xff]  }
  0x3f   : > { %835 = vst [vmem:[%s6045_s15 + $0x90] sm:$0xff] %v834_v18   ;;  %839 = vst [vmem:[%s6045_s15 + $0x98] sm:$0xff] %v838_v19   ;;  %v846_v21 = vld [vmem:[%s6040_s14 + $0x128] sm:$0xff]   ;;  %v850_v22 = vld [vmem:[%s6040_s14 + $0x130] sm:$0xff]  }
  0x40   : > { %843 = vst [vmem:[%s6045_s15 + $0xa0] sm:$0xff] %v842_v20   ;;  %v854_v23 = vld [vmem:[%s6040_s14 + $0x138] sm:$0xff]   ;;  %847 = vst [vmem:[%s6045_s15 + $0xa8] sm:$0xff] %v846_v21   ;;  %v858_v24 = vld [vmem:[%s6040_s14 + $0x180] sm:$0xff]  }
  0x41   : > { %851 = vst [vmem:[%s6045_s15 + $0xb0] sm:$0xff] %v850_v22   ;;  %855 = vst [vmem:[%s6045_s15 + $0xb8] sm:$0xff] %v854_v23   ;;  %v862_v25 = vld [vmem:[%s6040_s14 + $0x188] sm:$0xff]   ;;  %v866_v26 = vld [vmem:[%s6040_s14 + $0x190] sm:$0xff]  }
  0x42   : > { %859 = vst [vmem:[%s6045_s15 + $0xc0] sm:$0xff] %v858_v24   ;;  %863 = vst [vmem:[%s6045_s15 + $0xc8] sm:$0xff] %v862_v25   ;;  %v870_v27 = vld [vmem:[%s6040_s14 + $0x198] sm:$0xff]   ;;  %v874_v28 = vld [vmem:[%s6040_s14 + $0x1a0] sm:$0xff]  }
  0x43   : > { %867 = vst [vmem:[%s6045_s15 + $0xd0] sm:$0xff] %v866_v26   ;;  %v878_v29 = vld [vmem:[%s6040_s14 + $0x1a8] sm:$0xff]   ;;  %871 = vst [vmem:[%s6045_s15 + $0xd8] sm:$0xff] %v870_v27   ;;  %v882_v30 = vld [vmem:[%s6040_s14 + $0x1b0] sm:$0xff]  }
  0x44   : > { %875 = vst [vmem:[%s6045_s15 + $0xe0] sm:$0xff] %v874_v28   ;;  %879 = vst [vmem:[%s6045_s15 + $0xe8] sm:$0xff] %v878_v29   ;;  %v886_v31 = vld [vmem:[%s6040_s14 + $0x1b8] sm:$0xff]   ;;  %v890_v32 = vld [vmem:[%s6040_s14 + $0x200] sm:$0xff]  }
  0x45   : > { %883 = vst [vmem:[%s6045_s15 + $0xf0] sm:$0xff] %v882_v30   ;;  %887 = vst [vmem:[%s6045_s15 + $0xf8] sm:$0xff] %v886_v31   ;;  %v894_v33 = vld [vmem:[%s6040_s14 + $0x208] sm:$0xff]   ;;  %v898_v34 = vld [vmem:[%s6040_s14 + $0x210] sm:$0xff]  }
  0x46   : > { %891 = vst [vmem:[%s6045_s15 + $0x100] sm:$0xff] %v890_v32   ;;  %v902_v35 = vld [vmem:[%s6040_s14 + $0x218] sm:$0xff]   ;;  %895 = vst [vmem:[%s6045_s15 + $0x108] sm:$0xff] %v894_v33   ;;  %v906_v36 = vld [vmem:[%s6040_s14 + $0x220] sm:$0xff]  }
  0x47   : > { %899 = vst [vmem:[%s6045_s15 + $0x110] sm:$0xff] %v898_v34   ;;  %903 = vst [vmem:[%s6045_s15 + $0x118] sm:$0xff] %v902_v35   ;;  %v910_v37 = vld [vmem:[%s6040_s14 + $0x228] sm:$0xff]   ;;  %v914_v38 = vld [vmem:[%s6040_s14 + $0x230] sm:$0xff]  }
  0x48   : > { %907 = vst [vmem:[%s6045_s15 + $0x120] sm:$0xff] %v906_v36   ;;  %911 = vst [vmem:[%s6045_s15 + $0x128] sm:$0xff] %v910_v37   ;;  %v918_v39 = vld [vmem:[%s6040_s14 + $0x238] sm:$0xff]   ;;  %v922_v40 = vld [vmem:[%s6040_s14 + $0x280] sm:$0xff]  }
  0x49   : > { %915 = vst [vmem:[%s6045_s15 + $0x130] sm:$0xff] %v914_v38   ;;  %v926_v41 = vld [vmem:[%s6040_s14 + $0x288] sm:$0xff]   ;;  %919 = vst [vmem:[%s6045_s15 + $0x138] sm:$0xff] %v918_v39   ;;  %v930_v42 = vld [vmem:[%s6040_s14 + $0x290] sm:$0xff]  }
  0x4a   : > { %923 = vst [vmem:[%s6045_s15 + $0x140] sm:$0xff] %v922_v40   ;;  %927 = vst [vmem:[%s6045_s15 + $0x148] sm:$0xff] %v926_v41   ;;  %v934_v43 = vld [vmem:[%s6040_s14 + $0x298] sm:$0xff]   ;;  %v938_v44 = vld [vmem:[%s6040_s14 + $0x2a0] sm:$0xff]  }
  0x4b   : > { %931 = vst [vmem:[%s6045_s15 + $0x150] sm:$0xff] %v930_v42   ;;  %935 = vst [vmem:[%s6045_s15 + $0x158] sm:$0xff] %v934_v43   ;;  %v942_v45 = vld [vmem:[%s6040_s14 + $0x2a8] sm:$0xff]   ;;  %v946_v46 = vld [vmem:[%s6040_s14 + $0x2b0] sm:$0xff]  }
  0x4c   : > { %939 = vst [vmem:[%s6045_s15 + $0x160] sm:$0xff] %v938_v44   ;;  %v950_v47 = vld [vmem:[%s6040_s14 + $0x2b8] sm:$0xff]   ;;  %943 = vst [vmem:[%s6045_s15 + $0x168] sm:$0xff] %v942_v45   ;;  %v954_v48 = vld [vmem:[%s6040_s14 + $0x300] sm:$0xff]  }
  0x4d   : > { %947 = vst [vmem:[%s6045_s15 + $0x170] sm:$0xff] %v946_v46   ;;  %951 = vst [vmem:[%s6045_s15 + $0x178] sm:$0xff] %v950_v47   ;;  %v958_v49 = vld [vmem:[%s6040_s14 + $0x308] sm:$0xff]   ;;  %v962_v50 = vld [vmem:[%s6040_s14 + $0x310] sm:$0xff]  }
  0x4e   : > { %955 = vst [vmem:[%s6045_s15 + $0x180] sm:$0xff] %v954_v48   ;;  %959 = vst [vmem:[%s6045_s15 + $0x188] sm:$0xff] %v958_v49   ;;  %v966_v51 = vld [vmem:[%s6040_s14 + $0x318] sm:$0xff]   ;;  %v970_v52 = vld [vmem:[%s6040_s14 + $0x320] sm:$0xff]  }
  0x4f   : > { %963 = vst [vmem:[%s6045_s15 + $0x190] sm:$0xff] %v962_v50   ;;  %v974_v53 = vld [vmem:[%s6040_s14 + $0x328] sm:$0xff]   ;;  %967 = vst [vmem:[%s6045_s15 + $0x198] sm:$0xff] %v966_v51   ;;  %v978_v54 = vld [vmem:[%s6040_s14 + $0x330] sm:$0xff]  }
  0x50   : > { %971 = vst [vmem:[%s6045_s15 + $0x1a0] sm:$0xff] %v970_v52   ;;  %975 = vst [vmem:[%s6045_s15 + $0x1a8] sm:$0xff] %v974_v53   ;;  %v982_v55 = vld [vmem:[%s6040_s14 + $0x338] sm:$0xff]   ;;  %v986_v56 = vld [vmem:[%s6040_s14 + $0x380] sm:$0xff]  }
  0x51   : > { %979 = vst [vmem:[%s6045_s15 + $0x1b0] sm:$0xff] %v978_v54   ;;  %983 = vst [vmem:[%s6045_s15 + $0x1b8] sm:$0xff] %v982_v55   ;;  %v990_v57 = vld [vmem:[%s6040_s14 + $0x388] sm:$0xff]   ;;  %v994_v58 = vld [vmem:[%s6040_s14 + $0x390] sm:$0xff]  }
  0x52   : > { %987 = vst [vmem:[%s6045_s15 + $0x1c0] sm:$0xff] %v986_v56   ;;  %v998_v59 = vld [vmem:[%s6040_s14 + $0x398] sm:$0xff]   ;;  %991 = vst [vmem:[%s6045_s15 + $0x1c8] sm:$0xff] %v990_v57   ;;  %v1002_v60 = vld [vmem:[%s6040_s14 + $0x3a0] sm:$0xff]  }
  0x53   : > { %995 = vst [vmem:[%s6045_s15 + $0x1d0] sm:$0xff] %v994_v58   ;;  %999 = vst [vmem:[%s6045_s15 + $0x1d8] sm:$0xff] %v998_v59   ;;  %v1006_v61 = vld [vmem:[%s6040_s14 + $0x3a8] sm:$0xff]   ;;  %v1010_v62 = vld [vmem:[%s6040_s14 + $0x3b0] sm:$0xff]  }
  0x54   : > { %1003 = vst [vmem:[%s6045_s15 + $0x1e0] sm:$0xff] %v1002_v60   ;;  %1007 = vst [vmem:[%s6045_s15 + $0x1e8] sm:$0xff] %v1006_v61   ;;  %v1014_v63 = vld [vmem:[%s6040_s14 + $0x3b8] sm:$0xff]  }
  0x55   : > { %1011 = vst [vmem:[%s6045_s15 + $0x1f0] sm:$0xff] %v1010_v62   ;;  %1015 = vst [vmem:[%s6045_s15 + $0x1f8] sm:$0xff] %v1014_v63  }
  0x56 PF: > { %p4543_p5 = scmp.ge.s32.totalorder %s5829_s20, 1  ;;  %p1295_p6 = scmp.lt.s32.totalorder %s5829_s20, 3 }
  0x58   : > { %p1296_p7 = pnand %p4543_p5, %p1295_p6 }
  0x59   : > { %v6177_v0 = vld [vmem:[%s6827_s3] sm:$0xff] (!%p1296_p7)   ;;  %s1302_s23 = sand.u32 (!%p1296_p7), 1, %s5821_s18   ;;  %v6183_v1 = vld [vmem:[%s6827_s3 + $0x8] sm:$0xff] (!%p1296_p7)   ;;  %vm1439_vm0 = vcmask (!%p1296_p7), 261120   ;;  %vm1607_vm1 = vcmask (!%p1296_p7), 130048   ;;  %s4546_s6 = sshll.u32 (!%p1296_p7), %s4533_s21, 4 }
  0x5a   : > { %1299 = sbr.rel (%p1296_p7) target bundleno = 572 (0x23c), region = 114  ;;  %s6185_s27 = sshll.u32 (!%p1296_p7), %s1302_s23, 9  ;;  %5220 = vmatprep.subr.bf16.mxu0 (!%p1296_p7), %v6177_v0  ;;  %5258 = vmatprep.subr.bf16.mxu1 (!%p1296_p7), %v6177_v0  ;;  %v6192_v2 = vld [vmem:[%s6826_s2] sm:$0xff] (!%p1296_p7)   ;;  %vm4436_vm2 = vcmask (!%p1296_p7), 257024  }
  0x5b   : > { %5221 = vmatpush3.bf16.msra.mxu0 (!%p1296_p7), %v6177_v0  ;;  %5259 = vmatpush3.bf16.msra.mxu1 (!%p1296_p7), %v6177_v0  ;;  %s6197_s18 = scalar_lea.vmem (!%p1296_p7), [#allocation3], %s6185_s27  ;;  %s6230_s30 = scalar_lea.vmem (!%p1296_p7), [#allocation2], %s6185_s27 }
  0x5c   : > { %v5678_v3 = vld [vmem:[%s6197_s18] sm:$0xff] (!%p1296_p7)   ;;  %5222 = vmatprep.subr.bf16.mxu0 (!%p1296_p7), %v6183_v1  ;;  %5260 = vmatprep.subr.bf16.mxu1 (!%p1296_p7), %v6183_v1  ;;  %v5680_v5 = vld [vmem:[%s6197_s18 + $0x8] sm:$0xff] (!%p1296_p7)   ;;  %v5683_v7 = vld [vmem:[%s6197_s18 + $0x10] sm:$0xff] (!%p1296_p7)   ;;  %p1343_p8 = scmp.lt.s32.totalorder (!%p1296_p7), %s4546_s6, 31 }
  0x5d   : > { %v5679_v4 = vld [vmem:[%s6197_s18 + $0x40] sm:$0xff] (!%p1296_p7)   ;;  %5224 = vmatprep.mubr.msk.bf16.mxu0 (!%p1296_p7), %vm1439_vm0, %v5678_v3  ;;  %v5682_v6 = vld [vmem:[%s6197_s18 + $0x48] sm:$0xff] (!%p1296_p7)   ;;  %v5684_v8 = vld [vmem:[%s6197_s18 + $0x50] sm:$0xff] (!%p1296_p7)  }
  0x5e   : > { %5262 = vmatprep.mubr.msk.bf16.mxu1 (!%p1296_p7), %vm1439_vm0, %v5679_v4  ;;  %v5685_v9 = vld [vmem:[%s6197_s18 + $0x18] sm:$0xff] (!%p1296_p7)   ;;  %v5687_v11 = vld [vmem:[%s6197_s18 + $0x20] sm:$0xff] (!%p1296_p7)   ;;  %v5689_v13 = vld [vmem:[%s6197_s18 + $0x28] sm:$0xff] (!%p1296_p7)  }
  0x5f   : > { %5223 = vmatpush3.bf16.msra.mxu0 (!%p1296_p7), %v6183_v1  ;;  %5261 = vmatpush3.bf16.msra.mxu1 (!%p1296_p7), %v6183_v1  ;;  %v5686_v10 = vld [vmem:[%s6197_s18 + $0x58] sm:$0xff] (!%p1296_p7)   ;;  %v5688_v12 = vld [vmem:[%s6197_s18 + $0x60] sm:$0xff] (!%p1296_p7)   ;;  %v5690_v14 = vld [vmem:[%s6197_s18 + $0x68] sm:$0xff] (!%p1296_p7)  }
  0x60   : > { %5240 = vmatprep.subr.bf16.mxu0 (!%p1296_p7), %v6192_v2  ;;  %5278 = vmatprep.subr.bf16.mxu1 (!%p1296_p7), %v6192_v2  ;;  %v5691_v15 = vld [vmem:[%s6197_s18 + $0x30] sm:$0xff] (!%p1296_p7)   ;;  %v5693_v17 = vld [vmem:[%s6197_s18 + $0x38] sm:$0xff] (!%p1296_p7)   ;;  %v5695_v19 = vld [vmem:[%s6230_s30] sm:$0xff] (!%p1296_p7)  }
  0x61   : > { %v5692_v16 = vld [vmem:[%s6197_s18 + $0x70] sm:$0xff]   ;;  %v5694_v18 = vld [vmem:[%s6197_s18 + $0x78] sm:$0xff]   ;;  %v5696_v20 = vld [vmem:[%s6230_s30 + $0x40] sm:$0xff]   ;;  %s6835_s6 = smov (!%p1343_p8, %s4546_s6), 31 }
  0x62   : > { %5225 = vmatmul.mubr.msk.bf16.vlgmr.msra.gmra.mrb[0].mxu0 %vm1439_vm0, %v5680_v5  ;;  %5263 = vmatmul.mubr.msk.bf16.vlgmr.msra.gmra.mrb[0].mxu1 %vm1439_vm0, %v5682_v6  ;;  %v5697_v21 = vld [vmem:[%s6230_s30 + $0x8] sm:$0xff]   ;;  %v5699_v23 = vld [vmem:[%s6230_s30 + $0x10] sm:$0xff]   ;;  %v5701_v25 = vld [vmem:[%s6230_s30 + $0x18] sm:$0xff]   ;;  %s4547_s20 = sshll.u32 %s6835_s6, 2 }
  0x63   : > { %5241 = vmatpush3.bf16.msra.mxu0 %v6192_v2  ;;  %5279 = vmatpush3.bf16.msra.mxu1 %v6192_v2  ;;  %v5698_v22 = vld [vmem:[%s6230_s30 + $0x48] sm:$0xff]   ;;  %v5700_v24 = vld [vmem:[%s6230_s30 + $0x50] sm:$0xff]   ;;  %v5702_v26 = vld [vmem:[%s6230_s30 + $0x58] sm:$0xff]   ;;  %s6731_s10 = scalar_lea.vmem %s6829_s5, %s4547_s20 }
  0x64   : > { %5228 = vmatprep.mubr.msk.bf16.mxu0 %vm1439_vm0, %v5683_v7  ;;  %5266 = vmatprep.mubr.msk.bf16.mxu1 %vm1439_vm0, %v5684_v8  ;;  %v5703_v27 = vld [vmem:[%s6230_s30 + $0x20] sm:$0xff]   ;;  %v5705_v29 = vld [vmem:[%s6230_s30 + $0x28] sm:$0xff]   ;;  %v5707_v31 = vld [vmem:[%s6230_s30 + $0x30] sm:$0xff]  }
  0x65   : > { %5296 = vmatprep.subr.bf16.mxu0 %v6177_v0  ;;  %5334 = vmatprep.subr.bf16.mxu1 %v6177_v0  ;;  %v5704_v28 = vld [vmem:[%s6230_s30 + $0x60] sm:$0xff]   ;;  %v5706_v30 = vld [vmem:[%s6230_s30 + $0x68] sm:$0xff]   ;;  %v5708_v32 = vld [vmem:[%s6230_s30 + $0x70] sm:$0xff]  }
  0x66   : > { %v5709_v33 = vld [vmem:[%s6230_s30 + $0x38] sm:$0xff]   ;;  %v5711_v35 = vld [vmem:[%s6197_s18 + $0x80] sm:$0xff]   ;;  %v5713_v37 = vld [vmem:[%s6197_s18 + $0x88] sm:$0xff]  }
  0x67   : > { %v5710_v34 = vld [vmem:[%s6230_s30 + $0x78] sm:$0xff]   ;;  %v5712_v36 = vld [vmem:[%s6197_s18 + $0xc0] sm:$0xff]   ;;  %v5714_v38 = vld [vmem:[%s6197_s18 + $0xc8] sm:$0xff]  }
  0x68   : > { %v5715_v39 = vld [vmem:[%s6197_s18 + $0x90] sm:$0xff]   ;;  %v5717_v41 = vld [vmem:[%s6197_s18 + $0x98] sm:$0xff]   ;;  %v5719_v43 = vld [vmem:[%s6197_s18 + $0xa0] sm:$0xff]  }
  0x69   : > { %v5716_v40 = vld [vmem:[%s6197_s18 + $0xd0] sm:$0xff]   ;;  %v5718_v42 = vld [vmem:[%s6197_s18 + $0xd8] sm:$0xff]   ;;  %v5720_v44 = vld [vmem:[%s6197_s18 + $0xe0] sm:$0xff]  }
  0x6a   : > { %5229 = vmatmul.mubr.msk.bf16.gmra.mrb[4].mxu0 %vm1439_vm0, %v5685_v9  ;;  %5267 = vmatmul.mubr.msk.bf16.gmra.mrb[4].mxu1 %vm1439_vm0, %v5686_v10  ;;  %v5721_v45 = vld [vmem:[%s6197_s18 + $0xa8] sm:$0xff]   ;;  %v5723_v47 = vld [vmem:[%s6197_s18 + $0xb0] sm:$0xff]   ;;  %v5725_v49 = vld [vmem:[%s6197_s18 + $0xb8] sm:$0xff]  }
  0x6b   : > { %5232 = vmatprep.mubr.msk.bf16.mxu0 %vm1439_vm0, %v5687_v11  ;;  %5270 = vmatprep.mubr.msk.bf16.mxu1 %vm1439_vm0, %v5688_v12  ;;  %v5722_v46 = vld [vmem:[%s6197_s18 + $0xe8] sm:$0xff]   ;;  %v5724_v48 = vld [vmem:[%s6197_s18 + $0xf0] sm:$0xff]   ;;  %v5726_v50 = vld [vmem:[%s6197_s18 + $0xf8] sm:$0xff]  }
  0x6c   : > { %v5727_v51 = vld [vmem:[%s6230_s30 + $0x80] sm:$0xff]   ;;  %v5729_v53 = vld [vmem:[%s6230_s30 + $0x88] sm:$0xff]   ;;  %v5731_v55 = vld [vmem:[%s6230_s30 + $0x90] sm:$0xff]  }
  0x6d   : > { %v5728_v52 = vld [vmem:[%s6230_s30 + $0xc0] sm:$0xff]   ;;  %v5730_v54 = vld [vmem:[%s6230_s30 + $0xc8] sm:$0xff]   ;;  %v5732_v56 = vld [vmem:[%s6230_s30 + $0xd0] sm:$0xff]  }
  0x6e   : > { %v5733_v57 = vld [vmem:[%s6230_s30 + $0x98] sm:$0xff]   ;;  %v5735_v59 = vld [vmem:[%s6230_s30 + $0xa0] sm:$0xff]   ;;  %v5737_v61 = vld [vmem:[%s6230_s30 + $0xa8] sm:$0xff]  }
  0x6f   : > { %v5734_v58 = vld [vmem:[%s6230_s30 + $0xd8] sm:$0xff]   ;;  %v5736_v60 = vld [vmem:[%s6230_s30 + $0xe0] sm:$0xff]   ;;  %v5738_v62 = vld [vmem:[%s6230_s30 + $0xe8] sm:$0xff]  }
  0x70   : > { %v5739_v63 = vld [vmem:[%s6230_s30 + $0xb0] sm:$0xff]   ;;  %v5741_v4 = vld [vmem:[%s6230_s30 + $0xb8] sm:$0xff]   ;;  %v5743_v6 = vld [vmem:[%s6197_s18 + $0x100] sm:$0xff]  }
  0x71   : > { %v5740_v3 = vld [vmem:[%s6230_s30 + $0xf0] sm:$0xff]   ;;  %v5742_v5 = vld [vmem:[%s6230_s30 + $0xf8] sm:$0xff]   ;;  %v5744_v7 = vld [vmem:[%s6197_s18 + $0x140] sm:$0xff]  }
  0x72   : > { %5233 = vmatmul.mubr.msk.bf16.gmra.mrb[8].mxu0 %vm1439_vm0, %v5689_v13  ;;  %5271 = vmatmul.mubr.msk.bf16.gmra.mrb[8].mxu1 %vm1439_vm0, %v5690_v14  ;;  %v5745_v8 = vld [vmem:[%s6197_s18 + $0x108] sm:$0xff]   ;;  %v5747_v10 = vld [vmem:[%s6197_s18 + $0x110] sm:$0xff]   ;;  %v5749_v12 = vld [vmem:[%s6197_s18 + $0x118] sm:$0xff]  }
  0x73   : > { %5236 = vmatprep.mubr.msk.bf16.mxu0 %vm1439_vm0, %v5691_v15  ;;  %5274 = vmatprep.mubr.msk.bf16.mxu1 %vm1439_vm0, %v5692_v16  ;;  %v5746_v9 = vld [vmem:[%s6197_s18 + $0x148] sm:$0xff]   ;;  %v5748_v11 = vld [vmem:[%s6197_s18 + $0x150] sm:$0xff]   ;;  %v5750_v13 = vld [vmem:[%s6197_s18 + $0x158] sm:$0xff]  }
  0x74   : > { %v5751_v14 = vld [vmem:[%s6197_s18 + $0x120] sm:$0xff]   ;;  %v5753_v16 = vld [vmem:[%s6197_s18 + $0x128] sm:$0xff]  }
  0x75   : > { %v5752_v15 = vld [vmem:[%s6197_s18 + $0x160] sm:$0xff]  }
  0x7a   : > { %5237 = vmatmul.mubr.msk.bf16.gmra.mrb[12].mxu0 %vm1439_vm0, %v5693_v17  ;;  %5275 = vmatmul.mubr.msk.bf16.gmra.mrb[12].mxu1 %vm1439_vm0, %v5694_v18  ;;  %v5754_v17 = vld [vmem:[%s6197_s18 + $0x168] sm:$0xff]   ;;  %v5755_v18 = vld [vmem:[%s6197_s18 + $0x130] sm:$0xff]  }
  0x7b   : > { %5242 = vmatprep.mubr.msk.bf16.mxu0 %vm1607_vm1, %v5695_v19  ;;  %5280 = vmatprep.mubr.msk.bf16.mxu1 %vm1607_vm1, %v5696_v20  ;;  %v5756_v19 = vld [vmem:[%s6197_s18 + $0x170] sm:$0xff]   ;;  %v5757_v20 = vld [vmem:[%s6197_s18 + $0x138] sm:$0xff]  }
  0x82   : > { %5243 = vmatmul.mubr.msk.bf16.vlgmr.msra.gmra.mrb[0].mxu0 %vm1607_vm1, %v5697_v21  ;;  %5281 = vmatmul.mubr.msk.bf16.vlgmr.msra.gmra.mrb[0].mxu1 %vm1607_vm1, %v5698_v22  ;;  %v5758_v21 = vld [vmem:[%s6197_s18 + $0x178] sm:$0xff]   ;;  %v5759_v22 = vld [vmem:[%s6230_s30 + $0x100] sm:$0xff]  }
  0x83   : > { %5297 = vmatpush3.bf16.msra.mxu0 %v6177_v0  ;;  %5335 = vmatpush3.bf16.msra.mxu1 %v6177_v0 }
  0x84   : > { %5246 = vmatprep.mubr.msk.bf16.mxu0 %vm1607_vm1, %v5699_v23  ;;  %5284 = vmatprep.mubr.msk.bf16.mxu1 %vm1607_vm1, %v5700_v24  ;;  %v5760_v23 = vld [vmem:[%s6230_s30 + $0x140] sm:$0xff]   ;;  %v5761_v24 = vld [vmem:[%s6230_s30 + $0x108] sm:$0xff]  }
  0x85   : > { %5298 = vmatprep.subr.bf16.mxu0 %v6183_v1  ;;  %5336 = vmatprep.subr.bf16.mxu1 %v6183_v1 }
  0x87   : > { %5299 = vmatpush3.bf16.msra.mxu0 %v6183_v1  ;;  %5337 = vmatpush3.bf16.msra.mxu1 %v6183_v1 }
  0x88   : > { %5316 = vmatprep.subr.bf16.mxu0 %v6192_v2  ;;  %5354 = vmatprep.subr.bf16.mxu1 %v6192_v2 }
  0x8a   : > { %5247 = vmatmul.mubr.msk.bf16.gmra.mrb[4].mxu0 %vm1607_vm1, %v5701_v25  ;;  %5285 = vmatmul.mubr.msk.bf16.gmra.mrb[4].mxu1 %vm1607_vm1, %v5702_v26  ;;  %v5762_v25 = vld [vmem:[%s6230_s30 + $0x148] sm:$0xff]   ;;  %v5763_v26 = vld [vmem:[%s6230_s30 + $0x110] sm:$0xff]  }
  0x8b   : > { %5250 = vmatprep.mubr.msk.bf16.mxu0 %vm1607_vm1, %v5703_v27  ;;  %5288 = vmatprep.mubr.msk.bf16.mxu1 %vm1607_vm1, %v5704_v28  ;;  %v5764_v27 = vld [vmem:[%s6230_s30 + $0x150] sm:$0xff]   ;;  %v5765_v28 = vld [vmem:[%s6230_s30 + $0x118] sm:$0xff]  }
  0x92   : > { %5251 = vmatmul.mubr.msk.bf16.gmra.mrb[8].mxu0 %vm1607_vm1, %v5705_v29  ;;  %5289 = vmatmul.mubr.msk.bf16.gmra.mrb[8].mxu1 %vm1607_vm1, %v5706_v30  ;;  %v5766_v29 = vld [vmem:[%s6230_s30 + $0x158] sm:$0xff]   ;;  %v5767_v30 = vld [vmem:[%s6230_s30 + $0x120] sm:$0xff]  }
  0x93   : > { %5254 = vmatprep.mubr.msk.bf16.mxu0 %vm1607_vm1, %v5707_v31  ;;  %5292 = vmatprep.mubr.msk.bf16.mxu1 %vm1607_vm1, %v5708_v32  ;;  %v5768_v31 = vld [vmem:[%s6230_s30 + $0x160] sm:$0xff]   ;;  %v5770_v32 = vld [vmem:[%s6230_s30 + $0x168] sm:$0xff]  }
  0x9a   : > { %5255 = vmatmul.mubr.msk.bf16.gmra.mrb[12].mxu0 %vm1607_vm1, %v5709_v33  ;;  %5293 = vmatmul.mubr.msk.bf16.gmra.mrb[12].mxu1 %vm1607_vm1, %v5710_v34  ;;  %v5772_v33 = vld [vmem:[%s6230_s30 + $0x170] sm:$0xff]   ;;  %v5773_v34 = vld [vmem:[%s6230_s30 + $0x138] sm:$0xff]  }
  0x9b   : > { %5300 = vmatprep.mubr.msk.bf16.mxu0 %vm1439_vm0, %v5711_v35  ;;  %5338 = vmatprep.mubr.msk.bf16.mxu1 %vm1439_vm0, %v5712_v36  ;;  %v5774_v35 = vld [vmem:[%s6230_s30 + $0x178] sm:$0xff]   ;;  %v5775_v36 = vld [vmem:[%s6197_s18 + $0x180] sm:$0xff]  }
  0xa2   : > { %5301 = vmatmul.mubr.msk.bf16.vlgmr.msra.gmra.mrb[16].mxu0 %vm1439_vm0, %v5713_v37  ;;  %5339 = vmatmul.mubr.msk.bf16.vlgmr.msra.gmra.mrb[16].mxu1 %vm1439_vm0, %v5714_v38  ;;  %v5776_v37 = vld [vmem:[%s6197_s18 + $0x1c0] sm:$0xff]   ;;  %v5777_v38 = vld [vmem:[%s6197_s18 + $0x188] sm:$0xff]  }
  0xa3   : > { %5317 = vmatpush3.bf16.msra.mxu0 %v6192_v2  ;;  %5355 = vmatpush3.bf16.msra.mxu1 %v6192_v2 }
  0xa4   : > { %5304 = vmatprep.mubr.msk.bf16.mxu0 %vm1439_vm0, %v5715_v39  ;;  %5342 = vmatprep.mubr.msk.bf16.mxu1 %vm1439_vm0, %v5716_v40  ;;  %v5778_v39 = vld [vmem:[%s6197_s18 + $0x1c8] sm:$0xff]   ;;  %v5779_v40 = vld [vmem:[%s6197_s18 + $0x190] sm:$0xff]  }
  0xa5   : > { %5372 = vmatprep.subr.bf16.mxu0 %v6177_v0  ;;  %5410 = vmatprep.subr.bf16.mxu1 %v6177_v0 }
  0xaa   : > { %5305 = vmatmul.mubr.msk.bf16.gmra.mrb[20].mxu0 %vm1439_vm0, %v5717_v41  ;;  %5343 = vmatmul.mubr.msk.bf16.gmra.mrb[20].mxu1 %vm1439_vm0, %v5718_v42  ;;  %v5780_v41 = vld [vmem:[%s6197_s18 + $0x1d0] sm:$0xff]   ;;  %v5781_v42 = vld [vmem:[%s6197_s18 + $0x198] sm:$0xff]  }
  0xab   : > { %5308 = vmatprep.mubr.msk.bf16.mxu0 %vm1439_vm0, %v5719_v43  ;;  %5346 = vmatprep.mubr.msk.bf16.mxu1 %vm1439_vm0, %v5720_v44  ;;  %v5782_v43 = vld [vmem:[%s6197_s18 + $0x1d8] sm:$0xff]   ;;  %v5783_v44 = vld [vmem:[%s6197_s18 + $0x1a0] sm:$0xff]  }
  0xb2   : > { %5309 = vmatmul.mubr.msk.bf16.gmra.mrb[24].mxu0 %vm1439_vm0, %v5721_v45  ;;  %5347 = vmatmul.mubr.msk.bf16.gmra.mrb[24].mxu1 %vm1439_vm0, %v5722_v46  ;;  %v5784_v45 = vld [vmem:[%s6197_s18 + $0x1e0] sm:$0xff]   ;;  %v5786_v46 = vld [vmem:[%s6197_s18 + $0x1e8] sm:$0xff]  }
  0xb3   : > { %5312 = vmatprep.mubr.msk.bf16.mxu0 %vm1439_vm0, %v5723_v47  ;;  %5350 = vmatprep.mubr.msk.bf16.mxu1 %vm1439_vm0, %v5724_v48  ;;  %v5787_v47 = vld [vmem:[%s6197_s18 + $0x1b0] sm:$0xff]  }
  0xb4   : > { %v5788_v48 = vld [vmem:[%s6197_s18 + $0x1f0] sm:$0xff]  }
  0xba   : > { %5313 = vmatmul.mubr.msk.bf16.gmra.mrb[28].mxu0 %vm1439_vm0, %v5725_v49  ;;  %5351 = vmatmul.mubr.msk.bf16.gmra.mrb[28].mxu1 %vm1439_vm0, %v5726_v50  ;;  %v5789_v49 = vld [vmem:[%s6197_s18 + $0x1b8] sm:$0xff]  }
  0xbb   : > { %5318 = vmatprep.mubr.msk.bf16.mxu0 %vm1607_vm1, %v5727_v51  ;;  %5356 = vmatprep.mubr.msk.bf16.mxu1 %vm1607_vm1, %v5728_v52  ;;  %v5790_v50 = vld [vmem:[%s6197_s18 + $0x1f8] sm:$0xff]   ;;  %v5791_v51 = vld [vmem:[%s6230_s30 + $0x180] sm:$0xff]  }
  0xbc   : > { %v5792_v52 = vld [vmem:[%s6230_s30 + $0x1c0] sm:$0xff]  }
  0xc2   : > { %5319 = vmatmul.mubr.msk.bf16.vlgmr.msra.gmra.mrb[16].mxu0 %vm1607_vm1, %v5729_v53  ;;  %5357 = vmatmul.mubr.msk.bf16.vlgmr.msra.gmra.mrb[16].mxu1 %vm1607_vm1, %v5730_v54  ;;  %v5793_v53 = vld [vmem:[%s6230_s30 + $0x188] sm:$0xff]  }
  0xc3   : > { %5373 = vmatpush3.bf16.msra.mxu0 %v6177_v0  ;;  %5411 = vmatpush3.bf16.msra.mxu1 %v6177_v0  ;;  %v5794_v54 = vld [vmem:[%s6230_s30 + $0x1c8] sm:$0xff]  }
  0xc4   : > { %5322 = vmatprep.mubr.msk.bf16.mxu0 %vm1607_vm1, %v5731_v55  ;;  %5360 = vmatprep.mubr.msk.bf16.mxu1 %vm1607_vm1, %v5732_v56  ;;  %v5795_v55 = vld [vmem:[%s6230_s30 + $0x190] sm:$0xff]  }
  0xc5   : > { %5374 = vmatprep.subr.bf16.mxu0 %v6183_v1  ;;  %5412 = vmatprep.subr.bf16.mxu1 %v6183_v1  ;;  %v5796_v56 = vld [vmem:[%s6230_s30 + $0x1d0] sm:$0xff]  }
  0xc7   : > { %5375 = vmatpush3.bf16.msra.mxu0 %v6183_v1  ;;  %5413 = vmatpush3.bf16.msra.mxu1 %v6183_v1 }
  0xc8   : > { %5392 = vmatprep.subr.bf16.mxu0 %v6192_v2  ;;  %5430 = vmatprep.subr.bf16.mxu1 %v6192_v2 }
  0xca   : > { %5323 = vmatmul.mubr.msk.bf16.gmra.mrb[20].mxu0 %vm1607_vm1, %v5733_v57  ;;  %5361 = vmatmul.mubr.msk.bf16.gmra.mrb[20].mxu1 %vm1607_vm1, %v5734_v58  ;;  %v5797_v57 = vld [vmem:[%s6230_s30 + $0x198] sm:$0xff]  }
  0xcb   : > { %5326 = vmatprep.mubr.msk.bf16.mxu0 %vm1607_vm1, %v5735_v59  ;;  %5364 = vmatprep.mubr.msk.bf16.mxu1 %vm1607_vm1, %v5736_v60  ;;  %v5798_v58 = vld [vmem:[%s6230_s30 + $0x1d8] sm:$0xff]   ;;  %v5799_v59 = vld [vmem:[%s6230_s30 + $0x1a0] sm:$0xff]  }
  0xcc   : > { %v5800_v60 = vld [vmem:[%s6230_s30 + $0x1e0] sm:$0xff]  }
  0xd2   : > { %5327 = vmatmul.mubr.msk.bf16.gmra.mrb[24].mxu0 %vm1607_vm1, %v5737_v61  ;;  %5365 = vmatmul.mubr.msk.bf16.gmra.mrb[24].mxu1 %vm1607_vm1, %v5738_v62  ;;  %v5801_v61 = vld [vmem:[%s6230_s30 + $0x1a8] sm:$0xff]  }
  0xd3   : > { %5330 = vmatprep.mubr.msk.bf16.mxu0 %vm1607_vm1, %v5739_v63  ;;  %5368 = vmatprep.mubr.msk.bf16.mxu1 %vm1607_vm1, %v5740_v3  ;;  %v5802_v62 = vld [vmem:[%s6230_s30 + $0x1e8] sm:$0xff]   ;;  %v5803_v63 = vld [vmem:[%s6230_s30 + $0x1b0] sm:$0xff]  }
  0xd4   : > { %v5804_v3 = vld [vmem:[%s6230_s30 + $0x1f0] sm:$0xff]  }
  0xda   : > { %5331 = vmatmul.mubr.msk.bf16.gmra.mrb[28].mxu0 %vm1607_vm1, %v5741_v4  ;;  %5369 = vmatmul.mubr.msk.bf16.gmra.mrb[28].mxu1 %vm1607_vm1, %v5742_v5 }
  0xdb   : > { %5376 = vmatprep.mubr.msk.bf16.mxu0 %vm1439_vm0, %v5743_v6  ;;  %5414 = vmatprep.mubr.msk.bf16.mxu1 %vm1439_vm0, %v5744_v7 }
  0xe2   : > { %5377 = vmatmul.mubr.msk.bf16.vlgmr.msra.gmra.mrb[32].mxu0 %vm1439_vm0, %v5745_v8  ;;  %5415 = vmatmul.mubr.msk.bf16.vlgmr.msra.gmra.mrb[32].mxu1 %vm1439_vm0, %v5746_v9  ;;  %v5805_v9 = vld [vmem:[%s6230_s30 + $0x1b8] sm:$0xff]  }
  0xe3   : > { %5393 = vmatpush3.bf16.msra.mxu0 %v6192_v2  ;;  %5431 = vmatpush3.bf16.msra.mxu1 %v6192_v2 }
  0xe4   : > { %5380 = vmatprep.mubr.msk.bf16.mxu0 %vm1439_vm0, %v5747_v10  ;;  %5418 = vmatprep.mubr.msk.bf16.mxu1 %vm1439_vm0, %v5748_v11  ;;  %v5806_v10 = vld [vmem:[%s6230_s30 + $0x1f8] sm:$0xff]  }
  0xe5   : > { %5448 = vmatprep.subr.bf16.mxu0 %v6177_v0  ;;  %5486 = vmatprep.subr.bf16.mxu1 %v6177_v0 }
  0xea   : > { %5381 = vmatmul.mubr.msk.bf16.gmra.mrb[36].mxu0 %vm1439_vm0, %v5749_v12  ;;  %5419 = vmatmul.mubr.msk.bf16.gmra.mrb[36].mxu1 %vm1439_vm0, %v5750_v13 }
  0xeb   : > { %5384 = vmatprep.mubr.msk.bf16.mxu0 %vm1439_vm0, %v5751_v14  ;;  %5422 = vmatprep.mubr.msk.bf16.mxu1 %vm1439_vm0, %v5752_v15 }
  0xf2   : > { %5385 = vmatmul.mubr.msk.bf16.gmra.mrb[40].mxu0 %vm1439_vm0, %v5753_v16  ;;  %5423 = vmatmul.mubr.msk.bf16.gmra.mrb[40].mxu1 %vm1439_vm0, %v5754_v17 }
  0xf3   : > { %5388 = vmatprep.mubr.msk.bf16.mxu0 %vm1439_vm0, %v5755_v18  ;;  %5426 = vmatprep.mubr.msk.bf16.mxu1 %vm1439_vm0, %v5756_v19 }
  0xfa   : > { %5389 = vmatmul.mubr.msk.bf16.gmra.mrb[44].mxu0 %vm1439_vm0, %v5757_v20  ;;  %5427 = vmatmul.mubr.msk.bf16.gmra.mrb[44].mxu1 %vm1439_vm0, %v5758_v21 }
  0xfb   : > { %5394 = vmatprep.mubr.msk.bf16.mxu0 %vm1607_vm1, %v5759_v22  ;;  %5432 = vmatprep.mubr.msk.bf16.mxu1 %vm1607_vm1, %v5760_v23 }
 0x102   : > { %5395 = vmatmul.mubr.msk.bf16.vlgmr.msra.gmra.mrb[32].mxu0 %vm1607_vm1, %v5761_v24  ;;  %5433 = vmatmul.mubr.msk.bf16.vlgmr.msra.gmra.mrb[32].mxu1 %vm1607_vm1, %v5762_v25 }
 0x103   : > { %5449 = vmatpush3.bf16.msra.mxu0 %v6177_v0  ;;  %5487 = vmatpush3.bf16.msra.mxu1 %v6177_v0  ;;  %v5769_v0 = vld [vmem:[%s6230_s30 + $0x128] sm:$0xff]  }
 0x104   : > { %5398 = vmatprep.mubr.msk.bf16.mxu0 %vm1607_vm1, %v5763_v26  ;;  %5436 = vmatprep.mubr.msk.bf16.mxu1 %vm1607_vm1, %v5764_v27 }
 0x105   : > { %5450 = vmatprep.subr.bf16.mxu0 %v6183_v1  ;;  %5488 = vmatprep.subr.bf16.mxu1 %v6183_v1 }
 0x107   : > { %5451 = vmatpush3.bf16.msra.mxu0 %v6183_v1  ;;  %5489 = vmatpush3.bf16.msra.mxu1 %v6183_v1  ;;  %v5771_v1 = vld [vmem:[%s6230_s30 + $0x130] sm:$0xff]  }
 0x108   : > { %5468 = vmatprep.subr.bf16.mxu0 %v6192_v2  ;;  %5506 = vmatprep.subr.bf16.mxu1 %v6192_v2 }
 0x10a   : > { %5399 = vmatmul.mubr.msk.bf16.gmra.mrb[36].mxu0 %vm1607_vm1, %v5765_v28  ;;  %5437 = vmatmul.mubr.msk.bf16.gmra.mrb[36].mxu1 %vm1607_vm1, %v5766_v29 }
 0x10b   : > { %5402 = vmatprep.mubr.msk.bf16.mxu0 %vm1607_vm1, %v5767_v30  ;;  %5440 = vmatprep.mubr.msk.bf16.mxu1 %vm1607_vm1, %v5768_v31 }
 0x112   : > { %5403 = vmatmul.mubr.msk.bf16.gmra.mrb[40].mxu0 %vm1607_vm1, %v5769_v0  ;;  %5441 = vmatmul.mubr.msk.bf16.gmra.mrb[40].mxu1 %vm1607_vm1, %v5770_v32 }
 0x113   : > { %5406 = vmatprep.mubr.msk.bf16.mxu0 %vm1607_vm1, %v5771_v1  ;;  %5444 = vmatprep.mubr.msk.bf16.mxu1 %vm1607_vm1, %v5772_v33 }
 0x11a   : > { %5407 = vmatmul.mubr.msk.bf16.gmra.mrb[44].mxu0 %vm1607_vm1, %v5773_v34  ;;  %5445 = vmatmul.mubr.msk.bf16.gmra.mrb[44].mxu1 %vm1607_vm1, %v5774_v35 }
 0x11b   : > { %5452 = vmatprep.mubr.msk.bf16.mxu0 %vm1439_vm0, %v5775_v36  ;;  %5490 = vmatprep.mubr.msk.bf16.mxu1 %vm1439_vm0, %v5776_v37 }
 0x122   : > { %5453 = vmatmul.mubr.msk.bf16.vlgmr.msra.gmra.mrb[48].mxu0 %vm1439_vm0, %v5777_v38  ;;  %5491 = vmatmul.mubr.msk.bf16.vlgmr.msra.gmra.mrb[48].mxu1 %vm1439_vm0, %v5778_v39 }
 0x123   : > { %5469 = vmatpush3.bf16.msra.mxu0 %v6192_v2  ;;  %5507 = vmatpush3.bf16.msra.mxu1 %v6192_v2  ;;  %v5785_v2 = vld [vmem:[%s6197_s18 + $0x1a8] sm:$0xff]  }
 0x124   : > { %5456 = vmatprep.mubr.msk.bf16.mxu0 %vm1439_vm0, %v5779_v40  ;;  %5494 = vmatprep.mubr.msk.bf16.mxu1 %vm1439_vm0, %v5780_v41 }
 0x12a   : > { %5457 = vmatmul.mubr.msk.bf16.gmra.mrb[52].mxu0 %vm1439_vm0, %v5781_v42  ;;  %5495 = vmatmul.mubr.msk.bf16.gmra.mrb[52].mxu1 %vm1439_vm0, %v5782_v43 }
 0x12b   : > { %5460 = vmatprep.mubr.msk.bf16.mxu0 %vm1439_vm0, %v5783_v44  ;;  %5498 = vmatprep.mubr.msk.bf16.mxu1 %vm1439_vm0, %v5784_v45 }
 0x132   : > { %5461 = vmatmul.mubr.msk.bf16.gmra.mrb[56].mxu0 %vm1439_vm0, %v5785_v2  ;;  %5499 = vmatmul.mubr.msk.bf16.gmra.mrb[56].mxu1 %vm1439_vm0, %v5786_v46 }
 0x133   : > { %5464 = vmatprep.mubr.msk.bf16.mxu0 %vm1439_vm0, %v5787_v47  ;;  %5502 = vmatprep.mubr.msk.bf16.mxu1 %vm1439_vm0, %v5788_v48 }
 0x13a   : > { %5465 = vmatmul.mubr.msk.bf16.gmra.mrb[60].mxu0 %vm1439_vm0, %v5789_v49  ;;  %5503 = vmatmul.mubr.msk.bf16.gmra.mrb[60].mxu1 %vm1439_vm0, %v5790_v50 }
 0x13b   : > { %5470 = vmatprep.mubr.msk.bf16.mxu0 %vm1607_vm1, %v5791_v51  ;;  %5508 = vmatprep.mubr.msk.bf16.mxu1 %vm1607_vm1, %v5792_v52 }
 0x142   : > { %5471 = vmatmul.mubr.msk.bf16.vlgmr.msra.gmra.mrb[48].mxu0 %vm1607_vm1, %v5793_v53  ;;  %5509 = vmatmul.mubr.msk.bf16.vlgmr.msra.gmra.mrb[48].mxu1 %vm1607_vm1, %v5794_v54 }
 0x143   : > { %5474 = vmatprep.mubr.msk.bf16.mxu0 %vm1607_vm1, %v5795_v55  ;;  %5512 = vmatprep.mubr.msk.bf16.mxu1 %vm1607_vm1, %v5796_v56 }
 0x14a   : > { %5475 = vmatmul.mubr.msk.bf16.gmra.mrb[52].mxu0 %vm1607_vm1, %v5797_v57  ;;  %5513 = vmatmul.mubr.msk.bf16.gmra.mrb[52].mxu1 %vm1607_vm1, %v5798_v58 }
 0x14b   : > { %5478 = vmatprep.mubr.msk.bf16.mxu0 %vm1607_vm1, %v5799_v59  ;;  %5516 = vmatprep.mubr.msk.bf16.mxu1 %vm1607_vm1, %v5800_v60 }
 0x152   : > { %5479 = vmatmul.mubr.msk.bf16.gmra.mrb[56].mxu0 %vm1607_vm1, %v5801_v61  ;;  %5517 = vmatmul.mubr.msk.bf16.gmra.mrb[56].mxu1 %vm1607_vm1, %v5802_v62 }
 0x153   : > { %5482 = vmatprep.mubr.msk.bf16.mxu0 %vm1607_vm1, %v5803_v63  ;;  %5520 = vmatprep.mubr.msk.bf16.mxu1 %vm1607_vm1, %v5804_v3 }
 0x155   : > { %v5244_v4 = vpop.f32.mrb[0].mxu0  ;;  %v5282_v5 = vpop.f32.mrb[0].mxu1 }
 0x156   : > { %v2087_v6 = vmax.f32 %v5244_v4, %v5282_v5  ;;  %v1666_v7 = vpop.f32.mrb[1].mxu0  ;;  %v2022_v8 = vpop.f32.mrb[1].mxu1 }
 0x157   : > { %v2085_v11 = vmax.f32 %v1666_v7, %v2022_v8  ;;  %v5245_v12 = vpop.f32.mrb[2].mxu0  ;;  %v5283_v13 = vpop.f32.mrb[2].mxu1 }
 0x158   : > { %v2088_v14 = vmax.f32 %v5245_v12, %v5283_v13  ;;  %v1669_v15 = vpop.f32.mrb[3].mxu0  ;;  %v2025_v16 = vpop.f32.mrb[3].mxu1 }
 0x159   : > { %v2086_v17 = vmax.f32 %v1669_v15, %v2025_v16 }
 0x15a   : > { %5483 = vmatmul.mubr.msk.bf16.gmra.mrb[60].mxu0 %vm1607_vm1, %v5805_v9  ;;  %5521 = vmatmul.mubr.msk.bf16.gmra.mrb[60].mxu1 %vm1607_vm1, %v5806_v10 }
 0x15d   : > { %v5248_v18 = vpop.f32.mrb[4].mxu0  ;;  %v5286_v19 = vpop.f32.mrb[4].mxu1 }
 0x15e   : > { %v2091_v20 = vmax.f32 %v5248_v18, %v5286_v19  ;;  %v1682_v21 = vpop.f32.mrb[5].mxu0  ;;  %v2038_v22 = vpop.f32.mrb[5].mxu1 }
 0x15f   : > { %v2089_v23 = vmax.f32 %v1682_v21, %v2038_v22  ;;  %v5249_v24 = vpop.f32.mrb[6].mxu0  ;;  %v5287_v25 = vpop.f32.mrb[6].mxu1 }
 0x160   : > { %v2092_v26 = vmax.f32 %v5249_v24, %v5287_v25  ;;  %v1685_v27 = vpop.f32.mrb[7].mxu0  ;;  %v2041_v28 = vpop.f32.mrb[7].mxu1 }
 0x161   : > { %v2090_v29 = vmax.f32 %v1685_v27, %v2041_v28 }
 0x165   : > { %v5252_v30 = vpop.f32.mrb[8].mxu0  ;;  %v5290_v31 = vpop.f32.mrb[8].mxu1 }
 0x166   : > { %v2095_v0 = vmax.f32 %v5252_v30, %v5290_v31  ;;  %v1698_v32 = vpop.f32.mrb[9].mxu0  ;;  %v2054_v1 = vpop.f32.mrb[9].mxu1 }
 0x167   : > { %v2093_v33 = vmax.f32 %v1698_v32, %v2054_v1  ;;  %v5253_v34 = vpop.f32.mrb[10].mxu0  ;;  %v5291_v35 = vpop.f32.mrb[10].mxu1 }
 0x168   : > { %v2096_v36 = vmax.f32 %v5253_v34, %v5291_v35  ;;  %v1701_v37 = vpop.f32.mrb[11].mxu0  ;;  %v2057_v38 = vpop.f32.mrb[11].mxu1 }
 0x169   : > { %v2094_v39 = vmax.f32 %v1701_v37, %v2057_v38 }
 0x16d   : > { %v6502_v40 = vpop.f32.mrb[12].mxu0  ;;  %v5294_v41 = vpop.f32.mrb[12].mxu1 }
 0x16e   : > { %v2099_v42 = vmax.f32 %v6502_v40, %v5294_v41  ;;  %v6505_v43 = vpop.f32.mrb[13].mxu0  ;;  %v2070_v44 = vpop.f32.mrb[13].mxu1 }
 0x16f   : > { %v2097_v45 = vmax.f32 %v6505_v43, %v2070_v44  ;;  %v6508_v2 = vpop.f32.mrb[14].mxu0  ;;  %v6510_v46 = vpop.f32.mrb[14].mxu1 }
 0x170   : > { %v2100_v47 = vmax.f32 %v6508_v2, %v6510_v46  ;;  %v6514_v48 = vpop.f32.mrb[15].mxu0  ;;  %v6516_v49 = vpop.f32.mrb[15].mxu1 }
 0x171   : > { %v2098_v50 = vmax.f32 %v6514_v48, %v6516_v49 }
 0x195   : > { %v5320_v51 = vpop.f32.mrb[16].mxu0  ;;  %v6520_v52 = vpop.f32.mrb[16].mxu1 }
 0x196   : > { %v6522_v53 = vmax.f32 %v2087_v6, %v5320_v51  ;;  %v2394_v54 = vpop.f32.mrb[17].mxu0  ;;  %v6524_v55 = vpop.f32.mrb[17].mxu1 }
 0x197   : > { %v6526_v56 = vmax.f32 %v2085_v11, %v2394_v54  ;;  %v5321_v57 = vpop.f32.mrb[18].mxu0  ;;  %v6528_v58 = vpop.f32.mrb[18].mxu1 }
 0x198   : > { %v2831_v59 = vmax.f32 %v6522_v53, %v6520_v52  ;;  %v6532_v60 = vmax.f32 %v2088_v14, %v5321_v57  ;;  %v2397_v61 = vpop.f32.mrb[19].mxu0  ;;  %v6534_v62 = vpop.f32.mrb[19].mxu1 }
 0x199   : > { %v2829_v63 = vmax.f32 %v6526_v56, %v6524_v55  ;;  %v6538_v3 = vmax.f32 %v2086_v17, %v2397_v61 }
 0x19a   : > { %v2832_v4 = vmax.f32 %v6532_v60, %v6528_v58 }
 0x19b   : > { %v2830_v5 = vmax.f32 %v6538_v3, %v6534_v62 }
 0x19d   : > { %v5324_v6 = vpop.f32.mrb[20].mxu0  ;;  %v6544_v7 = vpop.f32.mrb[20].mxu1 }
 0x19e   : > { %v6546_v8 = vmax.f32 %v2091_v20, %v5324_v6  ;;  %v2410_v9 = vpop.f32.mrb[21].mxu0  ;;  %v6548_v10 = vpop.f32.mrb[21].mxu1 }
 0x19f   : > { %v6550_v11 = vmax.f32 %v2089_v23, %v2410_v9  ;;  %v5325_v12 = vpop.f32.mrb[22].mxu0  ;;  %v6552_v13 = vpop.f32.mrb[22].mxu1 }
 0x1a0   : > { %v2835_v14 = vmax.f32 %v6546_v8, %v6544_v7  ;;  %v6556_v15 = vmax.f32 %v2092_v26, %v5325_v12  ;;  %v2413_v16 = vpop.f32.mrb[23].mxu0  ;;  %v6558_v17 = vpop.f32.mrb[23].mxu1 }
 0x1a1   : > { %v2833_v18 = vmax.f32 %v6550_v11, %v6548_v10  ;;  %v6562_v19 = vmax.f32 %v2090_v29, %v2413_v16 }
 0x1a2   : > { %v2836_v20 = vmax.f32 %v6556_v15, %v6552_v13 }
 0x1a3   : > { %v2834_v21 = vmax.f32 %v6562_v19, %v6558_v17 }
 0x1a5   : > { %v5328_v22 = vpop.f32.mrb[24].mxu0  ;;  %v6568_v23 = vpop.f32.mrb[24].mxu1 }
 0x1a6   : > { %v6570_v24 = vmax.f32 %v2095_v0, %v5328_v22  ;;  %v2426_v25 = vpop.f32.mrb[25].mxu0  ;;  %v6572_v26 = vpop.f32.mrb[25].mxu1 }
 0x1a7   : > { %v6574_v27 = vmax.f32 %v2093_v33, %v2426_v25  ;;  %v5329_v28 = vpop.f32.mrb[26].mxu0  ;;  %v6576_v30 = vpop.f32.mrb[26].mxu1 }
 0x1a8   : > { %v2839_v29 = vmax.f32 %v6570_v24, %v6568_v23  ;;  %v6580_v31 = vmax.f32 %v2096_v36, %v5329_v28  ;;  %v2429_v32 = vpop.f32.mrb[27].mxu0  ;;  %v6582_v1 = vpop.f32.mrb[27].mxu1 }
 0x1a9   : > { %v2837_v0 = vmax.f32 %v6574_v27, %v6572_v26  ;;  %v6586_v34 = vmax.f32 %v2094_v39, %v2429_v32 }
 0x1aa   : > { %v2840_v33 = vmax.f32 %v6580_v31, %v6576_v30 }
 0x1ab   : > { %v2838_v35 = vmax.f32 %v6586_v34, %v6582_v1 }
 0x1ad   : > { %v5332_v37 = vpop.f32.mrb[28].mxu0  ;;  %v6592_v38 = vpop.f32.mrb[28].mxu1 }
 0x1ae   : > { %v6594_v40 = vmax.f32 %v2099_v42, %v5332_v37  ;;  %v2442_v36 = vpop.f32.mrb[29].mxu0  ;;  %v6596_v41 = vpop.f32.mrb[29].mxu1 }
 0x1af   : > { %v6598_v43 = vmax.f32 %v2097_v45, %v2442_v36  ;;  %v5333_v44 = vpop.f32.mrb[30].mxu0  ;;  %v6600_v2 = vpop.f32.mrb[30].mxu1 }
 0x1b0   : > { %v2843_v39 = vmax.f32 %v6594_v40, %v6592_v38  ;;  %v6604_v46 = vmax.f32 %v2100_v47, %v5333_v44  ;;  %v2445_v48 = vpop.f32.mrb[31].mxu0  ;;  %v6606_v49 = vpop.f32.mrb[31].mxu1 }
 0x1b1   : > { %v2841_v42 = vmax.f32 %v6598_v43, %v6596_v41  ;;  %v6610_v51 = vmax.f32 %v2098_v50, %v2445_v48 }
 0x1b2   : > { %v2844_v45 = vmax.f32 %v6604_v46, %v6600_v2 }
 0x1b3   : > { %v2842_v52 = vmax.f32 %v6610_v51, %v6606_v49 }
 0x1d5   : > { %v5396_v53 = vpop.f32.mrb[32].mxu0  ;;  %v6616_v54 = vpop.f32.mrb[32].mxu1 }
 0x1d6   : > { %v6618_v55 = vmax.f32 %v2831_v59, %v5396_v53  ;;  %v3138_v47 = vpop.f32.mrb[33].mxu0  ;;  %v6620_v56 = vpop.f32.mrb[33].mxu1 }
 0x1d7   : > { %v6622_v57 = vmax.f32 %v2829_v63, %v3138_v47  ;;  %v5397_v58 = vpop.f32.mrb[34].mxu0  ;;  %v6624_v60 = vpop.f32.mrb[34].mxu1 }
 0x1d8   : > { %v3575_v50 = vmax.f32 %v6618_v55, %v6616_v54  ;;  %v6628_v61 = vmax.f32 %v2832_v4, %v5397_v58  ;;  %v3141_v62 = vpop.f32.mrb[35].mxu0  ;;  %v6630_v3 = vpop.f32.mrb[35].mxu1 }
 0x1d9   : > { %v3573_v59 = vmax.f32 %v6622_v57, %v6620_v56  ;;  %v6634_v6 = vmax.f32 %v2830_v5, %v3141_v62 }
 0x1da   : > { %v3576_v63 = vmax.f32 %v6628_v61, %v6624_v60 }
 0x1db   : > { %v3574_v7 = vmax.f32 %v6634_v6, %v6630_v3 }
 0x1dd   : > { %v5400_v8 = vpop.f32.mrb[36].mxu0  ;;  %v6640_v9 = vpop.f32.mrb[36].mxu1 }
 0x1de   : > { %v6642_v10 = vmax.f32 %v2835_v14, %v5400_v8  ;;  %v3154_v4 = vpop.f32.mrb[37].mxu0  ;;  %v6644_v11 = vpop.f32.mrb[37].mxu1 }
 0x1df   : > { %v6646_v12 = vmax.f32 %v2833_v18, %v3154_v4  ;;  %v5401_v13 = vpop.f32.mrb[38].mxu0  ;;  %v6648_v15 = vpop.f32.mrb[38].mxu1 }
 0x1e0   : > { %v3579_v5 = vmax.f32 %v6642_v10, %v6640_v9  ;;  %v6652_v16 = vmax.f32 %v2836_v20, %v5401_v13  ;;  %v3157_v17 = vpop.f32.mrb[39].mxu0  ;;  %v6654_v19 = vpop.f32.mrb[39].mxu1 }
 0x1e1   : > { %v3577_v14 = vmax.f32 %v6646_v12, %v6644_v11  ;;  %v6658_v22 = vmax.f32 %v2834_v21, %v3157_v17 }
 0x1e2   : > { %v3580_v18 = vmax.f32 %v6652_v16, %v6648_v15 }
 0x1e3   : > { %v3578_v23 = vmax.f32 %v6658_v22, %v6654_v19 }
 0x1e5   : > { %v5404_v24 = vpop.f32.mrb[40].mxu0  ;;  %v6664_v25 = vpop.f32.mrb[40].mxu1 }
 0x1e6   : > { %v6666_v26 = vmax.f32 %v2839_v29, %v5404_v24  ;;  %v3170_v20 = vpop.f32.mrb[41].mxu0  ;;  %v6668_v27 = vpop.f32.mrb[41].mxu1 }
 0x1e7   : > { %v6670_v28 = vmax.f32 %v2837_v0, %v3170_v20  ;;  %v5405_v30 = vpop.f32.mrb[42].mxu0  ;;  %v6672_v31 = vpop.f32.mrb[42].mxu1 }
 0x1e8   : > { %v3583_v21 = vmax.f32 %v6666_v26, %v6664_v25  ;;  %v6676_v32 = vmax.f32 %v2840_v33, %v5405_v30  ;;  %v3173_v1 = vpop.f32.mrb[43].mxu0  ;;  %v6678_v34 = vpop.f32.mrb[43].mxu1 }
 0x1e9   : > { %v3581_v29 = vmax.f32 %v6670_v28, %v6668_v27  ;;  %v6682_v37 = vmax.f32 %v2838_v35, %v3173_v1 }
 0x1ea   : > { %v3584_v0 = vmax.f32 %v6676_v32, %v6672_v31 }
 0x1eb   : > { %v3582_v38 = vmax.f32 %v6682_v37, %v6678_v34 }
 0x1ed   : > { %v5408_v40 = vpop.f32.mrb[44].mxu0  ;;  %v6688_v36 = vpop.f32.mrb[44].mxu1 }
 0x1ee   : > { %v6690_v33 = vmax.f32 %v2843_v39, %v5408_v40  ;;  %v3186_v41 = vpop.f32.mrb[45].mxu0  ;;  %v6692_v43 = vpop.f32.mrb[45].mxu1 }
 0x1ef   : > { %v6694_v44 = vmax.f32 %v2841_v42, %v3186_v41  ;;  %v5409_v2 = vpop.f32.mrb[46].mxu0  ;;  %v6696_v35 = vpop.f32.mrb[46].mxu1 }
 0x1f0   : > { %v3587_v46 = vmax.f32 %v6690_v33, %v6688_v36  ;;  %v6700_v48 = vmax.f32 %v2844_v45, %v5409_v2  ;;  %v3189_v49 = vpop.f32.mrb[47].mxu0  ;;  %v6702_v51 = vpop.f32.mrb[47].mxu1 }
 0x1f1   : > { %v3585_v39 = vmax.f32 %v6694_v44, %v6692_v43  ;;  %v6706_v53 = vmax.f32 %v2842_v52, %v3189_v49  ;;  %v6717_v52 = vld [vmem:[%s6828_s4] ss:$0 sm:$0xff] }
 0x1f2   : > { %v3588_v42 = vmax.f32 %v6700_v48, %v6696_v35 }
 0x1f3   : > { %v3586_v54 = vmax.f32 %v6706_v53, %v6702_v51 }
 0x215   : > { %v5472_v55 = vpop.f32.mrb[48].mxu0  ;;  %v5510_v45 = vpop.f32.mrb[48].mxu1 }
 0x216   : > { %v3947_v47 = vmax.f32 %v3575_v50, %v5472_v55  ;;  %v3882_v56 = vpop.f32.mrb[49].mxu0  ;;  %v4254_v57 = vpop.f32.mrb[49].mxu1 }
 0x217   : > { %v3945_v58 = vmax.f32 %v3573_v59, %v3882_v56  ;;  %v5473_v62 = vpop.f32.mrb[50].mxu0  ;;  %v5511_v8 = vpop.f32.mrb[50].mxu1 }
 0x218   : > { %v4319_v4 = vmax.f32 %v3947_v47, %v5510_v45  ;;  %v3948_v13 = vmax.f32 %v3576_v63, %v5473_v62  ;;  %v3885_v17 = vpop.f32.mrb[51].mxu0  ;;  %v4257_v24 = vpop.f32.mrb[51].mxu1 }
 0x219   : > { %v4317_v20 = vmax.f32 %v3945_v58, %v4254_v57  ;;  %v3946_v50 = vmax.f32 %v3574_v7, %v3885_v17 }
 0x21a   : > { %v4342_v30 = vadd.f32 %v6717_v52, %v4319_v4  ;;  %v4320_v1 = vmax.f32 %v3948_v13, %v5511_v8 }
 0x21b   : > { %v4340_v59 = vadd.f32 %v6717_v52, %v4317_v20  ;;  %v4318_v40 = vmax.f32 %v3946_v50, %v4257_v24 }
 0x21c   : > { %v4358_v41 = vmax.f32 %v4342_v30, 0.0  ;;  %v4343_v2 = vadd.f32 %v6717_v52, %v4320_v1 }
 0x21d   : > { %v4356_v60 = vmax.f32 %v4340_v59, 0.0  ;;  %v4341_v61 = vadd.f32 %v6717_v52, %v4318_v40  ;;  %v5476_v3 = vpop.f32.mrb[52].mxu0  ;;  %v5514_v6 = vpop.f32.mrb[52].mxu1 }
 0x21e   : > { %v5054_v63 = vpack.c.bf16 %v4358_v41, %v4358_v41  ;;  %v4359_v7 = vmax.f32 %v4343_v2, 0.0  ;;  %v3951_v49 = vmax.f32 %v3579_v5, %v5476_v3  ;;  %v3898_v55 = vpop.f32.mrb[53].mxu0  ;;  %v4270_v45 = vpop.f32.mrb[53].mxu1 }
 0x21f   : > { %v5052_v47 = vpack.c.bf16 %v4356_v60, %v4356_v60  ;;  %v4357_v56 = vmax.f32 %v4341_v61, 0.0  ;;  %v3949_v57 = vmax.f32 %v3577_v14, %v3898_v55  ;;  %v5477_v58 = vpop.f32.mrb[54].mxu0  ;;  %v5515_v62 = vpop.f32.mrb[54].mxu1 }
 0x220   : > { %4439 = vst.msk [vmem:[%s6731_s10 + $0x8] sm:$0xf] %vm4436_vm2, %v5054_v63  ;;  %v5055_v8 = vpack.c.bf16 %v4359_v7, %v4359_v7  ;;  %v4323_v4 = vmax.f32 %v3951_v49, %v5514_v6  ;;  %v3952_v9 = vmax.f32 %v3580_v18, %v5477_v58  ;;  %v3901_v10 = vpop.f32.mrb[55].mxu0  ;;  %v4273_v5 = vpop.f32.mrb[55].mxu1 }
 0x221   : > { %4437 = vst.msk [vmem:[%s6731_s10] sm:$0xf] %vm4436_vm2, %v5052_v47  ;;  %v5053_v13 = vpack.c.bf16 %v4357_v56, %v4357_v56  ;;  %v4321_v17 = vmax.f32 %v3949_v57, %v4270_v45  ;;  %v3950_v11 = vmax.f32 %v3578_v23, %v3901_v10 }
 0x222   : > { %4440 = vst.msk [vmem:[%s6731_s10 + $0xc] sm:$0xf] %vm4436_vm2, %v5055_v8  ;;  %v4346_v12 = vadd.f32 %v6717_v52, %v4323_v4  ;;  %v4324_v14 = vmax.f32 %v3952_v9, %v5515_v62 }
 0x223   : > { %4438 = vst.msk [vmem:[%s6731_s10 + $0x4] sm:$0xf] %vm4436_vm2, %v5053_v13  ;;  %v4344_v15 = vadd.f32 %v6717_v52, %v4321_v17  ;;  %v4322_v16 = vmax.f32 %v3950_v11, %v4273_v5 }
 0x224   : > { %v4362_v18 = vmax.f32 %v4346_v12, 0.0  ;;  %v4347_v24 = vadd.f32 %v6717_v52, %v4324_v14 }
 0x225   : > { %v4360_v20 = vmax.f32 %v4344_v15, 0.0  ;;  %v4345_v50 = vadd.f32 %v6717_v52, %v4322_v16  ;;  %v5480_v30 = vpop.f32.mrb[56].mxu0  ;;  %v5518_v19 = vpop.f32.mrb[56].mxu1 }
 0x226   : > { %v5058_v22 = vpack.c.bf16 %v4362_v18, %v4362_v18  ;;  %v4363_v23 = vmax.f32 %v4347_v24, 0.0  ;;  %v3955_v1 = vmax.f32 %v3583_v21, %v5480_v30  ;;  %v3914_v59 = vpop.f32.mrb[57].mxu0  ;;  %v4286_v40 = vpop.f32.mrb[57].mxu1 }
 0x227   : > { %v5056_v41 = vpack.c.bf16 %v4360_v20, %v4360_v20  ;;  %v4361_v2 = vmax.f32 %v4345_v50, 0.0  ;;  %v3953_v60 = vmax.f32 %v3581_v29, %v3914_v59  ;;  %v5481_v61 = vpop.f32.mrb[58].mxu0  ;;  %v5519_v3 = vpop.f32.mrb[58].mxu1 }
 0x228   : > { %4443 = vst.msk [vmem:[%s6731_s10 + $0x18] sm:$0xf] %vm4436_vm2, %v5058_v22  ;;  %v5059_v6 = vpack.c.bf16 %v4363_v23, %v4363_v23  ;;  %v4327_v63 = vmax.f32 %v3955_v1, %v5518_v19  ;;  %v3956_v25 = vmax.f32 %v3584_v0, %v5481_v61  ;;  %v3917_v26 = vpop.f32.mrb[59].mxu0  ;;  %v4289_v21 = vpop.f32.mrb[59].mxu1 }
 0x229   : > { %4441 = vst.msk [vmem:[%s6731_s10 + $0x10] sm:$0xf] %vm4436_vm2, %v5056_v41  ;;  %v5057_v7 = vpack.c.bf16 %v4361_v2, %v4361_v2  ;;  %v4325_v49 = vmax.f32 %v3953_v60, %v4286_v40  ;;  %v3954_v27 = vmax.f32 %v3582_v38, %v3917_v26 }
 0x22a   : > { %4444 = vst.msk [vmem:[%s6731_s10 + $0x1c] sm:$0xf] %vm4436_vm2, %v5059_v6  ;;  %v4350_v28 = vadd.f32 %v6717_v52, %v4327_v63  ;;  %v4328_v29 = vmax.f32 %v3956_v25, %v5519_v3 }
 0x22b   : > { %4442 = vst.msk [vmem:[%s6731_s10 + $0x14] sm:$0xf] %vm4436_vm2, %v5057_v7  ;;  %v4348_v31 = vadd.f32 %v6717_v52, %v4325_v49  ;;  %v4326_v32 = vmax.f32 %v3954_v27, %v4289_v21 }
 0x22c   : > { %v4366_v0 = vmax.f32 %v4350_v28, 0.0  ;;  %v4351_v55 = vadd.f32 %v6717_v52, %v4328_v29 }
 0x22d   : > { %v4364_v45 = vmax.f32 %v4348_v31, 0.0  ;;  %v4349_v47 = vadd.f32 %v6717_v52, %v4326_v32  ;;  %v5484_v56 = vpop.f32.mrb[60].mxu0  ;;  %v5522_v34 = vpop.f32.mrb[60].mxu1 }
 0x22e   : > { %v5062_v37 = vpack.c.bf16 %v4366_v0, %v4366_v0  ;;  %v4367_v38 = vmax.f32 %v4351_v55, 0.0  ;;  %v3959_v57 = vmax.f32 %v3587_v46, %v5484_v56  ;;  %v3930_v58 = vpop.f32.mrb[61].mxu0  ;;  %v4302_v62 = vpop.f32.mrb[61].mxu1 }
 0x22f   : > { %v5060_v8 = vpack.c.bf16 %v4364_v45, %v4364_v45  ;;  %v4365_v4 = vmax.f32 %v4349_v47, 0.0  ;;  %v3957_v9 = vmax.f32 %v3585_v39, %v3930_v58  ;;  %v5485_v10 = vpop.f32.mrb[62].mxu0  ;;  %v5523_v5 = vpop.f32.mrb[62].mxu1 }
 0x230   : > { %4447 = vst.msk [vmem:[%s6731_s10 + $0x28] sm:$0xf] %vm4436_vm2, %v5062_v37  ;;  %v5063_v13 = vpack.c.bf16 %v4367_v38, %v4367_v38  ;;  %v4331_v17 = vmax.f32 %v3959_v57, %v5522_v34  ;;  %v3960_v36 = vmax.f32 %v3588_v42, %v5485_v10  ;;  %v3933_v33 = vpop.f32.mrb[63].mxu0  ;;  %v4305_v46 = vpop.f32.mrb[63].mxu1 }
 0x231   : > { %4445 = vst.msk [vmem:[%s6731_s10 + $0x20] sm:$0xf] %vm4436_vm2, %v5060_v8  ;;  %v5061_v11 = vpack.c.bf16 %v4365_v4, %v4365_v4  ;;  %v4329_v12 = vmax.f32 %v3957_v9, %v4302_v62  ;;  %v3958_v43 = vmax.f32 %v3586_v54, %v3933_v33 }
 0x232   : > { %4448 = vst.msk [vmem:[%s6731_s10 + $0x2c] sm:$0xf] %vm4436_vm2, %v5063_v13  ;;  %v4354_v44 = vadd.f32 %v6717_v52, %v4331_v17  ;;  %v4332_v39 = vmax.f32 %v3960_v36, %v5523_v5 }
 0x233   : > { %4446 = vst.msk [vmem:[%s6731_s10 + $0x24] sm:$0xf] %vm4436_vm2, %v5061_v11  ;;  %v4352_v35 = vadd.f32 %v6717_v52, %v4329_v12  ;;  %v4330_v48 = vmax.f32 %v3958_v43, %v4305_v46 }
 0x234   : > { %v4370_v42 = vmax.f32 %v4354_v44, 0.0  ;;  %v4355_v14 = vadd.f32 %v6717_v52, %v4332_v39 }
 0x235   : > { %v4368_v15 = vmax.f32 %v4352_v35, 0.0  ;;  %v4353_v51 = vadd.f32 %v6717_v52, %v4330_v48 }
 0x236   : > { %v5066_v53 = vpack.c.bf16 %v4370_v42, %v4370_v42  ;;  %v4371_v54 = vmax.f32 %v4355_v14, 0.0 }
 0x237   : > { %v5064_v16 = vpack.c.bf16 %v4368_v15, %v4368_v15  ;;  %v4369_v18 = vmax.f32 %v4353_v51, 0.0 }
 0x238   : > { %4451 = vst.msk [vmem:[%s6731_s10 + $0x38] sm:$0xf] %vm4436_vm2, %v5066_v53  ;;  %v5067_v24 = vpack.c.bf16 %v4371_v54, %v4371_v54 }
 0x239   : > { %4449 = vst.msk [vmem:[%s6731_s10 + $0x30] sm:$0xf] %vm4436_vm2, %v5064_v16  ;;  %v5065_v20 = vpack.c.bf16 %v4369_v18, %v4369_v18 }
 0x23a   : > { %4452 = vst.msk [vmem:[%s6731_s10 + $0x3c] sm:$0xf] %vm4436_vm2, %v5067_v24 }
 0x23b   : > { %4450 = vst.msk [vmem:[%s6731_s10 + $0x34] sm:$0xf] %vm4436_vm2, %v5065_v20 }
 0x23c PF: > { %p12_p9 = scmp.ge.s32.totalorder %s5878_s22, 4   ;;  %s6831_s18 = smov %s5825_s19 }
 0x23d   : > { %s6832_s19 = smov %s5887_s25  ;;  %s6833_s20 = smov %s5878_s22 }
 0x23e   :  { %14 = sbr.rel (!%p12_p9) target bundleno = 2 (0x2), region = 179 }

// kernel: surfacenet_forward.7
= control target key start
LH: loop header
LB: loop body
LE: loop exit
PB: predicated region body
PF: predicated region fallthrough
CT: control target
= control target key end

     0   :  { %vm111_vm0 = vcmask 261120   ;;  %vm279_vm1 = vcmask 130048   ;;  %s5305_s3 = inlined_call_operand.vmem [shape: bf16[32,128], index: 3, kind: input, shape index: {}]   ;;  %s5306_s1 = inlined_call_operand.vmem [shape: bf16[8,128,32], index: 1, kind: input, shape index: {}]   ;;  %s5307_s2 = inlined_call_operand.vmem [shape: bf16[16,128], index: 2, kind: input, shape index: {}]   ;;  %s5308_s0 = inlined_call_operand.vmem [shape: bf16[8,128,16], index: 0, kind: input, shape index: {}]   ;;  %s5309_s4 = inlined_call_operand.vmem [shape: f32[1,128], index: 4, kind: input, shape index: {}]   ;;  %s5310_s5 = inlined_call_operand.vmem [shape: bf16[128,128], index: 5, kind: output, shape index: {}]  }
   0x1   :  { %v4439_v0 = vld [vmem:[%s5305_s3] sm:$0xff]   ;;  %v4444_v1 = vld [vmem:[%s5305_s3 + $0x8] sm:$0xff]   ;;  %v4282_v7 = vld [vmem:[%s5306_s1 + $0x10] sm:$0xff]  }
   0x2   :  { %3843 = vmatprep.subr.bf16.mxu0 %v4439_v0  ;;  %3881 = vmatprep.subr.bf16.mxu1 %v4439_v0  ;;  %v4277_v2 = vld [vmem:[%s5306_s1] sm:$0xff]   ;;  %v4279_v4 = vld [vmem:[%s5306_s1 + $0x8] sm:$0xff]   ;;  %v4283_v8 = vld [vmem:[%s5306_s1 + $0x50] sm:$0xff]  }
   0x3   :  { %3844 = vmatpush3.bf16.msra.mxu0 %v4439_v0  ;;  %3882 = vmatpush3.bf16.msra.mxu1 %v4439_v0  ;;  %v4278_v3 = vld [vmem:[%s5306_s1 + $0x40] sm:$0xff]   ;;  %v4281_v6 = vld [vmem:[%s5306_s1 + $0x48] sm:$0xff]   ;;  %v4284_v9 = vld [vmem:[%s5306_s1 + $0x18] sm:$0xff]  }
   0x4   :  { %3845 = vmatprep.subr.bf16.mxu0 %v4444_v1  ;;  %3883 = vmatprep.subr.bf16.mxu1 %v4444_v1  ;;  %v4466_v5 = vld [vmem:[%s5307_s2] sm:$0xff]   ;;  %v4285_v10 = vld [vmem:[%s5306_s1 + $0x58] sm:$0xff]   ;;  %v4288_v13 = vld [vmem:[%s5306_s1 + $0x28] sm:$0xff]  }
   0x5   :  { %3847 = vmatprep.mubr.msk.bf16.mxu0 %vm111_vm0, %v4277_v2  ;;  %3885 = vmatprep.mubr.msk.bf16.mxu1 %vm111_vm0, %v4278_v3  ;;  %v4286_v11 = vld [vmem:[%s5306_s1 + $0x20] sm:$0xff]   ;;  %v4289_v14 = vld [vmem:[%s5306_s1 + $0x68] sm:$0xff]   ;;  %v4290_v15 = vld [vmem:[%s5306_s1 + $0x30] sm:$0xff]  }
   0x6   :  { %v4287_v12 = vld [vmem:[%s5306_s1 + $0x60] sm:$0xff]   ;;  %v4291_v16 = vld [vmem:[%s5306_s1 + $0x70] sm:$0xff]   ;;  %v4292_v17 = vld [vmem:[%s5306_s1 + $0x38] sm:$0xff]  }
   0x7   :  { %3846 = vmatpush3.bf16.msra.mxu0 %v4444_v1  ;;  %3884 = vmatpush3.bf16.msra.mxu1 %v4444_v1  ;;  %v4293_v18 = vld [vmem:[%s5306_s1 + $0x78] sm:$0xff]   ;;  %v4294_v19 = vld [vmem:[%s5308_s0] sm:$0xff]   ;;  %v4296_v21 = vld [vmem:[%s5308_s0 + $0x8] sm:$0xff]  }
   0x8   :  { %3863 = vmatprep.subr.bf16.mxu0 %v4466_v5  ;;  %3901 = vmatprep.subr.bf16.mxu1 %v4466_v5  ;;  %v4295_v20 = vld [vmem:[%s5308_s0 + $0x40] sm:$0xff]   ;;  %v4297_v22 = vld [vmem:[%s5308_s0 + $0x48] sm:$0xff]   ;;  %v4298_v23 = vld [vmem:[%s5308_s0 + $0x10] sm:$0xff]  }
   0x9   :  { %v4299_v24 = vld [vmem:[%s5308_s0 + $0x50] sm:$0xff]   ;;  %v4300_v25 = vld [vmem:[%s5308_s0 + $0x18] sm:$0xff]   ;;  %v4302_v27 = vld [vmem:[%s5308_s0 + $0x20] sm:$0xff]  }
   0xa   :  { %3848 = vmatmul.mubr.msk.bf16.vlgmr.msra.gmra.mrb[0].mxu0 %vm111_vm0, %v4279_v4  ;;  %3886 = vmatmul.mubr.msk.bf16.vlgmr.msra.gmra.mrb[0].mxu1 %vm111_vm0, %v4281_v6  ;;  %v4301_v26 = vld [vmem:[%s5308_s0 + $0x58] sm:$0xff]   ;;  %v4303_v28 = vld [vmem:[%s5308_s0 + $0x60] sm:$0xff]   ;;  %v4304_v29 = vld [vmem:[%s5308_s0 + $0x28] sm:$0xff]  }
   0xb   :  { %3864 = vmatpush3.bf16.msra.mxu0 %v4466_v5  ;;  %3902 = vmatpush3.bf16.msra.mxu1 %v4466_v5  ;;  %v4305_v30 = vld [vmem:[%s5308_s0 + $0x68] sm:$0xff]   ;;  %v4306_v31 = vld [vmem:[%s5308_s0 + $0x30] sm:$0xff]   ;;  %v4308_v33 = vld [vmem:[%s5308_s0 + $0x38] sm:$0xff]  }
   0xc   :  { %3851 = vmatprep.mubr.msk.bf16.mxu0 %vm111_vm0, %v4282_v7  ;;  %3889 = vmatprep.mubr.msk.bf16.mxu1 %vm111_vm0, %v4283_v8  ;;  %v4307_v32 = vld [vmem:[%s5308_s0 + $0x70] sm:$0xff]   ;;  %v4309_v34 = vld [vmem:[%s5308_s0 + $0x78] sm:$0xff]   ;;  %v4310_v35 = vld [vmem:[%s5306_s1 + $0x80] sm:$0xff]  }
   0xd   :  { %3919 = vmatprep.subr.bf16.mxu0 %v4439_v0  ;;  %3957 = vmatprep.subr.bf16.mxu1 %v4439_v0  ;;  %v4311_v36 = vld [vmem:[%s5306_s1 + $0xc0] sm:$0xff]   ;;  %v4312_v37 = vld [vmem:[%s5306_s1 + $0x88] sm:$0xff]   ;;  %v4314_v39 = vld [vmem:[%s5306_s1 + $0x90] sm:$0xff]  }
   0xe   :  { %v4313_v38 = vld [vmem:[%s5306_s1 + $0xc8] sm:$0xff]   ;;  %v4315_v40 = vld [vmem:[%s5306_s1 + $0xd0] sm:$0xff]   ;;  %v4316_v41 = vld [vmem:[%s5306_s1 + $0x98] sm:$0xff]  }
   0xf   :  { %v4317_v42 = vld [vmem:[%s5306_s1 + $0xd8] sm:$0xff]   ;;  %v4318_v43 = vld [vmem:[%s5306_s1 + $0xa0] sm:$0xff]   ;;  %v4320_v45 = vld [vmem:[%s5306_s1 + $0xa8] sm:$0xff]  }
  0x10   :  { %v4319_v44 = vld [vmem:[%s5306_s1 + $0xe0] sm:$0xff]   ;;  %v4321_v46 = vld [vmem:[%s5306_s1 + $0xe8] sm:$0xff]   ;;  %v4322_v47 = vld [vmem:[%s5306_s1 + $0xb0] sm:$0xff]  }
  0x11   :  { %v4323_v48 = vld [vmem:[%s5306_s1 + $0xf0] sm:$0xff]   ;;  %v4324_v49 = vld [vmem:[%s5306_s1 + $0xb8] sm:$0xff]   ;;  %v4326_v51 = vld [vmem:[%s5308_s0 + $0x80] sm:$0xff]  }
  0x12   :  { %3852 = vmatmul.mubr.msk.bf16.gmra.mrb[4].mxu0 %vm111_vm0, %v4284_v9  ;;  %3890 = vmatmul.mubr.msk.bf16.gmra.mrb[4].mxu1 %vm111_vm0, %v4285_v10  ;;  %v4325_v50 = vld [vmem:[%s5306_s1 + $0xf8] sm:$0xff]   ;;  %v4327_v52 = vld [vmem:[%s5308_s0 + $0xc0] sm:$0xff]   ;;  %v4328_v53 = vld [vmem:[%s5308_s0 + $0x88] sm:$0xff]  }
  0x13   :  { %3855 = vmatprep.mubr.msk.bf16.mxu0 %vm111_vm0, %v4286_v11  ;;  %3893 = vmatprep.mubr.msk.bf16.mxu1 %vm111_vm0, %v4287_v12  ;;  %v4329_v54 = vld [vmem:[%s5308_s0 + $0xc8] sm:$0xff]   ;;  %v4330_v55 = vld [vmem:[%s5308_s0 + $0x90] sm:$0xff]   ;;  %v4332_v57 = vld [vmem:[%s5308_s0 + $0x98] sm:$0xff]  }
  0x14   :  { %v4331_v56 = vld [vmem:[%s5308_s0 + $0xd0] sm:$0xff]   ;;  %v4333_v58 = vld [vmem:[%s5308_s0 + $0xd8] sm:$0xff]   ;;  %v4334_v59 = vld [vmem:[%s5308_s0 + $0xa0] sm:$0xff]  }
  0x15   :  { %v4335_v60 = vld [vmem:[%s5308_s0 + $0xe0] sm:$0xff]   ;;  %v4336_v61 = vld [vmem:[%s5308_s0 + $0xa8] sm:$0xff]   ;;  %v4338_v63 = vld [vmem:[%s5308_s0 + $0xb0] sm:$0xff]  }
  0x16   :  { %v4337_v62 = vld [vmem:[%s5308_s0 + $0xe8] sm:$0xff]   ;;  %v4339_v2 = vld [vmem:[%s5308_s0 + $0xf0] sm:$0xff]   ;;  %v4340_v3 = vld [vmem:[%s5308_s0 + $0xb8] sm:$0xff]  }
  0x17   :  { %v4341_v4 = vld [vmem:[%s5308_s0 + $0xf8] sm:$0xff]   ;;  %v4342_v6 = vld [vmem:[%s5306_s1 + $0x100] sm:$0xff]   ;;  %v4344_v8 = vld [vmem:[%s5306_s1 + $0x108] sm:$0xff]  }
  0x18   :  { %v4343_v7 = vld [vmem:[%s5306_s1 + $0x140] sm:$0xff]   ;;  %v4345_v9 = vld [vmem:[%s5306_s1 + $0x148] sm:$0xff]   ;;  %v4346_v10 = vld [vmem:[%s5306_s1 + $0x110] sm:$0xff]  }
  0x19   :  { %v4347_v11 = vld [vmem:[%s5306_s1 + $0x150] sm:$0xff]   ;;  %v4348_v12 = vld [vmem:[%s5306_s1 + $0x118] sm:$0xff]  }
  0x1a   :  { %3856 = vmatmul.mubr.msk.bf16.gmra.mrb[8].mxu0 %vm111_vm0, %v4288_v13  ;;  %3894 = vmatmul.mubr.msk.bf16.gmra.mrb[8].mxu1 %vm111_vm0, %v4289_v14  ;;  %v4349_v13 = vld [vmem:[%s5306_s1 + $0x158] sm:$0xff]   ;;  %v4350_v14 = vld [vmem:[%s5306_s1 + $0x120] sm:$0xff]  }
  0x1b   :  { %3859 = vmatprep.mubr.msk.bf16.mxu0 %vm111_vm0, %v4290_v15  ;;  %3897 = vmatprep.mubr.msk.bf16.mxu1 %vm111_vm0, %v4291_v16  ;;  %v4351_v15 = vld [vmem:[%s5306_s1 + $0x160] sm:$0xff]   ;;  %v4352_v16 = vld [vmem:[%s5306_s1 + $0x128] sm:$0xff]  }
  0x22   :  { %3860 = vmatmul.mubr.msk.bf16.gmra.mrb[12].mxu0 %vm111_vm0, %v4292_v17  ;;  %3898 = vmatmul.mubr.msk.bf16.gmra.mrb[12].mxu1 %vm111_vm0, %v4293_v18  ;;  %v4353_v17 = vld [vmem:[%s5306_s1 + $0x168] sm:$0xff]   ;;  %v4354_v18 = vld [vmem:[%s5306_s1 + $0x130] sm:$0xff]  }
  0x23   :  { %3865 = vmatprep.mubr.msk.bf16.mxu0 %vm279_vm1, %v4294_v19  ;;  %3903 = vmatprep.mubr.msk.bf16.mxu1 %vm279_vm1, %v4295_v20  ;;  %v4355_v19 = vld [vmem:[%s5306_s1 + $0x170] sm:$0xff]   ;;  %v4356_v20 = vld [vmem:[%s5306_s1 + $0x138] sm:$0xff]  }
  0x2a   :  { %3866 = vmatmul.mubr.msk.bf16.vlgmr.msra.gmra.mrb[0].mxu0 %vm279_vm1, %v4296_v21  ;;  %3904 = vmatmul.mubr.msk.bf16.vlgmr.msra.gmra.mrb[0].mxu1 %vm279_vm1, %v4297_v22  ;;  %v4357_v21 = vld [vmem:[%s5306_s1 + $0x178] sm:$0xff]   ;;  %v4358_v22 = vld [vmem:[%s5308_s0 + $0x100] sm:$0xff]  }
  0x2b   :  { %3920 = vmatpush3.bf16.msra.mxu0 %v4439_v0  ;;  %3958 = vmatpush3.bf16.msra.mxu1 %v4439_v0 }
  0x2c   :  { %3869 = vmatprep.mubr.msk.bf16.mxu0 %vm279_vm1, %v4298_v23  ;;  %3907 = vmatprep.mubr.msk.bf16.mxu1 %vm279_vm1, %v4299_v24  ;;  %v4359_v23 = vld [vmem:[%s5308_s0 + $0x140] sm:$0xff]   ;;  %v4360_v24 = vld [vmem:[%s5308_s0 + $0x108] sm:$0xff]  }
  0x2d   :  { %3921 = vmatprep.subr.bf16.mxu0 %v4444_v1  ;;  %3959 = vmatprep.subr.bf16.mxu1 %v4444_v1 }
  0x2f   :  { %3922 = vmatpush3.bf16.msra.mxu0 %v4444_v1  ;;  %3960 = vmatpush3.bf16.msra.mxu1 %v4444_v1 }
  0x30   :  { %3939 = vmatprep.subr.bf16.mxu0 %v4466_v5  ;;  %3977 = vmatprep.subr.bf16.mxu1 %v4466_v5 }
  0x32   :  { %3870 = vmatmul.mubr.msk.bf16.gmra.mrb[4].mxu0 %vm279_vm1, %v4300_v25  ;;  %3908 = vmatmul.mubr.msk.bf16.gmra.mrb[4].mxu1 %vm279_vm1, %v4301_v26  ;;  %v4361_v25 = vld [vmem:[%s5308_s0 + $0x148] sm:$0xff]   ;;  %v4362_v26 = vld [vmem:[%s5308_s0 + $0x110] sm:$0xff]  }
  0x33   :  { %3873 = vmatprep.mubr.msk.bf16.mxu0 %vm279_vm1, %v4302_v27  ;;  %3911 = vmatprep.mubr.msk.bf16.mxu1 %vm279_vm1, %v4303_v28  ;;  %v4363_v27 = vld [vmem:[%s5308_s0 + $0x150] sm:$0xff]   ;;  %v4364_v28 = vld [vmem:[%s5308_s0 + $0x118] sm:$0xff]  }
  0x3a   :  { %3874 = vmatmul.mubr.msk.bf16.gmra.mrb[8].mxu0 %vm279_vm1, %v4304_v29  ;;  %3912 = vmatmul.mubr.msk.bf16.gmra.mrb[8].mxu1 %vm279_vm1, %v4305_v30  ;;  %v4365_v29 = vld [vmem:[%s5308_s0 + $0x158] sm:$0xff]   ;;  %v4367_v30 = vld [vmem:[%s5308_s0 + $0x160] sm:$0xff]  }
  0x3b   :  { %3877 = vmatprep.mubr.msk.bf16.mxu0 %vm279_vm1, %v4306_v31  ;;  %3915 = vmatprep.mubr.msk.bf16.mxu1 %vm279_vm1, %v4307_v32  ;;  %v4368_v31 = vld [vmem:[%s5308_s0 + $0x128] sm:$0xff]   ;;  %v4370_v32 = vld [vmem:[%s5308_s0 + $0x130] sm:$0xff]  }
  0x42   :  { %3878 = vmatmul.mubr.msk.bf16.gmra.mrb[12].mxu0 %vm279_vm1, %v4308_v33  ;;  %3916 = vmatmul.mubr.msk.bf16.gmra.mrb[12].mxu1 %vm279_vm1, %v4309_v34  ;;  %v4371_v33 = vld [vmem:[%s5308_s0 + $0x170] sm:$0xff]   ;;  %v4372_v34 = vld [vmem:[%s5308_s0 + $0x138] sm:$0xff]  }
  0x43   :  { %3923 = vmatprep.mubr.msk.bf16.mxu0 %vm111_vm0, %v4310_v35  ;;  %3961 = vmatprep.mubr.msk.bf16.mxu1 %vm111_vm0, %v4311_v36  ;;  %v4373_v35 = vld [vmem:[%s5308_s0 + $0x178] sm:$0xff]   ;;  %v4374_v36 = vld [vmem:[%s5306_s1 + $0x180] sm:$0xff]  }
  0x4a   :  { %3924 = vmatmul.mubr.msk.bf16.vlgmr.msra.gmra.mrb[16].mxu0 %vm111_vm0, %v4312_v37  ;;  %3962 = vmatmul.mubr.msk.bf16.vlgmr.msra.gmra.mrb[16].mxu1 %vm111_vm0, %v4313_v38  ;;  %v4375_v37 = vld [vmem:[%s5306_s1 + $0x1c0] sm:$0xff]   ;;  %v4376_v38 = vld [vmem:[%s5306_s1 + $0x188] sm:$0xff]  }
  0x4b   :  { %3940 = vmatpush3.bf16.msra.mxu0 %v4466_v5  ;;  %3978 = vmatpush3.bf16.msra.mxu1 %v4466_v5 }
  0x4c   :  { %3927 = vmatprep.mubr.msk.bf16.mxu0 %vm111_vm0, %v4314_v39  ;;  %3965 = vmatprep.mubr.msk.bf16.mxu1 %vm111_vm0, %v4315_v40  ;;  %v4377_v39 = vld [vmem:[%s5306_s1 + $0x1c8] sm:$0xff]   ;;  %v4378_v40 = vld [vmem:[%s5306_s1 + $0x190] sm:$0xff]  }
  0x4d   :  { %3995 = vmatprep.subr.bf16.mxu0 %v4439_v0  ;;  %4033 = vmatprep.subr.bf16.mxu1 %v4439_v0 }
  0x52   :  { %3928 = vmatmul.mubr.msk.bf16.gmra.mrb[20].mxu0 %vm111_vm0, %v4316_v41  ;;  %3966 = vmatmul.mubr.msk.bf16.gmra.mrb[20].mxu1 %vm111_vm0, %v4317_v42  ;;  %v4379_v41 = vld [vmem:[%s5306_s1 + $0x1d0] sm:$0xff]   ;;  %v4380_v42 = vld [vmem:[%s5306_s1 + $0x198] sm:$0xff]  }
  0x53   :  { %3931 = vmatprep.mubr.msk.bf16.mxu0 %vm111_vm0, %v4318_v43  ;;  %3969 = vmatprep.mubr.msk.bf16.mxu1 %vm111_vm0, %v4319_v44  ;;  %v4381_v43 = vld [vmem:[%s5306_s1 + $0x1d8] sm:$0xff]   ;;  %v4382_v44 = vld [vmem:[%s5306_s1 + $0x1a0] sm:$0xff]  }
  0x5a   :  { %3932 = vmatmul.mubr.msk.bf16.gmra.mrb[24].mxu0 %vm111_vm0, %v4320_v45  ;;  %3970 = vmatmul.mubr.msk.bf16.gmra.mrb[24].mxu1 %vm111_vm0, %v4321_v46  ;;  %v4384_v45 = vld [vmem:[%s5306_s1 + $0x1a8] sm:$0xff]  }
  0x5b   :  { %3935 = vmatprep.mubr.msk.bf16.mxu0 %vm111_vm0, %v4322_v47  ;;  %3973 = vmatprep.mubr.msk.bf16.mxu1 %vm111_vm0, %v4323_v48  ;;  %v4385_v46 = vld [vmem:[%s5306_s1 + $0x1e8] sm:$0xff]   ;;  %v4386_v47 = vld [vmem:[%s5306_s1 + $0x1b0] sm:$0xff]  }
  0x5c   :  { %v4387_v48 = vld [vmem:[%s5306_s1 + $0x1f0] sm:$0xff]  }
  0x62   :  { %3936 = vmatmul.mubr.msk.bf16.gmra.mrb[28].mxu0 %vm111_vm0, %v4324_v49  ;;  %3974 = vmatmul.mubr.msk.bf16.gmra.mrb[28].mxu1 %vm111_vm0, %v4325_v50  ;;  %v4388_v49 = vld [vmem:[%s5306_s1 + $0x1b8] sm:$0xff]  }
  0x63   :  { %3941 = vmatprep.mubr.msk.bf16.mxu0 %vm279_vm1, %v4326_v51  ;;  %3979 = vmatprep.mubr.msk.bf16.mxu1 %vm279_vm1, %v4327_v52  ;;  %v4389_v50 = vld [vmem:[%s5306_s1 + $0x1f8] sm:$0xff]   ;;  %v4390_v51 = vld [vmem:[%s5308_s0 + $0x180] sm:$0xff]  }
  0x64   :  { %v4391_v52 = vld [vmem:[%s5308_s0 + $0x1c0] sm:$0xff]  }
  0x6a   :  { %3942 = vmatmul.mubr.msk.bf16.vlgmr.msra.gmra.mrb[16].mxu0 %vm279_vm1, %v4328_v53  ;;  %3980 = vmatmul.mubr.msk.bf16.vlgmr.msra.gmra.mrb[16].mxu1 %vm279_vm1, %v4329_v54  ;;  %v4392_v53 = vld [vmem:[%s5308_s0 + $0x188] sm:$0xff]  }
  0x6b   :  { %3996 = vmatpush3.bf16.msra.mxu0 %v4439_v0  ;;  %4034 = vmatpush3.bf16.msra.mxu1 %v4439_v0  ;;  %v4393_v54 = vld [vmem:[%s5308_s0 + $0x1c8] sm:$0xff]  }
  0x6c   :  { %3945 = vmatprep.mubr.msk.bf16.mxu0 %vm279_vm1, %v4330_v55  ;;  %3983 = vmatprep.mubr.msk.bf16.mxu1 %vm279_vm1, %v4331_v56  ;;  %v4394_v55 = vld [vmem:[%s5308_s0 + $0x190] sm:$0xff]  }
  0x6d   :  { %3997 = vmatprep.subr.bf16.mxu0 %v4444_v1  ;;  %4035 = vmatprep.subr.bf16.mxu1 %v4444_v1  ;;  %v4395_v56 = vld [vmem:[%s5308_s0 + $0x1d0] sm:$0xff]  }
  0x6f   :  { %3998 = vmatpush3.bf16.msra.mxu0 %v4444_v1  ;;  %4036 = vmatpush3.bf16.msra.mxu1 %v4444_v1 }
  0x70   :  { %4015 = vmatprep.subr.bf16.mxu0 %v4466_v5  ;;  %4053 = vmatprep.subr.bf16.mxu1 %v4466_v5 }
  0x72   :  { %3946 = vmatmul.mubr.msk.bf16.gmra.mrb[20].mxu0 %vm279_vm1, %v4332_v57  ;;  %3984 = vmatmul.mubr.msk.bf16.gmra.mrb[20].mxu1 %vm279_vm1, %v4333_v58  ;;  %v4396_v57 = vld [vmem:[%s5308_s0 + $0x198] sm:$0xff]  }
  0x73   :  { %3949 = vmatprep.mubr.msk.bf16.mxu0 %vm279_vm1, %v4334_v59  ;;  %3987 = vmatprep.mubr.msk.bf16.mxu1 %vm279_vm1, %v4335_v60  ;;  %v4397_v58 = vld [vmem:[%s5308_s0 + $0x1d8] sm:$0xff]   ;;  %v4398_v59 = vld [vmem:[%s5308_s0 + $0x1a0] sm:$0xff]  }
  0x74   :  { %v4399_v60 = vld [vmem:[%s5308_s0 + $0x1e0] sm:$0xff]  }
  0x7a   :  { %3950 = vmatmul.mubr.msk.bf16.gmra.mrb[24].mxu0 %vm279_vm1, %v4336_v61  ;;  %3988 = vmatmul.mubr.msk.bf16.gmra.mrb[24].mxu1 %vm279_vm1, %v4337_v62  ;;  %v4400_v61 = vld [vmem:[%s5308_s0 + $0x1a8] sm:$0xff]  }
  0x7b   :  { %3953 = vmatprep.mubr.msk.bf16.mxu0 %vm279_vm1, %v4338_v63  ;;  %3991 = vmatprep.mubr.msk.bf16.mxu1 %vm279_vm1, %v4339_v2  ;;  %v4401_v62 = vld [vmem:[%s5308_s0 + $0x1e8] sm:$0xff]   ;;  %v4402_v63 = vld [vmem:[%s5308_s0 + $0x1b0] sm:$0xff]  }
  0x7c   :  { %v4403_v2 = vld [vmem:[%s5308_s0 + $0x1f0] sm:$0xff]  }
  0x82   :  { %3954 = vmatmul.mubr.msk.bf16.gmra.mrb[28].mxu0 %vm279_vm1, %v4340_v3  ;;  %3992 = vmatmul.mubr.msk.bf16.gmra.mrb[28].mxu1 %vm279_vm1, %v4341_v4 }
  0x83   :  { %3999 = vmatprep.mubr.msk.bf16.mxu0 %vm111_vm0, %v4342_v6  ;;  %4037 = vmatprep.mubr.msk.bf16.mxu1 %vm111_vm0, %v4343_v7 }
  0x8a   :  { %4000 = vmatmul.mubr.msk.bf16.vlgmr.msra.gmra.mrb[32].mxu0 %vm111_vm0, %v4344_v8  ;;  %4038 = vmatmul.mubr.msk.bf16.vlgmr.msra.gmra.mrb[32].mxu1 %vm111_vm0, %v4345_v9  ;;  %v4404_v9 = vld [vmem:[%s5308_s0 + $0x1b8] sm:$0xff]  }
  0x8b   :  { %4016 = vmatpush3.bf16.msra.mxu0 %v4466_v5  ;;  %4054 = vmatpush3.bf16.msra.mxu1 %v4466_v5 }
  0x8c   :  { %4003 = vmatprep.mubr.msk.bf16.mxu0 %vm111_vm0, %v4346_v10  ;;  %4041 = vmatprep.mubr.msk.bf16.mxu1 %vm111_vm0, %v4347_v11  ;;  %v4405_v10 = vld [vmem:[%s5308_s0 + $0x1f8] sm:$0xff]  }
  0x8d   :  { %4071 = vmatprep.subr.bf16.mxu0 %v4439_v0  ;;  %4109 = vmatprep.subr.bf16.mxu1 %v4439_v0 }
  0x92   :  { %4004 = vmatmul.mubr.msk.bf16.gmra.mrb[36].mxu0 %vm111_vm0, %v4348_v12  ;;  %4042 = vmatmul.mubr.msk.bf16.gmra.mrb[36].mxu1 %vm111_vm0, %v4349_v13 }
  0x93   :  { %4007 = vmatprep.mubr.msk.bf16.mxu0 %vm111_vm0, %v4350_v14  ;;  %4045 = vmatprep.mubr.msk.bf16.mxu1 %vm111_vm0, %v4351_v15 }
  0x9a   :  { %4008 = vmatmul.mubr.msk.bf16.gmra.mrb[40].mxu0 %vm111_vm0, %v4352_v16  ;;  %4046 = vmatmul.mubr.msk.bf16.gmra.mrb[40].mxu1 %vm111_vm0, %v4353_v17 }
  0x9b   :  { %4011 = vmatprep.mubr.msk.bf16.mxu0 %vm111_vm0, %v4354_v18  ;;  %4049 = vmatprep.mubr.msk.bf16.mxu1 %vm111_vm0, %v4355_v19 }
  0xa2   :  { %4012 = vmatmul.mubr.msk.bf16.gmra.mrb[44].mxu0 %vm111_vm0, %v4356_v20  ;;  %4050 = vmatmul.mubr.msk.bf16.gmra.mrb[44].mxu1 %vm111_vm0, %v4357_v21 }
  0xa3   :  { %4017 = vmatprep.mubr.msk.bf16.mxu0 %vm279_vm1, %v4358_v22  ;;  %4055 = vmatprep.mubr.msk.bf16.mxu1 %vm279_vm1, %v4359_v23 }
  0xaa   :  { %4018 = vmatmul.mubr.msk.bf16.vlgmr.msra.gmra.mrb[32].mxu0 %vm279_vm1, %v4360_v24  ;;  %4056 = vmatmul.mubr.msk.bf16.vlgmr.msra.gmra.mrb[32].mxu1 %vm279_vm1, %v4361_v25 }
  0xab   :  { %4072 = vmatpush3.bf16.msra.mxu0 %v4439_v0  ;;  %4110 = vmatpush3.bf16.msra.mxu1 %v4439_v0  ;;  %v4366_v0 = vld [vmem:[%s5308_s0 + $0x120] sm:$0xff]  }
  0xac   :  { %4021 = vmatprep.mubr.msk.bf16.mxu0 %vm279_vm1, %v4362_v26  ;;  %4059 = vmatprep.mubr.msk.bf16.mxu1 %vm279_vm1, %v4363_v27 }
  0xad   :  { %4073 = vmatprep.subr.bf16.mxu0 %v4444_v1  ;;  %4111 = vmatprep.subr.bf16.mxu1 %v4444_v1 }
  0xaf   :  { %4074 = vmatpush3.bf16.msra.mxu0 %v4444_v1  ;;  %4112 = vmatpush3.bf16.msra.mxu1 %v4444_v1  ;;  %v4369_v1 = vld [vmem:[%s5308_s0 + $0x168] sm:$0xff]  }
  0xb0   :  { %4091 = vmatprep.subr.bf16.mxu0 %v4466_v5  ;;  %4129 = vmatprep.subr.bf16.mxu1 %v4466_v5 }
  0xb2   :  { %4022 = vmatmul.mubr.msk.bf16.gmra.mrb[36].mxu0 %vm279_vm1, %v4364_v28  ;;  %4060 = vmatmul.mubr.msk.bf16.gmra.mrb[36].mxu1 %vm279_vm1, %v4365_v29 }
  0xb3   :  { %4025 = vmatprep.mubr.msk.bf16.mxu0 %vm279_vm1, %v4366_v0  ;;  %4063 = vmatprep.mubr.msk.bf16.mxu1 %vm279_vm1, %v4367_v30 }
  0xba   :  { %4026 = vmatmul.mubr.msk.bf16.gmra.mrb[40].mxu0 %vm279_vm1, %v4368_v31  ;;  %4064 = vmatmul.mubr.msk.bf16.gmra.mrb[40].mxu1 %vm279_vm1, %v4369_v1 }
  0xbb   :  { %4029 = vmatprep.mubr.msk.bf16.mxu0 %vm279_vm1, %v4370_v32  ;;  %4067 = vmatprep.mubr.msk.bf16.mxu1 %vm279_vm1, %v4371_v33 }
  0xc2   :  { %4030 = vmatmul.mubr.msk.bf16.gmra.mrb[44].mxu0 %vm279_vm1, %v4372_v34  ;;  %4068 = vmatmul.mubr.msk.bf16.gmra.mrb[44].mxu1 %vm279_vm1, %v4373_v35 }
  0xc3   :  { %4075 = vmatprep.mubr.msk.bf16.mxu0 %vm111_vm0, %v4374_v36  ;;  %4113 = vmatprep.mubr.msk.bf16.mxu1 %vm111_vm0, %v4375_v37 }
  0xca   :  { %4076 = vmatmul.mubr.msk.bf16.vlgmr.msra.gmra.mrb[48].mxu0 %vm111_vm0, %v4376_v38  ;;  %4114 = vmatmul.mubr.msk.bf16.vlgmr.msra.gmra.mrb[48].mxu1 %vm111_vm0, %v4377_v39 }
  0xcb   :  { %4092 = vmatpush3.bf16.msra.mxu0 %v4466_v5  ;;  %4130 = vmatpush3.bf16.msra.mxu1 %v4466_v5  ;;  %v4383_v5 = vld [vmem:[%s5306_s1 + $0x1e0] sm:$0xff]  }
  0xcc   :  { %4079 = vmatprep.mubr.msk.bf16.mxu0 %vm111_vm0, %v4378_v40  ;;  %4117 = vmatprep.mubr.msk.bf16.mxu1 %vm111_vm0, %v4379_v41 }
  0xd2   :  { %4080 = vmatmul.mubr.msk.bf16.gmra.mrb[52].mxu0 %vm111_vm0, %v4380_v42  ;;  %4118 = vmatmul.mubr.msk.bf16.gmra.mrb[52].mxu1 %vm111_vm0, %v4381_v43 }
  0xd3   :  { %4083 = vmatprep.mubr.msk.bf16.mxu0 %vm111_vm0, %v4382_v44  ;;  %4121 = vmatprep.mubr.msk.bf16.mxu1 %vm111_vm0, %v4383_v5 }
  0xda   :  { %4084 = vmatmul.mubr.msk.bf16.gmra.mrb[56].mxu0 %vm111_vm0, %v4384_v45  ;;  %4122 = vmatmul.mubr.msk.bf16.gmra.mrb[56].mxu1 %vm111_vm0, %v4385_v46 }
  0xdb   :  { %4087 = vmatprep.mubr.msk.bf16.mxu0 %vm111_vm0, %v4386_v47  ;;  %4125 = vmatprep.mubr.msk.bf16.mxu1 %vm111_vm0, %v4387_v48 }
  0xe2   :  { %4088 = vmatmul.mubr.msk.bf16.gmra.mrb[60].mxu0 %vm111_vm0, %v4388_v49  ;;  %4126 = vmatmul.mubr.msk.bf16.gmra.mrb[60].mxu1 %vm111_vm0, %v4389_v50 }
  0xe3   :  { %4093 = vmatprep.mubr.msk.bf16.mxu0 %vm279_vm1, %v4390_v51  ;;  %4131 = vmatprep.mubr.msk.bf16.mxu1 %vm279_vm1, %v4391_v52 }
  0xea   :  { %4094 = vmatmul.mubr.msk.bf16.vlgmr.msra.gmra.mrb[48].mxu0 %vm279_vm1, %v4392_v53  ;;  %4132 = vmatmul.mubr.msk.bf16.vlgmr.msra.gmra.mrb[48].mxu1 %vm279_vm1, %v4393_v54 }
  0xeb   :  { %4097 = vmatprep.mubr.msk.bf16.mxu0 %vm279_vm1, %v4394_v55  ;;  %4135 = vmatprep.mubr.msk.bf16.mxu1 %vm279_vm1, %v4395_v56 }
  0xf2   :  { %4098 = vmatmul.mubr.msk.bf16.gmra.mrb[52].mxu0 %vm279_vm1, %v4396_v57  ;;  %4136 = vmatmul.mubr.msk.bf16.gmra.mrb[52].mxu1 %vm279_vm1, %v4397_v58 }
  0xf3   :  { %4101 = vmatprep.mubr.msk.bf16.mxu0 %vm279_vm1, %v4398_v59  ;;  %4139 = vmatprep.mubr.msk.bf16.mxu1 %vm279_vm1, %v4399_v60 }
  0xfa   :  { %4102 = vmatmul.mubr.msk.bf16.gmra.mrb[56].mxu0 %vm279_vm1, %v4400_v61  ;;  %4140 = vmatmul.mubr.msk.bf16.gmra.mrb[56].mxu1 %vm279_vm1, %v4401_v62 }
  0xfb   :  { %4105 = vmatprep.mubr.msk.bf16.mxu0 %vm279_vm1, %v4402_v63  ;;  %4143 = vmatprep.mubr.msk.bf16.mxu1 %vm279_vm1, %v4403_v2 }
  0xfd   :  { %v3867_v3 = vpop.f32.mrb[0].mxu0  ;;  %v3905_v4 = vpop.f32.mrb[0].mxu1 }
  0xfe   :  { %v759_v6 = vmax.f32 %v3867_v3, %v3905_v4  ;;  %v338_v7 = vpop.f32.mrb[1].mxu0  ;;  %v694_v8 = vpop.f32.mrb[1].mxu1 }
  0xff   :  { %v757_v11 = vmax.f32 %v338_v7, %v694_v8  ;;  %v3868_v12 = vpop.f32.mrb[2].mxu0  ;;  %v3906_v13 = vpop.f32.mrb[2].mxu1 }
 0x100   :  { %v760_v14 = vmax.f32 %v3868_v12, %v3906_v13  ;;  %v341_v15 = vpop.f32.mrb[3].mxu0  ;;  %v697_v16 = vpop.f32.mrb[3].mxu1 }
 0x101   :  { %v758_v17 = vmax.f32 %v341_v15, %v697_v16 }
 0x102   :  { %4106 = vmatmul.mubr.msk.bf16.gmra.mrb[60].mxu0 %vm279_vm1, %v4404_v9  ;;  %4144 = vmatmul.mubr.msk.bf16.gmra.mrb[60].mxu1 %vm279_vm1, %v4405_v10 }
 0x105   :  { %v3871_v18 = vpop.f32.mrb[4].mxu0  ;;  %v3909_v19 = vpop.f32.mrb[4].mxu1 }
 0x106   :  { %v763_v20 = vmax.f32 %v3871_v18, %v3909_v19  ;;  %v354_v21 = vpop.f32.mrb[5].mxu0  ;;  %v710_v22 = vpop.f32.mrb[5].mxu1 }
 0x107   :  { %v761_v23 = vmax.f32 %v354_v21, %v710_v22  ;;  %v3872_v24 = vpop.f32.mrb[6].mxu0  ;;  %v3910_v25 = vpop.f32.mrb[6].mxu1 }
 0x108   :  { %v764_v26 = vmax.f32 %v3872_v24, %v3910_v25  ;;  %v357_v27 = vpop.f32.mrb[7].mxu0  ;;  %v713_v28 = vpop.f32.mrb[7].mxu1 }
 0x109   :  { %v762_v29 = vmax.f32 %v357_v27, %v713_v28 }
 0x10d   :  { %v3875_v0 = vpop.f32.mrb[8].mxu0  ;;  %v3913_v30 = vpop.f32.mrb[8].mxu1 }
 0x10e   :  { %v767_v31 = vmax.f32 %v3875_v0, %v3913_v30  ;;  %v370_v1 = vpop.f32.mrb[9].mxu0  ;;  %v726_v32 = vpop.f32.mrb[9].mxu1 }
 0x10f   :  { %v765_v33 = vmax.f32 %v370_v1, %v726_v32  ;;  %v3876_v34 = vpop.f32.mrb[10].mxu0  ;;  %v3914_v35 = vpop.f32.mrb[10].mxu1 }
 0x110   :  { %v768_v36 = vmax.f32 %v3876_v34, %v3914_v35  ;;  %v373_v37 = vpop.f32.mrb[11].mxu0  ;;  %v729_v38 = vpop.f32.mrb[11].mxu1 }
 0x111   :  { %v766_v39 = vmax.f32 %v373_v37, %v729_v38 }
 0x115   :  { %v5011_v40 = vpop.f32.mrb[12].mxu0  ;;  %v3917_v41 = vpop.f32.mrb[12].mxu1 }
 0x116   :  { %v771_v42 = vmax.f32 %v5011_v40, %v3917_v41  ;;  %v5014_v43 = vpop.f32.mrb[13].mxu0  ;;  %v742_v44 = vpop.f32.mrb[13].mxu1 }
 0x117   :  { %v769_v5 = vmax.f32 %v5014_v43, %v742_v44  ;;  %v5017_v45 = vpop.f32.mrb[14].mxu0  ;;  %v5019_v46 = vpop.f32.mrb[14].mxu1 }
 0x118   :  { %v772_v47 = vmax.f32 %v5017_v45, %v5019_v46  ;;  %v5023_v48 = vpop.f32.mrb[15].mxu0  ;;  %v5025_v49 = vpop.f32.mrb[15].mxu1 }
 0x119   :  { %v770_v50 = vmax.f32 %v5023_v48, %v5025_v49 }
 0x13d   :  { %v3943_v51 = vpop.f32.mrb[16].mxu0  ;;  %v5029_v52 = vpop.f32.mrb[16].mxu1 }
 0x13e   :  { %v5031_v53 = vmax.f32 %v759_v6, %v3943_v51  ;;  %v1066_v54 = vpop.f32.mrb[17].mxu0  ;;  %v5033_v55 = vpop.f32.mrb[17].mxu1 }
 0x13f   :  { %v5035_v56 = vmax.f32 %v757_v11, %v1066_v54  ;;  %v3944_v57 = vpop.f32.mrb[18].mxu0  ;;  %v5037_v58 = vpop.f32.mrb[18].mxu1 }
 0x140   :  { %v1503_v59 = vmax.f32 %v5031_v53, %v5029_v52  ;;  %v5041_v60 = vmax.f32 %v760_v14, %v3944_v57  ;;  %v1069_v61 = vpop.f32.mrb[19].mxu0  ;;  %v5043_v62 = vpop.f32.mrb[19].mxu1 }
 0x141   :  { %v1501_v63 = vmax.f32 %v5035_v56, %v5033_v55  ;;  %v5047_v2 = vmax.f32 %v758_v17, %v1069_v61 }
 0x142   :  { %v1504_v3 = vmax.f32 %v5041_v60, %v5037_v58 }
 0x143   :  { %v1502_v4 = vmax.f32 %v5047_v2, %v5043_v62 }
 0x145   :  { %v3947_v6 = vpop.f32.mrb[20].mxu0  ;;  %v5053_v7 = vpop.f32.mrb[20].mxu1 }
 0x146   :  { %v5055_v8 = vmax.f32 %v763_v20, %v3947_v6  ;;  %v1082_v9 = vpop.f32.mrb[21].mxu0  ;;  %v5057_v10 = vpop.f32.mrb[21].mxu1 }
 0x147   :  { %v5059_v11 = vmax.f32 %v761_v23, %v1082_v9  ;;  %v3948_v12 = vpop.f32.mrb[22].mxu0  ;;  %v5061_v13 = vpop.f32.mrb[22].mxu1 }
 0x148   :  { %v1507_v14 = vmax.f32 %v5055_v8, %v5053_v7  ;;  %v5065_v15 = vmax.f32 %v764_v26, %v3948_v12  ;;  %v1085_v16 = vpop.f32.mrb[23].mxu0  ;;  %v5067_v17 = vpop.f32.mrb[23].mxu1 }
 0x149   :  { %v1505_v18 = vmax.f32 %v5059_v11, %v5057_v10  ;;  %v5071_v19 = vmax.f32 %v762_v29, %v1085_v16 }
 0x14a   :  { %v1508_v20 = vmax.f32 %v5065_v15, %v5061_v13 }
 0x14b   :  { %v1506_v21 = vmax.f32 %v5071_v19, %v5067_v17 }
 0x14d   :  { %v3951_v22 = vpop.f32.mrb[24].mxu0  ;;  %v5077_v23 = vpop.f32.mrb[24].mxu1 }
 0x14e   :  { %v5079_v24 = vmax.f32 %v767_v31, %v3951_v22  ;;  %v1098_v25 = vpop.f32.mrb[25].mxu0  ;;  %v5081_v26 = vpop.f32.mrb[25].mxu1 }
 0x14f   :  { %v5083_v27 = vmax.f32 %v765_v33, %v1098_v25  ;;  %v3952_v28 = vpop.f32.mrb[26].mxu0  ;;  %v5085_v0 = vpop.f32.mrb[26].mxu1 }
 0x150   :  { %v1511_v29 = vmax.f32 %v5079_v24, %v5077_v23  ;;  %v5089_v30 = vmax.f32 %v768_v36, %v3952_v28  ;;  %v1101_v1 = vpop.f32.mrb[27].mxu0  ;;  %v5091_v32 = vpop.f32.mrb[27].mxu1 }
 0x151   :  { %v1509_v31 = vmax.f32 %v5083_v27, %v5081_v26  ;;  %v5095_v34 = vmax.f32 %v766_v39, %v1101_v1 }
 0x152   :  { %v1512_v33 = vmax.f32 %v5089_v30, %v5085_v0 }
 0x153   :  { %v1510_v35 = vmax.f32 %v5095_v34, %v5091_v32 }
 0x155   :  { %v3955_v37 = vpop.f32.mrb[28].mxu0  ;;  %v5101_v38 = vpop.f32.mrb[28].mxu1 }
 0x156   :  { %v5103_v40 = vmax.f32 %v771_v42, %v3955_v37  ;;  %v1114_v36 = vpop.f32.mrb[29].mxu0  ;;  %v5105_v41 = vpop.f32.mrb[29].mxu1 }
 0x157   :  { %v5107_v43 = vmax.f32 %v769_v5, %v1114_v36  ;;  %v3956_v44 = vpop.f32.mrb[30].mxu0  ;;  %v5109_v45 = vpop.f32.mrb[30].mxu1 }
 0x158   :  { %v1515_v39 = vmax.f32 %v5103_v40, %v5101_v38  ;;  %v5113_v46 = vmax.f32 %v772_v47, %v3956_v44  ;;  %v1117_v48 = vpop.f32.mrb[31].mxu0  ;;  %v5115_v49 = vpop.f32.mrb[31].mxu1 }
 0x159   :  { %v1513_v42 = vmax.f32 %v5107_v43, %v5105_v41  ;;  %v5119_v51 = vmax.f32 %v770_v50, %v1117_v48 }
 0x15a   :  { %v1516_v5 = vmax.f32 %v5113_v46, %v5109_v45 }
 0x15b   :  { %v1514_v52 = vmax.f32 %v5119_v51, %v5115_v49 }
 0x17d   :  { %v4019_v53 = vpop.f32.mrb[32].mxu0  ;;  %v5125_v54 = vpop.f32.mrb[32].mxu1 }
 0x17e   :  { %v5127_v55 = vmax.f32 %v1503_v59, %v4019_v53  ;;  %v1810_v47 = vpop.f32.mrb[33].mxu0  ;;  %v5129_v56 = vpop.f32.mrb[33].mxu1 }
 0x17f   :  { %v5131_v57 = vmax.f32 %v1501_v63, %v1810_v47  ;;  %v4020_v58 = vpop.f32.mrb[34].mxu0  ;;  %v5133_v60 = vpop.f32.mrb[34].mxu1 }
 0x180   :  { %v2247_v50 = vmax.f32 %v5127_v55, %v5125_v54  ;;  %v5137_v61 = vmax.f32 %v1504_v3, %v4020_v58  ;;  %v1813_v62 = vpop.f32.mrb[35].mxu0  ;;  %v5139_v2 = vpop.f32.mrb[35].mxu1  ;;  %v5224_v58 = vld [vmem:[%s5309_s4] ss:$0 sm:$0xff] }
 0x181   :  { %v2245_v59 = vmax.f32 %v5131_v57, %v5129_v56  ;;  %v5143_v6 = vmax.f32 %v1502_v4, %v1813_v62 }
 0x182   :  { %v2248_v63 = vmax.f32 %v5137_v61, %v5133_v60 }
 0x183   :  { %v2246_v7 = vmax.f32 %v5143_v6, %v5139_v2 }
 0x185   :  { %v4023_v8 = vpop.f32.mrb[36].mxu0  ;;  %v5149_v9 = vpop.f32.mrb[36].mxu1 }
 0x186   :  { %v5151_v10 = vmax.f32 %v1507_v14, %v4023_v8  ;;  %v1826_v3 = vpop.f32.mrb[37].mxu0  ;;  %v5153_v11 = vpop.f32.mrb[37].mxu1 }
 0x187   :  { %v5155_v12 = vmax.f32 %v1505_v18, %v1826_v3  ;;  %v4024_v13 = vpop.f32.mrb[38].mxu0  ;;  %v5157_v15 = vpop.f32.mrb[38].mxu1 }
 0x188   :  { %v2251_v4 = vmax.f32 %v5151_v10, %v5149_v9  ;;  %v5161_v16 = vmax.f32 %v1508_v20, %v4024_v13  ;;  %v1829_v17 = vpop.f32.mrb[39].mxu0  ;;  %v5163_v19 = vpop.f32.mrb[39].mxu1 }
 0x189   :  { %v2249_v14 = vmax.f32 %v5155_v12, %v5153_v11  ;;  %v5167_v22 = vmax.f32 %v1506_v21, %v1829_v17 }
 0x18a   :  { %v2252_v18 = vmax.f32 %v5161_v16, %v5157_v15 }
 0x18b   :  { %v2250_v23 = vmax.f32 %v5167_v22, %v5163_v19 }
 0x18d   :  { %v4027_v24 = vpop.f32.mrb[40].mxu0  ;;  %v5173_v25 = vpop.f32.mrb[40].mxu1 }
 0x18e   :  { %v5175_v26 = vmax.f32 %v1511_v29, %v4027_v24  ;;  %v1842_v20 = vpop.f32.mrb[41].mxu0  ;;  %v5177_v27 = vpop.f32.mrb[41].mxu1 }
 0x18f   :  { %v5179_v28 = vmax.f32 %v1509_v31, %v1842_v20  ;;  %v4028_v0 = vpop.f32.mrb[42].mxu0  ;;  %v5181_v30 = vpop.f32.mrb[42].mxu1 }
 0x190   :  { %v2255_v21 = vmax.f32 %v5175_v26, %v5173_v25  ;;  %v5185_v1 = vmax.f32 %v1512_v33, %v4028_v0  ;;  %v1845_v32 = vpop.f32.mrb[43].mxu0  ;;  %v5187_v34 = vpop.f32.mrb[43].mxu1 }
 0x191   :  { %v2253_v29 = vmax.f32 %v5179_v28, %v5177_v27  ;;  %v5191_v37 = vmax.f32 %v1510_v35, %v1845_v32 }
 0x192   :  { %v2256_v31 = vmax.f32 %v5185_v1, %v5181_v30 }
 0x193   :  { %v2254_v38 = vmax.f32 %v5191_v37, %v5187_v34 }
 0x195   :  { %v4031_v40 = vpop.f32.mrb[44].mxu0  ;;  %v5197_v36 = vpop.f32.mrb[44].mxu1 }
 0x196   :  { %v5199_v41 = vmax.f32 %v1515_v39, %v4031_v40  ;;  %v1858_v33 = vpop.f32.mrb[45].mxu0  ;;  %v5201_v43 = vpop.f32.mrb[45].mxu1 }
 0x197   :  { %v5203_v44 = vmax.f32 %v1513_v42, %v1858_v33  ;;  %v4032_v45 = vpop.f32.mrb[46].mxu0  ;;  %v5205_v46 = vpop.f32.mrb[46].mxu1 }
 0x198   :  { %v2259_v35 = vmax.f32 %v5199_v41, %v5197_v36  ;;  %v5209_v48 = vmax.f32 %v1516_v5, %v4032_v45  ;;  %v1861_v49 = vpop.f32.mrb[47].mxu0  ;;  %v5211_v51 = vpop.f32.mrb[47].mxu1 }
 0x199   :  { %v2257_v39 = vmax.f32 %v5203_v44, %v5201_v43  ;;  %v5215_v53 = vmax.f32 %v1514_v52, %v1861_v49 }
 0x19a   :  { %v2260_v42 = vmax.f32 %v5209_v48, %v5205_v46 }
 0x19b   :  { %v2258_v54 = vmax.f32 %v5215_v53, %v5211_v51 }
 0x1bd   :  { %v4095_v55 = vpop.f32.mrb[48].mxu0  ;;  %v4133_v47 = vpop.f32.mrb[48].mxu1 }
 0x1be   :  { %v2619_v56 = vmax.f32 %v2247_v50, %v4095_v55  ;;  %v2554_v57 = vpop.f32.mrb[49].mxu0  ;;  %v2926_v5 = vpop.f32.mrb[49].mxu1 }
 0x1bf   :  { %v2617_v60 = vmax.f32 %v2245_v59, %v2554_v57  ;;  %v4096_v61 = vpop.f32.mrb[50].mxu0  ;;  %v4134_v52 = vpop.f32.mrb[50].mxu1 }
 0x1c0   :  { %v2991_v62 = vmax.f32 %v2619_v56, %v4133_v47  ;;  %v2620_v8 = vmax.f32 %v2248_v63, %v4096_v61  ;;  %v2557_v3 = vpop.f32.mrb[51].mxu0  ;;  %v2929_v13 = vpop.f32.mrb[51].mxu1 }
 0x1c1   :  { %v2989_v17 = vmax.f32 %v2617_v60, %v2926_v5  ;;  %v2618_v24 = vmax.f32 %v2246_v7, %v2557_v3 }
 0x1c2   :  { %v3014_v50 = vadd.f32 %v5224_v58, %v2991_v62  ;;  %v2992_v20 = vmax.f32 %v2620_v8, %v4134_v52 }
 0x1c3   :  { %v3012_v0 = vadd.f32 %v5224_v58, %v2989_v17  ;;  %v2990_v32 = vmax.f32 %v2618_v24, %v2929_v13 }
 0x1c4   :  { %v3015_v40 = vadd.f32 %v5224_v58, %v2992_v20  ;;  %v3030_v63 = vmax.f32 %v3014_v50, 0.0 }
 0x1c5   :  { %v3013_v59 = vadd.f32 %v5224_v58, %v2990_v32  ;;  %v4099_v33 = vpop.f32.mrb[52].mxu0  ;;  %v4137_v45 = vpop.f32.mrb[52].mxu1  ;;  %v3028_v7 = vmax.f32 %v3012_v0, 0.0 }
 0x1c6   :  { %v3031_v49 = vmax.f32 %v3015_v40, 0.0  ;;  %v2623_v55 = vmax.f32 %v2251_v4, %v4099_v33  ;;  %v2570_v2 = vpop.f32.mrb[53].mxu0  ;;  %v2942_v6 = vpop.f32.mrb[53].mxu1 }
 0x1c7   :  { %v3029_v47 = vmax.f32 %v3013_v59, 0.0  ;;  %v2621_v56 = vmax.f32 %v2249_v14, %v2570_v2  ;;  %v4100_v57 = vpop.f32.mrb[54].mxu0  ;;  %v4138_v5 = vpop.f32.mrb[54].mxu1 }
 0x1c8   :  { %v3652_v60 = vpack.c.bf16 %v3031_v49, %v3030_v63  ;;  %v2995_v61 = vmax.f32 %v2623_v55, %v4137_v45  ;;  %v2624_v52 = vmax.f32 %v2252_v18, %v4100_v57  ;;  %v2573_v62 = vpop.f32.mrb[55].mxu0  ;;  %v2945_v8 = vpop.f32.mrb[55].mxu1 }
 0x1c9   :  { %v3647_v9 = vpack.c.bf16 %v3029_v47, %v3028_v7  ;;  %v2993_v10 = vmax.f32 %v2621_v56, %v2942_v6  ;;  %v2622_v4 = vmax.f32 %v2250_v23, %v2573_v62 }
 0x1ca   :  { %3684 = vst [vmem:[%s5310_s5 + $0x8] sm:$0xff] %v3652_v60   ;;  %v3018_v11 = vadd.f32 %v5224_v58, %v2995_v61  ;;  %v2996_v12 = vmax.f32 %v2624_v52, %v4138_v5 }
 0x1cb   :  { %3648 = vst [vmem:[%s5310_s5] sm:$0xff] %v3647_v9   ;;  %v3016_v15 = vadd.f32 %v5224_v58, %v2993_v10  ;;  %v2994_v16 = vmax.f32 %v2622_v4, %v2945_v8 }
 0x1cc   :  { %v3019_v14 = vadd.f32 %v5224_v58, %v2996_v12  ;;  %v3034_v23 = vmax.f32 %v3018_v11, 0.0 }
 0x1cd   :  { %v3017_v18 = vadd.f32 %v5224_v58, %v2994_v16  ;;  %v4103_v19 = vpop.f32.mrb[56].mxu0  ;;  %v4141_v22 = vpop.f32.mrb[56].mxu1  ;;  %v3032_v50 = vmax.f32 %v3016_v15, 0.0 }
 0x1ce   :  { %v3035_v3 = vmax.f32 %v3019_v14, 0.0  ;;  %v2627_v13 = vmax.f32 %v2255_v21, %v4103_v19  ;;  %v2586_v17 = vpop.f32.mrb[57].mxu0  ;;  %v2958_v24 = vpop.f32.mrb[57].mxu1 }
 0x1cf   :  { %v3033_v20 = vmax.f32 %v3017_v18, 0.0  ;;  %v2625_v0 = vmax.f32 %v2253_v29, %v2586_v17  ;;  %v4104_v32 = vpop.f32.mrb[58].mxu0  ;;  %v4142_v40 = vpop.f32.mrb[58].mxu1 }
 0x1d0   :  { %v3662_v59 = vpack.c.bf16 %v3035_v3, %v3034_v23  ;;  %v2999_v33 = vmax.f32 %v2627_v13, %v4141_v22  ;;  %v2628_v45 = vmax.f32 %v2256_v31, %v4104_v32  ;;  %v2589_v63 = vpop.f32.mrb[59].mxu0  ;;  %v2961_v49 = vpop.f32.mrb[59].mxu1 }
 0x1d1   :  { %v3657_v25 = vpack.c.bf16 %v3033_v20, %v3032_v50  ;;  %v2997_v26 = vmax.f32 %v2625_v0, %v2958_v24  ;;  %v2626_v21 = vmax.f32 %v2254_v38, %v2589_v63 }
 0x1d2   :  { %3686 = vst [vmem:[%s5310_s5 + $0x18] sm:$0xff] %v3662_v59   ;;  %v3022_v27 = vadd.f32 %v5224_v58, %v2999_v33  ;;  %v3000_v28 = vmax.f32 %v2628_v45, %v4142_v40 }
 0x1d3   :  { %3685 = vst [vmem:[%s5310_s5 + $0x10] sm:$0xff] %v3657_v25   ;;  %v3020_v30 = vadd.f32 %v5224_v58, %v2997_v26  ;;  %v2998_v1 = vmax.f32 %v2626_v21, %v2961_v49 }
 0x1d4   :  { %v3023_v29 = vadd.f32 %v5224_v58, %v3000_v28  ;;  %v3038_v38 = vmax.f32 %v3022_v27, 0.0 }
 0x1d5   :  { %v3021_v31 = vadd.f32 %v5224_v58, %v2998_v1  ;;  %v4107_v34 = vpop.f32.mrb[60].mxu0  ;;  %v4145_v37 = vpop.f32.mrb[60].mxu1  ;;  %v3036_v47 = vmax.f32 %v3020_v30, 0.0 }
 0x1d6   :  { %v3039_v55 = vmax.f32 %v3023_v29, 0.0  ;;  %v2631_v2 = vmax.f32 %v2259_v35, %v4107_v34  ;;  %v2602_v6 = vpop.f32.mrb[61].mxu0  ;;  %v2974_v7 = vpop.f32.mrb[61].mxu1 }
 0x1d7   :  { %v3037_v56 = vmax.f32 %v3021_v31, 0.0  ;;  %v2629_v57 = vmax.f32 %v2257_v39, %v2602_v6  ;;  %v4108_v5 = vpop.f32.mrb[62].mxu0  ;;  %v4146_v60 = vpop.f32.mrb[62].mxu1 }
 0x1d8   :  { %v3672_v61 = vpack.c.bf16 %v3039_v55, %v3038_v38  ;;  %v3003_v52 = vmax.f32 %v2631_v2, %v4145_v37  ;;  %v2632_v62 = vmax.f32 %v2260_v42, %v4108_v5  ;;  %v2605_v8 = vpop.f32.mrb[63].mxu0  ;;  %v2977_v9 = vpop.f32.mrb[63].mxu1 }
 0x1d9   :  { %v3667_v36 = vpack.c.bf16 %v3037_v56, %v3036_v47  ;;  %v3001_v41 = vmax.f32 %v2629_v57, %v2974_v7  ;;  %v2630_v35 = vmax.f32 %v2258_v54, %v2605_v8 }
 0x1da   :  { %3688 = vst [vmem:[%s5310_s5 + $0x28] sm:$0xff] %v3672_v61   ;;  %v3026_v43 = vadd.f32 %v5224_v58, %v3003_v52  ;;  %v3004_v44 = vmax.f32 %v2632_v62, %v4146_v60 }
 0x1db   :  { %3687 = vst [vmem:[%s5310_s5 + $0x20] sm:$0xff] %v3667_v36   ;;  %v3024_v46 = vadd.f32 %v5224_v58, %v3001_v41  ;;  %v3002_v48 = vmax.f32 %v2630_v35, %v2977_v9 }
 0x1dc   :  { %v3027_v39 = vadd.f32 %v5224_v58, %v3004_v44  ;;  %v3042_v51 = vmax.f32 %v3026_v43, 0.0 }
 0x1dd   :  { %v3025_v42 = vadd.f32 %v5224_v58, %v3002_v48  ;;  %v3040_v54 = vmax.f32 %v3024_v46, 0.0 }
 0x1de   :  { %v3043_v53 = vmax.f32 %v3027_v39, 0.0 }
 0x1df   :  { %v3041_v10 = vmax.f32 %v3025_v42, 0.0 }
 0x1e0   :  { %v3682_v4 = vpack.c.bf16 %v3043_v53, %v3042_v51 }
 0x1e1   :  { %v3677_v11 = vpack.c.bf16 %v3041_v10, %v3040_v54 }
 0x1e2   :  { %3690 = vst [vmem:[%s5310_s5 + $0x38] sm:$0xff] %v3682_v4  }
 0x1e3   :  { %3689 = vst [vmem:[%s5310_s5 + $0x30] sm:$0xff] %v3677_v11  }

// kernel: surfacenet_forward.8
= control target key start
LH: loop header
LB: loop body
LE: loop exit
PB: predicated region body
PF: predicated region fallthrough
CT: control target
= control target key end

     0   :  { %vm310_vm0 = vcmask 130048   ;;  %s5378_s3 = inlined_call_operand.vmem [shape: bf16[128,128], index: 3, kind: input, shape index: {}]   ;;  %s5379_s1 = inlined_call_operand.vmem [shape: bf16[8,128,128], index: 1, kind: input, shape index: {}]   ;;  %s5380_s2 = inlined_call_operand.vmem [shape: bf16[16,128], index: 2, kind: input, shape index: {}]   ;;  %s5381_s0 = inlined_call_operand.vmem [shape: bf16[8,128,16], index: 0, kind: input, shape index: {}]   ;;  %s5382_s4 = inlined_call_operand.vmem [shape: f32[1,128], index: 4, kind: input, shape index: {}]   ;;  %s5383_s5 = inlined_call_operand.vmem [shape: bf16[128,128], index: 5, kind: output, shape index: {}]  }
   0x1   :  { %v4459_v0 = vld [vmem:[%s5378_s3] sm:$0xff]   ;;  %v4464_v1 = vld [vmem:[%s5378_s3 + $0x8] sm:$0xff]   ;;  %v4475_v2 = vld [vmem:[%s5378_s3 + $0x10] sm:$0xff]  }
   0x2   :  { %3752 = vmatprep.subr.bf16.mxu0 %v4459_v0  ;;  %3802 = vmatprep.subr.bf16.mxu1 %v4459_v0  ;;  %v4482_v3 = vld [vmem:[%s5378_s3 + $0x18] sm:$0xff]   ;;  %v4288_v4 = vld [vmem:[%s5379_s1] sm:$0xff]   ;;  %v4508_v7 = vld [vmem:[%s5378_s3 + $0x28] sm:$0xff]  }
   0x3   :  { %3753 = vmatpush3.bf16.msra.mxu0 %v4459_v0  ;;  %3803 = vmatpush3.bf16.msra.mxu1 %v4459_v0  ;;  %v4289_v5 = vld [vmem:[%s5379_s1 + $0x40] sm:$0xff]   ;;  %v4517_v8 = vld [vmem:[%s5378_s3 + $0x30] sm:$0xff]   ;;  %v4526_v9 = vld [vmem:[%s5378_s3 + $0x38] sm:$0xff]  }
   0x4   :  { %3754 = vmatprep.subr.bf16.mxu0 %v4464_v1  ;;  %3804 = vmatprep.subr.bf16.mxu1 %v4464_v1  ;;  %v4499_v6 = vld [vmem:[%s5378_s3 + $0x20] sm:$0xff]   ;;  %v4290_v11 = vld [vmem:[%s5379_s1 + $0x8] sm:$0xff]   ;;  %v4293_v13 = vld [vmem:[%s5379_s1 + $0x10] sm:$0xff]  }
   0x5   :  { %3768 = vmatprep.mubr.bf16.mxu0 %v4288_v4  ;;  %3818 = vmatprep.mubr.bf16.mxu1 %v4289_v5  ;;  %v4535_v10 = vld [vmem:[%s5380_s2] sm:$0xff]   ;;  %v4292_v12 = vld [vmem:[%s5379_s1 + $0x48] sm:$0xff]   ;;  %v4294_v14 = vld [vmem:[%s5379_s1 + $0x50] sm:$0xff]  }
   0x6   :  { %v4295_v15 = vld [vmem:[%s5379_s1 + $0x18] sm:$0xff]   ;;  %v4297_v17 = vld [vmem:[%s5379_s1 + $0x20] sm:$0xff]   ;;  %v4299_v19 = vld [vmem:[%s5379_s1 + $0x28] sm:$0xff]  }
   0x7   :  { %3755 = vmatpush3.bf16.msra.mxu0 %v4464_v1  ;;  %3805 = vmatpush3.bf16.msra.mxu1 %v4464_v1  ;;  %v4296_v16 = vld [vmem:[%s5379_s1 + $0x58] sm:$0xff]   ;;  %v4298_v18 = vld [vmem:[%s5379_s1 + $0x60] sm:$0xff]   ;;  %v4300_v20 = vld [vmem:[%s5379_s1 + $0x68] sm:$0xff]  }
   0x8   :  { %3756 = vmatprep.subr.bf16.mxu0 %v4475_v2  ;;  %3806 = vmatprep.subr.bf16.mxu1 %v4475_v2  ;;  %v4301_v21 = vld [vmem:[%s5379_s1 + $0x30] sm:$0xff]   ;;  %v4303_v23 = vld [vmem:[%s5379_s1 + $0x38] sm:$0xff]   ;;  %v4305_v25 = vld [vmem:[%s5381_s0] sm:$0xff]  }
   0x9   :  { %v4302_v22 = vld [vmem:[%s5379_s1 + $0x70] sm:$0xff]   ;;  %v4304_v24 = vld [vmem:[%s5379_s1 + $0x78] sm:$0xff]   ;;  %v4306_v26 = vld [vmem:[%s5381_s0 + $0x40] sm:$0xff]  }
   0xa   :  { %v4307_v27 = vld [vmem:[%s5381_s0 + $0x8] sm:$0xff]   ;;  %v4309_v29 = vld [vmem:[%s5381_s0 + $0x10] sm:$0xff]   ;;  %v4311_v31 = vld [vmem:[%s5381_s0 + $0x18] sm:$0xff]  }
   0xb   :  { %3757 = vmatpush3.bf16.msra.mxu0 %v4475_v2  ;;  %3807 = vmatpush3.bf16.msra.mxu1 %v4475_v2  ;;  %v4308_v28 = vld [vmem:[%s5381_s0 + $0x48] sm:$0xff]   ;;  %v4310_v30 = vld [vmem:[%s5381_s0 + $0x50] sm:$0xff]   ;;  %v4312_v32 = vld [vmem:[%s5381_s0 + $0x58] sm:$0xff]  }
   0xc   :  { %3758 = vmatprep.subr.bf16.mxu0 %v4482_v3  ;;  %3808 = vmatprep.subr.bf16.mxu1 %v4482_v3  ;;  %v4313_v33 = vld [vmem:[%s5381_s0 + $0x20] sm:$0xff]   ;;  %v4315_v35 = vld [vmem:[%s5381_s0 + $0x28] sm:$0xff]   ;;  %v4317_v37 = vld [vmem:[%s5381_s0 + $0x30] sm:$0xff]  }
   0xd   :  { %v4314_v34 = vld [vmem:[%s5381_s0 + $0x60] sm:$0xff]   ;;  %v4316_v36 = vld [vmem:[%s5381_s0 + $0x68] sm:$0xff]   ;;  %v4318_v38 = vld [vmem:[%s5381_s0 + $0x70] sm:$0xff]  }
   0xe   :  { %v4319_v39 = vld [vmem:[%s5381_s0 + $0x38] sm:$0xff]   ;;  %v4321_v41 = vld [vmem:[%s5379_s1 + $0x80] sm:$0xff]   ;;  %v4323_v43 = vld [vmem:[%s5379_s1 + $0x88] sm:$0xff]  }
   0xf   :  { %3759 = vmatpush3.bf16.msra.mxu0 %v4482_v3  ;;  %3809 = vmatpush3.bf16.msra.mxu1 %v4482_v3  ;;  %v4320_v40 = vld [vmem:[%s5381_s0 + $0x78] sm:$0xff]   ;;  %v4322_v42 = vld [vmem:[%s5379_s1 + $0xc0] sm:$0xff]   ;;  %v4324_v44 = vld [vmem:[%s5379_s1 + $0xc8] sm:$0xff]  }
  0x10   :  { %3760 = vmatprep.subr.bf16.mxu0 %v4499_v6  ;;  %3810 = vmatprep.subr.bf16.mxu1 %v4499_v6  ;;  %v4325_v45 = vld [vmem:[%s5379_s1 + $0x90] sm:$0xff]   ;;  %v4327_v47 = vld [vmem:[%s5379_s1 + $0x98] sm:$0xff]   ;;  %v4329_v49 = vld [vmem:[%s5379_s1 + $0xa0] sm:$0xff]  }
  0x11   :  { %v4326_v46 = vld [vmem:[%s5379_s1 + $0xd0] sm:$0xff]   ;;  %v4328_v48 = vld [vmem:[%s5379_s1 + $0xd8] sm:$0xff]   ;;  %v4330_v50 = vld [vmem:[%s5379_s1 + $0xe0] sm:$0xff]  }
  0x12   :  { %v4331_v51 = vld [vmem:[%s5379_s1 + $0xa8] sm:$0xff]   ;;  %v4333_v53 = vld [vmem:[%s5379_s1 + $0xb0] sm:$0xff]   ;;  %v4335_v55 = vld [vmem:[%s5379_s1 + $0xb8] sm:$0xff]  }
  0x13   :  { %3761 = vmatpush3.bf16.msra.mxu0 %v4499_v6  ;;  %3811 = vmatpush3.bf16.msra.mxu1 %v4499_v6  ;;  %v4332_v52 = vld [vmem:[%s5379_s1 + $0xe8] sm:$0xff]   ;;  %v4334_v54 = vld [vmem:[%s5379_s1 + $0xf0] sm:$0xff]   ;;  %v4336_v56 = vld [vmem:[%s5379_s1 + $0xf8] sm:$0xff]  }
  0x14   :  { %3762 = vmatprep.subr.bf16.mxu0 %v4508_v7  ;;  %3812 = vmatprep.subr.bf16.mxu1 %v4508_v7  ;;  %v4337_v57 = vld [vmem:[%s5381_s0 + $0x80] sm:$0xff]   ;;  %v4339_v59 = vld [vmem:[%s5381_s0 + $0x88] sm:$0xff]   ;;  %v4341_v61 = vld [vmem:[%s5381_s0 + $0x90] sm:$0xff]  }
  0x15   :  { %v4338_v58 = vld [vmem:[%s5381_s0 + $0xc0] sm:$0xff]   ;;  %v4340_v60 = vld [vmem:[%s5381_s0 + $0xc8] sm:$0xff]   ;;  %v4342_v62 = vld [vmem:[%s5381_s0 + $0xd0] sm:$0xff]  }
  0x16   :  { %v4343_v63 = vld [vmem:[%s5381_s0 + $0x98] sm:$0xff]   ;;  %v4346_v5 = vld [vmem:[%s5381_s0 + $0xe0] sm:$0xff]  }
  0x17   :  { %3763 = vmatpush3.bf16.msra.mxu0 %v4508_v7  ;;  %3813 = vmatpush3.bf16.msra.mxu1 %v4508_v7  ;;  %v4344_v4 = vld [vmem:[%s5381_s0 + $0xd8] sm:$0xff]  }
  0x18   :  { %3764 = vmatprep.subr.bf16.mxu0 %v4517_v8  ;;  %3814 = vmatprep.subr.bf16.mxu1 %v4517_v8 }
  0x1b   :  { %3765 = vmatpush3.bf16.msra.mxu0 %v4517_v8  ;;  %3815 = vmatpush3.bf16.msra.mxu1 %v4517_v8 }
  0x1c   :  { %3766 = vmatprep.subr.bf16.mxu0 %v4526_v9  ;;  %3816 = vmatprep.subr.bf16.mxu1 %v4526_v9 }
  0x1f   :  { %3767 = vmatpush3.bf16.msra.mxu0 %v4526_v9  ;;  %3817 = vmatpush3.bf16.msra.mxu1 %v4526_v9 }
  0x20   :  { %3784 = vmatprep.subr.bf16.mxu0 %v4535_v10  ;;  %3834 = vmatprep.subr.bf16.mxu1 %v4535_v10 }
  0x22   :  { %3769 = vmatmul.mubr.bf16.vlgmr.msra.gmra.mrb[0].mxu0 %v4290_v11  ;;  %3819 = vmatmul.mubr.bf16.vlgmr.msra.gmra.mrb[0].mxu1 %v4292_v12  ;;  %v4348_v11 = vld [vmem:[%s5381_s0 + $0xe8] sm:$0xff]   ;;  %v4350_v12 = vld [vmem:[%s5381_s0 + $0xf0] sm:$0xff]  }
  0x23   :  { %3785 = vmatpush3.bf16.msra.mxu0 %v4535_v10  ;;  %3835 = vmatpush3.bf16.msra.mxu1 %v4535_v10 }
  0x24   :  { %3772 = vmatprep.mubr.bf16.mxu0 %v4293_v13  ;;  %3822 = vmatprep.mubr.bf16.mxu1 %v4294_v14  ;;  %v4352_v13 = vld [vmem:[%s5381_s0 + $0xf8] sm:$0xff]   ;;  %v4354_v14 = vld [vmem:[%s5379_s1 + $0x140] sm:$0xff]  }
  0x25   :  { %3852 = vmatprep.subr.bf16.mxu0 %v4459_v0  ;;  %3902 = vmatprep.subr.bf16.mxu1 %v4459_v0 }
  0x2a   :  { %3773 = vmatmul.mubr.bf16.gmra.mrb[4].mxu0 %v4295_v15  ;;  %3823 = vmatmul.mubr.bf16.gmra.mrb[4].mxu1 %v4296_v16  ;;  %v4356_v15 = vld [vmem:[%s5379_s1 + $0x148] sm:$0xff]   ;;  %v4358_v16 = vld [vmem:[%s5379_s1 + $0x150] sm:$0xff]  }
  0x2b   :  { %3776 = vmatprep.mubr.bf16.mxu0 %v4297_v17  ;;  %3826 = vmatprep.mubr.bf16.mxu1 %v4298_v18  ;;  %v4359_v17 = vld [vmem:[%s5379_s1 + $0x118] sm:$0xff]  }
  0x2c   :  { %v4360_v18 = vld [vmem:[%s5379_s1 + $0x158] sm:$0xff]  }
  0x32   :  { %3777 = vmatmul.mubr.bf16.gmra.mrb[8].mxu0 %v4299_v19  ;;  %3827 = vmatmul.mubr.bf16.gmra.mrb[8].mxu1 %v4300_v20  ;;  %v4362_v19 = vld [vmem:[%s5379_s1 + $0x160] sm:$0xff]   ;;  %v4363_v20 = vld [vmem:[%s5379_s1 + $0x128] sm:$0xff]  }
  0x33   :  { %3780 = vmatprep.mubr.bf16.mxu0 %v4301_v21  ;;  %3830 = vmatprep.mubr.bf16.mxu1 %v4302_v22  ;;  %v4364_v21 = vld [vmem:[%s5379_s1 + $0x168] sm:$0xff]   ;;  %v4365_v22 = vld [vmem:[%s5379_s1 + $0x130] sm:$0xff]  }
  0x3a   :  { %3781 = vmatmul.mubr.bf16.gmra.mrb[12].mxu0 %v4303_v23  ;;  %3831 = vmatmul.mubr.bf16.gmra.mrb[12].mxu1 %v4304_v24  ;;  %v4366_v23 = vld [vmem:[%s5379_s1 + $0x170] sm:$0xff]   ;;  %v4367_v24 = vld [vmem:[%s5379_s1 + $0x138] sm:$0xff]  }
  0x3b   :  { %3786 = vmatprep.mubr.msk.bf16.mxu0 %vm310_vm0, %v4305_v25  ;;  %3836 = vmatprep.mubr.msk.bf16.mxu1 %vm310_vm0, %v4306_v26  ;;  %v4368_v25 = vld [vmem:[%s5379_s1 + $0x178] sm:$0xff]   ;;  %v4369_v26 = vld [vmem:[%s5381_s0 + $0x100] sm:$0xff]  }
  0x42   :  { %3787 = vmatmul.mubr.msk.bf16.vlgmr.msra.gmra.mrb[0].mxu0 %vm310_vm0, %v4307_v27  ;;  %3837 = vmatmul.mubr.msk.bf16.vlgmr.msra.gmra.mrb[0].mxu1 %vm310_vm0, %v4308_v28  ;;  %v4370_v27 = vld [vmem:[%s5381_s0 + $0x140] sm:$0xff]   ;;  %v4371_v28 = vld [vmem:[%s5381_s0 + $0x108] sm:$0xff]  }
  0x43   :  { %3853 = vmatpush3.bf16.msra.mxu0 %v4459_v0  ;;  %3903 = vmatpush3.bf16.msra.mxu1 %v4459_v0 }
  0x44   :  { %3854 = vmatprep.subr.bf16.mxu0 %v4464_v1  ;;  %3904 = vmatprep.subr.bf16.mxu1 %v4464_v1 }
  0x45   :  { %3790 = vmatprep.mubr.msk.bf16.mxu0 %vm310_vm0, %v4309_v29  ;;  %3840 = vmatprep.mubr.msk.bf16.mxu1 %vm310_vm0, %v4310_v30  ;;  %v4372_v29 = vld [vmem:[%s5381_s0 + $0x148] sm:$0xff]   ;;  %v4373_v30 = vld [vmem:[%s5381_s0 + $0x110] sm:$0xff]  }
  0x47   :  { %3855 = vmatpush3.bf16.msra.mxu0 %v4464_v1  ;;  %3905 = vmatpush3.bf16.msra.mxu1 %v4464_v1 }
  0x48   :  { %3856 = vmatprep.subr.bf16.mxu0 %v4475_v2  ;;  %3906 = vmatprep.subr.bf16.mxu1 %v4475_v2 }
  0x4a   :  { %3791 = vmatmul.mubr.msk.bf16.gmra.mrb[4].mxu0 %vm310_vm0, %v4311_v31  ;;  %3841 = vmatmul.mubr.msk.bf16.gmra.mrb[4].mxu1 %vm310_vm0, %v4312_v32  ;;  %v4374_v31 = vld [vmem:[%s5381_s0 + $0x150] sm:$0xff]   ;;  %v4418_v32 = vld [vmem:[%s5378_s3 + $0x8] sm:$0xff]  }
  0x4b   :  { %3857 = vmatpush3.bf16.msra.mxu0 %v4475_v2  ;;  %3907 = vmatpush3.bf16.msra.mxu1 %v4475_v2 }
  0x4c   :  { %3858 = vmatprep.subr.bf16.mxu0 %v4482_v3  ;;  %3908 = vmatprep.subr.bf16.mxu1 %v4482_v3 }
  0x4d   :  { %3794 = vmatprep.mubr.msk.bf16.mxu0 %vm310_vm0, %v4313_v33  ;;  %3844 = vmatprep.mubr.msk.bf16.mxu1 %vm310_vm0, %v4314_v34  ;;  %v4375_v33 = vld [vmem:[%s5381_s0 + $0x118] sm:$0xff]  }
  0x4e   :  { %v4376_v34 = vld [vmem:[%s5381_s0 + $0x158] sm:$0xff]  }
  0x4f   :  { %3859 = vmatpush3.bf16.msra.mxu0 %v4482_v3  ;;  %3909 = vmatpush3.bf16.msra.mxu1 %v4482_v3 }
  0x50   :  { %3860 = vmatprep.subr.bf16.mxu0 %v4499_v6  ;;  %3910 = vmatprep.subr.bf16.mxu1 %v4499_v6 }
  0x52   :  { %3795 = vmatmul.mubr.msk.bf16.gmra.mrb[8].mxu0 %vm310_vm0, %v4315_v35  ;;  %3845 = vmatmul.mubr.msk.bf16.gmra.mrb[8].mxu1 %vm310_vm0, %v4316_v36  ;;  %v4419_v35 = vld [vmem:[%s5378_s3 + $0x10] sm:$0xff]   ;;  %v4377_v36 = vld [vmem:[%s5381_s0 + $0x120] sm:$0xff]  }
  0x53   :  { %3861 = vmatpush3.bf16.msra.mxu0 %v4499_v6  ;;  %3911 = vmatpush3.bf16.msra.mxu1 %v4499_v6 }
  0x54   :  { %3862 = vmatprep.subr.bf16.mxu0 %v4508_v7  ;;  %3912 = vmatprep.subr.bf16.mxu1 %v4508_v7 }
  0x55   :  { %3798 = vmatprep.mubr.msk.bf16.mxu0 %vm310_vm0, %v4317_v37  ;;  %3848 = vmatprep.mubr.msk.bf16.mxu1 %vm310_vm0, %v4318_v38  ;;  %v4378_v37 = vld [vmem:[%s5381_s0 + $0x160] sm:$0xff]   ;;  %v4420_v38 = vld [vmem:[%s5378_s3 + $0x18] sm:$0xff]  }
  0x57   :  { %3863 = vmatpush3.bf16.msra.mxu0 %v4508_v7  ;;  %3913 = vmatpush3.bf16.msra.mxu1 %v4508_v7 }
  0x58   :  { %3864 = vmatprep.subr.bf16.mxu0 %v4517_v8  ;;  %3914 = vmatprep.subr.bf16.mxu1 %v4517_v8 }
  0x5a   :  { %3799 = vmatmul.mubr.msk.bf16.gmra.mrb[12].mxu0 %vm310_vm0, %v4319_v39  ;;  %3849 = vmatmul.mubr.msk.bf16.gmra.mrb[12].mxu1 %vm310_vm0, %v4320_v40  ;;  %v4379_v39 = vld [vmem:[%s5381_s0 + $0x128] sm:$0xff]  }
  0x5b   :  { %3865 = vmatpush3.bf16.msra.mxu0 %v4517_v8  ;;  %3915 = vmatpush3.bf16.msra.mxu1 %v4517_v8  ;;  %v4380_v40 = vld [vmem:[%s5381_s0 + $0x168] sm:$0xff]  }
  0x5c   :  { %3866 = vmatprep.subr.bf16.mxu0 %v4526_v9  ;;  %3916 = vmatprep.subr.bf16.mxu1 %v4526_v9 }
  0x5d   :  { %3868 = vmatprep.mubr.bf16.mxu0 %v4321_v41  ;;  %3918 = vmatprep.mubr.bf16.mxu1 %v4322_v42  ;;  %v4421_v41 = vld [vmem:[%s5378_s3 + $0x20] sm:$0xff]   ;;  %v4381_v42 = vld [vmem:[%s5381_s0 + $0x130] sm:$0xff]  }
  0x5f   :  { %3867 = vmatpush3.bf16.msra.mxu0 %v4526_v9  ;;  %3917 = vmatpush3.bf16.msra.mxu1 %v4526_v9 }
  0x60   :  { %3884 = vmatprep.subr.bf16.mxu0 %v4535_v10  ;;  %3934 = vmatprep.subr.bf16.mxu1 %v4535_v10 }
  0x62   :  { %3869 = vmatmul.mubr.bf16.vlgmr.msra.gmra.mrb[16].mxu0 %v4323_v43  ;;  %3919 = vmatmul.mubr.bf16.vlgmr.msra.gmra.mrb[16].mxu1 %v4324_v44  ;;  %v4382_v43 = vld [vmem:[%s5381_s0 + $0x170] sm:$0xff]   ;;  %v4422_v44 = vld [vmem:[%s5378_s3 + $0x28] sm:$0xff]  }
  0x63   :  { %3885 = vmatpush3.bf16.msra.mxu0 %v4535_v10  ;;  %3935 = vmatpush3.bf16.msra.mxu1 %v4535_v10 }
  0x64   :  { %3872 = vmatprep.mubr.bf16.mxu0 %v4325_v45  ;;  %3922 = vmatprep.mubr.bf16.mxu1 %v4326_v46  ;;  %v4383_v45 = vld [vmem:[%s5381_s0 + $0x138] sm:$0xff]  }
  0x65   :  { %3952 = vmatprep.subr.bf16.mxu0 %v4459_v0  ;;  %4002 = vmatprep.subr.bf16.mxu1 %v4459_v0  ;;  %v4384_v46 = vld [vmem:[%s5381_s0 + $0x178] sm:$0xff]  }
  0x6a   :  { %3873 = vmatmul.mubr.bf16.gmra.mrb[20].mxu0 %v4327_v47  ;;  %3923 = vmatmul.mubr.bf16.gmra.mrb[20].mxu1 %v4328_v48  ;;  %v4423_v47 = vld [vmem:[%s5378_s3 + $0x30] sm:$0xff]   ;;  %v4385_v48 = vld [vmem:[%s5379_s1 + $0x180] sm:$0xff]  }
  0x6b   :  { %3876 = vmatprep.mubr.bf16.mxu0 %v4329_v49  ;;  %3926 = vmatprep.mubr.bf16.mxu1 %v4330_v50  ;;  %v4386_v49 = vld [vmem:[%s5379_s1 + $0x1c0] sm:$0xff]   ;;  %v4424_v50 = vld [vmem:[%s5378_s3 + $0x38] sm:$0xff]  }
  0x72   :  { %3877 = vmatmul.mubr.bf16.gmra.mrb[24].mxu0 %v4331_v51  ;;  %3927 = vmatmul.mubr.bf16.gmra.mrb[24].mxu1 %v4332_v52  ;;  %v4387_v51 = vld [vmem:[%s5379_s1 + $0x188] sm:$0xff]  }
  0x73   :  { %3880 = vmatprep.mubr.bf16.mxu0 %v4333_v53  ;;  %3930 = vmatprep.mubr.bf16.mxu1 %v4334_v54  ;;  %v4388_v52 = vld [vmem:[%s5379_s1 + $0x1c8] sm:$0xff]   ;;  %v4425_v53 = vld [vmem:[%s5380_s2] sm:$0xff]   ;;  %v4389_v54 = vld [vmem:[%s5379_s1 + $0x190] sm:$0xff]  }
  0x7a   :  { %3881 = vmatmul.mubr.bf16.gmra.mrb[28].mxu0 %v4335_v55  ;;  %3931 = vmatmul.mubr.bf16.gmra.mrb[28].mxu1 %v4336_v56  ;;  %v4390_v55 = vld [vmem:[%s5379_s1 + $0x1d0] sm:$0xff]   ;;  %v4391_v56 = vld [vmem:[%s5379_s1 + $0x198] sm:$0xff]  }
  0x7b   :  { %3886 = vmatprep.mubr.msk.bf16.mxu0 %vm310_vm0, %v4337_v57  ;;  %3936 = vmatprep.mubr.msk.bf16.mxu1 %vm310_vm0, %v4338_v58  ;;  %v4392_v57 = vld [vmem:[%s5379_s1 + $0x1d8] sm:$0xff]   ;;  %v4393_v58 = vld [vmem:[%s5379_s1 + $0x1a0] sm:$0xff]  }
  0x82   :  { %3887 = vmatmul.mubr.msk.bf16.vlgmr.msra.gmra.mrb[16].mxu0 %vm310_vm0, %v4339_v59  ;;  %3937 = vmatmul.mubr.msk.bf16.vlgmr.msra.gmra.mrb[16].mxu1 %vm310_vm0, %v4340_v60  ;;  %v4394_v59 = vld [vmem:[%s5379_s1 + $0x1e0] sm:$0xff]   ;;  %v4395_v60 = vld [vmem:[%s5379_s1 + $0x1a8] sm:$0xff]  }
  0x83   :  { %3953 = vmatpush3.bf16.msra.mxu0 %v4459_v0  ;;  %4003 = vmatpush3.bf16.msra.mxu1 %v4459_v0  ;;  %v4345_v0 = vld [vmem:[%s5381_s0 + $0xa0] sm:$0xff]  }
  0x84   :  { %3954 = vmatprep.subr.bf16.mxu0 %v4464_v1  ;;  %4004 = vmatprep.subr.bf16.mxu1 %v4464_v1 }
  0x85   :  { %3890 = vmatprep.mubr.msk.bf16.mxu0 %vm310_vm0, %v4341_v61  ;;  %3940 = vmatprep.mubr.msk.bf16.mxu1 %vm310_vm0, %v4342_v62  ;;  %v4396_v61 = vld [vmem:[%s5379_s1 + $0x1e8] sm:$0xff]   ;;  %v4397_v62 = vld [vmem:[%s5379_s1 + $0x1b0] sm:$0xff]  }
  0x87   :  { %3955 = vmatpush3.bf16.msra.mxu0 %v4464_v1  ;;  %4005 = vmatpush3.bf16.msra.mxu1 %v4464_v1  ;;  %v4347_v1 = vld [vmem:[%s5381_s0 + $0xa8] sm:$0xff]  }
  0x88   :  { %3956 = vmatprep.subr.bf16.mxu0 %v4475_v2  ;;  %4006 = vmatprep.subr.bf16.mxu1 %v4475_v2 }
  0x8a   :  { %3891 = vmatmul.mubr.msk.bf16.gmra.mrb[20].mxu0 %vm310_vm0, %v4343_v63  ;;  %3941 = vmatmul.mubr.msk.bf16.gmra.mrb[20].mxu1 %vm310_vm0, %v4344_v4  ;;  %v4398_v63 = vld [vmem:[%s5379_s1 + $0x1f0] sm:$0xff]   ;;  %v4399_v4 = vld [vmem:[%s5379_s1 + $0x1b8] sm:$0xff]  }
  0x8b   :  { %3957 = vmatpush3.bf16.msra.mxu0 %v4475_v2  ;;  %4007 = vmatpush3.bf16.msra.mxu1 %v4475_v2  ;;  %v4349_v2 = vld [vmem:[%s5381_s0 + $0xb0] sm:$0xff]  }
  0x8c   :  { %3958 = vmatprep.subr.bf16.mxu0 %v4482_v3  ;;  %4008 = vmatprep.subr.bf16.mxu1 %v4482_v3 }
  0x8d   :  { %3894 = vmatprep.mubr.msk.bf16.mxu0 %vm310_vm0, %v4345_v0  ;;  %3944 = vmatprep.mubr.msk.bf16.mxu1 %vm310_vm0, %v4346_v5  ;;  %v4400_v0 = vld [vmem:[%s5379_s1 + $0x1f8] sm:$0xff]   ;;  %v4401_v5 = vld [vmem:[%s5381_s0 + $0x180] sm:$0xff]  }
  0x8f   :  { %3959 = vmatpush3.bf16.msra.mxu0 %v4482_v3  ;;  %4009 = vmatpush3.bf16.msra.mxu1 %v4482_v3  ;;  %v4351_v3 = vld [vmem:[%s5381_s0 + $0xb8] sm:$0xff]  }
  0x90   :  { %3960 = vmatprep.subr.bf16.mxu0 %v4499_v6  ;;  %4010 = vmatprep.subr.bf16.mxu1 %v4499_v6 }
  0x92   :  { %3895 = vmatmul.mubr.msk.bf16.gmra.mrb[24].mxu0 %vm310_vm0, %v4347_v1  ;;  %3945 = vmatmul.mubr.msk.bf16.gmra.mrb[24].mxu1 %vm310_vm0, %v4348_v11  ;;  %v4402_v1 = vld [vmem:[%s5381_s0 + $0x1c0] sm:$0xff]   ;;  %v4403_v11 = vld [vmem:[%s5381_s0 + $0x188] sm:$0xff]  }
  0x93   :  { %3961 = vmatpush3.bf16.msra.mxu0 %v4499_v6  ;;  %4011 = vmatpush3.bf16.msra.mxu1 %v4499_v6  ;;  %v4353_v6 = vld [vmem:[%s5379_s1 + $0x100] sm:$0xff]  }
  0x94   :  { %3962 = vmatprep.subr.bf16.mxu0 %v4508_v7  ;;  %4012 = vmatprep.subr.bf16.mxu1 %v4508_v7 }
  0x95   :  { %3898 = vmatprep.mubr.msk.bf16.mxu0 %vm310_vm0, %v4349_v2  ;;  %3948 = vmatprep.mubr.msk.bf16.mxu1 %vm310_vm0, %v4350_v12  ;;  %v4404_v2 = vld [vmem:[%s5381_s0 + $0x1c8] sm:$0xff]   ;;  %v4405_v12 = vld [vmem:[%s5381_s0 + $0x190] sm:$0xff]  }
  0x97   :  { %3963 = vmatpush3.bf16.msra.mxu0 %v4508_v7  ;;  %4013 = vmatpush3.bf16.msra.mxu1 %v4508_v7  ;;  %v4355_v7 = vld [vmem:[%s5379_s1 + $0x108] sm:$0xff]  }
  0x98   :  { %3964 = vmatprep.subr.bf16.mxu0 %v4517_v8  ;;  %4014 = vmatprep.subr.bf16.mxu1 %v4517_v8 }
  0x9a   :  { %3899 = vmatmul.mubr.msk.bf16.gmra.mrb[28].mxu0 %vm310_vm0, %v4351_v3  ;;  %3949 = vmatmul.mubr.msk.bf16.gmra.mrb[28].mxu1 %vm310_vm0, %v4352_v13  ;;  %v4406_v3 = vld [vmem:[%s5381_s0 + $0x1d0] sm:$0xff]   ;;  %v4407_v13 = vld [vmem:[%s5381_s0 + $0x198] sm:$0xff]  }
  0x9b   :  { %3965 = vmatpush3.bf16.msra.mxu0 %v4517_v8  ;;  %4015 = vmatpush3.bf16.msra.mxu1 %v4517_v8  ;;  %v4357_v8 = vld [vmem:[%s5379_s1 + $0x110] sm:$0xff]  }
  0x9c   :  { %3966 = vmatprep.subr.bf16.mxu0 %v4526_v9  ;;  %4016 = vmatprep.subr.bf16.mxu1 %v4526_v9 }
  0x9d   :  { %3968 = vmatprep.mubr.bf16.mxu0 %v4353_v6  ;;  %4018 = vmatprep.mubr.bf16.mxu1 %v4354_v14  ;;  %v4408_v6 = vld [vmem:[%s5381_s0 + $0x1d8] sm:$0xff]   ;;  %v4409_v14 = vld [vmem:[%s5381_s0 + $0x1a0] sm:$0xff]  }
  0x9f   :  { %3967 = vmatpush3.bf16.msra.mxu0 %v4526_v9  ;;  %4017 = vmatpush3.bf16.msra.mxu1 %v4526_v9  ;;  %v4417_v9 = vld [vmem:[%s5378_s3] sm:$0xff]  }
  0xa0   :  { %3984 = vmatprep.subr.bf16.mxu0 %v4535_v10  ;;  %4034 = vmatprep.subr.bf16.mxu1 %v4535_v10 }
  0xa2   :  { %3969 = vmatmul.mubr.bf16.vlgmr.msra.gmra.mrb[32].mxu0 %v4355_v7  ;;  %4019 = vmatmul.mubr.bf16.vlgmr.msra.gmra.mrb[32].mxu1 %v4356_v15  ;;  %v4410_v7 = vld [vmem:[%s5381_s0 + $0x1e0] sm:$0xff]   ;;  %v4411_v15 = vld [vmem:[%s5381_s0 + $0x1a8] sm:$0xff]  }
  0xa3   :  { %3985 = vmatpush3.bf16.msra.mxu0 %v4535_v10  ;;  %4035 = vmatpush3.bf16.msra.mxu1 %v4535_v10  ;;  %v4361_v10 = vld [vmem:[%s5379_s1 + $0x120] sm:$0xff]  }
  0xa4   :  { %3972 = vmatprep.mubr.bf16.mxu0 %v4357_v8  ;;  %4022 = vmatprep.mubr.bf16.mxu1 %v4358_v16  ;;  %v4412_v8 = vld [vmem:[%s5381_s0 + $0x1e8] sm:$0xff]   ;;  %v4413_v16 = vld [vmem:[%s5381_s0 + $0x1b0] sm:$0xff]  }
  0xa5   :  { %4052 = vmatprep.subr.bf16.mxu0 %v4417_v9  ;;  %4102 = vmatprep.subr.bf16.mxu1 %v4417_v9 }
  0xaa   :  { %3973 = vmatmul.mubr.bf16.gmra.mrb[36].mxu0 %v4359_v17  ;;  %4023 = vmatmul.mubr.bf16.gmra.mrb[36].mxu1 %v4360_v18 }
  0xab   :  { %3976 = vmatprep.mubr.bf16.mxu0 %v4361_v10  ;;  %4026 = vmatprep.mubr.bf16.mxu1 %v4362_v19 }
  0xb2   :  { %3977 = vmatmul.mubr.bf16.gmra.mrb[40].mxu0 %v4363_v20  ;;  %4027 = vmatmul.mubr.bf16.gmra.mrb[40].mxu1 %v4364_v21  ;;  %v4415_v21 = vld [vmem:[%s5381_s0 + $0x1b8] sm:$0xff]  }
  0xb3   :  { %3980 = vmatprep.mubr.bf16.mxu0 %v4365_v22  ;;  %4030 = vmatprep.mubr.bf16.mxu1 %v4366_v23  ;;  %v4416_v22 = vld [vmem:[%s5381_s0 + $0x1f8] sm:$0xff]  }
  0xba   :  { %3981 = vmatmul.mubr.bf16.gmra.mrb[44].mxu0 %v4367_v24  ;;  %4031 = vmatmul.mubr.bf16.gmra.mrb[44].mxu1 %v4368_v25 }
  0xbb   :  { %3986 = vmatprep.mubr.msk.bf16.mxu0 %vm310_vm0, %v4369_v26  ;;  %4036 = vmatprep.mubr.msk.bf16.mxu1 %vm310_vm0, %v4370_v27 }
  0xc2   :  { %3987 = vmatmul.mubr.msk.bf16.vlgmr.msra.gmra.mrb[32].mxu0 %vm310_vm0, %v4371_v28  ;;  %4037 = vmatmul.mubr.msk.bf16.vlgmr.msra.gmra.mrb[32].mxu1 %vm310_vm0, %v4372_v29 }
  0xc3   :  { %4053 = vmatpush3.bf16.msra.mxu0 %v4417_v9  ;;  %4103 = vmatpush3.bf16.msra.mxu1 %v4417_v9  ;;  %v4414_v9 = vld [vmem:[%s5381_s0 + $0x1f0] sm:$0xff]  }
  0xc4   :  { %4054 = vmatprep.subr.bf16.mxu0 %v4418_v32  ;;  %4104 = vmatprep.subr.bf16.mxu1 %v4418_v32 }
  0xc5   :  { %3990 = vmatprep.mubr.msk.bf16.mxu0 %vm310_vm0, %v4373_v30  ;;  %4040 = vmatprep.mubr.msk.bf16.mxu1 %vm310_vm0, %v4374_v31 }
  0xc7   :  { %4055 = vmatpush3.bf16.msra.mxu0 %v4418_v32  ;;  %4105 = vmatpush3.bf16.msra.mxu1 %v4418_v32 }
  0xc8   :  { %4056 = vmatprep.subr.bf16.mxu0 %v4419_v35  ;;  %4106 = vmatprep.subr.bf16.mxu1 %v4419_v35 }
  0xca   :  { %3991 = vmatmul.mubr.msk.bf16.gmra.mrb[36].mxu0 %vm310_vm0, %v4375_v33  ;;  %4041 = vmatmul.mubr.msk.bf16.gmra.mrb[36].mxu1 %vm310_vm0, %v4376_v34 }
  0xcb   :  { %4057 = vmatpush3.bf16.msra.mxu0 %v4419_v35  ;;  %4107 = vmatpush3.bf16.msra.mxu1 %v4419_v35 }
  0xcc   :  { %4058 = vmatprep.subr.bf16.mxu0 %v4420_v38  ;;  %4108 = vmatprep.subr.bf16.mxu1 %v4420_v38 }
  0xcd   :  { %3994 = vmatprep.mubr.msk.bf16.mxu0 %vm310_vm0, %v4377_v36  ;;  %4044 = vmatprep.mubr.msk.bf16.mxu1 %vm310_vm0, %v4378_v37 }
  0xcf   :  { %4059 = vmatpush3.bf16.msra.mxu0 %v4420_v38  ;;  %4109 = vmatpush3.bf16.msra.mxu1 %v4420_v38 }
  0xd0   :  { %4060 = vmatprep.subr.bf16.mxu0 %v4421_v41  ;;  %4110 = vmatprep.subr.bf16.mxu1 %v4421_v41 }
  0xd2   :  { %3995 = vmatmul.mubr.msk.bf16.gmra.mrb[40].mxu0 %vm310_vm0, %v4379_v39  ;;  %4045 = vmatmul.mubr.msk.bf16.gmra.mrb[40].mxu1 %vm310_vm0, %v4380_v40 }
  0xd3   :  { %4061 = vmatpush3.bf16.msra.mxu0 %v4421_v41  ;;  %4111 = vmatpush3.bf16.msra.mxu1 %v4421_v41 }
  0xd4   :  { %4062 = vmatprep.subr.bf16.mxu0 %v4422_v44  ;;  %4112 = vmatprep.subr.bf16.mxu1 %v4422_v44 }
  0xd5   :  { %3998 = vmatprep.mubr.msk.bf16.mxu0 %vm310_vm0, %v4381_v42  ;;  %4048 = vmatprep.mubr.msk.bf16.mxu1 %vm310_vm0, %v4382_v43 }
  0xd7   :  { %4063 = vmatpush3.bf16.msra.mxu0 %v4422_v44  ;;  %4113 = vmatpush3.bf16.msra.mxu1 %v4422_v44 }
  0xd8   :  { %4064 = vmatprep.subr.bf16.mxu0 %v4423_v47  ;;  %4114 = vmatprep.subr.bf16.mxu1 %v4423_v47 }
  0xda   :  { %3999 = vmatmul.mubr.msk.bf16.gmra.mrb[44].mxu0 %vm310_vm0, %v4383_v45  ;;  %4049 = vmatmul.mubr.msk.bf16.gmra.mrb[44].mxu1 %vm310_vm0, %v4384_v46 }
  0xdb   :  { %4065 = vmatpush3.bf16.msra.mxu0 %v4423_v47  ;;  %4115 = vmatpush3.bf16.msra.mxu1 %v4423_v47 }
  0xdc   :  { %4066 = vmatprep.subr.bf16.mxu0 %v4424_v50  ;;  %4116 = vmatprep.subr.bf16.mxu1 %v4424_v50 }
  0xdd   :  { %4068 = vmatprep.mubr.bf16.mxu0 %v4385_v48  ;;  %4118 = vmatprep.mubr.bf16.mxu1 %v4386_v49 }
  0xdf   :  { %4067 = vmatpush3.bf16.msra.mxu0 %v4424_v50  ;;  %4117 = vmatpush3.bf16.msra.mxu1 %v4424_v50 }
  0xe0   :  { %4084 = vmatprep.subr.bf16.mxu0 %v4425_v53  ;;  %4134 = vmatprep.subr.bf16.mxu1 %v4425_v53 }
  0xe2   :  { %4069 = vmatmul.mubr.bf16.vlgmr.msra.gmra.mrb[48].mxu0 %v4387_v51  ;;  %4119 = vmatmul.mubr.bf16.vlgmr.msra.gmra.mrb[48].mxu1 %v4388_v52 }
  0xe3   :  { %4085 = vmatpush3.bf16.msra.mxu0 %v4425_v53  ;;  %4135 = vmatpush3.bf16.msra.mxu1 %v4425_v53 }
  0xe4   :  { %4072 = vmatprep.mubr.bf16.mxu0 %v4389_v54  ;;  %4122 = vmatprep.mubr.bf16.mxu1 %v4390_v55 }
  0xea   :  { %4073 = vmatmul.mubr.bf16.gmra.mrb[52].mxu0 %v4391_v56  ;;  %4123 = vmatmul.mubr.bf16.gmra.mrb[52].mxu1 %v4392_v57 }
  0xeb   :  { %4076 = vmatprep.mubr.bf16.mxu0 %v4393_v58  ;;  %4126 = vmatprep.mubr.bf16.mxu1 %v4394_v59 }
  0xf2   :  { %4077 = vmatmul.mubr.bf16.gmra.mrb[56].mxu0 %v4395_v60  ;;  %4127 = vmatmul.mubr.bf16.gmra.mrb[56].mxu1 %v4396_v61 }
  0xf3   :  { %4080 = vmatprep.mubr.bf16.mxu0 %v4397_v62  ;;  %4130 = vmatprep.mubr.bf16.mxu1 %v4398_v63 }
  0xfa   :  { %4081 = vmatmul.mubr.bf16.gmra.mrb[60].mxu0 %v4399_v4  ;;  %4131 = vmatmul.mubr.bf16.gmra.mrb[60].mxu1 %v4400_v0 }
  0xfb   :  { %4086 = vmatprep.mubr.msk.bf16.mxu0 %vm310_vm0, %v4401_v5  ;;  %4136 = vmatprep.mubr.msk.bf16.mxu1 %vm310_vm0, %v4402_v1 }
 0x102   :  { %4087 = vmatmul.mubr.msk.bf16.vlgmr.msra.gmra.mrb[48].mxu0 %vm310_vm0, %v4403_v11  ;;  %4137 = vmatmul.mubr.msk.bf16.vlgmr.msra.gmra.mrb[48].mxu1 %vm310_vm0, %v4404_v2 }
 0x103   :  { %4090 = vmatprep.mubr.msk.bf16.mxu0 %vm310_vm0, %v4405_v12  ;;  %4140 = vmatprep.mubr.msk.bf16.mxu1 %vm310_vm0, %v4406_v3 }
 0x10a   :  { %4091 = vmatmul.mubr.msk.bf16.gmra.mrb[52].mxu0 %vm310_vm0, %v4407_v13  ;;  %4141 = vmatmul.mubr.msk.bf16.gmra.mrb[52].mxu1 %vm310_vm0, %v4408_v6 }
 0x10b   :  { %4094 = vmatprep.mubr.msk.bf16.mxu0 %vm310_vm0, %v4409_v14  ;;  %4144 = vmatprep.mubr.msk.bf16.mxu1 %vm310_vm0, %v4410_v7 }
 0x112   :  { %4095 = vmatmul.mubr.msk.bf16.gmra.mrb[56].mxu0 %vm310_vm0, %v4411_v15  ;;  %4145 = vmatmul.mubr.msk.bf16.gmra.mrb[56].mxu1 %vm310_vm0, %v4412_v8 }
 0x113   :  { %4098 = vmatprep.mubr.msk.bf16.mxu0 %vm310_vm0, %v4413_v16  ;;  %4148 = vmatprep.mubr.msk.bf16.mxu1 %vm310_vm0, %v4414_v9 }
 0x115   :  { %v3788_v17 = vpop.f32.mrb[0].mxu0  ;;  %v3838_v18 = vpop.f32.mrb[0].mxu1 }
 0x116   :  { %v774_v10 = vmax.f32 %v3788_v17, %v3838_v18  ;;  %v369_v19 = vpop.f32.mrb[1].mxu0  ;;  %v709_v20 = vpop.f32.mrb[1].mxu1 }
 0x117   :  { %v772_v23 = vmax.f32 %v369_v19, %v709_v20  ;;  %v3789_v24 = vpop.f32.mrb[2].mxu0  ;;  %v3839_v25 = vpop.f32.mrb[2].mxu1 }
 0x118   :  { %v775_v26 = vmax.f32 %v3789_v24, %v3839_v25  ;;  %v372_v27 = vpop.f32.mrb[3].mxu0  ;;  %v712_v28 = vpop.f32.mrb[3].mxu1 }
 0x119   :  { %v773_v29 = vmax.f32 %v372_v27, %v712_v28 }
 0x11a   :  { %4099 = vmatmul.mubr.msk.bf16.gmra.mrb[60].mxu0 %vm310_vm0, %v4415_v21  ;;  %4149 = vmatmul.mubr.msk.bf16.gmra.mrb[60].mxu1 %vm310_vm0, %v4416_v22 }
 0x11d   :  { %v3792_v30 = vpop.f32.mrb[4].mxu0  ;;  %v3842_v31 = vpop.f32.mrb[4].mxu1 }
 0x11e   :  { %v778_v32 = vmax.f32 %v3792_v30, %v3842_v31  ;;  %v385_v33 = vpop.f32.mrb[5].mxu0  ;;  %v725_v34 = vpop.f32.mrb[5].mxu1 }
 0x11f   :  { %v776_v35 = vmax.f32 %v385_v33, %v725_v34  ;;  %v3793_v36 = vpop.f32.mrb[6].mxu0  ;;  %v3843_v37 = vpop.f32.mrb[6].mxu1 }
 0x120   :  { %v779_v38 = vmax.f32 %v3793_v36, %v3843_v37  ;;  %v388_v39 = vpop.f32.mrb[7].mxu0  ;;  %v728_v40 = vpop.f32.mrb[7].mxu1 }
 0x121   :  { %v777_v41 = vmax.f32 %v388_v39, %v728_v40 }
 0x125   :  { %v3796_v42 = vpop.f32.mrb[8].mxu0  ;;  %v3846_v43 = vpop.f32.mrb[8].mxu1 }
 0x126   :  { %v782_v44 = vmax.f32 %v3796_v42, %v3846_v43  ;;  %v401_v45 = vpop.f32.mrb[9].mxu0  ;;  %v741_v46 = vpop.f32.mrb[9].mxu1 }
 0x127   :  { %v780_v47 = vmax.f32 %v401_v45, %v741_v46  ;;  %v3797_v48 = vpop.f32.mrb[10].mxu0  ;;  %v3847_v49 = vpop.f32.mrb[10].mxu1 }
 0x128   :  { %v783_v50 = vmax.f32 %v3797_v48, %v3847_v49  ;;  %v404_v51 = vpop.f32.mrb[11].mxu0  ;;  %v744_v52 = vpop.f32.mrb[11].mxu1 }
 0x129   :  { %v781_v53 = vmax.f32 %v404_v51, %v744_v52 }
 0x12d   :  { %v5084_v54 = vpop.f32.mrb[12].mxu0  ;;  %v3850_v55 = vpop.f32.mrb[12].mxu1 }
 0x12e   :  { %v786_v56 = vmax.f32 %v5084_v54, %v3850_v55  ;;  %v5087_v57 = vpop.f32.mrb[13].mxu0  ;;  %v757_v58 = vpop.f32.mrb[13].mxu1 }
 0x12f   :  { %v784_v59 = vmax.f32 %v5087_v57, %v757_v58  ;;  %v5090_v60 = vpop.f32.mrb[14].mxu0  ;;  %v5092_v61 = vpop.f32.mrb[14].mxu1 }
 0x130   :  { %v787_v62 = vmax.f32 %v5090_v60, %v5092_v61  ;;  %v5096_v63 = vpop.f32.mrb[15].mxu0  ;;  %v5098_v4 = vpop.f32.mrb[15].mxu1 }
 0x131   :  { %v785_v0 = vmax.f32 %v5096_v63, %v5098_v4 }
 0x155   :  { %v3888_v5 = vpop.f32.mrb[16].mxu0  ;;  %v5102_v1 = vpop.f32.mrb[16].mxu1 }
 0x156   :  { %v5104_v11 = vmax.f32 %v774_v10, %v3888_v5  ;;  %v1065_v2 = vpop.f32.mrb[17].mxu0  ;;  %v5106_v12 = vpop.f32.mrb[17].mxu1 }
 0x157   :  { %v5108_v3 = vmax.f32 %v772_v23, %v1065_v2  ;;  %v3889_v13 = vpop.f32.mrb[18].mxu0  ;;  %v5110_v6 = vpop.f32.mrb[18].mxu1 }
 0x158   :  { %v1486_v14 = vmax.f32 %v5104_v11, %v5102_v1  ;;  %v5114_v7 = vmax.f32 %v775_v26, %v3889_v13  ;;  %v1068_v15 = vpop.f32.mrb[19].mxu0  ;;  %v5116_v8 = vpop.f32.mrb[19].mxu1 }
 0x159   :  { %v1484_v16 = vmax.f32 %v5108_v3, %v5106_v12  ;;  %v5120_v9 = vmax.f32 %v773_v29, %v1068_v15 }
 0x15a   :  { %v1487_v17 = vmax.f32 %v5114_v7, %v5110_v6 }
 0x15b   :  { %v1485_v18 = vmax.f32 %v5120_v9, %v5116_v8 }
 0x15d   :  { %v3892_v10 = vpop.f32.mrb[20].mxu0  ;;  %v5126_v19 = vpop.f32.mrb[20].mxu1 }
 0x15e   :  { %v5128_v20 = vmax.f32 %v778_v32, %v3892_v10  ;;  %v1081_v21 = vpop.f32.mrb[21].mxu0  ;;  %v5130_v22 = vpop.f32.mrb[21].mxu1 }
 0x15f   :  { %v5132_v23 = vmax.f32 %v776_v35, %v1081_v21  ;;  %v3893_v24 = vpop.f32.mrb[22].mxu0  ;;  %v5134_v25 = vpop.f32.mrb[22].mxu1 }
 0x160   :  { %v1490_v26 = vmax.f32 %v5128_v20, %v5126_v19  ;;  %v5138_v27 = vmax.f32 %v779_v38, %v3893_v24  ;;  %v1084_v28 = vpop.f32.mrb[23].mxu0  ;;  %v5140_v29 = vpop.f32.mrb[23].mxu1 }
 0x161   :  { %v1488_v30 = vmax.f32 %v5132_v23, %v5130_v22  ;;  %v5144_v31 = vmax.f32 %v777_v41, %v1084_v28 }
 0x162   :  { %v1491_v32 = vmax.f32 %v5138_v27, %v5134_v25 }
 0x163   :  { %v1489_v33 = vmax.f32 %v5144_v31, %v5140_v29 }
 0x165   :  { %v3896_v34 = vpop.f32.mrb[24].mxu0  ;;  %v5150_v35 = vpop.f32.mrb[24].mxu1 }
 0x166   :  { %v5152_v36 = vmax.f32 %v782_v44, %v3896_v34  ;;  %v1097_v37 = vpop.f32.mrb[25].mxu0  ;;  %v5154_v38 = vpop.f32.mrb[25].mxu1 }
 0x167   :  { %v5156_v39 = vmax.f32 %v780_v47, %v1097_v37  ;;  %v3897_v40 = vpop.f32.mrb[26].mxu0  ;;  %v5158_v42 = vpop.f32.mrb[26].mxu1 }
 0x168   :  { %v1494_v41 = vmax.f32 %v5152_v36, %v5150_v35  ;;  %v5162_v43 = vmax.f32 %v783_v50, %v3897_v40  ;;  %v1100_v45 = vpop.f32.mrb[27].mxu0  ;;  %v5164_v46 = vpop.f32.mrb[27].mxu1 }
 0x169   :  { %v1492_v44 = vmax.f32 %v5156_v39, %v5154_v38  ;;  %v5168_v48 = vmax.f32 %v781_v53, %v1100_v45 }
 0x16a   :  { %v1495_v47 = vmax.f32 %v5162_v43, %v5158_v42 }
 0x16b   :  { %v1493_v49 = vmax.f32 %v5168_v48, %v5164_v46 }
 0x16d   :  { %v3900_v51 = vpop.f32.mrb[28].mxu0  ;;  %v5174_v52 = vpop.f32.mrb[28].mxu1 }
 0x16e   :  { %v5176_v54 = vmax.f32 %v786_v56, %v3900_v51  ;;  %v1113_v50 = vpop.f32.mrb[29].mxu0  ;;  %v5178_v55 = vpop.f32.mrb[29].mxu1 }
 0x16f   :  { %v5180_v57 = vmax.f32 %v784_v59, %v1113_v50  ;;  %v3901_v58 = vpop.f32.mrb[30].mxu0  ;;  %v5182_v60 = vpop.f32.mrb[30].mxu1 }
 0x170   :  { %v1498_v53 = vmax.f32 %v5176_v54, %v5174_v52  ;;  %v5186_v61 = vmax.f32 %v787_v62, %v3901_v58  ;;  %v1116_v63 = vpop.f32.mrb[31].mxu0  ;;  %v5188_v4 = vpop.f32.mrb[31].mxu1 }
 0x171   :  { %v1496_v56 = vmax.f32 %v5180_v57, %v5178_v55  ;;  %v5192_v5 = vmax.f32 %v785_v0, %v1116_v63 }
 0x172   :  { %v1499_v59 = vmax.f32 %v5186_v61, %v5182_v60 }
 0x173   :  { %v1497_v1 = vmax.f32 %v5192_v5, %v5188_v4 }
 0x195   :  { %v3988_v11 = vpop.f32.mrb[32].mxu0  ;;  %v5198_v2 = vpop.f32.mrb[32].mxu1 }
 0x196   :  { %v5200_v12 = vmax.f32 %v1486_v14, %v3988_v11  ;;  %v1777_v62 = vpop.f32.mrb[33].mxu0  ;;  %v5202_v3 = vpop.f32.mrb[33].mxu1 }
 0x197   :  { %v5204_v13 = vmax.f32 %v1484_v16, %v1777_v62  ;;  %v3989_v6 = vpop.f32.mrb[34].mxu0  ;;  %v5206_v7 = vpop.f32.mrb[34].mxu1 }
 0x198   :  { %v2198_v0 = vmax.f32 %v5200_v12, %v5198_v2  ;;  %v5210_v15 = vmax.f32 %v1487_v17, %v3989_v6  ;;  %v1780_v8 = vpop.f32.mrb[35].mxu0  ;;  %v5212_v9 = vpop.f32.mrb[35].mxu1  ;;  %v5297_v6 = vld [vmem:[%s5382_s4] ss:$0 sm:$0xff] }
 0x199   :  { %v2196_v14 = vmax.f32 %v5204_v13, %v5202_v3  ;;  %v5216_v10 = vmax.f32 %v1485_v18, %v1780_v8 }
 0x19a   :  { %v2199_v16 = vmax.f32 %v5210_v15, %v5206_v7 }
 0x19b   :  { %v2197_v19 = vmax.f32 %v5216_v10, %v5212_v9 }
 0x19d   :  { %v3992_v20 = vpop.f32.mrb[36].mxu0  ;;  %v5222_v21 = vpop.f32.mrb[36].mxu1 }
 0x19e   :  { %v5224_v22 = vmax.f32 %v1490_v26, %v3992_v20  ;;  %v1793_v17 = vpop.f32.mrb[37].mxu0  ;;  %v5226_v23 = vpop.f32.mrb[37].mxu1 }
 0x19f   :  { %v5228_v24 = vmax.f32 %v1488_v30, %v1793_v17  ;;  %v3993_v25 = vpop.f32.mrb[38].mxu0  ;;  %v5230_v27 = vpop.f32.mrb[38].mxu1 }
 0x1a0   :  { %v2202_v18 = vmax.f32 %v5224_v22, %v5222_v21  ;;  %v5234_v28 = vmax.f32 %v1491_v32, %v3993_v25  ;;  %v1796_v29 = vpop.f32.mrb[39].mxu0  ;;  %v5236_v31 = vpop.f32.mrb[39].mxu1 }
 0x1a1   :  { %v2200_v26 = vmax.f32 %v5228_v24, %v5226_v23  ;;  %v5240_v34 = vmax.f32 %v1489_v33, %v1796_v29 }
 0x1a2   :  { %v2203_v30 = vmax.f32 %v5234_v28, %v5230_v27 }
 0x1a3   :  { %v2201_v35 = vmax.f32 %v5240_v34, %v5236_v31 }
 0x1a5   :  { %v3996_v36 = vpop.f32.mrb[40].mxu0  ;;  %v5246_v37 = vpop.f32.mrb[40].mxu1 }
 0x1a6   :  { %v5248_v38 = vmax.f32 %v1494_v41, %v3996_v36  ;;  %v1809_v32 = vpop.f32.mrb[41].mxu0  ;;  %v5250_v39 = vpop.f32.mrb[41].mxu1 }
 0x1a7   :  { %v5252_v40 = vmax.f32 %v1492_v44, %v1809_v32  ;;  %v3997_v42 = vpop.f32.mrb[42].mxu0  ;;  %v5254_v43 = vpop.f32.mrb[42].mxu1 }
 0x1a8   :  { %v2206_v33 = vmax.f32 %v5248_v38, %v5246_v37  ;;  %v5258_v45 = vmax.f32 %v1495_v47, %v3997_v42  ;;  %v1812_v46 = vpop.f32.mrb[43].mxu0  ;;  %v5260_v48 = vpop.f32.mrb[43].mxu1 }
 0x1a9   :  { %v2204_v41 = vmax.f32 %v5252_v40, %v5250_v39  ;;  %v5264_v51 = vmax.f32 %v1493_v49, %v1812_v46 }
 0x1aa   :  { %v2207_v44 = vmax.f32 %v5258_v45, %v5254_v43 }
 0x1ab   :  { %v2205_v52 = vmax.f32 %v5264_v51, %v5260_v48 }
 0x1ad   :  { %v4000_v54 = vpop.f32.mrb[44].mxu0  ;;  %v5270_v50 = vpop.f32.mrb[44].mxu1 }
 0x1ae   :  { %v5272_v55 = vmax.f32 %v1498_v53, %v4000_v54  ;;  %v1825_v47 = vpop.f32.mrb[45].mxu0  ;;  %v5274_v57 = vpop.f32.mrb[45].mxu1 }
 0x1af   :  { %v5276_v58 = vmax.f32 %v1496_v56, %v1825_v47  ;;  %v4001_v60 = vpop.f32.mrb[46].mxu0  ;;  %v5278_v61 = vpop.f32.mrb[46].mxu1 }
 0x1b0   :  { %v2210_v49 = vmax.f32 %v5272_v55, %v5270_v50  ;;  %v5282_v63 = vmax.f32 %v1499_v59, %v4001_v60  ;;  %v1828_v4 = vpop.f32.mrb[47].mxu0  ;;  %v5284_v5 = vpop.f32.mrb[47].mxu1 }
 0x1b1   :  { %v2208_v53 = vmax.f32 %v5276_v58, %v5274_v57  ;;  %v5288_v11 = vmax.f32 %v1497_v1, %v1828_v4 }
 0x1b2   :  { %v2211_v56 = vmax.f32 %v5282_v63, %v5278_v61 }
 0x1b3   :  { %v2209_v2 = vmax.f32 %v5288_v11, %v5284_v5 }
 0x1d5   :  { %v4088_v12 = vpop.f32.mrb[48].mxu0  ;;  %v4138_v62 = vpop.f32.mrb[48].mxu1 }
 0x1d6   :  { %v2554_v3 = vmax.f32 %v2198_v0, %v4088_v12  ;;  %v2489_v13 = vpop.f32.mrb[49].mxu0  ;;  %v2845_v59 = vpop.f32.mrb[49].mxu1 }
 0x1d7   :  { %v2552_v7 = vmax.f32 %v2196_v14, %v2489_v13  ;;  %v4089_v15 = vpop.f32.mrb[50].mxu0  ;;  %v4139_v1 = vpop.f32.mrb[50].mxu1 }
 0x1d8   :  { %v2910_v8 = vmax.f32 %v2554_v3, %v4138_v62  ;;  %v2555_v20 = vmax.f32 %v2199_v16, %v4089_v15  ;;  %v2492_v17 = vpop.f32.mrb[51].mxu0  ;;  %v2848_v25 = vpop.f32.mrb[51].mxu1 }
 0x1d9   :  { %v2908_v29 = vmax.f32 %v2552_v7, %v2845_v59  ;;  %v2553_v36 = vmax.f32 %v2197_v19, %v2492_v17 }
 0x1da   :  { %v2933_v0 = vadd.f32 %v5297_v6, %v2910_v8  ;;  %v2911_v32 = vmax.f32 %v2555_v20, %v4139_v1 }
 0x1db   :  { %v2931_v42 = vadd.f32 %v5297_v6, %v2908_v29  ;;  %v2909_v46 = vmax.f32 %v2553_v36, %v2848_v25 }
 0x1dc   :  { %v2934_v54 = vadd.f32 %v5297_v6, %v2911_v32  ;;  %v2949_v16 = vmax.f32 %v2933_v0, 0.0 }
 0x1dd   :  { %v2932_v14 = vadd.f32 %v5297_v6, %v2909_v46  ;;  %v4092_v47 = vpop.f32.mrb[52].mxu0  ;;  %v4142_v60 = vpop.f32.mrb[52].mxu1  ;;  %v2947_v19 = vmax.f32 %v2931_v42, 0.0 }
 0x1de   :  { %v2950_v4 = vmax.f32 %v2934_v54, 0.0  ;;  %v2558_v12 = vmax.f32 %v2202_v18, %v4092_v47  ;;  %v2505_v9 = vpop.f32.mrb[53].mxu0  ;;  %v2861_v10 = vpop.f32.mrb[53].mxu1 }
 0x1df   :  { %v2948_v62 = vmax.f32 %v2932_v14, 0.0  ;;  %v2556_v3 = vmax.f32 %v2200_v26, %v2505_v9  ;;  %v4093_v13 = vpop.f32.mrb[54].mxu0  ;;  %v4143_v59 = vpop.f32.mrb[54].mxu1 }
 0x1e0   :  { %v3513_v7 = vpack.c.bf16 %v2950_v4, %v2949_v16  ;;  %v2914_v15 = vmax.f32 %v2558_v12, %v4142_v60  ;;  %v2559_v1 = vmax.f32 %v2203_v30, %v4093_v13  ;;  %v2508_v8 = vpop.f32.mrb[55].mxu0  ;;  %v2864_v20 = vpop.f32.mrb[55].mxu1 }
 0x1e1   :  { %v3508_v21 = vpack.c.bf16 %v2948_v62, %v2947_v19  ;;  %v2912_v22 = vmax.f32 %v2556_v3, %v2861_v10  ;;  %v2557_v18 = vmax.f32 %v2201_v35, %v2508_v8 }
 0x1e2   :  { %3545 = vst [vmem:[%s5383_s5 + $0x8] sm:$0xff] %v3513_v7   ;;  %v2937_v23 = vadd.f32 %v5297_v6, %v2914_v15  ;;  %v2915_v24 = vmax.f32 %v2559_v1, %v4143_v59 }
 0x1e3   :  { %3509 = vst [vmem:[%s5383_s5] sm:$0xff] %v3508_v21   ;;  %v2935_v27 = vadd.f32 %v5297_v6, %v2912_v22  ;;  %v2913_v28 = vmax.f32 %v2557_v18, %v2864_v20 }
 0x1e4   :  { %v2938_v26 = vadd.f32 %v5297_v6, %v2915_v24  ;;  %v2953_v35 = vmax.f32 %v2937_v23, 0.0 }
 0x1e5   :  { %v2936_v30 = vadd.f32 %v5297_v6, %v2913_v28  ;;  %v4096_v31 = vpop.f32.mrb[56].mxu0  ;;  %v4146_v34 = vpop.f32.mrb[56].mxu1  ;;  %v2951_v0 = vmax.f32 %v2935_v27, 0.0 }
 0x1e6   :  { %v2954_v17 = vmax.f32 %v2938_v26, 0.0  ;;  %v2562_v25 = vmax.f32 %v2206_v33, %v4096_v31  ;;  %v2521_v29 = vpop.f32.mrb[57].mxu0  ;;  %v2877_v36 = vpop.f32.mrb[57].mxu1 }
 0x1e7   :  { %v2952_v32 = vmax.f32 %v2936_v30, 0.0  ;;  %v2560_v42 = vmax.f32 %v2204_v41, %v2521_v29  ;;  %v4097_v46 = vpop.f32.mrb[58].mxu0  ;;  %v4147_v54 = vpop.f32.mrb[58].mxu1 }
 0x1e8   :  { %v3523_v14 = vpack.c.bf16 %v2954_v17, %v2953_v35  ;;  %v2918_v47 = vmax.f32 %v2562_v25, %v4146_v34  ;;  %v2563_v60 = vmax.f32 %v2207_v44, %v4097_v46  ;;  %v2524_v16 = vpop.f32.mrb[59].mxu0  ;;  %v2880_v4 = vpop.f32.mrb[59].mxu1 }
 0x1e9   :  { %v3518_v37 = vpack.c.bf16 %v2952_v32, %v2951_v0  ;;  %v2916_v38 = vmax.f32 %v2560_v42, %v2877_v36  ;;  %v2561_v33 = vmax.f32 %v2205_v52, %v2524_v16 }
 0x1ea   :  { %3547 = vst [vmem:[%s5383_s5 + $0x18] sm:$0xff] %v3523_v14   ;;  %v2941_v39 = vadd.f32 %v5297_v6, %v2918_v47  ;;  %v2919_v40 = vmax.f32 %v2563_v60, %v4147_v54 }
 0x1eb   :  { %3546 = vst [vmem:[%s5383_s5 + $0x10] sm:$0xff] %v3518_v37   ;;  %v2939_v43 = vadd.f32 %v5297_v6, %v2916_v38  ;;  %v2917_v45 = vmax.f32 %v2561_v33, %v2880_v4 }
 0x1ec   :  { %v2942_v41 = vadd.f32 %v5297_v6, %v2919_v40  ;;  %v2957_v52 = vmax.f32 %v2941_v39, 0.0 }
 0x1ed   :  { %v2940_v44 = vadd.f32 %v5297_v6, %v2917_v45  ;;  %v4100_v48 = vpop.f32.mrb[60].mxu0  ;;  %v4150_v51 = vpop.f32.mrb[60].mxu1  ;;  %v2955_v62 = vmax.f32 %v2939_v43, 0.0 }
 0x1ee   :  { %v2958_v12 = vmax.f32 %v2942_v41, 0.0  ;;  %v2566_v9 = vmax.f32 %v2210_v49, %v4100_v48  ;;  %v2537_v10 = vpop.f32.mrb[61].mxu0  ;;  %v2893_v19 = vpop.f32.mrb[61].mxu1 }
 0x1ef   :  { %v2956_v3 = vmax.f32 %v2940_v44, 0.0  ;;  %v2564_v13 = vmax.f32 %v2208_v53, %v2537_v10  ;;  %v4101_v59 = vpop.f32.mrb[62].mxu0  ;;  %v4151_v7 = vpop.f32.mrb[62].mxu1 }
 0x1f0   :  { %v3533_v15 = vpack.c.bf16 %v2958_v12, %v2957_v52  ;;  %v2922_v1 = vmax.f32 %v2566_v9, %v4150_v51  ;;  %v2567_v8 = vmax.f32 %v2211_v56, %v4101_v59  ;;  %v2540_v20 = vpop.f32.mrb[63].mxu0  ;;  %v2896_v21 = vpop.f32.mrb[63].mxu1 }
 0x1f1   :  { %v3528_v50 = vpack.c.bf16 %v2956_v3, %v2955_v62  ;;  %v2920_v55 = vmax.f32 %v2564_v13, %v2893_v19  ;;  %v2565_v49 = vmax.f32 %v2209_v2, %v2540_v20 }
 0x1f2   :  { %3549 = vst [vmem:[%s5383_s5 + $0x28] sm:$0xff] %v3533_v15   ;;  %v2945_v57 = vadd.f32 %v5297_v6, %v2922_v1  ;;  %v2923_v58 = vmax.f32 %v2567_v8, %v4151_v7 }
 0x1f3   :  { %3548 = vst [vmem:[%s5383_s5 + $0x20] sm:$0xff] %v3528_v50   ;;  %v2943_v61 = vadd.f32 %v5297_v6, %v2920_v55  ;;  %v2921_v63 = vmax.f32 %v2565_v49, %v2896_v21 }
 0x1f4   :  { %v2946_v53 = vadd.f32 %v5297_v6, %v2923_v58  ;;  %v2961_v5 = vmax.f32 %v2945_v57, 0.0 }
 0x1f5   :  { %v2944_v56 = vadd.f32 %v5297_v6, %v2921_v63  ;;  %v2959_v2 = vmax.f32 %v2943_v61, 0.0 }
 0x1f6   :  { %v2962_v11 = vmax.f32 %v2946_v53, 0.0 }
 0x1f7   :  { %v2960_v22 = vmax.f32 %v2944_v56, 0.0 }
 0x1f8   :  { %v3543_v18 = vpack.c.bf16 %v2962_v11, %v2961_v5 }
 0x1f9   :  { %v3538_v23 = vpack.c.bf16 %v2960_v22, %v2959_v2 }
 0x1fa   :  { %3551 = vst [vmem:[%s5383_s5 + $0x38] sm:$0xff] %v3543_v18  }
 0x1fb   :  { %3550 = vst [vmem:[%s5383_s5 + $0x30] sm:$0xff] %v3538_v23  }

// kernel: surfacenet_forward.9
= control target key start
LH: loop header
LB: loop body
LE: loop exit
PB: predicated region body
PF: predicated region fallthrough
CT: control target
= control target key end

     0   :  { %v2550_v2 = vmov 0   ;;  %vm263_vm0 = vcmask 130048   ;;  %s3399_s0 = inlined_call_operand.vmem [shape: bf16[8,64,16], index: 0, kind: input, shape index: {}]   ;;  %s3400_s1 = inlined_call_operand.vmem [shape: bf16[8,64,128], index: 1, kind: input, shape index: {}]   ;;  %s3401_s2 = inlined_call_operand.vmem [shape: bf16[16,256], index: 2, kind: input, shape index: {}]   ;;  %s3402_s3 = inlined_call_operand.vmem [shape: bf16[128,256], index: 3, kind: input, shape index: {}]   ;;  %s3403_s4 = inlined_call_operand.vmem [shape: f32[1,256], index: 4, kind: input, shape index: {}]   ;;  %s3404_s5 = inlined_call_operand.hbm [shape: f32[64,256], index: 5, kind: output, shape index: {}]  }
   0x1   :  { %v2587_v0 = vld [vmem:[%s3402_s3 + $0x4] ss:$8 sps:$4 sm:$0xff]   ;;  %v2592_v1 = vld [vmem:[%s3402_s3] ss:$8 sps:$4 sm:$0xff]   ;;  %192 = vmatprep.mubr.bf16.mxu0 %v2550_v2  ;;  %423 = vmatprep.mubr.bf16.mxu1 %v2550_v2  ;;  %v2601_v3 = vld [vmem:[%s3402_s3 + $0x14] ss:$8 sps:$4 sm:$0xff]  }
   0x2   :  { %160 = vmatprep.subr.bf16.mxu0 %v2587_v0  ;;  %391 = vmatprep.subr.bf16.mxu1 %v2587_v0  ;;  %v2608_v4 = vld [vmem:[%s3402_s3 + $0x10] ss:$8 sps:$4 sm:$0xff]   ;;  %v2615_v5 = vld [vmem:[%s3402_s3 + $0x24] ss:$8 sps:$4 sm:$0xff]   ;;  %v2622_v6 = vld [vmem:[%s3402_s3 + $0x20] ss:$8 sps:$4 sm:$0xff]  }
   0x3   :  { %161 = vmatpush1.bf16.msra.mxu0 %v2592_v1  ;;  %392 = vmatpush1.bf16.msra.mxu1 %v2592_v1  ;;  %v2629_v7 = vld [vmem:[%s3402_s3 + $0x34] ss:$8 sps:$4 sm:$0xff]   ;;  %v2636_v8 = vld [vmem:[%s3402_s3 + $0x30] ss:$8 sps:$4 sm:$0xff]   ;;  %v2643_v9 = vld [vmem:[%s3402_s3 + $0x44] ss:$8 sps:$4 sm:$0xff]  }
   0x4   :  { %162 = vmatprep.subr.bf16.mxu0 %v2601_v3  ;;  %393 = vmatprep.subr.bf16.mxu1 %v2601_v3  ;;  %v2650_v10 = vld [vmem:[%s3402_s3 + $0x40] ss:$8 sps:$4 sm:$0xff]   ;;  %v2657_v11 = vld [vmem:[%s3402_s3 + $0x54] ss:$8 sps:$4 sm:$0xff]   ;;  %v2664_v12 = vld [vmem:[%s3402_s3 + $0x50] ss:$8 sps:$4 sm:$0xff]  }
   0x5   :  { %v2671_v13 = vld [vmem:[%s3402_s3 + $0x64] ss:$8 sps:$4 sm:$0xff]   ;;  %v2678_v14 = vld [vmem:[%s3402_s3 + $0x60] ss:$8 sps:$4 sm:$0xff]   ;;  %v2685_v15 = vld [vmem:[%s3402_s3 + $0x74] ss:$8 sps:$4 sm:$0xff]  }
   0x6   :  { %v2692_v16 = vld [vmem:[%s3402_s3 + $0x70] ss:$8 sps:$4 sm:$0xff]   ;;  %v2699_v17 = vld [vmem:[%s3401_s2 + $0x4] ss:$8 sps:$4 sm:$0xff]   ;;  %v2712_v20 = vld [vmem:[%s3401_s2] ss:$8 sps:$4 sm:$0xff]  }
   0x7   :  { %163 = vmatpush1.bf16.msra.mxu0 %v2608_v4  ;;  %394 = vmatpush1.bf16.msra.mxu1 %v2608_v4  ;;  %v2459_v18 = vld [vmem:[%s3400_s1] sm:$0xff]   ;;  %v2464_v21 = vld [vmem:[%s3400_s1 + $0x8] sm:$0xff]   ;;  %v2466_v23 = vld [vmem:[%s3400_s1 + $0x10] sm:$0xff]  }
   0x8   :  { %164 = vmatprep.subr.bf16.mxu0 %v2615_v5  ;;  %395 = vmatprep.subr.bf16.mxu1 %v2615_v5  ;;  %v2462_v19 = vld [vmem:[%s3400_s1 + $0x20] sm:$0xff]   ;;  %v2465_v22 = vld [vmem:[%s3400_s1 + $0x28] sm:$0xff]   ;;  %v2467_v24 = vld [vmem:[%s3400_s1 + $0x30] sm:$0xff]  }
   0x9   :  { %v2468_v25 = vld [vmem:[%s3400_s1 + $0x18] sm:$0xff]   ;;  %v2470_v27 = vld [vmem:[%s3399_s0] sm:$0xff]  }
   0xa   :  { %v2469_v26 = vld [vmem:[%s3400_s1 + $0x38] sm:$0xff]   ;;  %v2471_v28 = vld [vmem:[%s3399_s0 + $0x20] sm:$0xff]  }
   0xb   :  { %165 = vmatpush1.bf16.msra.mxu0 %v2622_v6  ;;  %396 = vmatpush1.bf16.msra.mxu1 %v2622_v6 }
   0xc   :  { %166 = vmatprep.subr.bf16.mxu0 %v2629_v7  ;;  %397 = vmatprep.subr.bf16.mxu1 %v2629_v7 }
   0xf   :  { %167 = vmatpush1.bf16.msra.mxu0 %v2636_v8  ;;  %398 = vmatpush1.bf16.msra.mxu1 %v2636_v8 }
  0x10   :  { %168 = vmatprep.subr.bf16.mxu0 %v2643_v9  ;;  %399 = vmatprep.subr.bf16.mxu1 %v2643_v9 }
  0x13   :  { %169 = vmatpush1.bf16.msra.mxu0 %v2650_v10  ;;  %400 = vmatpush1.bf16.msra.mxu1 %v2650_v10 }
  0x14   :  { %170 = vmatprep.subr.bf16.mxu0 %v2657_v11  ;;  %401 = vmatprep.subr.bf16.mxu1 %v2657_v11 }
  0x17   :  { %171 = vmatpush1.bf16.msra.mxu0 %v2664_v12  ;;  %402 = vmatpush1.bf16.msra.mxu1 %v2664_v12 }
  0x18   :  { %172 = vmatprep.subr.bf16.mxu0 %v2671_v13  ;;  %403 = vmatprep.subr.bf16.mxu1 %v2671_v13 }
  0x1b   :  { %173 = vmatpush1.bf16.msra.mxu0 %v2678_v14  ;;  %404 = vmatpush1.bf16.msra.mxu1 %v2678_v14 }
  0x1c   :  { %174 = vmatprep.subr.bf16.mxu0 %v2685_v15  ;;  %405 = vmatprep.subr.bf16.mxu1 %v2685_v15 }
  0x1f   :  { %175 = vmatpush1.bf16.msra.mxu0 %v2692_v16  ;;  %406 = vmatpush1.bf16.msra.mxu1 %v2692_v16 }
  0x20   :  { %276 = vmatprep.subr.bf16.mxu0 %v2699_v17  ;;  %496 = vmatprep.subr.bf16.mxu1 %v2699_v17 }
  0x22   :  { %193 = vmatmul.mubr.bf16.vlgmr.msra.gmra.mrb[0].mxu0 %v2459_v18  ;;  %424 = vmatmul.mubr.bf16.vlgmr.msra.gmra.mrb[0].mxu1 %v2462_v19 }
  0x23   :  { %277 = vmatpush1.bf16.msra.mxu0 %v2712_v20  ;;  %497 = vmatpush1.bf16.msra.mxu1 %v2712_v20 }
  0x24   :  { %202 = vmatprep.mubr.bf16.mxu0 %v2550_v2  ;;  %433 = vmatprep.mubr.bf16.mxu1 %v2550_v2 }
  0x25   :  { %627 = vmatprep.subr.bf16.mxu0 %v2587_v0  ;;  %863 = vmatprep.subr.bf16.mxu1 %v2587_v0 }
  0x2a   :  { %203 = vmatmul.mubr.bf16.gmra.mrb[4].mxu0 %v2464_v21  ;;  %434 = vmatmul.mubr.bf16.gmra.mrb[4].mxu1 %v2465_v22 }
  0x2b   :  { %212 = vmatprep.mubr.bf16.mxu0 %v2550_v2  ;;  %443 = vmatprep.mubr.bf16.mxu1 %v2550_v2 }
  0x32   :  { %213 = vmatmul.mubr.bf16.gmra.mrb[8].mxu0 %v2466_v23  ;;  %444 = vmatmul.mubr.bf16.gmra.mrb[8].mxu1 %v2467_v24 }
  0x33   :  { %222 = vmatprep.mubr.bf16.mxu0 %v2550_v2  ;;  %453 = vmatprep.mubr.bf16.mxu1 %v2550_v2 }
  0x3a   :  { %223 = vmatmul.mubr.bf16.gmra.mrb[12].mxu0 %v2468_v25  ;;  %454 = vmatmul.mubr.bf16.gmra.mrb[12].mxu1 %v2469_v26 }
  0x3b   :  { %308 = vmatprep.mubr.bf16.mxu0 %v2550_v2  ;;  %528 = vmatprep.mubr.bf16.mxu1 %v2550_v2 }
  0x42   :  { %2103 = vmatmul.mubr.msk.bf16.vlgmr.msra.gmra.mrb[0].mxu0 %vm263_vm0, %v2470_v27  ;;  %2131 = vmatmul.mubr.msk.bf16.vlgmr.msra.gmra.mrb[0].mxu1 %vm263_vm0, %v2471_v28 }
  0x43   :  { %628 = vmatpush1.bf16.msra.mxu0 %v2592_v1  ;;  %864 = vmatpush1.bf16.msra.mxu1 %v2592_v1 }
  0x44   :  { %629 = vmatprep.subr.bf16.mxu0 %v2601_v3  ;;  %865 = vmatprep.subr.bf16.mxu1 %v2601_v3 }
  0x45   :  { %10 = vsyncpa [#allocation3], 0  ;;  %318 = vmatprep.mubr.bf16.mxu0 %v2550_v2  ;;  %538 = vmatprep.mubr.bf16.mxu1 %v2550_v2  ;;  %v2472_v29 = vld [vmem:[%s3399_s0 + $0x8] sm:$0xff]   ;;  %v2474_v31 = vld [vmem:[%s3399_s0 + $0x10] sm:$0xff]  }
  0x46   :  { %v2473_v30 = vld [vmem:[%s3399_s0 + $0x28] sm:$0xff]   ;;  %v2475_v32 = vld [vmem:[%s3399_s0 + $0x30] sm:$0xff]   ;;  %v2476_v33 = vld [vmem:[%s3399_s0 + $0x18] sm:$0xff]  }
  0x47   :  { %630 = vmatpush1.bf16.msra.mxu0 %v2608_v4  ;;  %866 = vmatpush1.bf16.msra.mxu1 %v2608_v4  ;;  %v2477_v34 = vld [vmem:[%s3399_s0 + $0x38] sm:$0xff]   ;;  %v2478_v35 = vld [vmem:[%s3400_s1 + $0x40] sm:$0xff]   ;;  %v2480_v37 = vld [vmem:[%s3400_s1 + $0x48] sm:$0xff]  }
  0x48   :  { %631 = vmatprep.subr.bf16.mxu0 %v2615_v5  ;;  %867 = vmatprep.subr.bf16.mxu1 %v2615_v5  ;;  %v2479_v36 = vld [vmem:[%s3400_s1 + $0x60] sm:$0xff]   ;;  %v2481_v38 = vld [vmem:[%s3400_s1 + $0x68] sm:$0xff]   ;;  %v2482_v39 = vld [vmem:[%s3400_s1 + $0x50] sm:$0xff]  }
  0x49   :  { %v2483_v40 = vld [vmem:[%s3400_s1 + $0x70] sm:$0xff]   ;;  %v2484_v41 = vld [vmem:[%s3400_s1 + $0x58] sm:$0xff]   ;;  %v2486_v43 = vld [vmem:[%s3399_s0 + $0x40] sm:$0xff]  }
  0x4a   :  { %2104 = vmatmul.mubr.msk.bf16.gmra.mrb[4].mxu0 %vm263_vm0, %v2472_v29  ;;  %2132 = vmatmul.mubr.msk.bf16.gmra.mrb[4].mxu1 %vm263_vm0, %v2473_v30  ;;  %v2485_v42 = vld [vmem:[%s3400_s1 + $0x78] sm:$0xff]   ;;  %v2487_v44 = vld [vmem:[%s3399_s0 + $0x60] sm:$0xff]   ;;  %v2488_v45 = vld [vmem:[%s3399_s0 + $0x48] sm:$0xff]  }
  0x4b   :  { %632 = vmatpush1.bf16.msra.mxu0 %v2622_v6  ;;  %868 = vmatpush1.bf16.msra.mxu1 %v2622_v6  ;;  %v2489_v46 = vld [vmem:[%s3399_s0 + $0x68] sm:$0xff]   ;;  %v2490_v47 = vld [vmem:[%s3399_s0 + $0x50] sm:$0xff]   ;;  %v2492_v49 = vld [vmem:[%s3399_s0 + $0x58] sm:$0xff]  }
  0x4c   :  { %633 = vmatprep.subr.bf16.mxu0 %v2629_v7  ;;  %869 = vmatprep.subr.bf16.mxu1 %v2629_v7  ;;  %v2491_v48 = vld [vmem:[%s3399_s0 + $0x70] sm:$0xff]   ;;  %v2493_v50 = vld [vmem:[%s3399_s0 + $0x78] sm:$0xff]   ;;  %v2494_v51 = vld [vmem:[%s3400_s1 + $0x80] sm:$0xff]  }
  0x4d   :  { %328 = vmatprep.mubr.bf16.mxu0 %v2550_v2  ;;  %548 = vmatprep.mubr.bf16.mxu1 %v2550_v2  ;;  %v2495_v52 = vld [vmem:[%s3400_s1 + $0xa0] sm:$0xff]   ;;  %v2496_v53 = vld [vmem:[%s3400_s1 + $0x88] sm:$0xff]   ;;  %v2498_v55 = vld [vmem:[%s3400_s1 + $0x90] sm:$0xff]  }
  0x4e   :  { %v2497_v54 = vld [vmem:[%s3400_s1 + $0xa8] sm:$0xff]   ;;  %v2499_v56 = vld [vmem:[%s3400_s1 + $0xb0] sm:$0xff]   ;;  %v2500_v57 = vld [vmem:[%s3400_s1 + $0x98] sm:$0xff]  }
  0x4f   :  { %634 = vmatpush1.bf16.msra.mxu0 %v2636_v8  ;;  %870 = vmatpush1.bf16.msra.mxu1 %v2636_v8  ;;  %v2501_v58 = vld [vmem:[%s3400_s1 + $0xb8] sm:$0xff]   ;;  %v2502_v59 = vld [vmem:[%s3399_s0 + $0x80] sm:$0xff]   ;;  %v2504_v61 = vld [vmem:[%s3399_s0 + $0x88] sm:$0xff]  }
  0x50   :  { %635 = vmatprep.subr.bf16.mxu0 %v2643_v9  ;;  %871 = vmatprep.subr.bf16.mxu1 %v2643_v9  ;;  %v2503_v60 = vld [vmem:[%s3399_s0 + $0xa0] sm:$0xff]   ;;  %v2505_v62 = vld [vmem:[%s3399_s0 + $0xa8] sm:$0xff]   ;;  %v2506_v63 = vld [vmem:[%s3399_s0 + $0x90] sm:$0xff]  }
  0x51   :  { %v2524_v23 = vld [vmem:[%s3399_s0 + $0xd8] sm:$0xff]  }
  0x52   :  { %2105 = vmatmul.mubr.msk.bf16.gmra.mrb[8].mxu0 %vm263_vm0, %v2474_v31  ;;  %2133 = vmatmul.mubr.msk.bf16.gmra.mrb[8].mxu1 %vm263_vm0, %v2475_v32  ;;  %v2525_v24 = vld [vmem:[%s3399_s0 + $0xf8] sm:$0xff]  }
  0x53   :  { %636 = vmatpush1.bf16.msra.mxu0 %v2650_v10  ;;  %872 = vmatpush1.bf16.msra.mxu1 %v2650_v10 }
  0x54   :  { %637 = vmatprep.subr.bf16.mxu0 %v2657_v11  ;;  %873 = vmatprep.subr.bf16.mxu1 %v2657_v11 }
  0x55   :  { %338 = vmatprep.mubr.bf16.mxu0 %v2550_v2  ;;  %558 = vmatprep.mubr.bf16.mxu1 %v2550_v2 }
  0x57   :  { %638 = vmatpush1.bf16.msra.mxu0 %v2664_v12  ;;  %874 = vmatpush1.bf16.msra.mxu1 %v2664_v12 }
  0x58   :  { %639 = vmatprep.subr.bf16.mxu0 %v2671_v13  ;;  %875 = vmatprep.subr.bf16.mxu1 %v2671_v13 }
  0x5a   :  { %2106 = vmatmul.mubr.msk.bf16.gmra.mrb[12].mxu0 %vm263_vm0, %v2476_v33  ;;  %2134 = vmatmul.mubr.msk.bf16.gmra.mrb[12].mxu1 %vm263_vm0, %v2477_v34 }
  0x5b   :  { %640 = vmatpush1.bf16.msra.mxu0 %v2678_v14  ;;  %876 = vmatpush1.bf16.msra.mxu1 %v2678_v14 }
  0x5c   :  { %641 = vmatprep.subr.bf16.mxu0 %v2685_v15  ;;  %877 = vmatprep.subr.bf16.mxu1 %v2685_v15 }
  0x5d   :  { %659 = vmatprep.mubr.bf16.mxu0 %v2550_v2  ;;  %895 = vmatprep.mubr.bf16.mxu1 %v2550_v2 }
  0x5f   :  { %642 = vmatpush1.bf16.msra.mxu0 %v2692_v16  ;;  %878 = vmatpush1.bf16.msra.mxu1 %v2692_v16 }
  0x60   :  { %732 = vmatprep.subr.bf16.mxu0 %v2699_v17  ;;  %968 = vmatprep.subr.bf16.mxu1 %v2699_v17 }
  0x62   :  { %660 = vmatmul.mubr.bf16.vlgmr.msra.gmra.mrb[16].mxu0 %v2478_v35  ;;  %896 = vmatmul.mubr.bf16.vlgmr.msra.gmra.mrb[16].mxu1 %v2479_v36 }
  0x63   :  { %733 = vmatpush1.bf16.msra.mxu0 %v2712_v20  ;;  %969 = vmatpush1.bf16.msra.mxu1 %v2712_v20 }
  0x64   :  { %669 = vmatprep.mubr.bf16.mxu0 %v2550_v2  ;;  %905 = vmatprep.mubr.bf16.mxu1 %v2550_v2 }
  0x65   :  { %1099 = vmatprep.subr.bf16.mxu0 %v2587_v0  ;;  %1335 = vmatprep.subr.bf16.mxu1 %v2587_v0 }
  0x6a   :  { %670 = vmatmul.mubr.bf16.gmra.mrb[20].mxu0 %v2480_v37  ;;  %906 = vmatmul.mubr.bf16.gmra.mrb[20].mxu1 %v2481_v38 }
  0x6b   :  { %679 = vmatprep.mubr.bf16.mxu0 %v2550_v2  ;;  %915 = vmatprep.mubr.bf16.mxu1 %v2550_v2 }
  0x72   :  { %680 = vmatmul.mubr.bf16.gmra.mrb[24].mxu0 %v2482_v39  ;;  %916 = vmatmul.mubr.bf16.gmra.mrb[24].mxu1 %v2483_v40 }
  0x73   :  { %689 = vmatprep.mubr.bf16.mxu0 %v2550_v2  ;;  %925 = vmatprep.mubr.bf16.mxu1 %v2550_v2 }
  0x7a   :  { %690 = vmatmul.mubr.bf16.gmra.mrb[28].mxu0 %v2484_v41  ;;  %926 = vmatmul.mubr.bf16.gmra.mrb[28].mxu1 %v2485_v42 }
  0x7b   :  { %764 = vmatprep.mubr.bf16.mxu0 %v2550_v2  ;;  %1000 = vmatprep.mubr.bf16.mxu1 %v2550_v2 }
  0x82   :  { %2159 = vmatmul.mubr.msk.bf16.vlgmr.msra.gmra.mrb[16].mxu0 %vm263_vm0, %v2486_v43  ;;  %2187 = vmatmul.mubr.msk.bf16.vlgmr.msra.gmra.mrb[16].mxu1 %vm263_vm0, %v2487_v44 }
  0x83   :  { %1100 = vmatpush1.bf16.msra.mxu0 %v2592_v1  ;;  %1336 = vmatpush1.bf16.msra.mxu1 %v2592_v1 }
  0x84   :  { %1101 = vmatprep.subr.bf16.mxu0 %v2601_v3  ;;  %1337 = vmatprep.subr.bf16.mxu1 %v2601_v3 }
  0x85   :  { %774 = vmatprep.mubr.bf16.mxu0 %v2550_v2  ;;  %1010 = vmatprep.mubr.bf16.mxu1 %v2550_v2 }
  0x87   :  { %1102 = vmatpush1.bf16.msra.mxu0 %v2608_v4  ;;  %1338 = vmatpush1.bf16.msra.mxu1 %v2608_v4 }
  0x88   :  { %1103 = vmatprep.subr.bf16.mxu0 %v2615_v5  ;;  %1339 = vmatprep.subr.bf16.mxu1 %v2615_v5 }
  0x8a   :  { %2160 = vmatmul.mubr.msk.bf16.gmra.mrb[20].mxu0 %vm263_vm0, %v2488_v45  ;;  %2188 = vmatmul.mubr.msk.bf16.gmra.mrb[20].mxu1 %vm263_vm0, %v2489_v46 }
  0x8b   :  { %1104 = vmatpush1.bf16.msra.mxu0 %v2622_v6  ;;  %1340 = vmatpush1.bf16.msra.mxu1 %v2622_v6 }
  0x8c   :  { %1105 = vmatprep.subr.bf16.mxu0 %v2629_v7  ;;  %1341 = vmatprep.subr.bf16.mxu1 %v2629_v7 }
  0x8d   :  { %784 = vmatprep.mubr.bf16.mxu0 %v2550_v2  ;;  %1020 = vmatprep.mubr.bf16.mxu1 %v2550_v2 }
  0x8f   :  { %1106 = vmatpush1.bf16.msra.mxu0 %v2636_v8  ;;  %1342 = vmatpush1.bf16.msra.mxu1 %v2636_v8 }
  0x90   :  { %1107 = vmatprep.subr.bf16.mxu0 %v2643_v9  ;;  %1343 = vmatprep.subr.bf16.mxu1 %v2643_v9 }
  0x92   :  { %2161 = vmatmul.mubr.msk.bf16.gmra.mrb[24].mxu0 %vm263_vm0, %v2490_v47  ;;  %2189 = vmatmul.mubr.msk.bf16.gmra.mrb[24].mxu1 %vm263_vm0, %v2491_v48 }
  0x93   :  { %1108 = vmatpush1.bf16.msra.mxu0 %v2650_v10  ;;  %1344 = vmatpush1.bf16.msra.mxu1 %v2650_v10 }
  0x94   :  { %1109 = vmatprep.subr.bf16.mxu0 %v2657_v11  ;;  %1345 = vmatprep.subr.bf16.mxu1 %v2657_v11 }
  0x95   :  { %794 = vmatprep.mubr.bf16.mxu0 %v2550_v2  ;;  %1030 = vmatprep.mubr.bf16.mxu1 %v2550_v2 }
  0x97   :  { %1110 = vmatpush1.bf16.msra.mxu0 %v2664_v12  ;;  %1346 = vmatpush1.bf16.msra.mxu1 %v2664_v12 }
  0x98   :  { %1111 = vmatprep.subr.bf16.mxu0 %v2671_v13  ;;  %1347 = vmatprep.subr.bf16.mxu1 %v2671_v13 }
  0x9a   :  { %2162 = vmatmul.mubr.msk.bf16.gmra.mrb[28].mxu0 %vm263_vm0, %v2492_v49  ;;  %2190 = vmatmul.mubr.msk.bf16.gmra.mrb[28].mxu1 %vm263_vm0, %v2493_v50 }
  0x9b   :  { %1112 = vmatpush1.bf16.msra.mxu0 %v2678_v14  ;;  %1348 = vmatpush1.bf16.msra.mxu1 %v2678_v14 }
  0x9c   :  { %1113 = vmatprep.subr.bf16.mxu0 %v2685_v15  ;;  %1349 = vmatprep.subr.bf16.mxu1 %v2685_v15 }
  0x9d   :  { %1131 = vmatprep.mubr.bf16.mxu0 %v2550_v2  ;;  %1367 = vmatprep.mubr.bf16.mxu1 %v2550_v2 }
  0x9f   :  { %1114 = vmatpush1.bf16.msra.mxu0 %v2692_v16  ;;  %1350 = vmatpush1.bf16.msra.mxu1 %v2692_v16 }
  0xa0   :  { %1204 = vmatprep.subr.bf16.mxu0 %v2699_v17  ;;  %1440 = vmatprep.subr.bf16.mxu1 %v2699_v17 }
  0xa2   :  { %1132 = vmatmul.mubr.bf16.vlgmr.msra.gmra.mrb[32].mxu0 %v2494_v51  ;;  %1368 = vmatmul.mubr.bf16.vlgmr.msra.gmra.mrb[32].mxu1 %v2495_v52 }
  0xa3   :  { %1205 = vmatpush1.bf16.msra.mxu0 %v2712_v20  ;;  %1441 = vmatpush1.bf16.msra.mxu1 %v2712_v20 }
  0xa4   :  { %1141 = vmatprep.mubr.bf16.mxu0 %v2550_v2  ;;  %1377 = vmatprep.mubr.bf16.mxu1 %v2550_v2 }
  0xa5   :  { %1571 = vmatprep.subr.bf16.mxu0 %v2587_v0  ;;  %1807 = vmatprep.subr.bf16.mxu1 %v2587_v0  ;;  %v2507_v0 = vld [vmem:[%s3399_s0 + $0xb0] sm:$0xff]  }
  0xaa   :  { %1142 = vmatmul.mubr.bf16.gmra.mrb[36].mxu0 %v2496_v53  ;;  %1378 = vmatmul.mubr.bf16.gmra.mrb[36].mxu1 %v2497_v54 }
  0xab   :  { %1151 = vmatprep.mubr.bf16.mxu0 %v2550_v2  ;;  %1387 = vmatprep.mubr.bf16.mxu1 %v2550_v2 }
  0xb2   :  { %1152 = vmatmul.mubr.bf16.gmra.mrb[40].mxu0 %v2498_v55  ;;  %1388 = vmatmul.mubr.bf16.gmra.mrb[40].mxu1 %v2499_v56 }
  0xb3   :  { %1161 = vmatprep.mubr.bf16.mxu0 %v2550_v2  ;;  %1397 = vmatprep.mubr.bf16.mxu1 %v2550_v2 }
  0xba   :  { %1162 = vmatmul.mubr.bf16.gmra.mrb[44].mxu0 %v2500_v57  ;;  %1398 = vmatmul.mubr.bf16.gmra.mrb[44].mxu1 %v2501_v58 }
  0xbb   :  { %1236 = vmatprep.mubr.bf16.mxu0 %v2550_v2  ;;  %1472 = vmatprep.mubr.bf16.mxu1 %v2550_v2 }
  0xc2   :  { %2215 = vmatmul.mubr.msk.bf16.vlgmr.msra.gmra.mrb[32].mxu0 %vm263_vm0, %v2502_v59  ;;  %2243 = vmatmul.mubr.msk.bf16.vlgmr.msra.gmra.mrb[32].mxu1 %vm263_vm0, %v2503_v60 }
  0xc3   :  { %1572 = vmatpush1.bf16.msra.mxu0 %v2592_v1  ;;  %1808 = vmatpush1.bf16.msra.mxu1 %v2592_v1  ;;  %v2508_v1 = vld [vmem:[%s3399_s0 + $0x98] sm:$0xff]  }
  0xc4   :  { %1573 = vmatprep.subr.bf16.mxu0 %v2601_v3  ;;  %1809 = vmatprep.subr.bf16.mxu1 %v2601_v3  ;;  %v2509_v3 = vld [vmem:[%s3399_s0 + $0xb8] sm:$0xff]  }
  0xc5   :  { %1246 = vmatprep.mubr.bf16.mxu0 %v2550_v2  ;;  %1482 = vmatprep.mubr.bf16.mxu1 %v2550_v2 }
  0xc7   :  { %1574 = vmatpush1.bf16.msra.mxu0 %v2608_v4  ;;  %1810 = vmatpush1.bf16.msra.mxu1 %v2608_v4  ;;  %v2510_v4 = vld [vmem:[%s3400_s1 + $0xc0] sm:$0xff]  }
  0xc8   :  { %1575 = vmatprep.subr.bf16.mxu0 %v2615_v5  ;;  %1811 = vmatprep.subr.bf16.mxu1 %v2615_v5  ;;  %v2511_v5 = vld [vmem:[%s3400_s1 + $0xe0] sm:$0xff]  }
  0xca   :  { %2216 = vmatmul.mubr.msk.bf16.gmra.mrb[36].mxu0 %vm263_vm0, %v2504_v61  ;;  %2244 = vmatmul.mubr.msk.bf16.gmra.mrb[36].mxu1 %vm263_vm0, %v2505_v62 }
  0xcb   :  { %1576 = vmatpush1.bf16.msra.mxu0 %v2622_v6  ;;  %1812 = vmatpush1.bf16.msra.mxu1 %v2622_v6  ;;  %v2512_v6 = vld [vmem:[%s3400_s1 + $0xc8] sm:$0xff]  }
  0xcc   :  { %1577 = vmatprep.subr.bf16.mxu0 %v2629_v7  ;;  %1813 = vmatprep.subr.bf16.mxu1 %v2629_v7  ;;  %v2513_v7 = vld [vmem:[%s3400_s1 + $0xe8] sm:$0xff]  }
  0xcd   :  { %1256 = vmatprep.mubr.bf16.mxu0 %v2550_v2  ;;  %1492 = vmatprep.mubr.bf16.mxu1 %v2550_v2 }
  0xcf   :  { %1578 = vmatpush1.bf16.msra.mxu0 %v2636_v8  ;;  %1814 = vmatpush1.bf16.msra.mxu1 %v2636_v8  ;;  %v2514_v8 = vld [vmem:[%s3400_s1 + $0xd0] sm:$0xff]  }
  0xd0   :  { %1579 = vmatprep.subr.bf16.mxu0 %v2643_v9  ;;  %1815 = vmatprep.subr.bf16.mxu1 %v2643_v9  ;;  %v2515_v9 = vld [vmem:[%s3400_s1 + $0xf0] sm:$0xff]  }
  0xd2   :  { %2217 = vmatmul.mubr.msk.bf16.gmra.mrb[40].mxu0 %vm263_vm0, %v2506_v63  ;;  %2245 = vmatmul.mubr.msk.bf16.gmra.mrb[40].mxu1 %vm263_vm0, %v2507_v0 }
  0xd3   :  { %1580 = vmatpush1.bf16.msra.mxu0 %v2650_v10  ;;  %1816 = vmatpush1.bf16.msra.mxu1 %v2650_v10  ;;  %v2516_v10 = vld [vmem:[%s3400_s1 + $0xd8] sm:$0xff]  }
  0xd4   :  { %1581 = vmatprep.subr.bf16.mxu0 %v2657_v11  ;;  %1817 = vmatprep.subr.bf16.mxu1 %v2657_v11  ;;  %v2517_v11 = vld [vmem:[%s3400_s1 + $0xf8] sm:$0xff]  }
  0xd5   :  { %1266 = vmatprep.mubr.bf16.mxu0 %v2550_v2  ;;  %1502 = vmatprep.mubr.bf16.mxu1 %v2550_v2 }
  0xd7   :  { %1582 = vmatpush1.bf16.msra.mxu0 %v2664_v12  ;;  %1818 = vmatpush1.bf16.msra.mxu1 %v2664_v12  ;;  %v2518_v12 = vld [vmem:[%s3399_s0 + $0xc0] sm:$0xff]  }
  0xd8   :  { %1583 = vmatprep.subr.bf16.mxu0 %v2671_v13  ;;  %1819 = vmatprep.subr.bf16.mxu1 %v2671_v13  ;;  %v2519_v13 = vld [vmem:[%s3399_s0 + $0xe0] sm:$0xff]  }
  0xda   :  { %2218 = vmatmul.mubr.msk.bf16.gmra.mrb[44].mxu0 %vm263_vm0, %v2508_v1  ;;  %2246 = vmatmul.mubr.msk.bf16.gmra.mrb[44].mxu1 %vm263_vm0, %v2509_v3 }
  0xdb   :  { %1584 = vmatpush1.bf16.msra.mxu0 %v2678_v14  ;;  %1820 = vmatpush1.bf16.msra.mxu1 %v2678_v14  ;;  %v2520_v14 = vld [vmem:[%s3399_s0 + $0xc8] sm:$0xff]  }
  0xdc   :  { %1585 = vmatprep.subr.bf16.mxu0 %v2685_v15  ;;  %1821 = vmatprep.subr.bf16.mxu1 %v2685_v15  ;;  %v2521_v15 = vld [vmem:[%s3399_s0 + $0xe8] sm:$0xff]  }
  0xdd   :  { %1603 = vmatprep.mubr.bf16.mxu0 %v2550_v2  ;;  %1839 = vmatprep.mubr.bf16.mxu1 %v2550_v2 }
  0xdf   :  { %1586 = vmatpush1.bf16.msra.mxu0 %v2692_v16  ;;  %1822 = vmatpush1.bf16.msra.mxu1 %v2692_v16  ;;  %v2522_v16 = vld [vmem:[%s3399_s0 + $0xd0] sm:$0xff]  }
  0xe0   :  { %1676 = vmatprep.subr.bf16.mxu0 %v2699_v17  ;;  %1912 = vmatprep.subr.bf16.mxu1 %v2699_v17  ;;  %v2523_v17 = vld [vmem:[%s3399_s0 + $0xf0] sm:$0xff]  }
  0xe2   :  { %1604 = vmatmul.mubr.bf16.vlgmr.msra.gmra.mrb[48].mxu0 %v2510_v4  ;;  %1840 = vmatmul.mubr.bf16.vlgmr.msra.gmra.mrb[48].mxu1 %v2511_v5 }
  0xe3   :  { %1677 = vmatpush1.bf16.msra.mxu0 %v2712_v20  ;;  %1913 = vmatpush1.bf16.msra.mxu1 %v2712_v20 }
  0xe4   :  { %1613 = vmatprep.mubr.bf16.mxu0 %v2550_v2  ;;  %1849 = vmatprep.mubr.bf16.mxu1 %v2550_v2 }
  0xea   :  { %1614 = vmatmul.mubr.bf16.gmra.mrb[52].mxu0 %v2512_v6  ;;  %1850 = vmatmul.mubr.bf16.gmra.mrb[52].mxu1 %v2513_v7 }
  0xeb   :  { %1623 = vmatprep.mubr.bf16.mxu0 %v2550_v2  ;;  %1859 = vmatprep.mubr.bf16.mxu1 %v2550_v2 }
  0xf2   :  { %1624 = vmatmul.mubr.bf16.gmra.mrb[56].mxu0 %v2514_v8  ;;  %1860 = vmatmul.mubr.bf16.gmra.mrb[56].mxu1 %v2515_v9 }
  0xf3   :  { %1633 = vmatprep.mubr.bf16.mxu0 %v2550_v2  ;;  %1869 = vmatprep.mubr.bf16.mxu1 %v2550_v2 }
  0xfa   :  { %1634 = vmatmul.mubr.bf16.gmra.mrb[60].mxu0 %v2516_v10  ;;  %1870 = vmatmul.mubr.bf16.gmra.mrb[60].mxu1 %v2517_v11 }
  0xfb   :  { %1708 = vmatprep.mubr.bf16.mxu0 %v2550_v2  ;;  %1944 = vmatprep.mubr.bf16.mxu1 %v2550_v2 }
 0x102   :  { %2271 = vmatmul.mubr.msk.bf16.vlgmr.msra.gmra.mrb[48].mxu0 %vm263_vm0, %v2518_v12  ;;  %2299 = vmatmul.mubr.msk.bf16.vlgmr.msra.gmra.mrb[48].mxu1 %vm263_vm0, %v2519_v13 }
 0x103   :  { %1718 = vmatprep.mubr.bf16.mxu0 %v2550_v2  ;;  %1954 = vmatprep.mubr.bf16.mxu1 %v2550_v2 }
 0x10a   :  { %2272 = vmatmul.mubr.msk.bf16.gmra.mrb[52].mxu0 %vm263_vm0, %v2520_v14  ;;  %2300 = vmatmul.mubr.msk.bf16.gmra.mrb[52].mxu1 %vm263_vm0, %v2521_v15 }
 0x10b   :  { %1728 = vmatprep.mubr.bf16.mxu0 %v2550_v2  ;;  %1964 = vmatprep.mubr.bf16.mxu1 %v2550_v2 }
 0x112   :  { %2273 = vmatmul.mubr.msk.bf16.gmra.mrb[56].mxu0 %vm263_vm0, %v2522_v16  ;;  %2301 = vmatmul.mubr.msk.bf16.gmra.mrb[56].mxu1 %vm263_vm0, %v2523_v17 }
 0x113   :  { %1738 = vmatprep.mubr.bf16.mxu0 %v2550_v2  ;;  %1974 = vmatprep.mubr.bf16.mxu1 %v2550_v2 }
 0x115   :  { %v310_v18 = vpop.f32.mrb[0].mxu0  ;;  %v530_v19 = vpop.f32.mrb[0].mxu1 }
 0x116   :  { %v569_v20 = vmax.f32 %v310_v18, %v530_v19  ;;  %v312_v21 = vpop.f32.mrb[1].mxu0  ;;  %v532_v22 = vpop.f32.mrb[1].mxu1 }
 0x117   :  { %v570_v25 = vmax.f32 %v312_v21, %v532_v22  ;;  %v314_v26 = vpop.f32.mrb[2].mxu0  ;;  %v534_v27 = vpop.f32.mrb[2].mxu1 }
 0x118   :  { %v571_v28 = vmax.f32 %v314_v26, %v534_v27  ;;  %v316_v29 = vpop.f32.mrb[3].mxu0  ;;  %v536_v30 = vpop.f32.mrb[3].mxu1 }
 0x119   :  { %v572_v2 = vmax.f32 %v316_v29, %v536_v30 }
 0x11a   :  { %2274 = vmatmul.mubr.msk.bf16.gmra.mrb[60].mxu0 %vm263_vm0, %v2524_v23  ;;  %2302 = vmatmul.mubr.msk.bf16.gmra.mrb[60].mxu1 %vm263_vm0, %v2525_v24 }
 0x11d   :  { %v320_v31 = vpop.f32.mrb[4].mxu0  ;;  %v540_v32 = vpop.f32.mrb[4].mxu1 }
 0x11e   :  { %v573_v33 = vmax.f32 %v320_v31, %v540_v32  ;;  %v322_v34 = vpop.f32.mrb[5].mxu0  ;;  %v542_v35 = vpop.f32.mrb[5].mxu1 }
 0x11f   :  { %v574_v36 = vmax.f32 %v322_v34, %v542_v35  ;;  %v324_v37 = vpop.f32.mrb[6].mxu0  ;;  %v544_v38 = vpop.f32.mrb[6].mxu1 }
 0x120   :  { %v575_v39 = vmax.f32 %v324_v37, %v544_v38  ;;  %v326_v40 = vpop.f32.mrb[7].mxu0  ;;  %v546_v41 = vpop.f32.mrb[7].mxu1 }
 0x121   :  { %v576_v42 = vmax.f32 %v326_v40, %v546_v41 }
 0x125   :  { %v330_v43 = vpop.f32.mrb[8].mxu0  ;;  %v550_v44 = vpop.f32.mrb[8].mxu1 }
 0x126   :  { %v577_v45 = vmax.f32 %v330_v43, %v550_v44  ;;  %v332_v46 = vpop.f32.mrb[9].mxu0  ;;  %v552_v47 = vpop.f32.mrb[9].mxu1 }
 0x127   :  { %v578_v48 = vmax.f32 %v332_v46, %v552_v47  ;;  %v334_v49 = vpop.f32.mrb[10].mxu0  ;;  %v554_v50 = vpop.f32.mrb[10].mxu1 }
 0x128   :  { %v579_v51 = vmax.f32 %v334_v49, %v554_v50  ;;  %v336_v52 = vpop.f32.mrb[11].mxu0  ;;  %v556_v53 = vpop.f32.mrb[11].mxu1 }
 0x129   :  { %v580_v54 = vmax.f32 %v336_v52, %v556_v53 }
 0x12d   :  { %v3106_v55 = vpop.f32.mrb[12].mxu0  ;;  %v560_v56 = vpop.f32.mrb[12].mxu1 }
 0x12e   :  { %v581_v57 = vmax.f32 %v3106_v55, %v560_v56  ;;  %v3109_v58 = vpop.f32.mrb[13].mxu0  ;;  %v562_v59 = vpop.f32.mrb[13].mxu1 }
 0x12f   :  { %v582_v60 = vmax.f32 %v3109_v58, %v562_v59  ;;  %v3112_v61 = vpop.f32.mrb[14].mxu0  ;;  %v3114_v62 = vpop.f32.mrb[14].mxu1 }
 0x130   :  { %v583_v63 = vmax.f32 %v3112_v61, %v3114_v62  ;;  %v3118_v0 = vpop.f32.mrb[15].mxu0  ;;  %v3120_v1 = vpop.f32.mrb[15].mxu1 }
 0x131   :  { %v584_v3 = vmax.f32 %v3118_v0, %v3120_v1 }
 0x155   :  { %v766_v4 = vpop.f32.mrb[16].mxu0  ;;  %v3124_v5 = vpop.f32.mrb[16].mxu1 }
 0x156   :  { %v3126_v6 = vmax.f32 %v569_v20, %v766_v4  ;;  %v768_v7 = vpop.f32.mrb[17].mxu0  ;;  %v3128_v8 = vpop.f32.mrb[17].mxu1 }
 0x157   :  { %v3130_v9 = vmax.f32 %v570_v25, %v768_v7  ;;  %v770_v10 = vpop.f32.mrb[18].mxu0  ;;  %v3132_v11 = vpop.f32.mrb[18].mxu1 }
 0x158   :  { %v1041_v12 = vmax.f32 %v3126_v6, %v3124_v5  ;;  %v3136_v13 = vmax.f32 %v571_v28, %v770_v10  ;;  %v772_v14 = vpop.f32.mrb[19].mxu0  ;;  %v3138_v15 = vpop.f32.mrb[19].mxu1 }
 0x159   :  { %v1042_v16 = vmax.f32 %v3130_v9, %v3128_v8  ;;  %v3142_v17 = vmax.f32 %v572_v2, %v772_v14 }
 0x15a   :  { %v1043_v18 = vmax.f32 %v3136_v13, %v3132_v11 }
 0x15b   :  { %v1044_v19 = vmax.f32 %v3142_v17, %v3138_v15 }
 0x15d   :  { %v776_v20 = vpop.f32.mrb[20].mxu0  ;;  %v3148_v21 = vpop.f32.mrb[20].mxu1 }
 0x15e   :  { %v3150_v22 = vmax.f32 %v573_v33, %v776_v20  ;;  %v778_v23 = vpop.f32.mrb[21].mxu0  ;;  %v3152_v24 = vpop.f32.mrb[21].mxu1 }
 0x15f   :  { %v3154_v25 = vmax.f32 %v574_v36, %v778_v23  ;;  %v780_v26 = vpop.f32.mrb[22].mxu0  ;;  %v3156_v27 = vpop.f32.mrb[22].mxu1 }
 0x160   :  { %v1045_v28 = vmax.f32 %v3150_v22, %v3148_v21  ;;  %v3160_v29 = vmax.f32 %v575_v39, %v780_v26  ;;  %v782_v30 = vpop.f32.mrb[23].mxu0  ;;  %v3162_v2 = vpop.f32.mrb[23].mxu1 }
 0x161   :  { %v1046_v31 = vmax.f32 %v3154_v25, %v3152_v24  ;;  %v3166_v32 = vmax.f32 %v576_v42, %v782_v30 }
 0x162   :  { %v1047_v33 = vmax.f32 %v3160_v29, %v3156_v27 }
 0x163   :  { %v1048_v34 = vmax.f32 %v3166_v32, %v3162_v2 }
 0x165   :  { %v786_v35 = vpop.f32.mrb[24].mxu0  ;;  %v3172_v36 = vpop.f32.mrb[24].mxu1 }
 0x166   :  { %v3174_v37 = vmax.f32 %v577_v45, %v786_v35  ;;  %v788_v38 = vpop.f32.mrb[25].mxu0  ;;  %v3176_v39 = vpop.f32.mrb[25].mxu1 }
 0x167   :  { %v3178_v40 = vmax.f32 %v578_v48, %v788_v38  ;;  %v790_v41 = vpop.f32.mrb[26].mxu0  ;;  %v3180_v43 = vpop.f32.mrb[26].mxu1 }
 0x168   :  { %v1049_v42 = vmax.f32 %v3174_v37, %v3172_v36  ;;  %v3184_v44 = vmax.f32 %v579_v51, %v790_v41  ;;  %v792_v46 = vpop.f32.mrb[27].mxu0  ;;  %v3186_v47 = vpop.f32.mrb[27].mxu1 }
 0x169   :  { %v1050_v45 = vmax.f32 %v3178_v40, %v3176_v39  ;;  %v3190_v49 = vmax.f32 %v580_v54, %v792_v46 }
 0x16a   :  { %v1051_v48 = vmax.f32 %v3184_v44, %v3180_v43 }
 0x16b   :  { %v1052_v50 = vmax.f32 %v3190_v49, %v3186_v47 }
 0x16d   :  { %v796_v52 = vpop.f32.mrb[28].mxu0  ;;  %v3196_v53 = vpop.f32.mrb[28].mxu1 }
 0x16e   :  { %v3198_v55 = vmax.f32 %v581_v57, %v796_v52  ;;  %v798_v51 = vpop.f32.mrb[29].mxu0  ;;  %v3200_v56 = vpop.f32.mrb[29].mxu1 }
 0x16f   :  { %v3202_v58 = vmax.f32 %v582_v60, %v798_v51  ;;  %v800_v59 = vpop.f32.mrb[30].mxu0  ;;  %v3204_v61 = vpop.f32.mrb[30].mxu1 }
 0x170   :  { %v1053_v54 = vmax.f32 %v3198_v55, %v3196_v53  ;;  %v3208_v62 = vmax.f32 %v583_v63, %v800_v59  ;;  %v802_v0 = vpop.f32.mrb[31].mxu0  ;;  %v3210_v1 = vpop.f32.mrb[31].mxu1 }
 0x171   :  { %v1054_v57 = vmax.f32 %v3202_v58, %v3200_v56  ;;  %v3214_v4 = vmax.f32 %v584_v3, %v802_v0 }
 0x172   :  { %v1055_v60 = vmax.f32 %v3208_v62, %v3204_v61 }
 0x173   :  { %v1056_v5 = vmax.f32 %v3214_v4, %v3210_v1 }
 0x195   :  { %v1238_v6 = vpop.f32.mrb[32].mxu0  ;;  %v3220_v7 = vpop.f32.mrb[32].mxu1 }
 0x196   :  { %v3222_v8 = vmax.f32 %v1041_v12, %v1238_v6  ;;  %v1240_v63 = vpop.f32.mrb[33].mxu0  ;;  %v3224_v9 = vpop.f32.mrb[33].mxu1 }
 0x197   :  { %v3226_v10 = vmax.f32 %v1042_v16, %v1240_v63  ;;  %v1242_v11 = vpop.f32.mrb[34].mxu0  ;;  %v3228_v13 = vpop.f32.mrb[34].mxu1 }
 0x198   :  { %v1513_v3 = vmax.f32 %v3222_v8, %v3220_v7  ;;  %v3232_v14 = vmax.f32 %v1043_v18, %v1242_v11  ;;  %v1244_v15 = vpop.f32.mrb[35].mxu0  ;;  %v3234_v17 = vpop.f32.mrb[35].mxu1  ;;  %v2003_v11 = vlaneseq }
 0x199   :  { %v1514_v12 = vmax.f32 %v3226_v10, %v3224_v9  ;;  %v3238_v20 = vmax.f32 %v1044_v19, %v1244_v15 }
 0x19a   :  { %v1515_v16 = vmax.f32 %v3232_v14, %v3228_v13  ;;  %v2004_v15 = vshrl.u32 %v2003_v11, 7 }
 0x19b   :  { %v1516_v21 = vmax.f32 %v3238_v20, %v3234_v17 }
 0x19d   :  { %v1248_v22 = vpop.f32.mrb[36].mxu0  ;;  %v3244_v23 = vpop.f32.mrb[36].mxu1 }
 0x19e   :  { %v3246_v24 = vmax.f32 %v1045_v28, %v1248_v22  ;;  %v1250_v18 = vpop.f32.mrb[37].mxu0  ;;  %v3248_v25 = vpop.f32.mrb[37].mxu1  ;;  %v2005_v22 = vsub.s32 0, %v2004_v15 }
 0x19f   :  { %v3250_v26 = vmax.f32 %v1046_v31, %v1250_v18  ;;  %v1252_v27 = vpop.f32.mrb[38].mxu0  ;;  %v3252_v29 = vpop.f32.mrb[38].mxu1  ;;  %v2009_v18 = vsub.s32 1, %v2004_v15 }
 0x1a0   :  { %v1517_v19 = vmax.f32 %v3246_v24, %v3244_v23  ;;  %v3256_v30 = vmax.f32 %v1047_v33, %v1252_v27  ;;  %v1254_v2 = vpop.f32.mrb[39].mxu0  ;;  %v3258_v32 = vpop.f32.mrb[39].mxu1 }
 0x1a1   :  { %v1518_v28 = vmax.f32 %v3250_v26, %v3248_v25  ;;  %v3262_v35 = vmax.f32 %v1048_v34, %v1254_v2 }
 0x1a2   :  { %v1519_v31 = vmax.f32 %v3256_v30, %v3252_v29 }
 0x1a3   :  { %v1520_v36 = vmax.f32 %v3262_v35, %v3258_v32 }
 0x1a5   :  { %v1258_v37 = vpop.f32.mrb[40].mxu0  ;;  %v3268_v38 = vpop.f32.mrb[40].mxu1 }
 0x1a6   :  { %v3270_v39 = vmax.f32 %v1049_v42, %v1258_v37  ;;  %v1260_v33 = vpop.f32.mrb[41].mxu0  ;;  %v3272_v40 = vpop.f32.mrb[41].mxu1 }
 0x1a7   :  { %v3274_v41 = vmax.f32 %v1050_v45, %v1260_v33  ;;  %v1262_v43 = vpop.f32.mrb[42].mxu0  ;;  %v3276_v44 = vpop.f32.mrb[42].mxu1 }
 0x1a8   :  { %v1521_v34 = vmax.f32 %v3270_v39, %v3268_v38  ;;  %v3280_v46 = vmax.f32 %v1051_v48, %v1262_v43  ;;  %v1264_v47 = vpop.f32.mrb[43].mxu0  ;;  %v3282_v49 = vpop.f32.mrb[43].mxu1 }
 0x1a9   :  { %v1522_v42 = vmax.f32 %v3274_v41, %v3272_v40  ;;  %v3286_v52 = vmax.f32 %v1052_v50, %v1264_v47 }
 0x1aa   :  { %v1523_v45 = vmax.f32 %v3280_v46, %v3276_v44 }
 0x1ab   :  { %v1524_v53 = vmax.f32 %v3286_v52, %v3282_v49 }
 0x1ad   :  { %v1268_v55 = vpop.f32.mrb[44].mxu0  ;;  %v3292_v51 = vpop.f32.mrb[44].mxu1 }
 0x1ae   :  { %v3294_v56 = vmax.f32 %v1053_v54, %v1268_v55  ;;  %v1270_v48 = vpop.f32.mrb[45].mxu0  ;;  %v3296_v58 = vpop.f32.mrb[45].mxu1 }
 0x1af   :  { %v3298_v59 = vmax.f32 %v1054_v57, %v1270_v48  ;;  %v1272_v61 = vpop.f32.mrb[46].mxu0  ;;  %v3300_v62 = vpop.f32.mrb[46].mxu1 }
 0x1b0   :  { %v1525_v50 = vmax.f32 %v3294_v56, %v3292_v51  ;;  %v3304_v0 = vmax.f32 %v1055_v60, %v1272_v61  ;;  %v1274_v1 = vpop.f32.mrb[47].mxu0  ;;  %v3306_v4 = vpop.f32.mrb[47].mxu1  ;;  %v2001_v60 = vld [vmem:[%s3403_s4] sm:$0x3]  ;;  %s2551_s4 = smov [#allocation2]  }
 0x1b1   :  { %v1526_v54 = vmax.f32 %v3298_v59, %v3296_v58  ;;  %v3310_v6 = vmax.f32 %v1056_v5, %v1274_v1  ;;  %v3322_v37 = vrot.slane %v2001_v60, %v2005_v22  ;;  %v3327_v55 = vrot.slane %v2001_v60, %v2009_v18  ;;  %s2066_s22 = sshll.u32 %s2551_s4, 4  ;;  %s2067_s22 = int_to_ptr.vmem [resolvable:$true] %s2066_s22 }
 0x1b2   :  { %v1527_v57 = vmax.f32 %v3304_v0, %v3300_v62  ;;  %s2526_s23 = scalar_lea.vmem %s2067_s22, 2048  ;;  %p2531_p1 = scmp.lt.s32.totalorder %s2067_s22, %s2067_s22 }
 0x1b3   :  { %v1528_v63 = vmax.f32 %v3310_v6, %v3306_v4  ;;  %p2527_p0 = scmp.ne.s32.totalorder %s2067_s22, %s2526_s23  ;;  %p2532_p2 = scmp.lt.s32.totalorder %s2526_s23, %s2526_s23 }
 0x1b5   :  { %p2533_p3 = por %p2532_p2, %p2531_p1 }
 0x1b7   :  { %p2534_p4 = pnand %p2533_p3, %p2527_p0 }
 0x1d5   :  { %v1710_v27 = vpop.f32.mrb[48].mxu0  ;;  %v1946_v2 = vpop.f32.mrb[48].mxu1 }
 0x1d6   :  { %v1749_v5 = vmax.f32 %v1513_v3, %v1710_v27  ;;  %v1712_v33 = vpop.f32.mrb[49].mxu0  ;;  %v1948_v43 = vpop.f32.mrb[49].mxu1 }
 0x1d7   :  { %v1750_v47 = vmax.f32 %v1514_v12, %v1712_v33  ;;  %v1714_v48 = vpop.f32.mrb[50].mxu0  ;;  %v1950_v61 = vpop.f32.mrb[50].mxu1 }
 0x1d8   :  { %v1985_v1 = vmax.f32 %v1749_v5, %v1946_v2  ;;  %v1751_v11 = vmax.f32 %v1515_v16, %v1714_v48  ;;  %v1716_v15 = vpop.f32.mrb[51].mxu0  ;;  %v1952_v7 = vpop.f32.mrb[51].mxu1 }
 0x1d9   :  { %v1986_v8 = vmax.f32 %v1750_v47, %v1948_v43  ;;  %v1752_v3 = vmax.f32 %v1516_v21, %v1716_v15 }
 0x1da   :  { %v2013_v22 = vadd.f32 %v3322_v37, %v1985_v1  ;;  %v1987_v9 = vmax.f32 %v1751_v11, %v1950_v61 }
 0x1db   :  { %v2014_v10 = vadd.f32 %v3327_v55, %v1986_v8  ;;  %v1988_v12 = vmax.f32 %v1752_v3, %v1952_v7 }
 0x1dc   :  { %v2029_v60 = vmax.f32 %v2013_v22, 0.0  ;;  %v2015_v18 = vadd.f32 %v3322_v37, %v1987_v9 }
 0x1dd   :  { %v2030_v27 = vmax.f32 %v2014_v10, 0.0  ;;  %v2016_v13 = vadd.f32 %v3327_v55, %v1988_v12  ;;  %v1720_v14 = vpop.f32.mrb[52].mxu0  ;;  %v1956_v16 = vpop.f32.mrb[52].mxu1 }
 0x1de   :  { %2045 = vst [vmem:[#allocation2] sm:$0xff] %v2029_v60  ;;  %v2031_v2 = vmax.f32 %v2015_v18, 0.0  ;;  %v1753_v17 = vmax.f32 %v1517_v19, %v1720_v14  ;;  %v1722_v20 = vpop.f32.mrb[53].mxu0  ;;  %v1958_v21 = vpop.f32.mrb[53].mxu1 }
 0x1df   :  { %2046 = vst [vmem:[#allocation2 + $0x8] sm:$0xff] %v2030_v27  ;;  %v2032_v5 = vmax.f32 %v2016_v13, 0.0  ;;  %v1754_v33 = vmax.f32 %v1518_v28, %v1722_v20  ;;  %v1724_v43 = vpop.f32.mrb[54].mxu0  ;;  %v1960_v47 = vpop.f32.mrb[54].mxu1 }
 0x1e0   :  { %2047 = vst [vmem:[#allocation2 + $0x10] sm:$0xff] %v2031_v2  ;;  %v1989_v48 = vmax.f32 %v1753_v17, %v1956_v16  ;;  %v1755_v61 = vmax.f32 %v1519_v31, %v1724_v43  ;;  %v1726_v1 = vpop.f32.mrb[55].mxu0  ;;  %v1962_v11 = vpop.f32.mrb[55].mxu1 }
 0x1e1   :  { %2048 = vst [vmem:[#allocation2 + $0x18] sm:$0xff] %v2032_v5  ;;  %v1990_v23 = vmax.f32 %v1754_v33, %v1958_v21  ;;  %v1756_v24 = vmax.f32 %v1520_v36, %v1726_v1 }
 0x1e2   :  { %v2017_v19 = vadd.f32 %v3322_v37, %v1989_v48  ;;  %v1991_v25 = vmax.f32 %v1755_v61, %v1960_v47 }
 0x1e3   :  { %v2018_v26 = vadd.f32 %v3327_v55, %v1990_v23  ;;  %v1992_v28 = vmax.f32 %v1756_v24, %v1962_v11 }
 0x1e4   :  { %v2033_v15 = vmax.f32 %v2017_v19, 0.0  ;;  %v2019_v7 = vadd.f32 %v3322_v37, %v1991_v25 }
 0x1e5   :  { %v2034_v8 = vmax.f32 %v2018_v26, 0.0  ;;  %v2020_v29 = vadd.f32 %v3327_v55, %v1992_v28  ;;  %v1730_v30 = vpop.f32.mrb[56].mxu0  ;;  %v1966_v31 = vpop.f32.mrb[56].mxu1 }
 0x1e6   :  { %2049 = vst [vmem:[#allocation2 + $0x20] sm:$0xff] %v2033_v15  ;;  %v2035_v3 = vmax.f32 %v2019_v7, 0.0  ;;  %v1757_v32 = vmax.f32 %v1521_v34, %v1730_v30  ;;  %v1732_v35 = vpop.f32.mrb[57].mxu0  ;;  %v1968_v36 = vpop.f32.mrb[57].mxu1 }
 0x1e7   :  { %2050 = vst [vmem:[#allocation2 + $0x28] sm:$0xff] %v2034_v8  ;;  %v2036_v22 = vmax.f32 %v2020_v29, 0.0  ;;  %v1758_v9 = vmax.f32 %v1522_v42, %v1732_v35  ;;  %v1734_v10 = vpop.f32.mrb[58].mxu0  ;;  %v1970_v12 = vpop.f32.mrb[58].mxu1 }
 0x1e8   :  { %2051 = vst [vmem:[#allocation2 + $0x30] sm:$0xff] %v2035_v3  ;;  %v1993_v60 = vmax.f32 %v1757_v32, %v1966_v31  ;;  %v1759_v18 = vmax.f32 %v1523_v45, %v1734_v10  ;;  %v1736_v27 = vpop.f32.mrb[59].mxu0  ;;  %v1972_v13 = vpop.f32.mrb[59].mxu1 }
 0x1e9   :  { %2052 = vst [vmem:[#allocation2 + $0x38] sm:$0xff] %v2036_v22  ;;  %v1994_v38 = vmax.f32 %v1758_v9, %v1968_v36  ;;  %v1760_v39 = vmax.f32 %v1524_v53, %v1736_v27 }
 0x1ea   :  { %v2021_v34 = vadd.f32 %v3322_v37, %v1993_v60  ;;  %v1995_v40 = vmax.f32 %v1759_v18, %v1970_v12 }
 0x1eb   :  { %v2022_v41 = vadd.f32 %v3327_v55, %v1994_v38  ;;  %v1996_v42 = vmax.f32 %v1760_v39, %v1972_v13 }
 0x1ec   :  { %v2037_v14 = vmax.f32 %v2021_v34, 0.0  ;;  %v2023_v16 = vadd.f32 %v3322_v37, %v1995_v40 }
 0x1ed   :  { %v2038_v2 = vmax.f32 %v2022_v41, 0.0  ;;  %v2024_v44 = vadd.f32 %v3327_v55, %v1996_v42  ;;  %v1740_v46 = vpop.f32.mrb[60].mxu0  ;;  %v1976_v45 = vpop.f32.mrb[60].mxu1 }
 0x1ee   :  { %2053 = vst [vmem:[#allocation2 + $0x40] sm:$0xff] %v2037_v14  ;;  %v2039_v17 = vmax.f32 %v2023_v16, 0.0  ;;  %v1761_v49 = vmax.f32 %v1525_v50, %v1740_v46  ;;  %v1742_v52 = vpop.f32.mrb[61].mxu0  ;;  %v1978_v53 = vpop.f32.mrb[61].mxu1 }
 0x1ef   :  { %2054 = vst [vmem:[#allocation2 + $0x48] sm:$0xff] %v2038_v2  ;;  %v2040_v20 = vmax.f32 %v2024_v44, 0.0  ;;  %v1762_v21 = vmax.f32 %v1526_v54, %v1742_v52  ;;  %v1744_v5 = vpop.f32.mrb[62].mxu0  ;;  %v1980_v33 = vpop.f32.mrb[62].mxu1 }
 0x1f0   :  { %2055 = vst [vmem:[#allocation2 + $0x50] sm:$0xff] %v2039_v17  ;;  %v1997_v43 = vmax.f32 %v1761_v49, %v1976_v45  ;;  %v1763_v47 = vmax.f32 %v1527_v57, %v1744_v5  ;;  %v1746_v48 = vpop.f32.mrb[63].mxu0  ;;  %v1982_v61 = vpop.f32.mrb[63].mxu1 }
 0x1f1   :  { %2056 = vst [vmem:[#allocation2 + $0x58] sm:$0xff] %v2040_v20  ;;  %v1998_v51 = vmax.f32 %v1762_v21, %v1978_v53  ;;  %v1764_v56 = vmax.f32 %v1528_v63, %v1746_v48 }
 0x1f2   :  { %v2025_v50 = vadd.f32 %v3322_v37, %v1997_v43  ;;  %v1999_v58 = vmax.f32 %v1763_v47, %v1980_v33 }
 0x1f3   :  { %v2026_v59 = vadd.f32 %v3327_v55, %v1998_v51  ;;  %v2000_v54 = vmax.f32 %v1764_v56, %v1982_v61 }
 0x1f4   :  { %v2041_v1 = vmax.f32 %v2025_v50, 0.0  ;;  %v2027_v62 = vadd.f32 %v3322_v37, %v1999_v58 }
 0x1f5   :  { %v2042_v0 = vmax.f32 %v2026_v59, 0.0  ;;  %v2028_v57 = vadd.f32 %v3327_v55, %v2000_v54 }
 0x1f6   :  { %2057 = vst [vmem:[#allocation2 + $0x60] sm:$0xff] %v2041_v1  ;;  %v2043_v11 = vmax.f32 %v2027_v62, 0.0 }
 0x1f7   :  { %2058 = vst [vmem:[#allocation2 + $0x68] sm:$0xff] %v2042_v0  ;;  %v2044_v4 = vmax.f32 %v2028_v57, 0.0 }
 0x1f8   :  { %2059 = vst [vmem:[#allocation2 + $0x70] sm:$0xff] %v2043_v11 }
 0x1f9   :  { %2060 = vst [vmem:[#allocation2 + $0x78] sm:$0xff] %v2044_v4 }
 0x1fa   :  { %2537 = shalt.err (!%p2534_p4)
}
 0x1fb   :  { %s2538_s26 = scalar_lea.hbm %s3404_s5, 2048 }
 0x1fc   :  { %p2539_p5 = scmp.ne.s32.totalorder %s3404_s5, %s2538_s26  ;;  %p2542_p6 = scmp.lt.u32.totalorder %s2538_s26, %s3404_s5 }
 0x1fe   :  { %p2544_p7 = pnand %p2542_p6, %p2539_p5 }
 0x200   :  { %2547 = shalt.err (!%p2544_p7)
}
 0x201   :  { %s2552_s3 = smov 256   ;;  %s2553_s6 = smov 16  }
 0x202   :  { %2072 = dma.vmem_to_hbm [thread:$0]  %s2067_s22, 2048, %s3404_s5, [#allocation3], %s2552_s3, %s2552_s3, %s2553_s6  }
 0x203   :  { %2548 = dma.done.wait [#allocation3], 2048  }
 0x204   :  { %2549 = vsyncadd [#allocation3], 4294965248 }
 0x205   :  { %2076 = vsyncpa [#allocation3], 1 }

</bundles_post_ra>
